<compile_context>
chip_gen: v7x
topology: tpu7x:2x2x1
jax: 0.10.0
libtpu: 0.0.40
codegen_flags: <defaults>
</compile_context>

<pallas_src>
import functools
import math

import jax
import jax.numpy as jnp
from jax.experimental import pallas as pl
from jax.experimental.pallas import tpu as pltpu

D_MODEL = 512
NUM_HEADS = 8
D_K = D_MODEL // NUM_HEADS
NEG_INF = -1e9


# ---------------------------------------------------------------------------
# Fused multi-head-attention kernel (one batch element per grid step)
# ---------------------------------------------------------------------------
def _mha_kernel(q_ref, k_ref, v_ref, bias_ref,
                wq_ref, wk_ref, wv_ref, wo_ref,
                bq_ref, bk_ref, bv_ref, bo_ref,
                o_ref, *, scale):
    xq = q_ref[0]                       # (Sq,  D)
    xk = k_ref[0]                       # (Skv, D)
    xv = v_ref[0]                       # (Skv, D)
    H = wq_ref.shape[0]
    Sq, D = xq.shape
    Skv = xk.shape[0]

    # Per-head projections as batched matmuls (same FLOPs as the fused
    # (S,D)@(D,D) projection, but needs no in-kernel reshape/transpose).
    xq_b = jnp.broadcast_to(xq, (H, Sq, D))
    xk_b = jnp.broadcast_to(xk, (H, Skv, D))
    xv_b = jnp.broadcast_to(xv, (H, Skv, D))

    q = jnp.einsum('hsd,hdk->hsk', xq_b, wq_ref[...],
                   preferred_element_type=jnp.float32) + bq_ref[...]   # (H,Sq,dk)
    k = jnp.einsum('hsd,hdk->hsk', xk_b, wk_ref[...],
                   preferred_element_type=jnp.float32) + bk_ref[...]   # (H,Skv,dk)
    v = jnp.einsum('hsd,hdk->hsk', xv_b, wv_ref[...],
                   preferred_element_type=jnp.float32) + bv_ref[...]   # (H,Skv,dk)

    # Scores: contract the last dims directly (no explicit transpose).
    s = jnp.einsum('hqd,hkd->hqk', q, k,
                   preferred_element_type=jnp.float32) * scale          # (H,Sq,Skv)
    s = s + bias_ref[0]                 # additive mask bias (Sq,Skv), bcast over H

    # Numerically-stable softmax; reciprocal goes to the EUP slot.
    m = jnp.max(s, axis=-1, keepdims=True)
    e = jnp.exp(s - m)
    denom = jnp.sum(e, axis=-1, keepdims=True)
    p = e * pl.reciprocal(denom, approx=True)

    attn = jnp.einsum('hqk,hkd->hqd', p, v,
                      preferred_element_type=jnp.float32)               # (H,Sq,dk)

    # combine_heads + W_o:  concat_h(attn_h) @ Wo == sum_h attn_h @ Wo[h]
    proj = jnp.einsum('hqk,hkd->hqd', attn, wo_ref[...],
                      preferred_element_type=jnp.float32)               # (H,Sq,D)
    o_ref[0] = jnp.sum(proj, axis=0) + bo_ref[...]                      # (Sq,D)


def multi_head_attention(params, q, k, v, mask=None):
    """q,k,v: (B, S, d_model) f32. mask: optional, broadcastable to (B,1,Sq,Skv)."""
    B, Sq, D = q.shape
    Skv = k.shape[1]
    H = NUM_HEADS
    dk = D // H

    # Pre-arrange weights per head (layout plumbing done once, outside the kernel).
    wq_h = params["wq"].reshape(D, H, dk).transpose(1, 0, 2)    # (H, D, dk)
    wk_h = params["wk"].reshape(D, H, dk).transpose(1, 0, 2)
    wv_h = params["wv"].reshape(D, H, dk).transpose(1, 0, 2)
    wo_h = params["wo"].reshape(H, dk, D)                        # (H, dk, D)
    bq_h = params["bq"].reshape(H, 1, dk)
    bk_h = params["bk"].reshape(H, 1, dk)
    bv_h = params["bv"].reshape(H, 1, dk)
    bo = params["bo"].reshape(1, D)

    # Additive mask bias, per batch only (NOT broadcast over heads).
    if mask is None:
        bias = jnp.zeros((B, Sq, Skv), jnp.float32)
    else:
        m = jnp.broadcast_to(mask, (B, 1, Sq, Skv))[:, 0]
        bias = jnp.where(m == 0, NEG_INF, 0.0).astype(jnp.float32)

    kernel = functools.partial(_mha_kernel, scale=1.0 / math.sqrt(dk))

    def _const_spec(shape):
        return pl.BlockSpec(shape, lambda b, _n=len(shape): (0,) * _n)

    out = pl.pallas_call(
        kernel,
        grid=(B,),
        in_specs=[
            pl.BlockSpec((1, Sq, D), lambda b: (b, 0, 0)),      # q
            pl.BlockSpec((1, Skv, D), lambda b: (b, 0, 0)),     # k
            pl.BlockSpec((1, Skv, D), lambda b: (b, 0, 0)),     # v
            pl.BlockSpec((1, Sq, Skv), lambda b: (b, 0, 0)),    # mask bias
            _const_spec((H, D, dk)),                            # wq (VMEM-resident)
            _const_spec((H, D, dk)),                            # wk
            _const_spec((H, D, dk)),                            # wv
            _const_spec((H, dk, D)),                            # wo
            _const_spec((H, 1, dk)),                            # bq
            _const_spec((H, 1, dk)),                            # bk
            _const_spec((H, 1, dk)),                            # bv
            _const_spec((1, D)),                                # bo
        ],
        out_specs=pl.BlockSpec((1, Sq, D), lambda b: (b, 0, 0)),
        out_shape=jax.ShapeDtypeStruct((B, Sq, D), jnp.float32),
        compiler_params=pltpu.CompilerParams(
            dimension_semantics=("parallel",),                  # v7x: 2 TCs over batch
            vmem_limit_bytes=32 * 1024 * 1024),
    )(q, k, v, bias, wq_h, wk_h, wv_h, wo_h, bq_h, bk_h, bv_h, bo)
    return out


# ---------------------------------------------------------------------------
# Pure-JAX reference (mirrors the PyTorch module math) + deterministic init
# ---------------------------------------------------------------------------
def mha_reference(params, q, k, v, mask=None):
    B, Sq, D = q.shape
    H, dk = NUM_HEADS, D // NUM_HEADS

    def proj(x, w, b):
        y = x @ w + b
        return y.reshape(B, -1, H, dk).transpose(0, 2, 1, 3)    # (B,H,S,dk)

    Q = proj(q, params["wq"], params["bq"])
    K = proj(k, params["wk"], params["bk"])
    V = proj(v, params["wv"], params["bv"])
    s = jnp.einsum('bhqd,bhkd->bhqk', Q, K) / math.sqrt(dk)
    if mask is not None:
        s = jnp.where(mask == 0, NEG_INF, s)
    p = jax.nn.softmax(s, axis=-1)
    o = jnp.einsum('bhqk,bhkd->bhqd', p, V)
    o = o.transpose(0, 2, 1, 3).reshape(B, Sq, D)
    return o @ params["wo"] + params["bo"]


def init_params(key):
    ks = jax.random.split(key, 8)
    std = 1.0 / math.sqrt(D_MODEL)

    def lin(kw, kb):
        w = jax.random.normal(kw, (D_MODEL, D_MODEL), jnp.float32) * std
        b = jax.random.normal(kb, (D_MODEL,), jnp.float32) * 0.02
        return w, b

    wq, bq = lin(ks[0], ks[1])
    wk, bk = lin(ks[2], ks[3])
    wv, bv = lin(ks[4], ks[5])
    wo, bo = lin(ks[6], ks[7])
    return {"wq": wq, "bq": bq, "wk": wk, "bk": bk,
            "wv": wv, "bv": bv, "wo": wo, "bo": bo}


if __name__ == "__main__":
    key = jax.random.PRNGKey(0)
    kp, kq, kk, kv = jax.random.split(key, 4)

    B, S = 2, 8
    params = init_params(kp)
    q = jax.random.normal(kq, (B, S, D_MODEL), jnp.float32)
    k = jax.random.normal(kk, (B, S, D_MODEL), jnp.float32)
    v = jax.random.normal(kv, (B, S, D_MODEL), jnp.float32)

    # Padding-style mask (B, 1, 1, S): second sequence has 3 padded keys.
    lengths = jnp.array([S, 5], jnp.int32)
    mask = (jnp.arange(S)[None, :] < lengths[:, None])[:, None, None, :]

    fwd = jax.jit(multi_head_attention)
    out = jax.block_until_ready(fwd(params, q, k, v, mask))

    ref = mha_reference(params, q, k, v, mask)
    assert out.shape == (B, S, D_MODEL)
    assert bool(jnp.all(jnp.isfinite(out)))
    max_err = float(jnp.max(jnp.abs(out - ref)))
    assert max_err < 1e-2, f"max abs err {max_err}"
    print("KERNEL_OK")
</pallas_src>

<mosaic_0001>
module attributes {stable_mosaic.version = 11 : i64} {
  func.func @_mha_kernel(%arg0: i32, %arg1: memref<1x8x512xf32, #tpu.memory_space<vmem>>, %arg2: memref<1x8x512xf32, #tpu.memory_space<vmem>>, %arg3: memref<1x8x512xf32, #tpu.memory_space<vmem>>, %arg4: memref<1x8x8xf32, #tpu.memory_space<vmem>>, %arg5: memref<8x512x64xf32, #tpu.memory_space<vmem>>, %arg6: memref<8x512x64xf32, #tpu.memory_space<vmem>>, %arg7: memref<8x512x64xf32, #tpu.memory_space<vmem>>, %arg8: memref<8x64x512xf32, #tpu.memory_space<vmem>>, %arg9: memref<8x1x64xf32, #tpu.memory_space<vmem>>, %arg10: memref<8x1x64xf32, #tpu.memory_space<vmem>>, %arg11: memref<8x1x64xf32, #tpu.memory_space<vmem>>, %arg12: memref<1x512xf32, #tpu.memory_space<vmem>>, %arg13: memref<1x8x512xf32, #tpu.memory_space<vmem>>) attributes {dimension_semantics = [#tpu.dimension_semantics<parallel>], iteration_bounds = array<i64: 2>, scalar_prefetch = 0 : i64, scratch_operands = 0 : i64, tpu.core_type = #tpu.core_type<tc>, window_params = [{transform_indices = @transform_0, window_bounds = array<i64: 1, 8, 512>}, {transform_indices = @transform_1, window_bounds = array<i64: 1, 8, 512>}, {transform_indices = @transform_2, window_bounds = array<i64: 1, 8, 512>}, {transform_indices = @transform_3, window_bounds = array<i64: 1, 8, 8>}, {pipeline_mode = #tpu.pipeline_mode<synchronous>, transform_indices = @transform_4, window_bounds = array<i64: 8, 512, 64>}, {pipeline_mode = #tpu.pipeline_mode<synchronous>, transform_indices = @transform_5, window_bounds = array<i64: 8, 512, 64>}, {pipeline_mode = #tpu.pipeline_mode<synchronous>, transform_indices = @transform_6, window_bounds = array<i64: 8, 512, 64>}, {pipeline_mode = #tpu.pipeline_mode<synchronous>, transform_indices = @transform_7, window_bounds = array<i64: 8, 64, 512>}, {pipeline_mode = #tpu.pipeline_mode<synchronous>, transform_indices = @transform_8, window_bounds = array<i64: 8, 1, 64>}, {pipeline_mode = #tpu.pipeline_mode<synchronous>, transform_indices = @transform_9, window_bounds = array<i64: 8, 1, 64>}, {pipeline_mode = #tpu.pipeline_mode<synchronous>, transform_indices = @transform_10, window_bounds = array<i64: 8, 1, 64>}, {pipeline_mode = #tpu.pipeline_mode<synchronous>, transform_indices = @transform_11, window_bounds = array<i64: 1, 512>}, {transform_indices = @transform_12, window_bounds = array<i64: 1, 8, 512>}]} {
    %c0 = arith.constant 0 : index
    %c0_0 = arith.constant 0 : index
    %c0_1 = arith.constant 0 : index
    %0 = vector.load %arg1[%c0, %c0_0, %c0_1] : memref<1x8x512xf32, #tpu.memory_space<vmem>>, vector<1x8x512xf32>
    %1 = vector.shape_cast %0 : vector<1x8x512xf32> to vector<8x512xf32>
    %c0_2 = arith.constant 0 : index
    %c0_3 = arith.constant 0 : index
    %c0_4 = arith.constant 0 : index
    %2 = vector.load %arg2[%c0_2, %c0_3, %c0_4] : memref<1x8x512xf32, #tpu.memory_space<vmem>>, vector<1x8x512xf32>
    %3 = vector.shape_cast %2 : vector<1x8x512xf32> to vector<8x512xf32>
    %c0_5 = arith.constant 0 : index
    %c0_6 = arith.constant 0 : index
    %c0_7 = arith.constant 0 : index
    %4 = vector.load %arg3[%c0_5, %c0_6, %c0_7] : memref<1x8x512xf32, #tpu.memory_space<vmem>>, vector<1x8x512xf32>
    %5 = vector.shape_cast %4 : vector<1x8x512xf32> to vector<8x512xf32>
    %6 = vector.shape_cast %1 : vector<8x512xf32> to vector<1x8x512xf32>
    %7 = vector.broadcast %6 : vector<1x8x512xf32> to vector<8x8x512xf32>
    %8 = vector.shape_cast %3 : vector<8x512xf32> to vector<1x8x512xf32>
    %9 = vector.broadcast %8 : vector<1x8x512xf32> to vector<8x8x512xf32>
    %10 = vector.shape_cast %5 : vector<8x512xf32> to vector<1x8x512xf32>
    %11 = vector.broadcast %10 : vector<1x8x512xf32> to vector<8x8x512xf32>
    %c0_8 = arith.constant 0 : index
    %c0_9 = arith.constant 0 : index
    %c0_10 = arith.constant 0 : index
    %12 = vector.load %arg5[%c0_8, %c0_9, %c0_10] : memref<8x512x64xf32, #tpu.memory_space<vmem>>, vector<8x512x64xf32>
    "tpu.trace_start"() <{level = 10 : i32, message = "hsd,hdk->hsk"}> : () -> ()
    %cst = arith.constant dense<0.000000e+00> : vector<8x8x64xf32>
    %13 = tpu.matmul %7, %12, %cst {dimension_numbers = #tpu.dot_dimension_numbers<[2], [1], [1], [2], [0, 0, 0, 1, 1, 2], [0], [0]>} : vector<8x8x512xf32>, vector<8x512x64xf32>, vector<8x8x64xf32> -> vector<8x8x64xf32>
    "tpu.trace_stop"() : () -> ()
    %c0_11 = arith.constant 0 : index
    %c0_12 = arith.constant 0 : index
    %c0_13 = arith.constant 0 : index
    %14 = vector.load %arg9[%c0_11, %c0_12, %c0_13] : memref<8x1x64xf32, #tpu.memory_space<vmem>>, vector<8x1x64xf32>
    %15 = vector.broadcast %14 : vector<8x1x64xf32> to vector<8x8x64xf32>
    %16 = arith.addf %13, %15 : vector<8x8x64xf32>
    %c0_14 = arith.constant 0 : index
    %c0_15 = arith.constant 0 : index
    %c0_16 = arith.constant 0 : index
    %17 = vector.load %arg6[%c0_14, %c0_15, %c0_16] : memref<8x512x64xf32, #tpu.memory_space<vmem>>, vector<8x512x64xf32>
    "tpu.trace_start"() <{level = 10 : i32, message = "hsd,hdk->hsk"}> : () -> ()
    %cst_17 = arith.constant dense<0.000000e+00> : vector<8x8x64xf32>
    %18 = tpu.matmul %9, %17, %cst_17 {dimension_numbers = #tpu.dot_dimension_numbers<[2], [1], [1], [2], [0, 0, 0, 1, 1, 2], [0], [0]>} : vector<8x8x512xf32>, vector<8x512x64xf32>, vector<8x8x64xf32> -> vector<8x8x64xf32>
    "tpu.trace_stop"() : () -> ()
    %c0_18 = arith.constant 0 : index
    %c0_19 = arith.constant 0 : index
    %c0_20 = arith.constant 0 : index
    %19 = vector.load %arg10[%c0_18, %c0_19, %c0_20] : memref<8x1x64xf32, #tpu.memory_space<vmem>>, vector<8x1x64xf32>
    %20 = vector.broadcast %19 : vector<8x1x64xf32> to vector<8x8x64xf32>
    %21 = arith.addf %18, %20 : vector<8x8x64xf32>
    %c0_21 = arith.constant 0 : index
    %c0_22 = arith.constant 0 : index
    %c0_23 = arith.constant 0 : index
    %22 = vector.load %arg7[%c0_21, %c0_22, %c0_23] : memref<8x512x64xf32, #tpu.memory_space<vmem>>, vector<8x512x64xf32>
    "tpu.trace_start"() <{level = 10 : i32, message = "hsd,hdk->hsk"}> : () -> ()
    %cst_24 = arith.constant dense<0.000000e+00> : vector<8x8x64xf32>
    %23 = tpu.matmul %11, %22, %cst_24 {dimension_numbers = #tpu.dot_dimension_numbers<[2], [1], [1], [2], [0, 0, 0, 1, 1, 2], [0], [0]>} : vector<8x8x512xf32>, vector<8x512x64xf32>, vector<8x8x64xf32> -> vector<8x8x64xf32>
    "tpu.trace_stop"() : () -> ()
    %c0_25 = arith.constant 0 : index
    %c0_26 = arith.constant 0 : index
    %c0_27 = arith.constant 0 : index
    %24 = vector.load %arg11[%c0_25, %c0_26, %c0_27] : memref<8x1x64xf32, #tpu.memory_space<vmem>>, vector<8x1x64xf32>
    %25 = vector.broadcast %24 : vector<8x1x64xf32> to vector<8x8x64xf32>
    %26 = arith.addf %23, %25 : vector<8x8x64xf32>
    "tpu.trace_start"() <{level = 10 : i32, message = "hqd,hkd->hqk"}> : () -> ()
    %cst_28 = arith.constant dense<0.000000e+00> : vector<8x8x8xf32>
    %27 = tpu.matmul %16, %21, %cst_28 {dimension_numbers = #tpu.dot_dimension_numbers<[2], [2], [1], [1], [0, 0, 0, 1, 1, 1], [0], [0]>} : vector<8x8x64xf32>, vector<8x8x64xf32>, vector<8x8x8xf32> -> vector<8x8x8xf32>
    "tpu.trace_stop"() : () -> ()
    %cst_29 = arith.constant 1.250000e-01 : f32
    %28 = vector.broadcast %cst_29 : f32 to vector<8x8x8xf32>
    %29 = arith.mulf %27, %28 : vector<8x8x8xf32>
    %c0_30 = arith.constant 0 : index
    %c0_31 = arith.constant 0 : index
    %c0_32 = arith.constant 0 : index
    %30 = vector.load %arg4[%c0_30, %c0_31, %c0_32] : memref<1x8x8xf32, #tpu.memory_space<vmem>>, vector<1x8x8xf32>
    %31 = vector.shape_cast %30 : vector<1x8x8xf32> to vector<8x8xf32>
    %32 = vector.shape_cast %31 : vector<8x8xf32> to vector<1x8x8xf32>
    %33 = vector.broadcast %32 : vector<1x8x8xf32> to vector<8x8x8xf32>
    %34 = arith.addf %29, %33 : vector<8x8x8xf32>
    %cst_33 = arith.constant dense<0xFF800000> : vector<8x8xf32>
    %35 = vector.multi_reduction <maximumf>, %34, %cst_33 [2] : vector<8x8x8xf32> to vector<8x8xf32>
    %36 = vector.shape_cast %35 : vector<8x8xf32> to vector<8x8x1xf32>
    %37 = vector.broadcast %36 : vector<8x8x1xf32> to vector<8x8x8xf32>
    %38 = arith.subf %34, %37 : vector<8x8x8xf32>
    %39 = math.exp %38 : vector<8x8x8xf32>
    %cst_34 = arith.constant dense<0.000000e+00> : vector<8x8xf32>
    %40 = vector.multi_reduction <add>, %39, %cst_34 [2] : vector<8x8x8xf32> to vector<8x8xf32>
    %41 = vector.shape_cast %40 : vector<8x8xf32> to vector<8x8x1xf32>
    %42 = tpu.reciprocal %41 {approx = true} : vector<8x8x1xf32> -> vector<8x8x1xf32>
    %43 = vector.broadcast %42 : vector<8x8x1xf32> to vector<8x8x8xf32>
    %44 = arith.mulf %39, %43 : vector<8x8x8xf32>
    "tpu.trace_start"() <{level = 10 : i32, message = "hqk,hkd->hqd"}> : () -> ()
    %cst_35 = arith.constant dense<0.000000e+00> : vector<8x8x64xf32>
    %45 = tpu.matmul %44, %26, %cst_35 {dimension_numbers = #tpu.dot_dimension_numbers<[2], [1], [1], [2], [0, 0, 0, 1, 1, 2], [0], [0]>} : vector<8x8x8xf32>, vector<8x8x64xf32>, vector<8x8x64xf32> -> vector<8x8x64xf32>
    "tpu.trace_stop"() : () -> ()
    %c0_36 = arith.constant 0 : index
    %c0_37 = arith.constant 0 : index
    %c0_38 = arith.constant 0 : index
    %46 = vector.load %arg8[%c0_36, %c0_37, %c0_38] : memref<8x64x512xf32, #tpu.memory_space<vmem>>, vector<8x64x512xf32>
    "tpu.trace_start"() <{level = 10 : i32, message = "hqk,hkd->hqd"}> : () -> ()
    %cst_39 = arith.constant dense<0.000000e+00> : vector<8x8x512xf32>
    %47 = tpu.matmul %45, %46, %cst_39 {dimension_numbers = #tpu.dot_dimension_numbers<[2], [1], [1], [2], [0, 0, 0, 1, 1, 2], [0], [0]>} : vector<8x8x64xf32>, vector<8x64x512xf32>, vector<8x8x512xf32> -> vector<8x8x512xf32>
    "tpu.trace_stop"() : () -> ()
    %cst_40 = arith.constant dense<0.000000e+00> : vector<8x512xf32>
    %48 = vector.multi_reduction <add>, %47, %cst_40 [0] : vector<8x8x512xf32> to vector<8x512xf32>
    %c0_41 = arith.constant 0 : index
    %c0_42 = arith.constant 0 : index
    %49 = vector.load %arg12[%c0_41, %c0_42] : memref<1x512xf32, #tpu.memory_space<vmem>>, vector<1x512xf32>
    %50 = vector.broadcast %49 : vector<1x512xf32> to vector<8x512xf32>
    %51 = arith.addf %48, %50 : vector<8x512xf32>
    %c0_43 = arith.constant 0 : index
    %c0_44 = arith.constant 0 : index
    %c0_45 = arith.constant 0 : index
    %52 = vector.load %arg13[%c0_43, %c0_44, %c0_45] : memref<1x8x512xf32, #tpu.memory_space<vmem>>, vector<1x8x512xf32>
    %53 = vector.shape_cast %52 : vector<1x8x512xf32> to vector<8x512xf32>
    %54 = vector.shape_cast %51 : vector<8x512xf32> to vector<1x8x512xf32>
    tpu.vector_store %arg13[%c0_43, %c0_44, %c0_45], %54 {strides = array<i32>} : memref<1x8x512xf32, #tpu.memory_space<vmem>>, vector<1x8x512xf32>,
    return
  }
  func.func @transform_0(%arg0: i32) -> (i32, i32, i32) {
    %c0_i32 = arith.constant 0 : i32
    %c0_i32_0 = arith.constant 0 : i32
    %c0_i32_1 = arith.constant 0 : i32
    return %arg0, %c0_i32, %c0_i32_0 : i32, i32, i32
  }
  func.func @transform_1(%arg0: i32) -> (i32, i32, i32) {
    %c0_i32 = arith.constant 0 : i32
    %c0_i32_0 = arith.constant 0 : i32
    %c0_i32_1 = arith.constant 0 : i32
    return %arg0, %c0_i32, %c0_i32_0 : i32, i32, i32
  }
  func.func @transform_2(%arg0: i32) -> (i32, i32, i32) {
    %c0_i32 = arith.constant 0 : i32
    %c0_i32_0 = arith.constant 0 : i32
    %c0_i32_1 = arith.constant 0 : i32
    return %arg0, %c0_i32, %c0_i32_0 : i32, i32, i32
  }
  func.func @transform_3(%arg0: i32) -> (i32, i32, i32) {
    %c0_i32 = arith.constant 0 : i32
    %c0_i32_0 = arith.constant 0 : i32
    %c0_i32_1 = arith.constant 0 : i32
    return %arg0, %c0_i32, %c0_i32_0 : i32, i32, i32
  }
  func.func @transform_4(%arg0: i32) -> (i32, i32, i32) {
    %c0_i32 = arith.constant 0 : i32
    %c0_i32_0 = arith.constant 0 : i32
    %c0_i32_1 = arith.constant 0 : i32
    %c0_i32_2 = arith.constant 0 : i32
    return %c0_i32, %c0_i32_0, %c0_i32_1 : i32, i32, i32
  }
  func.func @transform_5(%arg0: i32) -> (i32, i32, i32) {
    %c0_i32 = arith.constant 0 : i32
    %c0_i32_0 = arith.constant 0 : i32
    %c0_i32_1 = arith.constant 0 : i32
    %c0_i32_2 = arith.constant 0 : i32
    return %c0_i32, %c0_i32_0, %c0_i32_1 : i32, i32, i32
  }
  func.func @transform_6(%arg0: i32) -> (i32, i32, i32) {
    %c0_i32 = arith.constant 0 : i32
    %c0_i32_0 = arith.constant 0 : i32
    %c0_i32_1 = arith.constant 0 : i32
    %c0_i32_2 = arith.constant 0 : i32
    return %c0_i32, %c0_i32_0, %c0_i32_1 : i32, i32, i32
  }
  func.func @transform_7(%arg0: i32) -> (i32, i32, i32) {
    %c0_i32 = arith.constant 0 : i32
    %c0_i32_0 = arith.constant 0 : i32
    %c0_i32_1 = arith.constant 0 : i32
    %c0_i32_2 = arith.constant 0 : i32
    return %c0_i32, %c0_i32_0, %c0_i32_1 : i32, i32, i32
  }
  func.func @transform_8(%arg0: i32) -> (i32, i32, i32) {
    %c0_i32 = arith.constant 0 : i32
    %c0_i32_0 = arith.constant 0 : i32
    %c0_i32_1 = arith.constant 0 : i32
    %c0_i32_2 = arith.constant 0 : i32
    return %c0_i32, %c0_i32_0, %c0_i32_1 : i32, i32, i32
  }
  func.func @transform_9(%arg0: i32) -> (i32, i32, i32) {
    %c0_i32 = arith.constant 0 : i32
    %c0_i32_0 = arith.constant 0 : i32
    %c0_i32_1 = arith.constant 0 : i32
    %c0_i32_2 = arith.constant 0 : i32
    return %c0_i32, %c0_i32_0, %c0_i32_1 : i32, i32, i32
  }
  func.func @transform_10(%arg0: i32) -> (i32, i32, i32) {
    %c0_i32 = arith.constant 0 : i32
    %c0_i32_0 = arith.constant 0 : i32
    %c0_i32_1 = arith.constant 0 : i32
    %c0_i32_2 = arith.constant 0 : i32
    return %c0_i32, %c0_i32_0, %c0_i32_1 : i32, i32, i32
  }
  func.func @transform_11(%arg0: i32) -> (i32, i32) {
    %c0_i32 = arith.constant 0 : i32
    %c0_i32_0 = arith.constant 0 : i32
    %c0_i32_1 = arith.constant 0 : i32
    return %c0_i32, %c0_i32_0 : i32, i32
  }
  func.func @transform_12(%arg0: i32) -> (i32, i32, i32) {
    %c0_i32 = arith.constant 0 : i32
    %c0_i32_0 = arith.constant 0 : i32
    %c0_i32_1 = arith.constant 0 : i32
    return %arg0, %c0_i32, %c0_i32_0 : i32, i32, i32
  }
}

</mosaic_0001>

<bundles_post_ra>
// kernel: multi_head_attention.1
= control target key start
LH: loop header
LB: loop body
LE: loop exit
PB: predicated region body
PF: predicated region fallthrough
CT: control target
= control target key end

     0   :  { %17 = vsyncpa [#allocation3], 0  ;;  %s18309_s0 = inlined_call_operand.vmem [shape: f32[2,8,512], index: 0, kind: input, shape index: {}]   ;;  %s18310_s1 = inlined_call_operand.vmem [shape: f32[2,8,512], index: 1, kind: input, shape index: {}]   ;;  %s18311_s2 = inlined_call_operand.vmem [shape: f32[2,8,512], index: 2, kind: input, shape index: {}]   ;;  %s18312_s3 = inlined_call_operand.vmem [shape: f32[2,8,8], index: 3, kind: input, shape index: {}]   ;;  %s18313_s4 = inlined_call_operand.vmem [shape: f32[8,512,64], index: 4, kind: input, shape index: {}]   ;;  %s18314_s5 = inlined_call_operand.vmem [shape: f32[8,512,64], index: 5, kind: input, shape index: {}]   ;;  %s18315_s6 = inlined_call_operand.vmem [shape: f32[8,512,64], index: 6, kind: input, shape index: {}]   ;;  %s18316_s7 = inlined_call_operand.vmem [shape: f32[8,64,512], index: 7, kind: input, shape index: {}]   ;;  %s18317_s8 = inlined_call_operand.vmem [shape: f32[8,1,64], index: 8, kind: input, shape index: {}]   ;;  %s18318_s9 = inlined_call_operand.vmem [shape: f32[8,1,64], index: 9, kind: input, shape index: {}]   ;;  %s18319_s10 = inlined_call_operand.vmem [shape: f32[8,1,64], index: 10, kind: input, shape index: {}]   ;;  %s18320_s11 = inlined_call_operand.vmem [shape: f32[1,512], index: 11, kind: input, shape index: {}]   ;;  %s18321_s12 = inlined_call_operand.hbm [shape: f32[2,8,512], index: 12, kind: output, shape index: {}]  }
   0x1   :  { %19 = vsyncpa [#allocation3 + $0x1], 0  ;;  %s12342_s21 = smov 0   ;;  %s12344_s22 = smov 0  }
   0x2   :  { %s12346_s23 = smov 0   ;;  %s12348_s24 = smov 0  }
   0x3 LB: > { %18326 = sst [smem:[#allocation5_spill]] %s12268_s23  ;;  %s12363_s25 = sadd.s32 4294967295, %s12272_s24   ;;  %s12272_s24 = sphi %s12348_s24, %s18333_s24   ;;  %s12268_s23 = sphi %s12346_s23, %s18335_s23   ;;  %s12264_s22 = sphi %s12344_s22, %s18337_s22   ;;  %s12260_s21 = sphi %s12342_s21, %s18336_s21  }
   0x4   : > { %s8428_s26 = sadd.s32 4294967294, %s12272_s24   ;;  %s12367_s27 = sadd.s32 1, %s12272_s24  }
   0x5   : > { %18327 = sst [smem:[#allocation6_spill]] %s12367_s27  ;;  %s304_s28 = sadd.s32 1, %s12268_s23 }
   0x6   : > { %s301_s29 = ssub.s32 %s12272_s24, %s12367_s27  ;;  %p314_p0 = scmp.ne.s32.totalorder %s12268_s23, %s12264_s22 }
   0x7   : > { %p302_p1 = scmp.eq.s32.totalorder %s301_s29, 0  ;;  %p315_p2 = scmp.eq.s32.totalorder %s12363_s25, 1 }
   0x8   : > { %p320_p3 = scmp.ne.s32.totalorder %s12264_s22, %s12260_s21  ;;  %p321_p4 = scmp.eq.s32.totalorder %s8428_s26, 1 }
   0x9   : > { %s12378_s30 = scalar_select %p302_p1, %s12268_s23, %s304_s28  }
   0xa   : > { %p12380_p5 = por %p315_p2, %p314_p0  ;;  %p12384_p6 = por %p321_p4, %p320_p3 }
   0xb   : > { %18328 = sst [smem:[#allocation7_spill]] %s12378_s30  ;;  %p8431_p7 = scmp.ge.s32.totalorder %s12272_s24, 1 }
   0xc   : > { %s18330_s14 = scalar_select %p12384_p6, 1, 0 }
   0xd   : > { %p394_p8 = scmp.lt.s32.totalorder %s12272_s24, 3 }
   0xe   : > { %18331 = sst [smem:[#allocation8_spill]] %s18330_s14 }
   0xf   : > { %p395_p9 = pnand %p8431_p7, %p394_p8 }
  0x10   : > { %v497_v0 = vld [vmem:[%s18313_s4 + $0x80] sm:$0xff] (!%p395_p9)  ;;  %v498_v1 = vld [vmem:[%s18313_s4 + $0x88] sm:$0xff] (!%p395_p9)  ;;  %v499_v11 = vld [vmem:[%s18313_s4 + $0x90] sm:$0xff] (!%p395_p9)  ;;  %p450_p10 = scmp.lt.s32.totalorder (!%p395_p9), %s12363_s25, 1  ;;  %vm12275_vm0 = vmmov (!%p395_p9), 0   ;;  %vm5545_vm1 = vcmask (!%p395_p9), 523264  }
  0x11   : > { %398 = sbr.rel (%p395_p9) target bundleno = 1880 (0x758), region = 68  ;;  %v529_v2 = vld [vmem:[%s18313_s4 + $0x180] sm:$0xff] (!%p395_p9)  ;;  %v10305_v3 = vpack.c.bf16 (!%p395_p9), %v498_v1, %v497_v0  ;;  %v530_v4 = vld [vmem:[%s18313_s4 + $0x188] sm:$0xff] (!%p395_p9)  ;;  %v500_v13 = vld [vmem:[%s18313_s4 + $0x98] sm:$0xff] (!%p395_p9)  ;;  %vm6171_vm2 = vcmask (!%p395_p9), 64512   ;;  %s12276_s30 = smov (!%p395_p9), [#allocation2]  }
  0x12   : > { %v481_v5 = vld [vmem:[%s18313_s4] sm:$0xff] (!%p395_p9)  ;;  %v482_v6 = vld [vmem:[%s18313_s4 + $0x8] sm:$0xff] (!%p395_p9)  ;;  %v10337_v7 = vpack.c.bf16 (!%p395_p9), %v530_v4, %v529_v2  ;;  %v531_v14 = vld [vmem:[%s18313_s4 + $0x190] sm:$0xff] (!%p395_p9)  ;;  %v10309_v16 = vpack.c.bf16 (!%p395_p9), %v500_v13, %v499_v11  ;;  %s12214_s28 = sshll.u32 (!%p395_p9), %s12276_s30, 4  ;;  %s12215_s28 = int_to_ptr.vmem [resolvable:$false] %s12214_s28 }
  0x13   : > { %v10307_v8 = vpack.c.bf16 (!%p395_p9), %v482_v6, %v481_v5  ;;  %v513_v9 = vld [vmem:[%s18313_s4 + $0x100] sm:$0xff] (!%p395_p9)  ;;  %v514_v10 = vld [vmem:[%s18313_s4 + $0x108] sm:$0xff] (!%p395_p9)  ;;  %10306 = vmatprep.subr.bf16.mxu0 (!%p395_p9), %v10305_v3  ;;  %v532_v15 = vld [vmem:[%s18313_s4 + $0x198] sm:$0xff] (!%p395_p9) }
  0x14   : > { %v10339_v12 = vpack.c.bf16 (!%p395_p9), %v514_v10, %v513_v9  ;;  %10338 = vmatprep.subr.bf16.mxu1 (!%p395_p9), %v10337_v7  ;;  %v10341_v17 = vpack.c.bf16 (!%p395_p9), %v532_v15, %v531_v14  ;;  %v483_v18 = vld [vmem:[%s18313_s4 + $0x10] sm:$0xff] (!%p395_p9)  ;;  %v484_v19 = vld [vmem:[%s18313_s4 + $0x18] sm:$0xff] (!%p395_p9)  ;;  %v501_v23 = vld [vmem:[%s18313_s4 + $0xa0] sm:$0xff] (!%p395_p9) }
  0x15   : > { %10308 = vmatpush3.bf16.msra.mxu0 (!%p395_p9), %v10307_v8  ;;  %v515_v20 = vld [vmem:[%s18313_s4 + $0x110] sm:$0xff] (!%p395_p9)  ;;  %v10311_v21 = vpack.c.bf16 (!%p395_p9), %v484_v19, %v483_v18  ;;  %v516_v22 = vld [vmem:[%s18313_s4 + $0x118] sm:$0xff] (!%p395_p9)  ;;  %v502_v24 = vld [vmem:[%s18313_s4 + $0xa8] sm:$0xff] (!%p395_p9) }
  0x16   : > { %10340 = vmatpush3.bf16.msra.mxu1 (!%p395_p9), %v10339_v12  ;;  %10310 = vmatprep.subr.bf16.mxu0 (!%p395_p9), %v10309_v16  ;;  %v10343_v25 = vpack.c.bf16 (!%p395_p9), %v516_v22, %v515_v20  ;;  %v10313_v26 = vpack.c.bf16 (!%p395_p9), %v502_v24, %v501_v23  ;;  %v533_v27 = vld [vmem:[%s18313_s4 + $0x1a0] sm:$0xff] (!%p395_p9)  ;;  %v534_v28 = vld [vmem:[%s18313_s4 + $0x1a8] sm:$0xff] (!%p395_p9)  ;;  %v503_v35 = vld [vmem:[%s18313_s4 + $0xb0] sm:$0xff] (!%p395_p9) }
  0x17   : > { %10342 = vmatprep.subr.bf16.mxu1 (!%p395_p9), %v10341_v17  ;;  %v485_v29 = vld [vmem:[%s18313_s4 + $0x20] sm:$0xff] (!%p395_p9)  ;;  %v10345_v30 = vpack.c.bf16 (!%p395_p9), %v534_v28, %v533_v27  ;;  %v486_v31 = vld [vmem:[%s18313_s4 + $0x28] sm:$0xff] (!%p395_p9)  ;;  %v504_v36 = vld [vmem:[%s18313_s4 + $0xb8] sm:$0xff] (!%p395_p9) }
  0x18   : > { %v517_v32 = vld [vmem:[%s18313_s4 + $0x120] sm:$0xff]  ;;  %v518_v33 = vld [vmem:[%s18313_s4 + $0x128] sm:$0xff]  ;;  %v10315_v34 = vpack.c.bf16 %v486_v31, %v485_v29  ;;  %v535_v37 = vld [vmem:[%s18313_s4 + $0x1b0] sm:$0xff]  ;;  %v10317_v39 = vpack.c.bf16 %v504_v36, %v503_v35  ;;  %s12502_s20 = scalar_select %p450_p10, %s12363_s25, 1 }
  0x19   : > { %10312 = vmatpush3.bf16.msra.mxu0 %v10311_v21  ;;  %v10347_v38 = vpack.c.bf16 %v518_v33, %v517_v32  ;;  %v536_v40 = vld [vmem:[%s18313_s4 + $0x1b8] sm:$0xff]  ;;  %v487_v41 = vld [vmem:[%s18313_s4 + $0x30] sm:$0xff]  ;;  %v505_v46 = vld [vmem:[%s18313_s4 + $0xc0] sm:$0xff] }
  0x1a   : > { %10344 = vmatpush3.bf16.msra.mxu1 %v10343_v25  ;;  %10314 = vmatprep.subr.bf16.mxu0 %v10313_v26  ;;  %v488_v42 = vld [vmem:[%s18313_s4 + $0x38] sm:$0xff]  ;;  %v10349_v43 = vpack.c.bf16 %v536_v40, %v535_v37  ;;  %v519_v44 = vld [vmem:[%s18313_s4 + $0x130] sm:$0xff]  ;;  %v506_v47 = vld [vmem:[%s18313_s4 + $0xc8] sm:$0xff]  ;;  %s12529_s29 = sshll.u32 %s12502_s20, 5  ;;  %s8439_s16 = sshll.u32 %s12502_s20, 3 }
  0x1b   : > { %10346 = vmatprep.subr.bf16.mxu1 %v10345_v30  ;;  %v520_v45 = vld [vmem:[%s18313_s4 + $0x138] sm:$0xff]  ;;  %v537_v48 = vld [vmem:[%s18313_s4 + $0x1c0] sm:$0xff]  ;;  %v538_v49 = vld [vmem:[%s18313_s4 + $0x1c8] sm:$0xff]  ;;  %v10319_v50 = vpack.c.bf16 %v488_v42, %v487_v41  ;;  %v10321_v52 = vpack.c.bf16 %v506_v47, %v505_v46  ;;  %s12553_s14 = scalar_lea.vmem %s18309_s0, %s12529_s29  ;;  %s14040_s19 = scalar_lea.vmem %s18310_s1, %s12529_s29 }
  0x1c   : > { %v10351_v51 = vpack.c.bf16 %v520_v45, %v519_v44  ;;  %v489_v53 = vld [vmem:[%s18313_s4 + $0x40] sm:$0xff]  ;;  %v490_v54 = vld [vmem:[%s18313_s4 + $0x48] sm:$0xff]  ;;  %v10353_v56 = vpack.c.bf16 %v538_v49, %v537_v48  ;;  %v507_v58 = vld [vmem:[%s18313_s4 + $0xd0] sm:$0xff]  ;;  %s15678_s17 = scalar_lea.vmem %s18311_s2, %s12529_s29  ;;  %s468_s26 = scalar_lea.vmem %s18312_s3, %s8439_s16 }
  0x1d   : > { %10316 = vmatpush3.bf16.msra.mxu0 %v10315_v34  ;;  %v521_v55 = vld [vmem:[%s18313_s4 + $0x140] sm:$0xff]  ;;  %v522_v57 = vld [vmem:[%s18313_s4 + $0x148] sm:$0xff]  ;;  %v508_v59 = vld [vmem:[%s18313_s4 + $0xd8] sm:$0xff]  ;;  %v10323_v62 = vpack.c.bf16 %v490_v54, %v489_v53  ;;  %s447_s29 = sand.u32 1, %s12264_s22   ;;  %s8512_s16 = sshll.u32 %s12363_s25, 9 }
  0x1e   : > { %10348 = vmatpush3.bf16.msra.mxu1 %v10347_v38  ;;  %10318 = vmatprep.subr.bf16.mxu0 %v10317_v39  ;;  %v539_v60 = vld [vmem:[%s18313_s4 + $0x1d0] sm:$0xff]  ;;  %v540_v61 = vld [vmem:[%s18313_s4 + $0x1d8] sm:$0xff]  ;;  %v10355_v63 = vpack.c.bf16 %v522_v57, %v521_v55  ;;  %v10325_v0 = vpack.c.bf16 %v508_v59, %v507_v58  ;;  %v509_v6 = vld [vmem:[%s18313_s4 + $0xe0] sm:$0xff]  ;;  %s8432_s23 = sshll.u32 %s447_s29, 5  ;;  %s8319_s25 = scalar_lea.sflag [#allocation3], %s447_s29 }
  0x1f   : > { %10350 = vmatprep.subr.bf16.mxu1 %v10349_v43  ;;  %v491_v1 = vld [vmem:[%s18313_s4 + $0x50] sm:$0xff]  ;;  %v492_v2 = vld [vmem:[%s18313_s4 + $0x58] sm:$0xff]  ;;  %v10357_v4 = vpack.c.bf16 %v540_v61, %v539_v60  ;;  %v510_v7 = vld [vmem:[%s18313_s4 + $0xe8] sm:$0xff]  ;;  %s449_s18 = scalar_lea.vmem [#allocation2], %s8432_s23  ;;  %s12216_s23 = scalar_lea.vmem %s12215_s28, 1024 }
  0x20   : > { %v523_v3 = vld [vmem:[%s18313_s4 + $0x150] sm:$0xff]  ;;  %v524_v5 = vld [vmem:[%s18313_s4 + $0x158] sm:$0xff]  ;;  %v541_v8 = vld [vmem:[%s18313_s4 + $0x1e0] sm:$0xff]  ;;  %v10327_v10 = vpack.c.bf16 %v492_v2, %v491_v1  ;;  %v10329_v14 = vpack.c.bf16 %v510_v7, %v509_v6 }
  0x21   : > { %10320 = vmatpush3.bf16.msra.mxu0 %v10319_v50  ;;  %v542_v9 = vld [vmem:[%s18313_s4 + $0x1e8] sm:$0xff]  ;;  %v493_v11 = vld [vmem:[%s18313_s4 + $0x60] sm:$0xff]  ;;  %v10359_v13 = vpack.c.bf16 %v524_v5, %v523_v3  ;;  %v511_v19 = vld [vmem:[%s18313_s4 + $0xf0] sm:$0xff] }
  0x22   : > { %10352 = vmatpush3.bf16.msra.mxu1 %v10351_v51  ;;  %10322 = vmatprep.subr.bf16.mxu0 %v10321_v52  ;;  %v494_v12 = vld [vmem:[%s18313_s4 + $0x68] sm:$0xff]  ;;  %v525_v15 = vld [vmem:[%s18313_s4 + $0x160] sm:$0xff]  ;;  %v10361_v18 = vpack.c.bf16 %v542_v9, %v541_v8  ;;  %v512_v20 = vld [vmem:[%s18313_s4 + $0xf8] sm:$0xff] }
  0x23   : > { %10354 = vmatprep.subr.bf16.mxu1 %v10353_v56  ;;  %v526_v16 = vld [vmem:[%s18313_s4 + $0x168] sm:$0xff]  ;;  %v12584_v21 = vld [vmem:[%s12553_s14 + $0x18] sm:$0xff]  ;;  %v543_v22 = vld [vmem:[%s18313_s4 + $0x1f0] sm:$0xff]  ;;  %v10331_v24 = vpack.c.bf16 %v494_v12, %v493_v11  ;;  %v10333_v26 = vpack.c.bf16 %v512_v20, %v511_v19 }
  0x24   : > { %v12574_v17 = vld [vmem:[%s12553_s14 + $0x8] sm:$0xff]  ;;  %v544_v23 = vld [vmem:[%s18313_s4 + $0x1f8] sm:$0xff]  ;;  %1183 = vmatprep.mubr.f32.mxu1 %v12584_v21  ;;  %v10363_v25 = vpack.c.bf16 %v526_v16, %v525_v15  ;;  %v495_v27 = vld [vmem:[%s18313_s4 + $0x70] sm:$0xff] }
  0x25   : > { %10324 = vmatpush3.bf16.msra.mxu0 %v10323_v62  ;;  %1113 = vmatprep.mubr.f32.mxu0 %v12574_v17  ;;  %v496_v28 = vld [vmem:[%s18313_s4 + $0x78] sm:$0xff]  ;;  %v527_v29 = vld [vmem:[%s18313_s4 + $0x170] sm:$0xff]  ;;  %v10365_v30 = vpack.c.bf16 %v544_v23, %v543_v22  ;;  %v561_v32 = vld [vmem:[%s18313_s4 + $0x280] sm:$0xff] }
  0x26   : > { %10356 = vmatpush3.bf16.msra.mxu1 %v10355_v63  ;;  %10326 = vmatprep.subr.bf16.mxu0 %v10325_v0  ;;  %v528_v31 = vld [vmem:[%s18313_s4 + $0x178] sm:$0xff]  ;;  %v562_v33 = vld [vmem:[%s18313_s4 + $0x288] sm:$0xff]  ;;  %v593_v34 = vld [vmem:[%s18313_s4 + $0x380] sm:$0xff]  ;;  %v10335_v36 = vpack.c.bf16 %v496_v28, %v495_v27 }
  0x27   : > { %10358 = vmatprep.subr.bf16.mxu1 %v10357_v4  ;;  %v594_v35 = vld [vmem:[%s18313_s4 + $0x388] sm:$0xff]  ;;  %v10367_v37 = vpack.c.bf16 %v528_v31, %v527_v29  ;;  %v10369_v38 = vpack.c.bf16 %v562_v33, %v561_v32  ;;  %v545_v39 = vld [vmem:[%s18313_s4 + $0x200] sm:$0xff]  ;;  %v563_v44 = vld [vmem:[%s18313_s4 + $0x290] sm:$0xff] }
  0x28   : > { %v546_v40 = vld [vmem:[%s18313_s4 + $0x208] sm:$0xff]  ;;  %v577_v41 = vld [vmem:[%s18313_s4 + $0x300] sm:$0xff]  ;;  %v10401_v42 = vpack.c.bf16 %v594_v35, %v593_v34  ;;  %v564_v45 = vld [vmem:[%s18313_s4 + $0x298] sm:$0xff] }
  0x29   : > { %10328 = vmatpush3.bf16.msra.mxu0 %v10327_v10  ;;  %v578_v43 = vld [vmem:[%s18313_s4 + $0x308] sm:$0xff]  ;;  %v595_v46 = vld [vmem:[%s18313_s4 + $0x390] sm:$0xff]  ;;  %v596_v47 = vld [vmem:[%s18313_s4 + $0x398] sm:$0xff]  ;;  %v10371_v50 = vpack.c.bf16 %v546_v40, %v545_v39  ;;  %v10373_v52 = vpack.c.bf16 %v564_v45, %v563_v44 }
  0x2a   : > { %10360 = vmatpush3.bf16.msra.mxu1 %v10359_v13  ;;  %10330 = vmatprep.subr.bf16.mxu0 %v10329_v14  ;;  %v12642_v48 = vld [vmem:[%s12553_s14] sm:$0xff]  ;;  %v12645_v49 = vld [vmem:[%s12553_s14 + $0x10] sm:$0xff]  ;;  %v10403_v51 = vpack.c.bf16 %v578_v43, %v577_v41  ;;  %v548_v54 = vld [vmem:[%s18313_s4 + $0x218] sm:$0xff]  ;;  %v10405_v56 = vpack.c.bf16 %v596_v47, %v595_v46 }
  0x2b   : > { %10362 = vmatprep.subr.bf16.mxu1 %v10361_v18  ;;  %v547_v53 = vld [vmem:[%s18313_s4 + $0x210] sm:$0xff]  ;;  %v580_v57 = vld [vmem:[%s18313_s4 + $0x318] sm:$0xff]  ;;  %v565_v58 = vld [vmem:[%s18313_s4 + $0x2a0] sm:$0xff] }
  0x2c   : > { %v579_v55 = vld [vmem:[%s18313_s4 + $0x310] sm:$0xff]  ;;  %v566_v59 = vld [vmem:[%s18313_s4 + $0x2a8] sm:$0xff]  ;;  %v597_v60 = vld [vmem:[%s18313_s4 + $0x3a0] sm:$0xff]  ;;  %v10375_v62 = vpack.c.bf16 %v548_v54, %v547_v53 }
  0x2d   : > { %10332 = vmatpush3.bf16.msra.mxu0 %v10331_v24  ;;  %v598_v61 = vld [vmem:[%s18313_s4 + $0x3a8] sm:$0xff]  ;;  %v10407_v63 = vpack.c.bf16 %v580_v57, %v579_v55  ;;  %v10377_v0 = vpack.c.bf16 %v566_v59, %v565_v58  ;;  %v549_v1 = vld [vmem:[%s18313_s4 + $0x220] sm:$0xff]  ;;  %v567_v6 = vld [vmem:[%s18313_s4 + $0x2b0] sm:$0xff] }
  0x2e   : > { %10364 = vmatpush3.bf16.msra.mxu1 %v10363_v25  ;;  %10334 = vmatprep.subr.bf16.mxu0 %v10333_v26  ;;  %v550_v2 = vld [vmem:[%s18313_s4 + $0x228] sm:$0xff]  ;;  %v581_v3 = vld [vmem:[%s18313_s4 + $0x320] sm:$0xff]  ;;  %v10409_v4 = vpack.c.bf16 %v598_v61, %v597_v60  ;;  %v568_v7 = vld [vmem:[%s18313_s4 + $0x2b8] sm:$0xff] }
  0x2f   : > { %10366 = vmatprep.subr.bf16.mxu1 %v10365_v30  ;;  %v582_v5 = vld [vmem:[%s18313_s4 + $0x328] sm:$0xff]  ;;  %v599_v8 = vld [vmem:[%s18313_s4 + $0x3b0] sm:$0xff]  ;;  %v600_v9 = vld [vmem:[%s18313_s4 + $0x3b8] sm:$0xff]  ;;  %v10379_v10 = vpack.c.bf16 %v550_v2, %v549_v1  ;;  %v10381_v12 = vpack.c.bf16 %v568_v7, %v567_v6 }
  0x30   : > { %v10411_v11 = vpack.c.bf16 %v582_v5, %v581_v3  ;;  %v551_v13 = vld [vmem:[%s18313_s4 + $0x230] sm:$0xff]  ;;  %v552_v14 = vld [vmem:[%s18313_s4 + $0x238] sm:$0xff]  ;;  %v10413_v16 = vpack.c.bf16 %v600_v9, %v599_v8  ;;  %v569_v19 = vld [vmem:[%s18313_s4 + $0x2c0] sm:$0xff] }
  0x31   : > { %10336 = vmatpush3.bf16.msra.mxu0 %v10335_v36  ;;  %v583_v15 = vld [vmem:[%s18313_s4 + $0x330] sm:$0xff]  ;;  %v584_v18 = vld [vmem:[%s18313_s4 + $0x338] sm:$0xff]  ;;  %v570_v20 = vld [vmem:[%s18313_s4 + $0x2c8] sm:$0xff]  ;;  %v10383_v24 = vpack.c.bf16 %v552_v14, %v551_v13 }
  0x32   : > { %10368 = vmatpush3.bf16.msra.mxu1 %v10367_v37  ;;  %10370 = vmatprep.subr.bf16.mxu0 %v10369_v38  ;;  %v601_v22 = vld [vmem:[%s18313_s4 + $0x3c0] sm:$0xff]  ;;  %v602_v23 = vld [vmem:[%s18313_s4 + $0x3c8] sm:$0xff]  ;;  %v10415_v25 = vpack.c.bf16 %v584_v18, %v583_v15  ;;  %v10385_v26 = vpack.c.bf16 %v570_v20, %v569_v19  ;;  %v571_v32 = vld [vmem:[%s18313_s4 + $0x2d0] sm:$0xff] }
  0x33   : > { %10402 = vmatprep.subr.bf16.mxu1 %v10401_v42  ;;  %v553_v27 = vld [vmem:[%s18313_s4 + $0x240] sm:$0xff]  ;;  %v554_v28 = vld [vmem:[%s18313_s4 + $0x248] sm:$0xff]  ;;  %v10417_v30 = vpack.c.bf16 %v602_v23, %v601_v22  ;;  %v572_v33 = vld [vmem:[%s18313_s4 + $0x2d8] sm:$0xff] }
  0x34   : > { %1114 = vmatmul.mubr.f32.vlgmr.msra.gmra.mrb[0].mxu0 %v12642_v48  ;;  %v585_v29 = vld [vmem:[%s18313_s4 + $0x340] sm:$0xff]  ;;  %v586_v31 = vld [vmem:[%s18313_s4 + $0x348] sm:$0xff]  ;;  %v603_v34 = vld [vmem:[%s18313_s4 + $0x3d0] sm:$0xff]  ;;  %v10387_v36 = vpack.c.bf16 %v554_v28, %v553_v27  ;;  %v10389_v38 = vpack.c.bf16 %v572_v33, %v571_v32 }
  0x35   : > { %1184 = vmatmul.mubr.f32.vlgmr.msra.gmra.mrb[0].mxu1 %v12645_v49  ;;  %10372 = vmatpush3.bf16.msra.mxu0 %v10371_v50  ;;  %v604_v35 = vld [vmem:[%s18313_s4 + $0x3d8] sm:$0xff]  ;;  %v10419_v37 = vpack.c.bf16 %v586_v31, %v585_v29  ;;  %v555_v39 = vld [vmem:[%s18313_s4 + $0x250] sm:$0xff]  ;;  %v573_v44 = vld [vmem:[%s18313_s4 + $0x2e0] sm:$0xff] }
  0x36   : > { %10404 = vmatpush3.bf16.msra.mxu1 %v10403_v51  ;;  %10374 = vmatprep.subr.bf16.mxu0 %v10373_v52  ;;  %v556_v40 = vld [vmem:[%s18313_s4 + $0x258] sm:$0xff]  ;;  %v587_v41 = vld [vmem:[%s18313_s4 + $0x350] sm:$0xff]  ;;  %v10421_v42 = vpack.c.bf16 %v604_v35, %v603_v34  ;;  %v574_v45 = vld [vmem:[%s18313_s4 + $0x2e8] sm:$0xff] }
  0x37   : > { %10406 = vmatprep.subr.bf16.mxu1 %v10405_v56  ;;  %1253 = vmatprep.mubr.f32.mxu0 %v12574_v17  ;;  %v588_v43 = vld [vmem:[%s18313_s4 + $0x358] sm:$0xff]  ;;  %v605_v46 = vld [vmem:[%s18313_s4 + $0x3e0] sm:$0xff]  ;;  %v606_v47 = vld [vmem:[%s18313_s4 + $0x3e8] sm:$0xff]  ;;  %v10391_v50 = vpack.c.bf16 %v556_v40, %v555_v39  ;;  %v10393_v52 = vpack.c.bf16 %v574_v45, %v573_v44 }
  0x38   : > { %1323 = vmatprep.mubr.f32.mxu1 %v12584_v21  ;;  %v10423_v51 = vpack.c.bf16 %v588_v43, %v587_v41  ;;  %v557_v53 = vld [vmem:[%s18313_s4 + $0x260] sm:$0xff]  ;;  %v558_v54 = vld [vmem:[%s18313_s4 + $0x268] sm:$0xff]  ;;  %v10425_v56 = vpack.c.bf16 %v606_v47, %v605_v46  ;;  %v575_v58 = vld [vmem:[%s18313_s4 + $0x2f0] sm:$0xff] }
  0x39   : > { %10376 = vmatpush3.bf16.msra.mxu0 %v10375_v62  ;;  %v589_v55 = vld [vmem:[%s18313_s4 + $0x360] sm:$0xff]  ;;  %v590_v57 = vld [vmem:[%s18313_s4 + $0x368] sm:$0xff]  ;;  %v576_v59 = vld [vmem:[%s18313_s4 + $0x2f8] sm:$0xff]  ;;  %v10395_v62 = vpack.c.bf16 %v558_v54, %v557_v53 }
  0x3a   : > { %10408 = vmatpush3.bf16.msra.mxu1 %v10407_v63  ;;  %10378 = vmatprep.subr.bf16.mxu0 %v10377_v0  ;;  %v607_v60 = vld [vmem:[%s18313_s4 + $0x3f0] sm:$0xff]  ;;  %v608_v61 = vld [vmem:[%s18313_s4 + $0x3f8] sm:$0xff]  ;;  %v10427_v63 = vpack.c.bf16 %v590_v57, %v589_v55  ;;  %v10397_v0 = vpack.c.bf16 %v576_v59, %v575_v58  ;;  %v625_v6 = vld [vmem:[%s18313_s4 + $0x480] sm:$0xff] }
  0x3b   : > { %10410 = vmatprep.subr.bf16.mxu1 %v10409_v4  ;;  %v559_v1 = vld [vmem:[%s18313_s4 + $0x270] sm:$0xff]  ;;  %v560_v2 = vld [vmem:[%s18313_s4 + $0x278] sm:$0xff]  ;;  %v10429_v4 = vpack.c.bf16 %v608_v61, %v607_v60  ;;  %v626_v7 = vld [vmem:[%s18313_s4 + $0x488] sm:$0xff] }
  0x3c   : > { %v591_v3 = vld [vmem:[%s18313_s4 + $0x370] sm:$0xff]  ;;  %v592_v5 = vld [vmem:[%s18313_s4 + $0x378] sm:$0xff]  ;;  %v657_v8 = vld [vmem:[%s18313_s4 + $0x580] sm:$0xff] }
  0x3d   : > { %10380 = vmatpush3.bf16.msra.mxu0 %v10379_v10  ;;  %v658_v9 = vld [vmem:[%s18313_s4 + $0x588] sm:$0xff]  ;;  %v10399_v10 = vpack.c.bf16 %v560_v2, %v559_v1  ;;  %v609_v13 = vld [vmem:[%s18313_s4 + $0x400] sm:$0xff]  ;;  %v627_v19 = vld [vmem:[%s18313_s4 + $0x490] sm:$0xff] }
  0x3e   : > { %10412 = vmatpush3.bf16.msra.mxu1 %v10411_v11  ;;  %10382 = vmatprep.subr.bf16.mxu0 %v10381_v12  ;;  %v10431_v11 = vpack.c.bf16 %v592_v5, %v591_v3  ;;  %v10433_v12 = vpack.c.bf16 %v626_v7, %v625_v6  ;;  %v610_v14 = vld [vmem:[%s18313_s4 + $0x408] sm:$0xff]  ;;  %v641_v15 = vld [vmem:[%s18313_s4 + $0x500] sm:$0xff]  ;;  %v628_v20 = vld [vmem:[%s18313_s4 + $0x498] sm:$0xff] }
  0x3f   : > { %10414 = vmatprep.subr.bf16.mxu1 %v10413_v16  ;;  %v10465_v16 = vpack.c.bf16 %v658_v9, %v657_v8  ;;  %v642_v18 = vld [vmem:[%s18313_s4 + $0x508] sm:$0xff]  ;;  %v659_v22 = vld [vmem:[%s18313_s4 + $0x590] sm:$0xff]  ;;  %v660_v23 = vld [vmem:[%s18313_s4 + $0x598] sm:$0xff] }
  0x40   : > { %v611_v27 = vld [vmem:[%s18313_s4 + $0x410] sm:$0xff]  ;;  %v612_v28 = vld [vmem:[%s18313_s4 + $0x418] sm:$0xff]  ;;  %v629_v32 = vld [vmem:[%s18313_s4 + $0x4a0] sm:$0xff] }
  0x41   : > { %10384 = vmatpush3.bf16.msra.mxu0 %v10383_v24  ;;  %v10435_v24 = vpack.c.bf16 %v610_v14, %v609_v13  ;;  %v643_v29 = vld [vmem:[%s18313_s4 + $0x510] sm:$0xff]  ;;  %v644_v31 = vld [vmem:[%s18313_s4 + $0x518] sm:$0xff]  ;;  %v630_v33 = vld [vmem:[%s18313_s4 + $0x4a8] sm:$0xff] }
  0x42   : > { %10416 = vmatpush3.bf16.msra.mxu1 %v10415_v25  ;;  %10386 = vmatprep.subr.bf16.mxu0 %v10385_v26  ;;  %v10467_v25 = vpack.c.bf16 %v642_v18, %v641_v15  ;;  %v10437_v26 = vpack.c.bf16 %v628_v20, %v627_v19  ;;  %v661_v34 = vld [vmem:[%s18313_s4 + $0x5a0] sm:$0xff]  ;;  %v662_v35 = vld [vmem:[%s18313_s4 + $0x5a8] sm:$0xff]  ;;  %v631_v44 = vld [vmem:[%s18313_s4 + $0x4b0] sm:$0xff] }
  0x43   : > { %10418 = vmatprep.subr.bf16.mxu1 %v10417_v30  ;;  %v10469_v30 = vpack.c.bf16 %v660_v23, %v659_v22  ;;  %v613_v39 = vld [vmem:[%s18313_s4 + $0x420] sm:$0xff]  ;;  %v614_v40 = vld [vmem:[%s18313_s4 + $0x428] sm:$0xff]  ;;  %v632_v45 = vld [vmem:[%s18313_s4 + $0x4b8] sm:$0xff] }
  0x44   : > { %v645_v41 = vld [vmem:[%s18313_s4 + $0x520] sm:$0xff]  ;;  %v646_v43 = vld [vmem:[%s18313_s4 + $0x528] sm:$0xff]  ;;  %v663_v46 = vld [vmem:[%s18313_s4 + $0x5b0] sm:$0xff] }
  0x45   : > { %10388 = vmatpush3.bf16.msra.mxu0 %v10387_v36  ;;  %v10439_v36 = vpack.c.bf16 %v612_v28, %v611_v27  ;;  %v664_v47 = vld [vmem:[%s18313_s4 + $0x5b8] sm:$0xff]  ;;  %v615_v53 = vld [vmem:[%s18313_s4 + $0x430] sm:$0xff]  ;;  %v633_v58 = vld [vmem:[%s18313_s4 + $0x4c0] sm:$0xff] }
  0x46   : > { %10420 = vmatpush3.bf16.msra.mxu1 %v10419_v37  ;;  %10390 = vmatprep.subr.bf16.mxu0 %v10389_v38  ;;  %v10471_v37 = vpack.c.bf16 %v644_v31, %v643_v29  ;;  %v10441_v38 = vpack.c.bf16 %v630_v33, %v629_v32  ;;  %v616_v54 = vld [vmem:[%s18313_s4 + $0x438] sm:$0xff]  ;;  %v647_v55 = vld [vmem:[%s18313_s4 + $0x530] sm:$0xff]  ;;  %v634_v59 = vld [vmem:[%s18313_s4 + $0x4c8] sm:$0xff] }
  0x47   : > { %10422 = vmatprep.subr.bf16.mxu1 %v10421_v42  ;;  %v10473_v42 = vpack.c.bf16 %v662_v35, %v661_v34  ;;  %v648_v57 = vld [vmem:[%s18313_s4 + $0x538] sm:$0xff]  ;;  %v665_v60 = vld [vmem:[%s18313_s4 + $0x5c0] sm:$0xff]  ;;  %v666_v61 = vld [vmem:[%s18313_s4 + $0x5c8] sm:$0xff] }
  0x48   : > { %v617_v1 = vld [vmem:[%s18313_s4 + $0x440] sm:$0xff]  ;;  %v618_v2 = vld [vmem:[%s18313_s4 + $0x448] sm:$0xff]  ;;  %v635_v6 = vld [vmem:[%s18313_s4 + $0x4d0] sm:$0xff] }
  0x49   : > { %10392 = vmatpush3.bf16.msra.mxu0 %v10391_v50  ;;  %v10443_v50 = vpack.c.bf16 %v614_v40, %v613_v39  ;;  %v649_v3 = vld [vmem:[%s18313_s4 + $0x540] sm:$0xff]  ;;  %v650_v5 = vld [vmem:[%s18313_s4 + $0x548] sm:$0xff]  ;;  %v636_v7 = vld [vmem:[%s18313_s4 + $0x4d8] sm:$0xff] }
  0x4a   : > { %10424 = vmatpush3.bf16.msra.mxu1 %v10423_v51  ;;  %10394 = vmatprep.subr.bf16.mxu0 %v10393_v52  ;;  %v10475_v51 = vpack.c.bf16 %v646_v43, %v645_v41  ;;  %v10445_v52 = vpack.c.bf16 %v632_v45, %v631_v44  ;;  %v667_v8 = vld [vmem:[%s18313_s4 + $0x5d0] sm:$0xff]  ;;  %v668_v9 = vld [vmem:[%s18313_s4 + $0x5d8] sm:$0xff]  ;;  %v637_v19 = vld [vmem:[%s18313_s4 + $0x4e0] sm:$0xff] }
  0x4b   : > { %10426 = vmatprep.subr.bf16.mxu1 %v10425_v56  ;;  %v10477_v56 = vpack.c.bf16 %v664_v47, %v663_v46  ;;  %v619_v13 = vld [vmem:[%s18313_s4 + $0x450] sm:$0xff]  ;;  %v620_v14 = vld [vmem:[%s18313_s4 + $0x458] sm:$0xff]  ;;  %v638_v20 = vld [vmem:[%s18313_s4 + $0x4e8] sm:$0xff] }
  0x4c   : > { %v651_v15 = vld [vmem:[%s18313_s4 + $0x550] sm:$0xff]  ;;  %v652_v18 = vld [vmem:[%s18313_s4 + $0x558] sm:$0xff]  ;;  %v669_v22 = vld [vmem:[%s18313_s4 + $0x5e0] sm:$0xff] }
  0x4d   : > { %10396 = vmatpush3.bf16.msra.mxu0 %v10395_v62  ;;  %v10447_v62 = vpack.c.bf16 %v616_v54, %v615_v53  ;;  %v670_v23 = vld [vmem:[%s18313_s4 + $0x5e8] sm:$0xff]  ;;  %v621_v27 = vld [vmem:[%s18313_s4 + $0x460] sm:$0xff]  ;;  %v639_v32 = vld [vmem:[%s18313_s4 + $0x4f0] sm:$0xff] }
  0x4e   : > { %10428 = vmatpush3.bf16.msra.mxu1 %v10427_v63  ;;  %10398 = vmatprep.subr.bf16.mxu0 %v10397_v0  ;;  %v10479_v63 = vpack.c.bf16 %v648_v57, %v647_v55  ;;  %v10449_v0 = vpack.c.bf16 %v634_v59, %v633_v58  ;;  %v622_v28 = vld [vmem:[%s18313_s4 + $0x468] sm:$0xff]  ;;  %v653_v29 = vld [vmem:[%s18313_s4 + $0x560] sm:$0xff]  ;;  %v640_v33 = vld [vmem:[%s18313_s4 + $0x4f8] sm:$0xff] }
  0x4f   : > { %10430 = vmatprep.subr.bf16.mxu1 %v10429_v4  ;;  %v10481_v4 = vpack.c.bf16 %v666_v61, %v665_v60  ;;  %v654_v31 = vld [vmem:[%s18313_s4 + $0x568] sm:$0xff]  ;;  %v671_v34 = vld [vmem:[%s18313_s4 + $0x5f0] sm:$0xff]  ;;  %v672_v35 = vld [vmem:[%s18313_s4 + $0x5f8] sm:$0xff] }
  0x50   : > { %v623_v39 = vld [vmem:[%s18313_s4 + $0x470] sm:$0xff]  ;;  %v624_v40 = vld [vmem:[%s18313_s4 + $0x478] sm:$0xff]  ;;  %v689_v44 = vld [vmem:[%s18313_s4 + $0x680] sm:$0xff] }
  0x51   : > { %10400 = vmatpush3.bf16.msra.mxu0 %v10399_v10  ;;  %v10451_v10 = vpack.c.bf16 %v618_v2, %v617_v1  ;;  %v655_v41 = vld [vmem:[%s18313_s4 + $0x570] sm:$0xff]  ;;  %v656_v43 = vld [vmem:[%s18313_s4 + $0x578] sm:$0xff]  ;;  %v690_v45 = vld [vmem:[%s18313_s4 + $0x688] sm:$0xff] }
  0x52   : > { %10432 = vmatpush3.bf16.msra.mxu1 %v10431_v11  ;;  %10434 = vmatprep.subr.bf16.mxu0 %v10433_v12  ;;  %v10483_v11 = vpack.c.bf16 %v650_v5, %v649_v3  ;;  %v10453_v12 = vpack.c.bf16 %v636_v7, %v635_v6  ;;  %v721_v46 = vld [vmem:[%s18313_s4 + $0x780] sm:$0xff]  ;;  %v722_v47 = vld [vmem:[%s18313_s4 + $0x788] sm:$0xff]  ;;  %v691_v58 = vld [vmem:[%s18313_s4 + $0x690] sm:$0xff] }
  0x53   : > { %10466 = vmatprep.subr.bf16.mxu1 %v10465_v16  ;;  %v10485_v16 = vpack.c.bf16 %v668_v9, %v667_v8  ;;  %v673_v53 = vld [vmem:[%s18313_s4 + $0x600] sm:$0xff]  ;;  %v674_v54 = vld [vmem:[%s18313_s4 + $0x608] sm:$0xff]  ;;  %v692_v59 = vld [vmem:[%s18313_s4 + $0x698] sm:$0xff] }
  0x54   : > { %1254 = vmatmul.mubr.f32.vlgmr.msra.gmra.mrb[2].mxu0 %v12642_v48  ;;  %v705_v55 = vld [vmem:[%s18313_s4 + $0x700] sm:$0xff]  ;;  %v706_v57 = vld [vmem:[%s18313_s4 + $0x708] sm:$0xff]  ;;  %v723_v60 = vld [vmem:[%s18313_s4 + $0x790] sm:$0xff] }
  0x55   : > { %1324 = vmatmul.mubr.f32.vlgmr.msra.gmra.mrb[2].mxu1 %v12645_v49  ;;  %10436 = vmatpush3.bf16.msra.mxu0 %v10435_v24  ;;  %v10455_v24 = vpack.c.bf16 %v620_v14, %v619_v13  ;;  %v724_v61 = vld [vmem:[%s18313_s4 + $0x798] sm:$0xff]  ;;  %v675_v1 = vld [vmem:[%s18313_s4 + $0x610] sm:$0xff]  ;;  %v693_v6 = vld [vmem:[%s18313_s4 + $0x6a0] sm:$0xff] }
  0x56   : > { %10468 = vmatpush3.bf16.msra.mxu1 %v10467_v25  ;;  %10438 = vmatprep.subr.bf16.mxu0 %v10437_v26  ;;  %v10487_v25 = vpack.c.bf16 %v652_v18, %v651_v15  ;;  %v10457_v26 = vpack.c.bf16 %v638_v20, %v637_v19  ;;  %v676_v2 = vld [vmem:[%s18313_s4 + $0x618] sm:$0xff]  ;;  %v707_v3 = vld [vmem:[%s18313_s4 + $0x710] sm:$0xff]  ;;  %v694_v7 = vld [vmem:[%s18313_s4 + $0x6a8] sm:$0xff] }
  0x57   : > { %10470 = vmatprep.subr.bf16.mxu1 %v10469_v30  ;;  %1393 = vmatprep.mubr.f32.mxu0 %v12574_v17  ;;  %v10489_v30 = vpack.c.bf16 %v670_v23, %v669_v22  ;;  %v708_v5 = vld [vmem:[%s18313_s4 + $0x718] sm:$0xff]  ;;  %v725_v8 = vld [vmem:[%s18313_s4 + $0x7a0] sm:$0xff]  ;;  %v726_v9 = vld [vmem:[%s18313_s4 + $0x7a8] sm:$0xff] }
  0x58   : > { %1463 = vmatprep.mubr.f32.mxu1 %v12584_v21  ;;  %v677_v13 = vld [vmem:[%s18313_s4 + $0x620] sm:$0xff]  ;;  %v678_v14 = vld [vmem:[%s18313_s4 + $0x628] sm:$0xff]  ;;  %v695_v19 = vld [vmem:[%s18313_s4 + $0x6b0] sm:$0xff] }
  0x59   : > { %10440 = vmatpush3.bf16.msra.mxu0 %v10439_v36  ;;  %v10459_v36 = vpack.c.bf16 %v622_v28, %v621_v27  ;;  %v709_v15 = vld [vmem:[%s18313_s4 + $0x720] sm:$0xff]  ;;  %v710_v18 = vld [vmem:[%s18313_s4 + $0x728] sm:$0xff]  ;;  %v696_v20 = vld [vmem:[%s18313_s4 + $0x6b8] sm:$0xff] }
  0x5a   : > { %10472 = vmatpush3.bf16.msra.mxu1 %v10471_v37  ;;  %10442 = vmatprep.subr.bf16.mxu0 %v10441_v38  ;;  %v10491_v37 = vpack.c.bf16 %v654_v31, %v653_v29  ;;  %v10461_v38 = vpack.c.bf16 %v640_v33, %v639_v32  ;;  %v727_v22 = vld [vmem:[%s18313_s4 + $0x7b0] sm:$0xff]  ;;  %v728_v23 = vld [vmem:[%s18313_s4 + $0x7b8] sm:$0xff]  ;;  %v697_v32 = vld [vmem:[%s18313_s4 + $0x6c0] sm:$0xff] }
  0x5b   : > { %10474 = vmatprep.subr.bf16.mxu1 %v10473_v42  ;;  %v10493_v42 = vpack.c.bf16 %v672_v35, %v671_v34  ;;  %v679_v27 = vld [vmem:[%s18313_s4 + $0x630] sm:$0xff]  ;;  %v680_v28 = vld [vmem:[%s18313_s4 + $0x638] sm:$0xff]  ;;  %v698_v33 = vld [vmem:[%s18313_s4 + $0x6c8] sm:$0xff] }
  0x5c   : > { %v711_v29 = vld [vmem:[%s18313_s4 + $0x730] sm:$0xff]  ;;  %v712_v31 = vld [vmem:[%s18313_s4 + $0x738] sm:$0xff]  ;;  %v729_v34 = vld [vmem:[%s18313_s4 + $0x7c0] sm:$0xff] }
  0x5d   : > { %10444 = vmatpush3.bf16.msra.mxu0 %v10443_v50  ;;  %v10463_v50 = vpack.c.bf16 %v624_v40, %v623_v39  ;;  %v730_v35 = vld [vmem:[%s18313_s4 + $0x7c8] sm:$0xff]  ;;  %v681_v39 = vld [vmem:[%s18313_s4 + $0x640] sm:$0xff] }
  0x5e   : > { %10476 = vmatpush3.bf16.msra.mxu1 %v10475_v51  ;;  %10446 = vmatprep.subr.bf16.mxu0 %v10445_v52  ;;  %v10495_v51 = vpack.c.bf16 %v656_v43, %v655_v41  ;;  %v10497_v52 = vpack.c.bf16 %v690_v45, %v689_v44  ;;  %v682_v40 = vld [vmem:[%s18313_s4 + $0x648] sm:$0xff]  ;;  %v713_v41 = vld [vmem:[%s18313_s4 + $0x740] sm:$0xff]  ;;  %v699_v44 = vld [vmem:[%s18313_s4 + $0x6d0] sm:$0xff] }
  0x5f   : > { %10478 = vmatprep.subr.bf16.mxu1 %v10477_v56  ;;  %v10529_v56 = vpack.c.bf16 %v722_v47, %v721_v46  ;;  %v714_v43 = vld [vmem:[%s18313_s4 + $0x748] sm:$0xff]  ;;  %v700_v45 = vld [vmem:[%s18313_s4 + $0x6d8] sm:$0xff]  ;;  %v731_v46 = vld [vmem:[%s18313_s4 + $0x7d0] sm:$0xff] }
  0x60   : > { %v732_v47 = vld [vmem:[%s18313_s4 + $0x7d8] sm:$0xff] }
  0x61   : > { %10448 = vmatpush3.bf16.msra.mxu0 %v10447_v62  ;;  %v10499_v62 = vpack.c.bf16 %v674_v54, %v673_v53  ;;  %v683_v53 = vld [vmem:[%s18313_s4 + $0x650] sm:$0xff]  ;;  %v684_v54 = vld [vmem:[%s18313_s4 + $0x658] sm:$0xff] }
  0x62   : > { %10480 = vmatpush3.bf16.msra.mxu1 %v10479_v63  ;;  %10450 = vmatprep.subr.bf16.mxu0 %v10449_v0  ;;  %v10531_v63 = vpack.c.bf16 %v706_v57, %v705_v55  ;;  %v10501_v0 = vpack.c.bf16 %v692_v59, %v691_v58  ;;  %v715_v55 = vld [vmem:[%s18313_s4 + $0x750] sm:$0xff]  ;;  %v716_v57 = vld [vmem:[%s18313_s4 + $0x758] sm:$0xff]  ;;  %v701_v58 = vld [vmem:[%s18313_s4 + $0x6e0] sm:$0xff] }
  0x63   : > { %10482 = vmatprep.subr.bf16.mxu1 %v10481_v4  ;;  %v10533_v4 = vpack.c.bf16 %v724_v61, %v723_v60  ;;  %v702_v59 = vld [vmem:[%s18313_s4 + $0x6e8] sm:$0xff]  ;;  %v733_v60 = vld [vmem:[%s18313_s4 + $0x7e0] sm:$0xff] }
  0x64   : > { %v734_v61 = vld [vmem:[%s18313_s4 + $0x7e8] sm:$0xff] }
  0x65   : > { %10452 = vmatpush3.bf16.msra.mxu0 %v10451_v10  ;;  %v10503_v10 = vpack.c.bf16 %v676_v2, %v675_v1  ;;  %v685_v1 = vld [vmem:[%s18313_s4 + $0x660] sm:$0xff]  ;;  %v686_v2 = vld [vmem:[%s18313_s4 + $0x668] sm:$0xff] }
  0x66   : > { %10484 = vmatpush3.bf16.msra.mxu1 %v10483_v11  ;;  %10454 = vmatprep.subr.bf16.mxu0 %v10453_v12  ;;  %v10535_v11 = vpack.c.bf16 %v708_v5, %v707_v3  ;;  %v10505_v12 = vpack.c.bf16 %v694_v7, %v693_v6  ;;  %v717_v3 = vld [vmem:[%s18313_s4 + $0x760] sm:$0xff]  ;;  %v718_v5 = vld [vmem:[%s18313_s4 + $0x768] sm:$0xff]  ;;  %v703_v6 = vld [vmem:[%s18313_s4 + $0x6f0] sm:$0xff] }
  0x67   : > { %10486 = vmatprep.subr.bf16.mxu1 %v10485_v16  ;;  %v10537_v16 = vpack.c.bf16 %v726_v9, %v725_v8  ;;  %v704_v7 = vld [vmem:[%s18313_s4 + $0x6f8] sm:$0xff]  ;;  %v735_v8 = vld [vmem:[%s18313_s4 + $0x7f0] sm:$0xff] }
  0x68   : > { %v736_v9 = vld [vmem:[%s18313_s4 + $0x7f8] sm:$0xff] }
  0x69   : > { %10456 = vmatpush3.bf16.msra.mxu0 %v10455_v24  ;;  %v10507_v24 = vpack.c.bf16 %v678_v14, %v677_v13  ;;  %v687_v13 = vld [vmem:[%s18313_s4 + $0x670] sm:$0xff]  ;;  %v688_v14 = vld [vmem:[%s18313_s4 + $0x678] sm:$0xff] }
  0x6a   : > { %10488 = vmatpush3.bf16.msra.mxu1 %v10487_v25  ;;  %10458 = vmatprep.subr.bf16.mxu0 %v10457_v26  ;;  %v10539_v25 = vpack.c.bf16 %v710_v18, %v709_v15  ;;  %v10509_v26 = vpack.c.bf16 %v696_v20, %v695_v19  ;;  %v719_v15 = vld [vmem:[%s18313_s4 + $0x770] sm:$0xff]  ;;  %v720_v18 = vld [vmem:[%s18313_s4 + $0x778] sm:$0xff]  ;;  %v753_v19 = vld [vmem:[%s18313_s4 + $0x880] sm:$0xff] }
  0x6b   : > { %10490 = vmatprep.subr.bf16.mxu1 %v10489_v30  ;;  %v10541_v30 = vpack.c.bf16 %v728_v23, %v727_v22  ;;  %v754_v20 = vld [vmem:[%s18313_s4 + $0x888] sm:$0xff]  ;;  %v785_v22 = vld [vmem:[%s18313_s4 + $0x980] sm:$0xff] }
  0x6c   : > { %v786_v23 = vld [vmem:[%s18313_s4 + $0x988] sm:$0xff] }
  0x6d   : > { %10460 = vmatpush3.bf16.msra.mxu0 %v10459_v36  ;;  %v10511_v36 = vpack.c.bf16 %v680_v28, %v679_v27  ;;  %v737_v27 = vld [vmem:[%s18313_s4 + $0x800] sm:$0xff]  ;;  %v738_v28 = vld [vmem:[%s18313_s4 + $0x808] sm:$0xff] }
  0x6e   : > { %10492 = vmatpush3.bf16.msra.mxu1 %v10491_v37  ;;  %10462 = vmatprep.subr.bf16.mxu0 %v10461_v38  ;;  %v10543_v37 = vpack.c.bf16 %v712_v31, %v711_v29  ;;  %v10513_v38 = vpack.c.bf16 %v698_v33, %v697_v32  ;;  %v769_v29 = vld [vmem:[%s18313_s4 + $0x900] sm:$0xff]  ;;  %v770_v31 = vld [vmem:[%s18313_s4 + $0x908] sm:$0xff]  ;;  %v755_v32 = vld [vmem:[%s18313_s4 + $0x890] sm:$0xff] }
  0x6f   : > { %10494 = vmatprep.subr.bf16.mxu1 %v10493_v42  ;;  %v10545_v42 = vpack.c.bf16 %v730_v35, %v729_v34  ;;  %v756_v33 = vld [vmem:[%s18313_s4 + $0x898] sm:$0xff]  ;;  %v787_v34 = vld [vmem:[%s18313_s4 + $0x990] sm:$0xff] }
  0x70   : > { %v788_v35 = vld [vmem:[%s18313_s4 + $0x998] sm:$0xff] }
  0x71   : > { %10464 = vmatpush3.bf16.msra.mxu0 %v10463_v50  ;;  %v10515_v50 = vpack.c.bf16 %v682_v40, %v681_v39  ;;  %v739_v39 = vld [vmem:[%s18313_s4 + $0x810] sm:$0xff]  ;;  %v740_v40 = vld [vmem:[%s18313_s4 + $0x818] sm:$0xff] }
  0x72   : > { %10496 = vmatpush3.bf16.msra.mxu1 %v10495_v51  ;;  %10498 = vmatprep.subr.bf16.mxu0 %v10497_v52  ;;  %v10547_v51 = vpack.c.bf16 %v714_v43, %v713_v41  ;;  %v10517_v52 = vpack.c.bf16 %v700_v45, %v699_v44  ;;  %v771_v41 = vld [vmem:[%s18313_s4 + $0x910] sm:$0xff]  ;;  %v772_v43 = vld [vmem:[%s18313_s4 + $0x918] sm:$0xff]  ;;  %v757_v44 = vld [vmem:[%s18313_s4 + $0x8a0] sm:$0xff] }
  0x73   : > { %10530 = vmatprep.subr.bf16.mxu1 %v10529_v56  ;;  %v10549_v56 = vpack.c.bf16 %v732_v47, %v731_v46  ;;  %v758_v45 = vld [vmem:[%s18313_s4 + $0x8a8] sm:$0xff]  ;;  %v789_v46 = vld [vmem:[%s18313_s4 + $0x9a0] sm:$0xff] }
  0x74   : > { %1394 = vmatmul.mubr.f32.vlgmr.msra.gmra.mrb[4].mxu0 %v12642_v48  ;;  %v790_v47 = vld [vmem:[%s18313_s4 + $0x9a8] sm:$0xff] }
  0x75   : > { %1464 = vmatmul.mubr.f32.vlgmr.msra.gmra.mrb[4].mxu1 %v12645_v49  ;;  %10500 = vmatpush3.bf16.msra.mxu0 %v10499_v62  ;;  %v10519_v62 = vpack.c.bf16 %v684_v54, %v683_v53  ;;  %v742_v53 = vld [vmem:[%s18313_s4 + $0x828] sm:$0xff]  ;;  %v773_v54 = vld [vmem:[%s18313_s4 + $0x920] sm:$0xff] }
  0x76   : > { %10532 = vmatpush3.bf16.msra.mxu1 %v10531_v63  ;;  %10502 = vmatprep.subr.bf16.mxu0 %v10501_v0  ;;  %v10551_v63 = vpack.c.bf16 %v716_v57, %v715_v55  ;;  %v10521_v0 = vpack.c.bf16 %v702_v59, %v701_v58  ;;  %v774_v55 = vld [vmem:[%s18313_s4 + $0x928] sm:$0xff]  ;;  %v760_v57 = vld [vmem:[%s18313_s4 + $0x8b8] sm:$0xff]  ;;  %v791_v58 = vld [vmem:[%s18313_s4 + $0x9b0] sm:$0xff] }
  0x77   : > { %10534 = vmatprep.subr.bf16.mxu1 %v10533_v4  ;;  %1533 = vmatprep.mubr.f32.mxu0 %v12574_v17  ;;  %v10553_v4 = vpack.c.bf16 %v734_v61, %v733_v60  ;;  %v792_v59 = vld [vmem:[%s18313_s4 + $0x9b8] sm:$0xff]  ;;  %v10603_v61 = vpack.c.bf16 %v774_v55, %v773_v54  ;;  %v818_v54 = vld [vmem:[%s18313_s4 + $0xa88] sm:$0xff] }
  0x78   : > { %1603 = vmatprep.mubr.f32.mxu1 %v12584_v21  ;;  %v850_v55 = vld [vmem:[%s18313_s4 + $0xb88] sm:$0xff] }
  0x79   : > { %10504 = vmatpush3.bf16.msra.mxu0 %v10503_v10  ;;  %v10523_v10 = vpack.c.bf16 %v686_v2, %v685_v1  ;;  %v776_v1 = vld [vmem:[%s18313_s4 + $0x938] sm:$0xff]  ;;  %v761_v2 = vld [vmem:[%s18313_s4 + $0x8c0] sm:$0xff] }
  0x7a   : > { %10536 = vmatpush3.bf16.msra.mxu1 %v10535_v11  ;;  %10506 = vmatprep.subr.bf16.mxu0 %v10505_v12  ;;  %v10555_v11 = vpack.c.bf16 %v718_v5, %v717_v3  ;;  %v10525_v12 = vpack.c.bf16 %v704_v7, %v703_v6  ;;  %v762_v3 = vld [vmem:[%s18313_s4 + $0x8c8] sm:$0xff] }
  0x7b   : > { %10538 = vmatprep.subr.bf16.mxu1 %v10537_v16  ;;  %v10557_v16 = vpack.c.bf16 %v736_v9, %v735_v8  ;;  %v794_v5 = vld [vmem:[%s18313_s4 + $0x9c8] sm:$0xff]  ;;  %v10577_v8 = vpack.c.bf16 %v762_v3, %v761_v2  ;;  %v745_v9 = vld [vmem:[%s18313_s4 + $0x840] sm:$0xff] }
  0x7d   : > { %10508 = vmatpush3.bf16.msra.mxu0 %v10507_v24  ;;  %v10527_v24 = vpack.c.bf16 %v688_v14, %v687_v13  ;;  %v778_v13 = vld [vmem:[%s18313_s4 + $0x948] sm:$0xff]  ;;  %v763_v14 = vld [vmem:[%s18313_s4 + $0x8d0] sm:$0xff] }
  0x7e   : > { %10540 = vmatpush3.bf16.msra.mxu1 %v10539_v25  ;;  %10510 = vmatprep.subr.bf16.mxu0 %v10509_v26  ;;  %v10559_v25 = vpack.c.bf16 %v720_v18, %v719_v15  ;;  %v10561_v26 = vpack.c.bf16 %v754_v20, %v753_v19  ;;  %v764_v15 = vld [vmem:[%s18313_s4 + $0x8d8] sm:$0xff] }
  0x7f   : > { %10542 = vmatprep.subr.bf16.mxu1 %v10541_v30  ;;  %v10593_v30 = vpack.c.bf16 %v786_v23, %v785_v22  ;;  %v796_v18 = vld [vmem:[%s18313_s4 + $0x9d8] sm:$0xff]  ;;  %v10581_v22 = vpack.c.bf16 %v764_v15, %v763_v14  ;;  %v747_v23 = vld [vmem:[%s18313_s4 + $0x850] sm:$0xff]  ;;  %v854_v14 = vld [vmem:[%s18313_s4 + $0xba8] sm:$0xff] }
  0x80   : > { %v13460_v15 = vld [vmem:[%s12553_s14 + $0x10] sm:$0xff] }
  0x81   : > { %10512 = vmatpush3.bf16.msra.mxu0 %v10511_v36  ;;  %v10563_v36 = vpack.c.bf16 %v738_v28, %v737_v27  ;;  %v780_v27 = vld [vmem:[%s18313_s4 + $0x958] sm:$0xff]  ;;  %v765_v28 = vld [vmem:[%s18313_s4 + $0x8e0] sm:$0xff] }
  0x82   : > { %10544 = vmatpush3.bf16.msra.mxu1 %v10543_v37  ;;  %10514 = vmatprep.subr.bf16.mxu0 %v10513_v38  ;;  %v10595_v37 = vpack.c.bf16 %v770_v31, %v769_v29  ;;  %v10565_v38 = vpack.c.bf16 %v756_v33, %v755_v32  ;;  %v766_v29 = vld [vmem:[%s18313_s4 + $0x8e8] sm:$0xff] }
  0x83   : > { %10546 = vmatprep.subr.bf16.mxu1 %v10545_v42  ;;  %v10597_v42 = vpack.c.bf16 %v788_v35, %v787_v34  ;;  %v798_v31 = vld [vmem:[%s18313_s4 + $0x9e8] sm:$0xff]  ;;  %v10585_v34 = vpack.c.bf16 %v766_v29, %v765_v28  ;;  %v749_v35 = vld [vmem:[%s18313_s4 + $0x860] sm:$0xff]  ;;  %v855_v29 = vld [vmem:[%s18313_s4 + $0xbb0] sm:$0xff] }
  0x84   : > { %v13482_v28 = vld [vmem:[%s12553_s14 + $0x8] sm:$0xff] }
  0x85   : > { %10516 = vmatpush3.bf16.msra.mxu0 %v10515_v50  ;;  %v10567_v50 = vpack.c.bf16 %v740_v40, %v739_v39  ;;  %v782_v39 = vld [vmem:[%s18313_s4 + $0x968] sm:$0xff]  ;;  %v767_v40 = vld [vmem:[%s18313_s4 + $0x8f0] sm:$0xff] }
  0x86   : > { %10548 = vmatpush3.bf16.msra.mxu1 %v10547_v51  ;;  %10518 = vmatprep.subr.bf16.mxu0 %v10517_v52  ;;  %v10599_v51 = vpack.c.bf16 %v772_v43, %v771_v41  ;;  %v10569_v52 = vpack.c.bf16 %v758_v45, %v757_v44  ;;  %v768_v41 = vld [vmem:[%s18313_s4 + $0x8f8] sm:$0xff] }
  0x87   : > { %10550 = vmatprep.subr.bf16.mxu1 %v10549_v56  ;;  %v759_v56 = vld [vmem:[%s18313_s4 + $0x8b0] sm:$0xff]  ;;  %v800_v43 = vld [vmem:[%s18313_s4 + $0x9f8] sm:$0xff] }
  0x89   : > { %10520 = vmatpush3.bf16.msra.mxu0 %v10519_v62  ;;  %v10573_v62 = vpack.c.bf16 %v760_v57, %v759_v56 }
  0x8a   : > { %10552 = vmatpush3.bf16.msra.mxu1 %v10551_v63  ;;  %10522 = vmatprep.subr.bf16.mxu0 %v10521_v0  ;;  %v744_v63 = vld [vmem:[%s18313_s4 + $0x838] sm:$0xff]  ;;  %v775_v0 = vld [vmem:[%s18313_s4 + $0x930] sm:$0xff] }
  0x8b   : > { %10554 = vmatprep.subr.bf16.mxu1 %v10553_v4  ;;  %v793_v4 = vld [vmem:[%s18313_s4 + $0x9c0] sm:$0xff]  ;;  %v10607_v7 = vpack.c.bf16 %v776_v1, %v775_v0  ;;  %v820_v0 = vld [vmem:[%s18313_s4 + $0xa98] sm:$0xff] }
  0x8c   : > { %v852_v1 = vld [vmem:[%s18313_s4 + $0xb98] sm:$0xff] }
  0x8d   : > { %10524 = vmatpush3.bf16.msra.mxu0 %v10523_v10  ;;  %v746_v10 = vld [vmem:[%s18313_s4 + $0x848] sm:$0xff] }
  0x8e   : > { %10556 = vmatpush3.bf16.msra.mxu1 %v10555_v11  ;;  %10526 = vmatprep.subr.bf16.mxu0 %v10525_v12  ;;  %v777_v11 = vld [vmem:[%s18313_s4 + $0x940] sm:$0xff]  ;;  %v10609_v12 = vpack.c.bf16 %v794_v5, %v793_v4  ;;  %v10579_v19 = vpack.c.bf16 %v746_v10, %v745_v9  ;;  %v803_v5 = vld [vmem:[%s18313_s4 + $0xa10] sm:$0xff]  ;;  %v836_v9 = vld [vmem:[%s18313_s4 + $0xb18] sm:$0xff] }
  0x8f   : > { %10558 = vmatprep.subr.bf16.mxu1 %v10557_v16  ;;  %v795_v16 = vld [vmem:[%s18313_s4 + $0x9d0] sm:$0xff]  ;;  %v10611_v20 = vpack.c.bf16 %v778_v13, %v777_v11  ;;  %v821_v10 = vld [vmem:[%s18313_s4 + $0xaa0] sm:$0xff]  ;;  %v822_v11 = vld [vmem:[%s18313_s4 + $0xaa8] sm:$0xff] }
  0x90   : > { %v853_v13 = vld [vmem:[%s18313_s4 + $0xba0] sm:$0xff] }
  0x91   : > { %10528 = vmatpush3.bf16.msra.mxu0 %v10527_v24  ;;  %v748_v24 = vld [vmem:[%s18313_s4 + $0x858] sm:$0xff] }
  0x92   : > { %10560 = vmatpush3.bf16.msra.mxu1 %v10559_v25  ;;  %10562 = vmatprep.subr.bf16.mxu0 %v10561_v26  ;;  %v779_v25 = vld [vmem:[%s18313_s4 + $0x950] sm:$0xff]  ;;  %v10613_v26 = vpack.c.bf16 %v796_v18, %v795_v16  ;;  %v10583_v32 = vpack.c.bf16 %v748_v24, %v747_v23  ;;  %v837_v23 = vld [vmem:[%s18313_s4 + $0xb20] sm:$0xff]  ;;  %v10665_v24 = vpack.c.bf16 %v854_v14, %v853_v13  ;;  %v864_v14 = vld [vmem:[%s18313_s4 + $0xbf8] sm:$0xff] }
  0x93   : > { %10594 = vmatprep.subr.bf16.mxu1 %v10593_v30  ;;  %v797_v30 = vld [vmem:[%s18313_s4 + $0x9e0] sm:$0xff]  ;;  %v10615_v33 = vpack.c.bf16 %v780_v27, %v779_v25  ;;  %v838_v25 = vld [vmem:[%s18313_s4 + $0xb28] sm:$0xff]  ;;  %v824_v27 = vld [vmem:[%s18313_s4 + $0xab8] sm:$0xff] }
  0x94   : > { %1534 = vmatmul.mubr.f32.vlgmr.msra.gmra.mrb[6].mxu0 %v12642_v48  ;;  %v741_v48 = vld [vmem:[%s18313_s4 + $0x820] sm:$0xff]  ;;  %v863_v13 = vld [vmem:[%s18313_s4 + $0xbf0] sm:$0xff] }
  0x95   : > { %1604 = vmatmul.mubr.f32.vlgmr.msra.gmra.mrb[6].mxu1 %v12645_v49  ;;  %10564 = vmatpush3.bf16.msra.mxu0 %v10563_v36  ;;  %v10601_v49 = vpack.c.bf16 %v790_v47, %v789_v46  ;;  %v10571_v60 = vpack.c.bf16 %v742_v53, %v741_v48  ;;  %v750_v36 = vld [vmem:[%s18313_s4 + $0x868] sm:$0xff]  ;;  %v10589_v46 = vpack.c.bf16 %v768_v41, %v767_v40  ;;  %v751_v47 = vld [vmem:[%s18313_s4 + $0x870] sm:$0xff]  ;;  %v784_v48 = vld [vmem:[%s18313_s4 + $0x978] sm:$0xff] }
  0x96   : > { %10596 = vmatpush3.bf16.msra.mxu1 %v10595_v37  ;;  %10566 = vmatprep.subr.bf16.mxu0 %v10565_v38  ;;  %v781_v37 = vld [vmem:[%s18313_s4 + $0x960] sm:$0xff]  ;;  %v10617_v38 = vpack.c.bf16 %v798_v31, %v797_v30  ;;  %v10587_v44 = vpack.c.bf16 %v750_v36, %v749_v35  ;;  %v856_v30 = vld [vmem:[%s18313_s4 + $0xbb8] sm:$0xff]  ;;  %v807_v35 = vld [vmem:[%s18313_s4 + $0xa30] sm:$0xff] }
  0x97   : > { %10598 = vmatprep.subr.bf16.mxu1 %v10597_v42  ;;  %1673 = vmatprep.mubr.f32.mxu0 %v12574_v17  ;;  %v743_v17 = vld [vmem:[%s18313_s4 + $0x830] sm:$0xff]  ;;  %v10619_v45 = vpack.c.bf16 %v782_v39, %v781_v37  ;;  %v817_v53 = vld [vmem:[%s18313_s4 + $0xa80] sm:$0xff]  ;;  %v13492_v31 = vld [vmem:[%s12553_s14 + $0x18] sm:$0xff] }
  0x98   : > { %1743 = vmatprep.mubr.f32.mxu1 %v12584_v21  ;;  %v10605_v21 = vpack.c.bf16 %v792_v59, %v791_v58  ;;  %v10575_v6 = vpack.c.bf16 %v744_v63, %v743_v17  ;;  %v799_v42 = vld [vmem:[%s18313_s4 + $0x9f0] sm:$0xff]  ;;  %v10625_v58 = vpack.c.bf16 %v818_v54, %v817_v53  ;;  %v801_v59 = vld [vmem:[%s18313_s4 + $0xa00] sm:$0xff]  ;;  %v834_v17 = vld [vmem:[%s18313_s4 + $0xb08] sm:$0xff] }
  0x99   : > { %10568 = vmatpush3.bf16.msra.mxu0 %v10567_v50  ;;  %v752_v50 = vld [vmem:[%s18313_s4 + $0x878] sm:$0xff]  ;;  %v819_v63 = vld [vmem:[%s18313_s4 + $0xa90] sm:$0xff]  ;;  %v825_v40 = vld [vmem:[%s18313_s4 + $0xac0] sm:$0xff] }
  0x9a   : > { %10600 = vmatpush3.bf16.msra.mxu1 %v10599_v51  ;;  %10570 = vmatprep.subr.bf16.mxu0 %v10569_v52  ;;  %v783_v51 = vld [vmem:[%s18313_s4 + $0x970] sm:$0xff]  ;;  %v10621_v52 = vpack.c.bf16 %v800_v43, %v799_v42  ;;  %v10591_v56 = vpack.c.bf16 %v752_v50, %v751_v47  ;;  %v10629_v4 = vpack.c.bf16 %v820_v0, %v819_v63  ;;  %v808_v36 = vld [vmem:[%s18313_s4 + $0xa38] sm:$0xff]  ;;  %v826_v41 = vld [vmem:[%s18313_s4 + $0xac8] sm:$0xff] }
  0x9b   : > { %10602 = vmatprep.subr.bf16.mxu1 %v10601_v49  ;;  %v849_v49 = vld [vmem:[%s18313_s4 + $0xb80] sm:$0xff]  ;;  %v10623_v57 = vpack.c.bf16 %v784_v48, %v783_v51  ;;  %v839_v37 = vld [vmem:[%s18313_s4 + $0xb30] sm:$0xff]  ;;  %v840_v39 = vld [vmem:[%s18313_s4 + $0xb38] sm:$0xff] }
  0x9c   : > { %v857_v42 = vld [vmem:[%s18313_s4 + $0xbc0] sm:$0xff]  ;;  %v858_v43 = vld [vmem:[%s18313_s4 + $0xbc8] sm:$0xff]  ;;  %v827_v53 = vld [vmem:[%s18313_s4 + $0xad0] sm:$0xff] }
  0x9d   : > { %10572 = vmatpush3.bf16.msra.mxu0 %v10571_v60  ;;  %v802_v60 = vld [vmem:[%s18313_s4 + $0xa08] sm:$0xff]  ;;  %v809_v47 = vld [vmem:[%s18313_s4 + $0xa40] sm:$0xff]  ;;  %v828_v54 = vld [vmem:[%s18313_s4 + $0xad8] sm:$0xff] }
  0x9e   : > { %10604 = vmatpush3.bf16.msra.mxu1 %v10603_v61  ;;  %10574 = vmatprep.subr.bf16.mxu0 %v10573_v62  ;;  %v833_v61 = vld [vmem:[%s18313_s4 + $0xb00] sm:$0xff]  ;;  %v10657_v62 = vpack.c.bf16 %v850_v55, %v849_v49  ;;  %v10627_v2 = vpack.c.bf16 %v802_v60, %v801_v59  ;;  %v810_v50 = vld [vmem:[%s18313_s4 + $0xa48] sm:$0xff]  ;;  %v859_v49 = vld [vmem:[%s18313_s4 + $0xbd0] sm:$0xff] }
  0x9f   : > { %10606 = vmatprep.subr.bf16.mxu1 %v10605_v21  ;;  %v851_v21 = vld [vmem:[%s18313_s4 + $0xb90] sm:$0xff]  ;;  %v10659_v3 = vpack.c.bf16 %v834_v17, %v833_v61  ;;  %v841_v51 = vld [vmem:[%s18313_s4 + $0xb40] sm:$0xff]  ;;  %v842_v48 = vld [vmem:[%s18313_s4 + $0xb48] sm:$0xff] }
  0xa0   : > { %v860_v55 = vld [vmem:[%s18313_s4 + $0xbd8] sm:$0xff]  ;;  %v811_v59 = vld [vmem:[%s18313_s4 + $0xa50] sm:$0xff]  ;;  %v829_v63 = vld [vmem:[%s18313_s4 + $0xae0] sm:$0xff] }
  0xa1   : > { %10576 = vmatpush3.bf16.msra.mxu0 %v10575_v6  ;;  %v804_v6 = vld [vmem:[%s18313_s4 + $0xa18] sm:$0xff]  ;;  %v843_v61 = vld [vmem:[%s18313_s4 + $0xb50] sm:$0xff]  ;;  %v830_v0 = vld [vmem:[%s18313_s4 + $0xae8] sm:$0xff] }
  0xa2   : > { %10608 = vmatpush3.bf16.msra.mxu1 %v10607_v7  ;;  %10578 = vmatprep.subr.bf16.mxu0 %v10577_v8  ;;  %v835_v7 = vld [vmem:[%s18313_s4 + $0xb10] sm:$0xff]  ;;  %v10661_v8 = vpack.c.bf16 %v852_v1, %v851_v21  ;;  %v10631_v16 = vpack.c.bf16 %v804_v6, %v803_v5  ;;  %v812_v60 = vld [vmem:[%s18313_s4 + $0xa58] sm:$0xff]  ;;  %v861_v21 = vld [vmem:[%s18313_s4 + $0xbe0] sm:$0xff] }
  0xa3   : > { %10610 = vmatprep.subr.bf16.mxu1 %v10609_v12  ;;  %v13450_v12 = vld [vmem:[%s12553_s14] sm:$0xff]  ;;  %v10663_v18 = vpack.c.bf16 %v836_v9, %v835_v7  ;;  %v844_v17 = vld [vmem:[%s18313_s4 + $0xb58] sm:$0xff]  ;;  %v862_v1 = vld [vmem:[%s18313_s4 + $0xbe8] sm:$0xff]  ;;  %s18267_s14 = scalar_lea.hbm %s18321_s12, %s8512_s16 }
  0xa4   : > { %v813_v5 = vld [vmem:[%s18313_s4 + $0xa60] sm:$0xff]  ;;  %v814_v6 = vld [vmem:[%s18313_s4 + $0xa68] sm:$0xff] }
  0xa5   : > { %10580 = vmatpush3.bf16.msra.mxu0 %v10579_v19  ;;  %v10633_v19 = vpack.c.bf16 %v822_v11, %v821_v10  ;;  %v845_v7 = vld [vmem:[%s18313_s4 + $0xb60] sm:$0xff]  ;;  %v846_v9 = vld [vmem:[%s18313_s4 + $0xb68] sm:$0xff]  ;;  %v831_v10 = vld [vmem:[%s18313_s4 + $0xaf0] sm:$0xff] }
  0xa6   : > { %10612 = vmatpush3.bf16.msra.mxu1 %v10611_v20  ;;  %10582 = vmatprep.subr.bf16.mxu0 %v10581_v22  ;;  %v805_v20 = vld [vmem:[%s18313_s4 + $0xa20] sm:$0xff]  ;;  %v806_v22 = vld [vmem:[%s18313_s4 + $0xa28] sm:$0xff]  ;;  %v832_v11 = vld [vmem:[%s18313_s4 + $0xaf8] sm:$0xff] }
  0xa7   : > { %10614 = vmatprep.subr.bf16.mxu1 %v10613_v26  ;;  %v823_v26 = vld [vmem:[%s18313_s4 + $0xab0] sm:$0xff] }
  0xa9   : > { %10584 = vmatpush3.bf16.msra.mxu0 %v10583_v32  ;;  %v10635_v32 = vpack.c.bf16 %v806_v22, %v805_v20  ;;  %v815_v20 = vld [vmem:[%s18313_s4 + $0xa70] sm:$0xff]  ;;  %v816_v22 = vld [vmem:[%s18313_s4 + $0xa78] sm:$0xff] }
  0xaa   : > { %10616 = vmatpush3.bf16.msra.mxu1 %v10615_v33  ;;  %10586 = vmatprep.subr.bf16.mxu0 %v10585_v34  ;;  %v10667_v33 = vpack.c.bf16 %v838_v25, %v837_v23  ;;  %v10637_v34 = vpack.c.bf16 %v824_v27, %v823_v26  ;;  %v847_v23 = vld [vmem:[%s18313_s4 + $0xb70] sm:$0xff]  ;;  %v848_v25 = vld [vmem:[%s18313_s4 + $0xb78] sm:$0xff]  ;;  %v881_v26 = vld [vmem:[%s18313_s4 + $0xc80] sm:$0xff] }
  0xab   : > { %10618 = vmatprep.subr.bf16.mxu1 %v10617_v38  ;;  %v10669_v38 = vpack.c.bf16 %v856_v30, %v855_v29  ;;  %v882_v27 = vld [vmem:[%s18313_s4 + $0xc88] sm:$0xff]  ;;  %v913_v29 = vld [vmem:[%s18313_s4 + $0xd80] sm:$0xff] }
  0xac   : > { %v914_v30 = vld [vmem:[%s18313_s4 + $0xd88] sm:$0xff] }
  0xad   : > { %10588 = vmatpush3.bf16.msra.mxu0 %v10587_v44  ;;  %v10639_v44 = vpack.c.bf16 %v808_v36, %v807_v35  ;;  %v865_v35 = vld [vmem:[%s18313_s4 + $0xc00] sm:$0xff]  ;;  %v866_v36 = vld [vmem:[%s18313_s4 + $0xc08] sm:$0xff] }
  0xae   : > { %10620 = vmatpush3.bf16.msra.mxu1 %v10619_v45  ;;  %10590 = vmatprep.subr.bf16.mxu0 %v10589_v46  ;;  %v10671_v45 = vpack.c.bf16 %v840_v39, %v839_v37  ;;  %v10641_v46 = vpack.c.bf16 %v826_v41, %v825_v40  ;;  %v897_v37 = vld [vmem:[%s18313_s4 + $0xd00] sm:$0xff]  ;;  %v898_v39 = vld [vmem:[%s18313_s4 + $0xd08] sm:$0xff]  ;;  %v883_v40 = vld [vmem:[%s18313_s4 + $0xc90] sm:$0xff] }
  0xaf   : > { %10622 = vmatprep.subr.bf16.mxu1 %v10621_v52  ;;  %v10673_v52 = vpack.c.bf16 %v858_v43, %v857_v42  ;;  %v884_v41 = vld [vmem:[%s18313_s4 + $0xc98] sm:$0xff]  ;;  %v915_v42 = vld [vmem:[%s18313_s4 + $0xd90] sm:$0xff] }
  0xb0   : > { %v916_v43 = vld [vmem:[%s18313_s4 + $0xd98] sm:$0xff] }
  0xb1   : > { %10592 = vmatpush3.bf16.msra.mxu0 %v10591_v56  ;;  %v10643_v56 = vpack.c.bf16 %v810_v50, %v809_v47  ;;  %v867_v47 = vld [vmem:[%s18313_s4 + $0xc10] sm:$0xff]  ;;  %v868_v50 = vld [vmem:[%s18313_s4 + $0xc18] sm:$0xff] }
  0xb2   : > { %10624 = vmatpush3.bf16.msra.mxu1 %v10623_v57  ;;  %10626 = vmatprep.subr.bf16.mxu0 %v10625_v58  ;;  %v10675_v57 = vpack.c.bf16 %v842_v48, %v841_v51  ;;  %v10645_v58 = vpack.c.bf16 %v828_v54, %v827_v53  ;;  %v899_v51 = vld [vmem:[%s18313_s4 + $0xd10] sm:$0xff]  ;;  %v900_v48 = vld [vmem:[%s18313_s4 + $0xd18] sm:$0xff]  ;;  %v885_v53 = vld [vmem:[%s18313_s4 + $0xca0] sm:$0xff] }
  0xb3   : > { %10658 = vmatprep.subr.bf16.mxu1 %v10657_v62  ;;  %v10677_v62 = vpack.c.bf16 %v860_v55, %v859_v49  ;;  %v886_v54 = vld [vmem:[%s18313_s4 + $0xca8] sm:$0xff]  ;;  %v917_v49 = vld [vmem:[%s18313_s4 + $0xda0] sm:$0xff] }
  0xb4   : > { %1674 = vmatmul.mubr.f32.vlgmr.msra.gmra.mrb[8].mxu0 %v13450_v12  ;;  %v918_v55 = vld [vmem:[%s18313_s4 + $0xda8] sm:$0xff] }
  0xb5   : > { %1744 = vmatmul.mubr.f32.vlgmr.msra.gmra.mrb[8].mxu1 %v13460_v15  ;;  %10628 = vmatpush3.bf16.msra.mxu0 %v10627_v2  ;;  %v10647_v2 = vpack.c.bf16 %v812_v60, %v811_v59  ;;  %v869_v59 = vld [vmem:[%s18313_s4 + $0xc20] sm:$0xff]  ;;  %v870_v60 = vld [vmem:[%s18313_s4 + $0xc28] sm:$0xff] }
  0xb6   : > { %10660 = vmatpush3.bf16.msra.mxu1 %v10659_v3  ;;  %10630 = vmatprep.subr.bf16.mxu0 %v10629_v4  ;;  %v10679_v3 = vpack.c.bf16 %v844_v17, %v843_v61  ;;  %v10649_v4 = vpack.c.bf16 %v830_v0, %v829_v63  ;;  %v901_v61 = vld [vmem:[%s18313_s4 + $0xd20] sm:$0xff]  ;;  %v902_v17 = vld [vmem:[%s18313_s4 + $0xd28] sm:$0xff]  ;;  %v887_v63 = vld [vmem:[%s18313_s4 + $0xcb0] sm:$0xff] }
  0xb7   : > { %10662 = vmatprep.subr.bf16.mxu1 %v10661_v8  ;;  %1813 = vmatprep.mubr.f32.mxu0 %v13482_v28  ;;  %v10681_v8 = vpack.c.bf16 %v862_v1, %v861_v21  ;;  %v888_v0 = vld [vmem:[%s18313_s4 + $0xcb8] sm:$0xff]  ;;  %v919_v21 = vld [vmem:[%s18313_s4 + $0xdb0] sm:$0xff] }
  0xb8   : > { %1883 = vmatprep.mubr.f32.mxu1 %v13492_v31  ;;  %v920_v1 = vld [vmem:[%s18313_s4 + $0xdb8] sm:$0xff] }
  0xb9   : > { %10632 = vmatpush3.bf16.msra.mxu0 %v10631_v16  ;;  %v10651_v16 = vpack.c.bf16 %v814_v6, %v813_v5  ;;  %v871_v5 = vld [vmem:[%s18313_s4 + $0xc30] sm:$0xff]  ;;  %v872_v6 = vld [vmem:[%s18313_s4 + $0xc38] sm:$0xff] }
  0xba   : > { %10664 = vmatpush3.bf16.msra.mxu1 %v10663_v18  ;;  %10634 = vmatprep.subr.bf16.mxu0 %v10633_v19  ;;  %v10683_v18 = vpack.c.bf16 %v846_v9, %v845_v7  ;;  %v10653_v19 = vpack.c.bf16 %v832_v11, %v831_v10  ;;  %v903_v7 = vld [vmem:[%s18313_s4 + $0xd30] sm:$0xff]  ;;  %v904_v9 = vld [vmem:[%s18313_s4 + $0xd38] sm:$0xff]  ;;  %v889_v10 = vld [vmem:[%s18313_s4 + $0xcc0] sm:$0xff] }
  0xbb   : > { %10666 = vmatprep.subr.bf16.mxu1 %v10665_v24  ;;  %v10685_v24 = vpack.c.bf16 %v864_v14, %v863_v13  ;;  %v890_v11 = vld [vmem:[%s18313_s4 + $0xcc8] sm:$0xff]  ;;  %v921_v13 = vld [vmem:[%s18313_s4 + $0xdc0] sm:$0xff] }
  0xbc   : > { %v922_v14 = vld [vmem:[%s18313_s4 + $0xdc8] sm:$0xff] }
  0xbd   : > { %10636 = vmatpush3.bf16.msra.mxu0 %v10635_v32  ;;  %v10655_v32 = vpack.c.bf16 %v816_v22, %v815_v20  ;;  %v873_v20 = vld [vmem:[%s18313_s4 + $0xc40] sm:$0xff]  ;;  %v874_v22 = vld [vmem:[%s18313_s4 + $0xc48] sm:$0xff] }
  0xbe   : > { %10668 = vmatpush3.bf16.msra.mxu1 %v10667_v33  ;;  %10638 = vmatprep.subr.bf16.mxu0 %v10637_v34  ;;  %v10687_v33 = vpack.c.bf16 %v848_v25, %v847_v23  ;;  %v10689_v34 = vpack.c.bf16 %v882_v27, %v881_v26  ;;  %v905_v23 = vld [vmem:[%s18313_s4 + $0xd40] sm:$0xff]  ;;  %v906_v25 = vld [vmem:[%s18313_s4 + $0xd48] sm:$0xff]  ;;  %v891_v26 = vld [vmem:[%s18313_s4 + $0xcd0] sm:$0xff] }
  0xbf   : > { %10670 = vmatprep.subr.bf16.mxu1 %v10669_v38  ;;  %v10721_v38 = vpack.c.bf16 %v914_v30, %v913_v29  ;;  %v892_v27 = vld [vmem:[%s18313_s4 + $0xcd8] sm:$0xff]  ;;  %v923_v29 = vld [vmem:[%s18313_s4 + $0xdd0] sm:$0xff] }
  0xc0   : > { %v924_v30 = vld [vmem:[%s18313_s4 + $0xdd8] sm:$0xff] }
  0xc1   : > { %10640 = vmatpush3.bf16.msra.mxu0 %v10639_v44  ;;  %v10691_v44 = vpack.c.bf16 %v866_v36, %v865_v35  ;;  %v875_v35 = vld [vmem:[%s18313_s4 + $0xc50] sm:$0xff]  ;;  %v876_v36 = vld [vmem:[%s18313_s4 + $0xc58] sm:$0xff] }
  0xc2   : > { %10672 = vmatpush3.bf16.msra.mxu1 %v10671_v45  ;;  %10642 = vmatprep.subr.bf16.mxu0 %v10641_v46  ;;  %v10723_v45 = vpack.c.bf16 %v898_v39, %v897_v37  ;;  %v10693_v46 = vpack.c.bf16 %v884_v41, %v883_v40  ;;  %v907_v37 = vld [vmem:[%s18313_s4 + $0xd50] sm:$0xff]  ;;  %v908_v39 = vld [vmem:[%s18313_s4 + $0xd58] sm:$0xff]  ;;  %v893_v40 = vld [vmem:[%s18313_s4 + $0xce0] sm:$0xff] }
  0xc3   : > { %10674 = vmatprep.subr.bf16.mxu1 %v10673_v52  ;;  %v10725_v52 = vpack.c.bf16 %v916_v43, %v915_v42  ;;  %v894_v41 = vld [vmem:[%s18313_s4 + $0xce8] sm:$0xff]  ;;  %v925_v42 = vld [vmem:[%s18313_s4 + $0xde0] sm:$0xff] }
  0xc4   : > { %v926_v43 = vld [vmem:[%s18313_s4 + $0xde8] sm:$0xff] }
  0xc5   : > { %10644 = vmatpush3.bf16.msra.mxu0 %v10643_v56  ;;  %v10695_v56 = vpack.c.bf16 %v868_v50, %v867_v47  ;;  %v877_v47 = vld [vmem:[%s18313_s4 + $0xc60] sm:$0xff]  ;;  %v878_v50 = vld [vmem:[%s18313_s4 + $0xc68] sm:$0xff] }
  0xc6   : > { %10676 = vmatpush3.bf16.msra.mxu1 %v10675_v57  ;;  %10646 = vmatprep.subr.bf16.mxu0 %v10645_v58  ;;  %v10727_v57 = vpack.c.bf16 %v900_v48, %v899_v51  ;;  %v10697_v58 = vpack.c.bf16 %v886_v54, %v885_v53  ;;  %v909_v51 = vld [vmem:[%s18313_s4 + $0xd60] sm:$0xff]  ;;  %v910_v48 = vld [vmem:[%s18313_s4 + $0xd68] sm:$0xff]  ;;  %v895_v53 = vld [vmem:[%s18313_s4 + $0xcf0] sm:$0xff] }
  0xc7   : > { %10678 = vmatprep.subr.bf16.mxu1 %v10677_v62  ;;  %v10729_v62 = vpack.c.bf16 %v918_v55, %v917_v49  ;;  %v896_v54 = vld [vmem:[%s18313_s4 + $0xcf8] sm:$0xff]  ;;  %v927_v49 = vld [vmem:[%s18313_s4 + $0xdf0] sm:$0xff] }
  0xc8   : > { %v928_v55 = vld [vmem:[%s18313_s4 + $0xdf8] sm:$0xff] }
  0xc9   : > { %10648 = vmatpush3.bf16.msra.mxu0 %v10647_v2  ;;  %v10699_v2 = vpack.c.bf16 %v870_v60, %v869_v59  ;;  %v879_v59 = vld [vmem:[%s18313_s4 + $0xc70] sm:$0xff]  ;;  %v880_v60 = vld [vmem:[%s18313_s4 + $0xc78] sm:$0xff] }
  0xca   : > { %10680 = vmatpush3.bf16.msra.mxu1 %v10679_v3  ;;  %10650 = vmatprep.subr.bf16.mxu0 %v10649_v4  ;;  %v10731_v3 = vpack.c.bf16 %v902_v17, %v901_v61  ;;  %v10701_v4 = vpack.c.bf16 %v888_v0, %v887_v63  ;;  %v911_v61 = vld [vmem:[%s18313_s4 + $0xd70] sm:$0xff]  ;;  %v912_v17 = vld [vmem:[%s18313_s4 + $0xd78] sm:$0xff]  ;;  %v945_v63 = vld [vmem:[%s18313_s4 + $0xe80] sm:$0xff] }
  0xcb   : > { %10682 = vmatprep.subr.bf16.mxu1 %v10681_v8  ;;  %v10733_v8 = vpack.c.bf16 %v920_v1, %v919_v21  ;;  %v946_v0 = vld [vmem:[%s18313_s4 + $0xe88] sm:$0xff]  ;;  %v977_v21 = vld [vmem:[%s18313_s4 + $0xf80] sm:$0xff] }
  0xcc   : > { %v978_v1 = vld [vmem:[%s18313_s4 + $0xf88] sm:$0xff] }
  0xcd   : > { %10652 = vmatpush3.bf16.msra.mxu0 %v10651_v16  ;;  %v10703_v16 = vpack.c.bf16 %v872_v6, %v871_v5  ;;  %v929_v5 = vld [vmem:[%s18313_s4 + $0xe00] sm:$0xff]  ;;  %v930_v6 = vld [vmem:[%s18313_s4 + $0xe08] sm:$0xff] }
  0xce   : > { %10684 = vmatpush3.bf16.msra.mxu1 %v10683_v18  ;;  %10654 = vmatprep.subr.bf16.mxu0 %v10653_v19  ;;  %v10735_v18 = vpack.c.bf16 %v904_v9, %v903_v7  ;;  %v10705_v19 = vpack.c.bf16 %v890_v11, %v889_v10  ;;  %v961_v7 = vld [vmem:[%s18313_s4 + $0xf00] sm:$0xff]  ;;  %v962_v9 = vld [vmem:[%s18313_s4 + $0xf08] sm:$0xff]  ;;  %v947_v10 = vld [vmem:[%s18313_s4 + $0xe90] sm:$0xff] }
  0xcf   : > { %10686 = vmatprep.subr.bf16.mxu1 %v10685_v24  ;;  %v10737_v24 = vpack.c.bf16 %v922_v14, %v921_v13  ;;  %v948_v11 = vld [vmem:[%s18313_s4 + $0xe98] sm:$0xff]  ;;  %v979_v13 = vld [vmem:[%s18313_s4 + $0xf90] sm:$0xff] }
  0xd0   : > { %v980_v14 = vld [vmem:[%s18313_s4 + $0xf98] sm:$0xff] }
  0xd1   : > { %10656 = vmatpush3.bf16.msra.mxu0 %v10655_v32  ;;  %v10707_v32 = vpack.c.bf16 %v874_v22, %v873_v20  ;;  %v931_v20 = vld [vmem:[%s18313_s4 + $0xe10] sm:$0xff]  ;;  %v932_v22 = vld [vmem:[%s18313_s4 + $0xe18] sm:$0xff] }
  0xd2   : > { %10688 = vmatpush3.bf16.msra.mxu1 %v10687_v33  ;;  %10690 = vmatprep.subr.bf16.mxu0 %v10689_v34  ;;  %v10739_v33 = vpack.c.bf16 %v906_v25, %v905_v23  ;;  %v10709_v34 = vpack.c.bf16 %v892_v27, %v891_v26  ;;  %v963_v23 = vld [vmem:[%s18313_s4 + $0xf10] sm:$0xff]  ;;  %v964_v25 = vld [vmem:[%s18313_s4 + $0xf18] sm:$0xff]  ;;  %v949_v26 = vld [vmem:[%s18313_s4 + $0xea0] sm:$0xff] }
  0xd3   : > { %10722 = vmatprep.subr.bf16.mxu1 %v10721_v38  ;;  %v10741_v38 = vpack.c.bf16 %v924_v30, %v923_v29  ;;  %v950_v27 = vld [vmem:[%s18313_s4 + $0xea8] sm:$0xff]  ;;  %v981_v29 = vld [vmem:[%s18313_s4 + $0xfa0] sm:$0xff] }
  0xd4   : > { %1814 = vmatmul.mubr.f32.vlgmr.msra.gmra.mrb[10].mxu0 %v13450_v12  ;;  %v982_v30 = vld [vmem:[%s18313_s4 + $0xfa8] sm:$0xff] }
  0xd5   : > { %1884 = vmatmul.mubr.f32.vlgmr.msra.gmra.mrb[10].mxu1 %v13460_v15  ;;  %10692 = vmatpush3.bf16.msra.mxu0 %v10691_v44  ;;  %v10711_v44 = vpack.c.bf16 %v876_v36, %v875_v35  ;;  %v933_v35 = vld [vmem:[%s18313_s4 + $0xe20] sm:$0xff]  ;;  %v934_v36 = vld [vmem:[%s18313_s4 + $0xe28] sm:$0xff] }
  0xd6   : > { %10724 = vmatpush3.bf16.msra.mxu1 %v10723_v45  ;;  %10694 = vmatprep.subr.bf16.mxu0 %v10693_v46  ;;  %v10743_v45 = vpack.c.bf16 %v908_v39, %v907_v37  ;;  %v10713_v46 = vpack.c.bf16 %v894_v41, %v893_v40  ;;  %v965_v37 = vld [vmem:[%s18313_s4 + $0xf20] sm:$0xff]  ;;  %v966_v39 = vld [vmem:[%s18313_s4 + $0xf28] sm:$0xff]  ;;  %v951_v40 = vld [vmem:[%s18313_s4 + $0xeb0] sm:$0xff] }
  0xd7   : > { %10726 = vmatprep.subr.bf16.mxu1 %v10725_v52  ;;  %1953 = vmatprep.mubr.f32.mxu0 %v13482_v28  ;;  %v10745_v52 = vpack.c.bf16 %v926_v43, %v925_v42  ;;  %v952_v41 = vld [vmem:[%s18313_s4 + $0xeb8] sm:$0xff]  ;;  %v983_v42 = vld [vmem:[%s18313_s4 + $0xfb0] sm:$0xff] }
  0xd8   : > { %2023 = vmatprep.mubr.f32.mxu1 %v13492_v31  ;;  %v984_v43 = vld [vmem:[%s18313_s4 + $0xfb8] sm:$0xff] }
  0xd9   : > { %10696 = vmatpush3.bf16.msra.mxu0 %v10695_v56  ;;  %v10715_v56 = vpack.c.bf16 %v878_v50, %v877_v47  ;;  %v936_v47 = vld [vmem:[%s18313_s4 + $0xe38] sm:$0xff]  ;;  %v967_v50 = vld [vmem:[%s18313_s4 + $0xf30] sm:$0xff] }
  0xda   : > { %10728 = vmatpush3.bf16.msra.mxu1 %v10727_v57  ;;  %10698 = vmatprep.subr.bf16.mxu0 %v10697_v58  ;;  %v10747_v57 = vpack.c.bf16 %v910_v48, %v909_v51  ;;  %v10717_v58 = vpack.c.bf16 %v896_v54, %v895_v53  ;;  %v968_v51 = vld [vmem:[%s18313_s4 + $0xf38] sm:$0xff]  ;;  %v954_v48 = vld [vmem:[%s18313_s4 + $0xec8] sm:$0xff]  ;;  %v985_v53 = vld [vmem:[%s18313_s4 + $0xfc0] sm:$0xff] }
  0xdb   : > { %10730 = vmatprep.subr.bf16.mxu1 %v10729_v62  ;;  %v10749_v62 = vpack.c.bf16 %v928_v55, %v927_v49  ;;  %v986_v54 = vld [vmem:[%s18313_s4 + $0xfc8] sm:$0xff]  ;;  %v10799_v55 = vpack.c.bf16 %v968_v51, %v967_v50 }
  0xdc   : > { %v2218_v50 = vld [vmem:[%s18314_s5 + $0x188] sm:$0xff] }
  0xdd   : > { %10700 = vmatpush3.bf16.msra.mxu0 %v10699_v2  ;;  %v10719_v2 = vpack.c.bf16 %v880_v60, %v879_v59  ;;  %v969_v59 = vld [vmem:[%s18313_s4 + $0xf40] sm:$0xff]  ;;  %v10801_v60 = vpack.c.bf16 %v986_v54, %v985_v53  ;;  %v2170_v54 = vld [vmem:[%s18314_s5 + $0x8] sm:$0xff] }
  0xde   : > { %10732 = vmatpush3.bf16.msra.mxu1 %v10731_v3  ;;  %10702 = vmatprep.subr.bf16.mxu0 %v10701_v4  ;;  %v10751_v3 = vpack.c.bf16 %v912_v17, %v911_v61  ;;  %v10753_v4 = vpack.c.bf16 %v946_v0, %v945_v63  ;;  %v970_v61 = vld [vmem:[%s18313_s4 + $0xf48] sm:$0xff]  ;;  %v956_v17 = vld [vmem:[%s18313_s4 + $0xed8] sm:$0xff]  ;;  %v987_v63 = vld [vmem:[%s18313_s4 + $0xfd0] sm:$0xff] }
  0xdf   : > { %10734 = vmatprep.subr.bf16.mxu1 %v10733_v8  ;;  %v10785_v8 = vpack.c.bf16 %v978_v1, %v977_v21  ;;  %v988_v0 = vld [vmem:[%s18313_s4 + $0xfd8] sm:$0xff]  ;;  %v10803_v1 = vpack.c.bf16 %v970_v61, %v969_v59  ;;  %v2169_v53 = vld [vmem:[%s18314_s5] sm:$0xff]  ;;  %v2219_v59 = vld [vmem:[%s18314_s5 + $0x190] sm:$0xff] }
  0xe0   : > { %v10819_v61 = vpack.c.bf16 %v2170_v54, %v2169_v53  ;;  %v2180_v53 = vld [vmem:[%s18314_s5 + $0x58] sm:$0xff]  ;;  %v2211_v54 = vld [vmem:[%s18314_s5 + $0x150] sm:$0xff] }
  0xe1   : > { %10704 = vmatpush3.bf16.msra.mxu0 %v10703_v16  ;;  %v10755_v16 = vpack.c.bf16 %v930_v6, %v929_v5  ;;  %v971_v5 = vld [vmem:[%s18313_s4 + $0xf50] sm:$0xff]  ;;  %v10805_v6 = vpack.c.bf16 %v988_v0, %v987_v63  ;;  %v2172_v0 = vld [vmem:[%s18314_s5 + $0x18] sm:$0xff] }
  0xe2   : > { %10736 = vmatpush3.bf16.msra.mxu1 %v10735_v18  ;;  %10706 = vmatprep.subr.bf16.mxu0 %v10705_v19  ;;  %v10787_v18 = vpack.c.bf16 %v962_v9, %v961_v7  ;;  %v10757_v19 = vpack.c.bf16 %v948_v11, %v947_v10  ;;  %v972_v7 = vld [vmem:[%s18313_s4 + $0xf58] sm:$0xff]  ;;  %v958_v9 = vld [vmem:[%s18313_s4 + $0xee8] sm:$0xff]  ;;  %v989_v10 = vld [vmem:[%s18313_s4 + $0xfe0] sm:$0xff] }
  0xe3   : > { %10738 = vmatprep.subr.bf16.mxu1 %v10737_v24  ;;  %v10789_v24 = vpack.c.bf16 %v980_v14, %v979_v13  ;;  %v990_v11 = vld [vmem:[%s18313_s4 + $0xfe8] sm:$0xff]  ;;  %v10807_v14 = vpack.c.bf16 %v972_v7, %v971_v5  ;;  %v2171_v63 = vld [vmem:[%s18314_s5 + $0x10] sm:$0xff]  ;;  %v2221_v5 = vld [vmem:[%s18314_s5 + $0x1a0] sm:$0xff] }
  0xe4   : > { %v14068_v7 = vld [vmem:[%s14040_s19 + $0x8] sm:$0xff] }
  0xe5   : > { %10708 = vmatpush3.bf16.msra.mxu0 %v10707_v32  ;;  %v10759_v32 = vpack.c.bf16 %v932_v22, %v931_v20  ;;  %v973_v20 = vld [vmem:[%s18313_s4 + $0xf60] sm:$0xff] }
  0xe6   : > { %10740 = vmatpush3.bf16.msra.mxu1 %v10739_v33  ;;  %10710 = vmatprep.subr.bf16.mxu0 %v10709_v34  ;;  %v10791_v33 = vpack.c.bf16 %v964_v25, %v963_v23  ;;  %v10761_v34 = vpack.c.bf16 %v950_v27, %v949_v26  ;;  %v10809_v23 = vpack.c.bf16 %v990_v11, %v989_v10  ;;  %v959_v25 = vld [vmem:[%s18313_s4 + $0xef0] sm:$0xff]  ;;  %v960_v26 = vld [vmem:[%s18313_s4 + $0xef8] sm:$0xff]  ;;  %v8440_v27 = vld [vmem:[%s18317_s8] ss:$0 sm:$0xff] }
  0xe7   : > { %10742 = vmatprep.subr.bf16.mxu1 %v10741_v38  ;;  %v10793_v38 = vpack.c.bf16 %v982_v30, %v981_v29  ;;  %v2173_v11 = vld [vmem:[%s18314_s5 + $0x20] sm:$0xff] }
  0xe9   : > { %10712 = vmatpush3.bf16.msra.mxu0 %v10711_v44  ;;  %v10763_v44 = vpack.c.bf16 %v934_v36, %v933_v35 }
  0xea   : > { %10744 = vmatpush3.bf16.msra.mxu1 %v10743_v45  ;;  %10714 = vmatprep.subr.bf16.mxu0 %v10713_v46  ;;  %v10795_v45 = vpack.c.bf16 %v966_v39, %v965_v37  ;;  %v10765_v46 = vpack.c.bf16 %v952_v41, %v951_v40  ;;  %v10781_v39 = vpack.c.bf16 %v960_v26, %v959_v25  ;;  %v943_v40 = vld [vmem:[%s18313_s4 + $0xe70] sm:$0xff]  ;;  %v944_v41 = vld [vmem:[%s18313_s4 + $0xe78] sm:$0xff] }
  0xeb   : > { %10746 = vmatprep.subr.bf16.mxu1 %v10745_v52  ;;  %v953_v52 = vld [vmem:[%s18313_s4 + $0xec0] sm:$0xff]  ;;  %v10783_v51 = vpack.c.bf16 %v944_v41, %v943_v40  ;;  %v2175_v26 = vld [vmem:[%s18314_s5 + $0x30] sm:$0xff]  ;;  %v2178_v41 = vld [vmem:[%s18314_s5 + $0x48] sm:$0xff] }
  0xec   : > { %v2177_v40 = vld [vmem:[%s18314_s5 + $0x40] sm:$0xff] }
  0xed   : > { %10716 = vmatpush3.bf16.msra.mxu0 %v10715_v56  ;;  %v10769_v56 = vpack.c.bf16 %v954_v48, %v953_v52 }
  0xee   : > { %10748 = vmatpush3.bf16.msra.mxu1 %v10747_v57  ;;  %10718 = vmatprep.subr.bf16.mxu0 %v10717_v58  ;;  %v937_v57 = vld [vmem:[%s18313_s4 + $0xe40] sm:$0xff]  ;;  %v938_v58 = vld [vmem:[%s18313_s4 + $0xe48] sm:$0xff] }
  0xef   : > { %10750 = vmatprep.subr.bf16.mxu1 %v10749_v62  ;;  %v955_v62 = vld [vmem:[%s18313_s4 + $0xed0] sm:$0xff]  ;;  %v10771_v21 = vpack.c.bf16 %v938_v58, %v937_v57  ;;  %v2188_v58 = vld [vmem:[%s18314_s5 + $0x98] sm:$0xff] }
  0xf0   : > { %v2187_v57 = vld [vmem:[%s18314_s5 + $0x90] sm:$0xff] }
  0xf1   : > { %10720 = vmatpush3.bf16.msra.mxu0 %v10719_v2  ;;  %v10773_v2 = vpack.c.bf16 %v956_v17, %v955_v62  ;;  %v10821_v17 = vpack.c.bf16 %v2188_v58, %v2187_v57  ;;  %v2198_v57 = vld [vmem:[%s18314_s5 + $0xe8] sm:$0xff]  ;;  %v2229_v58 = vld [vmem:[%s18314_s5 + $0x1e0] sm:$0xff] }
  0xf2   : > { %10752 = vmatpush3.bf16.msra.mxu1 %v10751_v3  ;;  %10754 = vmatprep.subr.bf16.mxu0 %v10753_v4  ;;  %v939_v3 = vld [vmem:[%s18313_s4 + $0xe50] sm:$0xff]  ;;  %v940_v4 = vld [vmem:[%s18313_s4 + $0xe58] sm:$0xff] }
  0xf3   : > { %10786 = vmatprep.subr.bf16.mxu1 %v10785_v8  ;;  %v957_v8 = vld [vmem:[%s18313_s4 + $0xee0] sm:$0xff]  ;;  %v10775_v13 = vpack.c.bf16 %v940_v4, %v939_v3  ;;  %v2190_v4 = vld [vmem:[%s18314_s5 + $0xa8] sm:$0xff] }
  0xf4   : > { %1954 = vmatmul.mubr.f32.vlgmr.msra.gmra.mrb[12].mxu0 %v13450_v12  ;;  %v2189_v3 = vld [vmem:[%s18314_s5 + $0xa0] sm:$0xff] }
  0xf5   : > { %2024 = vmatmul.mubr.f32.vlgmr.msra.gmra.mrb[12].mxu1 %v13460_v15  ;;  %10756 = vmatpush3.bf16.msra.mxu0 %v10755_v16  ;;  %v10777_v16 = vpack.c.bf16 %v958_v9, %v957_v8  ;;  %v10823_v8 = vpack.c.bf16 %v2172_v0, %v2171_v63  ;;  %v14072_v9 = vld [vmem:[%s14040_s19 + $0x18] sm:$0xff]  ;;  %v2182_v63 = vld [vmem:[%s18314_s5 + $0x68] sm:$0xff]  ;;  %v2213_v0 = vld [vmem:[%s18314_s5 + $0x160] sm:$0xff] }
  0xf6   : > { %10788 = vmatpush3.bf16.msra.mxu1 %v10787_v18  ;;  %10758 = vmatprep.subr.bf16.mxu0 %v10757_v19  ;;  %v941_v18 = vld [vmem:[%s18313_s4 + $0xe60] sm:$0xff]  ;;  %v942_v19 = vld [vmem:[%s18313_s4 + $0xe68] sm:$0xff] }
  0xf7   : > { %10790 = vmatprep.subr.bf16.mxu1 %v10789_v24  ;;  %2093 = vmatprep.mubr.f32.mxu0 %v13482_v28  ;;  %v935_v28 = vld [vmem:[%s18313_s4 + $0xe30] sm:$0xff]  ;;  %v974_v24 = vld [vmem:[%s18313_s4 + $0xf68] sm:$0xff]  ;;  %v10779_v36 = vpack.c.bf16 %v942_v19, %v941_v18  ;;  %v2192_v19 = vld [vmem:[%s18314_s5 + $0xb8] sm:$0xff] }
  0xf8   : > { %2163 = vmatprep.mubr.f32.mxu1 %v13492_v31  ;;  %v10797_v31 = vpack.c.bf16 %v984_v43, %v983_v42  ;;  %v10767_v49 = vpack.c.bf16 %v936_v47, %v935_v28  ;;  %v975_v42 = vld [vmem:[%s18313_s4 + $0xf70] sm:$0xff]  ;;  %v2186_v28 = vld [vmem:[%s18314_s5 + $0x88] sm:$0xff]  ;;  %v2217_v47 = vld [vmem:[%s18314_s5 + $0x180] sm:$0xff] }
  0xf9   : > { %10760 = vmatpush3.bf16.msra.mxu0 %v10759_v32  ;;  %v991_v32 = vld [vmem:[%s18313_s4 + $0xff0] sm:$0xff] }
  0xfa   : > { %10792 = vmatpush3.bf16.msra.mxu1 %v10791_v33  ;;  %10762 = vmatprep.subr.bf16.mxu0 %v10761_v34  ;;  %v992_v33 = vld [vmem:[%s18313_s4 + $0xff8] sm:$0xff]  ;;  %v2191_v18 = vld [vmem:[%s18314_s5 + $0xb0] sm:$0xff] }
  0xfb   : > { %10794 = vmatprep.subr.bf16.mxu1 %v10793_v38  ;;  %v10811_v38 = vpack.c.bf16 %v974_v24, %v973_v20  ;;  %v2223_v20 = vld [vmem:[%s18314_s5 + $0x1b0] sm:$0xff]  ;;  %v10829_v25 = vpack.c.bf16 %v2192_v19, %v2191_v18 }
  0xfc   : > { %v2183_v19 = vld [vmem:[%s18314_s5 + $0x70] sm:$0xff] }
  0xfd   : > { %10764 = vmatpush3.bf16.msra.mxu0 %v10763_v44  ;;  %v10813_v44 = vpack.c.bf16 %v992_v33, %v991_v32  ;;  %v2208_v32 = vld [vmem:[%s18314_s5 + $0x138] sm:$0xff]  ;;  %v2193_v33 = vld [vmem:[%s18314_s5 + $0xc0] sm:$0xff] }
  0xfe   : > { %10796 = vmatpush3.bf16.msra.mxu1 %v10795_v45  ;;  %10766 = vmatprep.subr.bf16.mxu0 %v10765_v46  ;;  %v976_v45 = vld [vmem:[%s18313_s4 + $0xf78] sm:$0xff]  ;;  %v2185_v46 = vld [vmem:[%s18314_s5 + $0x80] sm:$0xff] }
  0xff   : > { %10798 = vmatprep.subr.bf16.mxu1 %v10797_v31  ;;  %v10815_v52 = vpack.c.bf16 %v976_v45, %v975_v42  ;;  %v10817_v48 = vpack.c.bf16 %v2186_v28, %v2185_v46  ;;  %v2209_v42 = vld [vmem:[%s18314_s5 + $0x140] sm:$0xff]  ;;  %v2195_v45 = vld [vmem:[%s18314_s5 + $0xd0] sm:$0xff]  ;;  %v2196_v46 = vld [vmem:[%s18314_s5 + $0xd8] sm:$0xff] }
 0x100   : > { %v2227_v28 = vld [vmem:[%s18314_s5 + $0x1d0] sm:$0xff] }
 0x101   : > { %10768 = vmatpush3.bf16.msra.mxu0 %v10767_v49  ;;  %v2201_v49 = vld [vmem:[%s18314_s5 + $0x100] sm:$0xff] }
 0x102   : > { %10800 = vmatpush3.bf16.msra.mxu1 %v10799_v55  ;;  %10770 = vmatprep.subr.bf16.mxu0 %v10769_v56  ;;  %v10849_v55 = vpack.c.bf16 %v2218_v50, %v2217_v47  ;;  %v2202_v56 = vld [vmem:[%s18314_s5 + $0x108] sm:$0xff]  ;;  %v2228_v47 = vld [vmem:[%s18314_s5 + $0x1d8] sm:$0xff]  ;;  %v10835_v50 = vpack.c.bf16 %v2178_v41, %v2177_v40  ;;  %v2251_v41 = vld [vmem:[%s18314_s5 + $0x290] sm:$0xff] }
 0x103   : > { %10802 = vmatprep.subr.bf16.mxu1 %v10801_v60  ;;  %v2220_v60 = vld [vmem:[%s18314_s5 + $0x198] sm:$0xff]  ;;  %v10851_v62 = vpack.c.bf16 %v2202_v56, %v2201_v49  ;;  %v10869_v49 = vpack.c.bf16 %v2228_v47, %v2227_v28  ;;  %v2197_v56 = vld [vmem:[%s18314_s5 + $0xe0] sm:$0xff]  ;;  %v2266_v40 = vld [vmem:[%s18314_s5 + $0x308] sm:$0xff] }
 0x105   : > { %10772 = vmatpush3.bf16.msra.mxu0 %v10771_v21  ;;  %v2203_v21 = vld [vmem:[%s18314_s5 + $0x110] sm:$0xff] }
 0x106   : > { %10804 = vmatpush3.bf16.msra.mxu1 %v10803_v1  ;;  %10774 = vmatprep.subr.bf16.mxu0 %v10773_v2  ;;  %v10853_v1 = vpack.c.bf16 %v2220_v60, %v2219_v59  ;;  %v2204_v2 = vld [vmem:[%s18314_s5 + $0x118] sm:$0xff]  ;;  %v2230_v59 = vld [vmem:[%s18314_s5 + $0x1e8] sm:$0xff] }
 0x107   : > { %v8545_v22 = vpop.f32.mrb[0].mxu0  ;;  %10806 = vmatprep.subr.bf16.mxu1 %v10805_v6  ;;  %v2222_v6 = vld [vmem:[%s18314_s5 + $0x1a8] sm:$0xff]  ;;  %v10855_v10 = vpack.c.bf16 %v2204_v2, %v2203_v21 }
 0x108   : > { %v8546_v29 = vpop.f32.mrb[1].mxu0  ;;  %v8580_v30 = vpop.f32.mrb[0].mxu1  ;;  %v2214_v2 = vld [vmem:[%s18314_s5 + $0x168] sm:$0xff] }
 0x109   : > { %v8547_v34 = vadd.f32 %v8546_v29, %v8545_v22  ;;  %10776 = vmatpush3.bf16.msra.mxu0 %v10775_v13  ;;  %v8581_v35 = vpop.f32.mrb[1].mxu1  ;;  %v2174_v13 = vld [vmem:[%s18314_s5 + $0x28] sm:$0xff]  ;;  %v2224_v22 = vld [vmem:[%s18314_s5 + $0x1b8] sm:$0xff]  ;;  %v2207_v29 = vld [vmem:[%s18314_s5 + $0x130] sm:$0xff] }
 0x10a   : > { %10808 = vmatpush3.bf16.msra.mxu1 %v10807_v14  ;;  %v8582_v37 = vadd.f32 %v8581_v35, %v8580_v30  ;;  %10778 = vmatprep.subr.bf16.mxu0 %v10777_v16  ;;  %v10857_v14 = vpack.c.bf16 %v2222_v6, %v2221_v5  ;;  %v2206_v16 = vld [vmem:[%s18314_s5 + $0x128] sm:$0xff]  ;;  %v10861_v30 = vpack.c.bf16 %v2224_v22, %v2223_v20  ;;  %v2225_v35 = vld [vmem:[%s18314_s5 + $0x1c0] sm:$0xff]  ;;  %v2184_v20 = vld [vmem:[%s18314_s5 + $0x78] sm:$0xff] }
 0x10b   : > { %v1116_v43 = vadd.f32 %v8547_v34, %v8440_v27  ;;  %10810 = vmatprep.subr.bf16.mxu1 %v10809_v23  ;;  %v10827_v23 = vpack.c.bf16 %v2174_v13, %v2173_v11  ;;  %v2176_v27 = vld [vmem:[%s18314_s5 + $0x38] sm:$0xff]  ;;  %v2194_v34 = vld [vmem:[%s18314_s5 + $0xc8] sm:$0xff]  ;;  %v8441_v5 = vld [vmem:[%s18317_s8 + $0x1] ss:$0 sm:$0xff] }
 0x10c   : > { %v2215_v22 = vld [vmem:[%s18314_s5 + $0x170] sm:$0xff] }
 0x10d   : > { %v14010_v31 = vadd.f32 %v8582_v37, %v1116_v43  ;;  %10780 = vmatpush3.bf16.msra.mxu0 %v10779_v36  ;;  %v2226_v36 = vld [vmem:[%s18314_s5 + $0x1c8] sm:$0xff]  ;;  %v10831_v37 = vpack.c.bf16 %v2176_v27, %v2175_v26  ;;  %v2249_v26 = vld [vmem:[%s18314_s5 + $0x280] sm:$0xff] }
 0x10e   : > { %10812 = vmatpush3.bf16.msra.mxu1 %v10811_v38  ;;  %10782 = vmatprep.subr.bf16.mxu0 %v10781_v39  ;;  %v10863_v38 = vpack.c.bf16 %v2208_v32, %v2207_v29  ;;  %v10833_v39 = vpack.c.bf16 %v2194_v34, %v2193_v33  ;;  %v10865_v43 = vpack.c.bf16 %v2226_v36, %v2225_v35  ;;  %v2250_v27 = vld [vmem:[%s18314_s5 + $0x288] sm:$0xff]  ;;  %v2281_v29 = vld [vmem:[%s18314_s5 + $0x380] sm:$0xff] }
 0x10f   : > { %10814 = vmatprep.subr.bf16.mxu1 %v10813_v44  ;;  %v2210_v44 = vld [vmem:[%s18314_s5 + $0x148] sm:$0xff]  ;;  %v10847_v33 = vpack.c.bf16 %v2184_v20, %v2183_v19  ;;  %v10881_v35 = vpack.c.bf16 %v2250_v27, %v2249_v26  ;;  %v2233_v36 = vld [vmem:[%s18314_s5 + $0x200] sm:$0xff] }
 0x110   : > { %v2274_v27 = vld [vmem:[%s18314_s5 + $0x348] sm:$0xff] }
 0x111   : > { %10784 = vmatpush3.bf16.msra.mxu0 %v10783_v51  ;;  %v10867_v51 = vpack.c.bf16 %v2210_v44, %v2209_v42  ;;  %v2252_v42 = vld [vmem:[%s18314_s5 + $0x298] sm:$0xff] }
 0x112   : > { %10816 = vmatpush3.bf16.msra.mxu1 %v10815_v52  ;;  %10818 = vmatprep.subr.bf16.mxu0 %v10817_v48  ;;  %v10837_v52 = vpack.c.bf16 %v2196_v46, %v2195_v45  ;;  %v2179_v48 = vld [vmem:[%s18314_s5 + $0x50] sm:$0xff]  ;;  %v2284_v44 = vld [vmem:[%s18314_s5 + $0x398] sm:$0xff]  ;;  %v14250_v45 = vld [vmem:[%s14040_s19] sm:$0xff] }
 0x113   : > { %10850 = vmatprep.subr.bf16.mxu1 %v10849_v55  ;;  %v2212_v55 = vld [vmem:[%s18314_s5 + $0x158] sm:$0xff]  ;;  %v10839_v60 = vpack.c.bf16 %v2180_v53, %v2179_v48  ;;  %v14253_v46 = vld [vmem:[%s14040_s19 + $0x10] sm:$0xff] }
 0x114   : > { %2094 = vmatmul.mubr.f32.vlgmr.msra.gmra.mrb[14].mxu0 %v13450_v12  ;;  %v10825_v12 = vpack.c.bf16 %v2190_v4, %v2189_v3  ;;  %v2199_v3 = vld [vmem:[%s18314_s5 + $0xf0] sm:$0xff]  ;;  %v2200_v4 = vld [vmem:[%s18314_s5 + $0xf8] sm:$0xff] }
 0x115   : > { %2164 = vmatmul.mubr.f32.vlgmr.msra.gmra.mrb[14].mxu1 %v13460_v15  ;;  %10820 = vmatpush3.bf16.msra.mxu0 %v10819_v61  ;;  %v2205_v15 = vld [vmem:[%s18314_s5 + $0x120] sm:$0xff]  ;;  %v10871_v61 = vpack.c.bf16 %v2212_v55, %v2211_v54  ;;  %v10845_v18 = vpack.c.bf16 %v2200_v4, %v2199_v3  ;;  %v2267_v48 = vld [vmem:[%s18314_s5 + $0x310] sm:$0xff]  ;;  %v2268_v54 = vld [vmem:[%s18314_s5 + $0x318] sm:$0xff] }
 0x116   : > { %10852 = vmatpush3.bf16.msra.mxu1 %v10851_v62  ;;  %10822 = vmatprep.subr.bf16.mxu0 %v10821_v17  ;;  %v10859_v24 = vpack.c.bf16 %v2206_v16, %v2205_v15  ;;  %v10841_v62 = vpack.c.bf16 %v2198_v57, %v2197_v56  ;;  %v2181_v17 = vld [vmem:[%s18314_s5 + $0x60] sm:$0xff]  ;;  %v10875_v16 = vpack.c.bf16 %v2214_v2, %v2213_v0  ;;  %v2254_v55 = vld [vmem:[%s18314_s5 + $0x2a8] sm:$0xff]  ;;  %v2287_v2 = vld [vmem:[%s18314_s5 + $0x3b0] sm:$0xff] }
 0x117   : > { %10854 = vmatprep.subr.bf16.mxu1 %v10853_v1  ;;  %2801 = vmatprep.mubr.f32.mxu0 %v14068_v7  ;;  %v10873_v1 = vpack.c.bf16 %v2230_v59, %v2229_v58  ;;  %v10843_v15 = vpack.c.bf16 %v2182_v63, %v2181_v17  ;;  %v2285_v56 = vld [vmem:[%s18314_s5 + $0x3a0] sm:$0xff]  ;;  %v2286_v57 = vld [vmem:[%s18314_s5 + $0x3a8] sm:$0xff]  ;;  %v10919_v59 = vpack.c.bf16 %v2268_v54, %v2267_v48  ;;  %v2288_v3 = vld [vmem:[%s18314_s5 + $0x3b8] sm:$0xff] }
 0x118   : > { %2871 = vmatprep.mubr.f32.mxu1 %v14072_v9  ;;  %v2269_v17 = vld [vmem:[%s18314_s5 + $0x320] sm:$0xff]  ;;  %v10921_v63 = vpack.c.bf16 %v2286_v57, %v2285_v56  ;;  %v2270_v0 = vld [vmem:[%s18314_s5 + $0x328] sm:$0xff]  ;;  %v2263_v57 = vld [vmem:[%s18314_s5 + $0x2f0] sm:$0xff] }
 0x119   : > { %10824 = vmatpush3.bf16.msra.mxu0 %v10823_v8  ;;  %v2245_v48 = vld [vmem:[%s18314_s5 + $0x260] sm:$0xff]  ;;  %v2278_v56 = vld [vmem:[%s18314_s5 + $0x368] sm:$0xff] }
 0x11a   : > { %10856 = vmatpush3.bf16.msra.mxu1 %v10855_v10  ;;  %10826 = vmatprep.subr.bf16.mxu0 %v10825_v12  ;;  %v2231_v10 = vld [vmem:[%s18314_s5 + $0x1f0] sm:$0xff]  ;;  %v2232_v12 = vld [vmem:[%s18314_s5 + $0x1f8] sm:$0xff]  ;;  %v2277_v54 = vld [vmem:[%s18314_s5 + $0x360] sm:$0xff] }
 0x11b   : > { %10858 = vmatprep.subr.bf16.mxu1 %v10857_v14 }
 0x11d   : > { %10828 = vmatpush3.bf16.msra.mxu0 %v10827_v23 }
 0x11e   : > { %10860 = vmatpush3.bf16.msra.mxu1 %v10859_v24  ;;  %10830 = vmatprep.subr.bf16.mxu0 %v10829_v25  ;;  %v10877_v24 = vpack.c.bf16 %v2232_v12, %v2231_v10  ;;  %v2216_v25 = vld [vmem:[%s18314_s5 + $0x178] sm:$0xff]  ;;  %v2271_v12 = vld [vmem:[%s18314_s5 + $0x330] sm:$0xff] }
 0x11f   : > { %10862 = vmatprep.subr.bf16.mxu1 %v10861_v30  ;;  %v2282_v30 = vld [vmem:[%s18314_s5 + $0x388] sm:$0xff]  ;;  %v10879_v34 = vpack.c.bf16 %v2216_v25, %v2215_v22  ;;  %v2240_v10 = vld [vmem:[%s18314_s5 + $0x238] sm:$0xff]  ;;  %v2273_v25 = vld [vmem:[%s18314_s5 + $0x340] sm:$0xff] }
 0x121   : > { %10832 = vmatpush3.bf16.msra.mxu0 %v10831_v37  ;;  %v2234_v37 = vld [vmem:[%s18314_s5 + $0x208] sm:$0xff] }
 0x122   : > { %10864 = vmatpush3.bf16.msra.mxu1 %v10863_v38  ;;  %10834 = vmatprep.subr.bf16.mxu0 %v10833_v39  ;;  %v2265_v38 = vld [vmem:[%s18314_s5 + $0x300] sm:$0xff]  ;;  %v10913_v39 = vpack.c.bf16 %v2282_v30, %v2281_v29  ;;  %v10883_v28 = vpack.c.bf16 %v2234_v37, %v2233_v36  ;;  %v2259_v29 = vld [vmem:[%s18314_s5 + $0x2d0] sm:$0xff]  ;;  %v2260_v30 = vld [vmem:[%s18314_s5 + $0x2d8] sm:$0xff]  ;;  %v10931_v36 = vpack.c.bf16 %v2274_v27, %v2273_v25 }
 0x123   : > { %10866 = vmatprep.subr.bf16.mxu1 %v10865_v43  ;;  %v2283_v43 = vld [vmem:[%s18314_s5 + $0x390] sm:$0xff]  ;;  %v10915_v47 = vpack.c.bf16 %v2266_v40, %v2265_v38  ;;  %v10901_v37 = vpack.c.bf16 %v2260_v30, %v2259_v29  ;;  %v2316_v29 = vld [vmem:[%s18314_s5 + $0x498] sm:$0xff] }
 0x124   : > { %v10917_v53 = vpack.c.bf16 %v2284_v44, %v2283_v43  ;;  %v2243_v38 = vld [vmem:[%s18314_s5 + $0x250] sm:$0xff]  ;;  %v2261_v43 = vld [vmem:[%s18314_s5 + $0x2e0] sm:$0xff]  ;;  %v2262_v44 = vld [vmem:[%s18314_s5 + $0x2e8] sm:$0xff] }
 0x125   : > { %10836 = vmatpush3.bf16.msra.mxu0 %v10835_v50  ;;  %v10885_v50 = vpack.c.bf16 %v2252_v42, %v2251_v41  ;;  %v2275_v40 = vld [vmem:[%s18314_s5 + $0x350] sm:$0xff]  ;;  %v2276_v42 = vld [vmem:[%s18314_s5 + $0x358] sm:$0xff] }
 0x126   : > { %10868 = vmatpush3.bf16.msra.mxu1 %v10867_v51  ;;  %10838 = vmatprep.subr.bf16.mxu0 %v10837_v52  ;;  %v2235_v51 = vld [vmem:[%s18314_s5 + $0x210] sm:$0xff]  ;;  %v2236_v52 = vld [vmem:[%s18314_s5 + $0x218] sm:$0xff] }
 0x127   : > { %v8615_v21 = vpop.f32.mrb[2].mxu0  ;;  %10870 = vmatprep.subr.bf16.mxu1 %v10869_v49  ;;  %v2253_v49 = vld [vmem:[%s18314_s5 + $0x2a0] sm:$0xff]  ;;  %v10887_v58 = vpack.c.bf16 %v2236_v52, %v2235_v51  ;;  %v10935_v51 = vpack.c.bf16 %v2276_v42, %v2275_v40  ;;  %v10905_v52 = vpack.c.bf16 %v2262_v44, %v2261_v43  ;;  %v2315_v27 = vld [vmem:[%s18314_s5 + $0x490] sm:$0xff]  ;;  %v2318_v43 = vld [vmem:[%s18314_s5 + $0x4a8] sm:$0xff] }
 0x128   : > { %v8616_v6 = vpop.f32.mrb[3].mxu0  ;;  %v8650_v8 = vpop.f32.mrb[2].mxu1  ;;  %v2347_v30 = vld [vmem:[%s18314_s5 + $0x590] sm:$0xff]  ;;  %v2317_v42 = vld [vmem:[%s18314_s5 + $0x4a0] sm:$0xff] }
 0x129   : > { %v8617_v11 = vadd.f32 %v8616_v6, %v8615_v21  ;;  %10840 = vmatpush3.bf16.msra.mxu0 %v10839_v60  ;;  %v8651_v13 = vpop.f32.mrb[3].mxu1  ;;  %v10889_v60 = vpack.c.bf16 %v2254_v55, %v2253_v49  ;;  %v2255_v21 = vld [vmem:[%s18314_s5 + $0x2b0] sm:$0xff]  ;;  %v2349_v44 = vld [vmem:[%s18314_s5 + $0x5a0] sm:$0xff] }
 0x12a   : > { %10872 = vmatpush3.bf16.msra.mxu1 %v10871_v61  ;;  %v8652_v14 = vadd.f32 %v8651_v13, %v8650_v8  ;;  %10842 = vmatprep.subr.bf16.mxu0 %v10841_v62  ;;  %v2237_v61 = vld [vmem:[%s18314_s5 + $0x220] sm:$0xff]  ;;  %v2238_v62 = vld [vmem:[%s18314_s5 + $0x228] sm:$0xff]  ;;  %v2239_v8 = vld [vmem:[%s18314_s5 + $0x230] sm:$0xff] }
 0x12b   : > { %v1256_v23 = vadd.f32 %v8617_v11, %v8441_v5  ;;  %10874 = vmatprep.subr.bf16.mxu1 %v10873_v1  ;;  %v2256_v1 = vld [vmem:[%s18314_s5 + $0x2b8] sm:$0xff]  ;;  %v10891_v4 = vpack.c.bf16 %v2238_v62, %v2237_v61  ;;  %v10923_v5 = vpack.c.bf16 %v2270_v0, %v2269_v17  ;;  %v10925_v11 = vpack.c.bf16 %v2288_v3, %v2287_v2  ;;  %v2295_v62 = vld [vmem:[%s18314_s5 + $0x3f0] sm:$0xff] }
 0x12c   : > { %v10893_v6 = vpack.c.bf16 %v2256_v1, %v2255_v21  ;;  %v2272_v13 = vld [vmem:[%s18314_s5 + $0x338] sm:$0xff]  ;;  %v10895_v19 = vpack.c.bf16 %v2240_v10, %v2239_v8  ;;  %v10939_v2 = vpack.c.bf16 %v2278_v56, %v2277_v54 }
 0x12d   : > { %v14223_v32 = vadd.f32 %v8652_v14, %v1256_v23  ;;  %10844 = vmatpush3.bf16.msra.mxu0 %v10843_v15  ;;  %v2257_v15 = vld [vmem:[%s18314_s5 + $0x2c0] sm:$0xff]  ;;  %v2258_v14 = vld [vmem:[%s18314_s5 + $0x2c8] sm:$0xff]  ;;  %v10927_v20 = vpack.c.bf16 %v2272_v13, %v2271_v12  ;;  %v2296_v17 = vld [vmem:[%s18314_s5 + $0x3f8] sm:$0xff] }
 0x12e   : > { %10876 = vmatpush3.bf16.msra.mxu1 %v10875_v16  ;;  %10846 = vmatprep.subr.bf16.mxu0 %v10845_v18  ;;  %v2289_v16 = vld [vmem:[%s18314_s5 + $0x3c0] sm:$0xff]  ;;  %v2290_v18 = vld [vmem:[%s18314_s5 + $0x3c8] sm:$0xff]  ;;  %v10897_v22 = vpack.c.bf16 %v2258_v14, %v2257_v15  ;;  %v10941_v10 = vpack.c.bf16 %v2296_v17, %v2295_v62  ;;  %v2280_v12 = vld [vmem:[%s18314_s5 + $0x378] sm:$0xff] }
 0x12f   : > { %10878 = vmatprep.subr.bf16.mxu1 %v10877_v24  ;;  %v2241_v23 = vld [vmem:[%s18314_s5 + $0x240] sm:$0xff]  ;;  %v2242_v24 = vld [vmem:[%s18314_s5 + $0x248] sm:$0xff]  ;;  %v10929_v26 = vpack.c.bf16 %v2290_v18, %v2289_v16  ;;  %v2320_v56 = vld [vmem:[%s18314_s5 + $0x4b8] sm:$0xff] }
 0x130   : > { %v2314_v13 = vld [vmem:[%s18314_s5 + $0x488] sm:$0xff]  ;;  %v2345_v15 = vld [vmem:[%s18314_s5 + $0x580] sm:$0xff]  ;;  %v2303_v62 = vld [vmem:[%s18314_s5 + $0x430] sm:$0xff] }
 0x131   : > { %10848 = vmatpush3.bf16.msra.mxu0 %v10847_v33  ;;  %v2291_v33 = vld [vmem:[%s18314_s5 + $0x3d0] sm:$0xff]  ;;  %v2346_v14 = vld [vmem:[%s18314_s5 + $0x588] sm:$0xff]  ;;  %v2304_v17 = vld [vmem:[%s18314_s5 + $0x438] sm:$0xff] }
 0x132   : > { %10880 = vmatpush3.bf16.msra.mxu1 %v10879_v34  ;;  %10882 = vmatprep.subr.bf16.mxu0 %v10881_v35  ;;  %v2292_v34 = vld [vmem:[%s18314_s5 + $0x3d8] sm:$0xff]  ;;  %v10899_v35 = vpack.c.bf16 %v2242_v24, %v2241_v23  ;;  %v2298_v23 = vld [vmem:[%s18314_s5 + $0x408] sm:$0xff]  ;;  %v2329_v24 = vld [vmem:[%s18314_s5 + $0x500] sm:$0xff]  ;;  %v10977_v25 = vpack.c.bf16 %v2346_v14, %v2345_v15 }
 0x133   : > { %10914 = vmatprep.subr.bf16.mxu1 %v10913_v39  ;;  %v2244_v39 = vld [vmem:[%s18314_s5 + $0x258] sm:$0xff]  ;;  %v10933_v41 = vpack.c.bf16 %v2292_v34, %v2291_v33  ;;  %v2338_v15 = vld [vmem:[%s18314_s5 + $0x548] sm:$0xff]  ;;  %v2323_v14 = vld [vmem:[%s18314_s5 + $0x4d0] sm:$0xff] }
 0x134   : > { %2802 = vmatmul.mubr.f32.vlgmr.msra.gmra.mrb[16].mxu0 %v14250_v45  ;;  %v2348_v33 = vld [vmem:[%s18314_s5 + $0x598] sm:$0xff] }
 0x135   : > { %2872 = vmatmul.mubr.f32.vlgmr.msra.gmra.mrb[16].mxu1 %v14253_v46  ;;  %10884 = vmatpush3.bf16.msra.mxu0 %v10883_v28  ;;  %v2293_v28 = vld [vmem:[%s18314_s5 + $0x3e0] sm:$0xff]  ;;  %v10981_v40 = vpack.c.bf16 %v2348_v33, %v2347_v30  ;;  %v2340_v30 = vld [vmem:[%s18314_s5 + $0x558] sm:$0xff] }
 0x136   : > { %10916 = vmatpush3.bf16.msra.mxu1 %v10915_v47  ;;  %10886 = vmatprep.subr.bf16.mxu0 %v10885_v50  ;;  %v2294_v47 = vld [vmem:[%s18314_s5 + $0x3e8] sm:$0xff]  ;;  %v10903_v50 = vpack.c.bf16 %v2244_v39, %v2243_v38  ;;  %v2300_v38 = vld [vmem:[%s18314_s5 + $0x418] sm:$0xff]  ;;  %v2331_v39 = vld [vmem:[%s18314_s5 + $0x510] sm:$0xff] }
 0x137   : > { %10918 = vmatprep.subr.bf16.mxu1 %v10917_v53  ;;  %2941 = vmatprep.mubr.f32.mxu0 %v14068_v7  ;;  %v2246_v53 = vld [vmem:[%s18314_s5 + $0x268] sm:$0xff]  ;;  %v10937_v55 = vpack.c.bf16 %v2294_v47, %v2293_v28  ;;  %v2325_v33 = vld [vmem:[%s18314_s5 + $0x4e0] sm:$0xff] }
 0x138   : > { %3011 = vmatprep.mubr.f32.mxu1 %v14072_v9  ;;  %v10907_v21 = vpack.c.bf16 %v2246_v53, %v2245_v48  ;;  %v2350_v28 = vld [vmem:[%s18314_s5 + $0x5a8] sm:$0xff]  ;;  %v2333_v53 = vld [vmem:[%s18314_s5 + $0x520] sm:$0xff] }
 0x139   : > { %10888 = vmatpush3.bf16.msra.mxu0 %v10887_v58  ;;  %v2264_v58 = vld [vmem:[%s18314_s5 + $0x2f8] sm:$0xff]  ;;  %v2302_v48 = vld [vmem:[%s18314_s5 + $0x428] sm:$0xff]  ;;  %v10985_v54 = vpack.c.bf16 %v2350_v28, %v2349_v44 }
 0x13a   : > { %10920 = vmatpush3.bf16.msra.mxu1 %v10919_v59  ;;  %10890 = vmatprep.subr.bf16.mxu0 %v10889_v60  ;;  %v8442_v59 = vld [vmem:[%s18317_s8 + $0x2] ss:$0 sm:$0xff]  ;;  %v10909_v3 = vpack.c.bf16 %v2264_v58, %v2263_v57  ;;  %v2351_v57 = vld [vmem:[%s18314_s5 + $0x5b0] sm:$0xff]  ;;  %v2352_v58 = vld [vmem:[%s18314_s5 + $0x5b8] sm:$0xff] }
 0x13b   : > { %10922 = vmatprep.subr.bf16.mxu1 %v10921_v63  ;;  %v2342_v28 = vld [vmem:[%s18314_s5 + $0x568] sm:$0xff] }
 0x13d   : > { %10892 = vmatpush3.bf16.msra.mxu0 %v10891_v4  ;;  %v2247_v4 = vld [vmem:[%s18314_s5 + $0x270] sm:$0xff] }
 0x13e   : > { %10924 = vmatpush3.bf16.msra.mxu1 %v10923_v5  ;;  %10894 = vmatprep.subr.bf16.mxu0 %v10893_v6  ;;  %v2248_v5 = vld [vmem:[%s18314_s5 + $0x278] sm:$0xff]  ;;  %v2279_v6 = vld [vmem:[%s18314_s5 + $0x370] sm:$0xff] }
 0x13f   : > { %10926 = vmatprep.subr.bf16.mxu1 %v10925_v11  ;;  %v2313_v11 = vld [vmem:[%s18314_s5 + $0x480] sm:$0xff]  ;;  %v10911_v18 = vpack.c.bf16 %v2248_v5, %v2247_v4  ;;  %v2354_v4 = vld [vmem:[%s18314_s5 + $0x5c8] sm:$0xff]  ;;  %v10959_v5 = vpack.c.bf16 %v2304_v17, %v2303_v62  ;;  %v2343_v62 = vld [vmem:[%s18314_s5 + $0x570] sm:$0xff] }
 0x141   : > { %10896 = vmatpush3.bf16.msra.mxu0 %v10895_v19  ;;  %v10943_v19 = vpack.c.bf16 %v2280_v12, %v2279_v6  ;;  %v2306_v12 = vld [vmem:[%s18314_s5 + $0x448] sm:$0xff] }
 0x142   : > { %10928 = vmatpush3.bf16.msra.mxu1 %v10927_v20  ;;  %10898 = vmatprep.subr.bf16.mxu0 %v10897_v22  ;;  %v10945_v20 = vpack.c.bf16 %v2314_v13, %v2313_v11  ;;  %v2297_v22 = vld [vmem:[%s18314_s5 + $0x400] sm:$0xff] }
 0x143   : > { %10930 = vmatprep.subr.bf16.mxu1 %v10929_v26  ;;  %v2330_v26 = vld [vmem:[%s18314_s5 + $0x508] sm:$0xff]  ;;  %v10947_v34 = vpack.c.bf16 %v2298_v23, %v2297_v22  ;;  %v2337_v11 = vld [vmem:[%s18314_s5 + $0x540] sm:$0xff] }
 0x144   : > { %v10995_v23 = vpack.c.bf16 %v2338_v15, %v2337_v11  ;;  %v2393_v11 = vld [vmem:[%s18314_s5 + $0x700] sm:$0xff]  ;;  %v2394_v15 = vld [vmem:[%s18314_s5 + $0x708] sm:$0xff] }
 0x145   : > { %10900 = vmatpush3.bf16.msra.mxu0 %v10899_v35  ;;  %v10979_v35 = vpack.c.bf16 %v2330_v26, %v2329_v24  ;;  %v2308_v26 = vld [vmem:[%s18314_s5 + $0x458] sm:$0xff] }
 0x146   : > { %10932 = vmatpush3.bf16.msra.mxu1 %v10931_v36  ;;  %10902 = vmatprep.subr.bf16.mxu0 %v10901_v37  ;;  %v10949_v36 = vpack.c.bf16 %v2316_v29, %v2315_v27  ;;  %v2299_v37 = vld [vmem:[%s18314_s5 + $0x410] sm:$0xff] }
 0x147   : > { %v8685_v49 = vpop.f32.mrb[4].mxu0  ;;  %10934 = vmatprep.subr.bf16.mxu1 %v10933_v41  ;;  %v2332_v41 = vld [vmem:[%s18314_s5 + $0x518] sm:$0xff]  ;;  %v10951_v47 = vpack.c.bf16 %v2300_v38, %v2299_v37  ;;  %v2339_v27 = vld [vmem:[%s18314_s5 + $0x550] sm:$0xff] }
 0x148   : > { %v8686_v60 = vpop.f32.mrb[5].mxu0  ;;  %v8720_v61 = vpop.f32.mrb[4].mxu1  ;;  %v10999_v38 = vpack.c.bf16 %v2340_v30, %v2339_v27  ;;  %v2395_v27 = vld [vmem:[%s18314_s5 + $0x710] sm:$0xff]  ;;  %v2396_v30 = vld [vmem:[%s18314_s5 + $0x718] sm:$0xff] }
 0x149   : > { %v8687_v63 = vadd.f32 %v8686_v60, %v8685_v49  ;;  %10904 = vmatpush3.bf16.msra.mxu0 %v10903_v50  ;;  %v8721_v0 = vpop.f32.mrb[5].mxu1  ;;  %v10983_v50 = vpack.c.bf16 %v2332_v41, %v2331_v39  ;;  %v2334_v49 = vld [vmem:[%s18314_s5 + $0x528] sm:$0xff] }
 0x14a   : > { %10936 = vmatpush3.bf16.msra.mxu1 %v10935_v51  ;;  %v8722_v1 = vadd.f32 %v8721_v0, %v8720_v61  ;;  %10906 = vmatprep.subr.bf16.mxu0 %v10905_v52  ;;  %v10953_v51 = vpack.c.bf16 %v2318_v43, %v2317_v42  ;;  %v2301_v52 = vld [vmem:[%s18314_s5 + $0x420] sm:$0xff]  ;;  %v10987_v60 = vpack.c.bf16 %v2334_v49, %v2333_v53  ;;  %v2310_v41 = vld [vmem:[%s18314_s5 + $0x468] sm:$0xff]  ;;  %v2359_v53 = vld [vmem:[%s18314_s5 + $0x5f0] sm:$0xff] }
 0x14b   : > { %v1396_v8 = vadd.f32 %v8687_v63, %v8442_v59  ;;  %10938 = vmatprep.subr.bf16.mxu1 %v10937_v55  ;;  %v2319_v55 = vld [vmem:[%s18314_s5 + $0x4b0] sm:$0xff]  ;;  %v10955_v59 = vpack.c.bf16 %v2302_v48, %v2301_v52  ;;  %v10989_v0 = vpack.c.bf16 %v2352_v58, %v2351_v57  ;;  %v2341_v42 = vld [vmem:[%s18314_s5 + $0x560] sm:$0xff] }
 0x14c   : > { %v10957_v61 = vpack.c.bf16 %v2320_v56, %v2319_v55  ;;  %v2335_v63 = vld [vmem:[%s18314_s5 + $0x530] sm:$0xff]  ;;  %v11003_v58 = vpack.c.bf16 %v2342_v28, %v2341_v42  ;;  %v2397_v42 = vld [vmem:[%s18314_s5 + $0x720] sm:$0xff] }
 0x14d   : > { %v14430_v16 = vadd.f32 %v8722_v1, %v1396_v8  ;;  %10908 = vmatpush3.bf16.msra.mxu0 %v10907_v21  ;;  %v2336_v21 = vld [vmem:[%s18314_s5 + $0x538] sm:$0xff]  ;;  %v2321_v1 = vld [vmem:[%s18314_s5 + $0x4c0] sm:$0xff]  ;;  %v2383_v28 = vld [vmem:[%s18314_s5 + $0x6b0] sm:$0xff] }
 0x14e   : > { %10940 = vmatpush3.bf16.msra.mxu1 %v10939_v2  ;;  %10910 = vmatprep.subr.bf16.mxu0 %v10909_v3  ;;  %v2322_v2 = vld [vmem:[%s18314_s5 + $0x4c8] sm:$0xff]  ;;  %v2353_v3 = vld [vmem:[%s18314_s5 + $0x5c0] sm:$0xff]  ;;  %v10991_v6 = vpack.c.bf16 %v2336_v21, %v2335_v63 }
 0x14f   : > { %10942 = vmatprep.subr.bf16.mxu1 %v10941_v10  ;;  %v10961_v8 = vpack.c.bf16 %v2322_v2, %v2321_v1  ;;  %v2305_v10 = vld [vmem:[%s18314_s5 + $0x440] sm:$0xff]  ;;  %v10993_v13 = vpack.c.bf16 %v2354_v4, %v2353_v3  ;;  %v2378_v1 = vld [vmem:[%s18314_s5 + $0x688] sm:$0xff] }
 0x150   : > { %v10963_v22 = vpack.c.bf16 %v2306_v12, %v2305_v10  ;;  %v2377_v21 = vld [vmem:[%s18314_s5 + $0x680] sm:$0xff]  ;;  %v2410_v3 = vld [vmem:[%s18314_s5 + $0x788] sm:$0xff] }
 0x151   : > { %10912 = vmatpush3.bf16.msra.mxu0 %v10911_v18  ;;  %v2324_v18 = vld [vmem:[%s18314_s5 + $0x4d8] sm:$0xff]  ;;  %v2409_v2 = vld [vmem:[%s18314_s5 + $0x780] sm:$0xff]  ;;  %v2362_v12 = vld [vmem:[%s18314_s5 + $0x608] sm:$0xff] }
 0x152   : > { %10944 = vmatpush3.bf16.msra.mxu1 %v10943_v19  ;;  %10946 = vmatprep.subr.bf16.mxu0 %v10945_v20  ;;  %v2355_v19 = vld [vmem:[%s18314_s5 + $0x5d0] sm:$0xff]  ;;  %v2356_v20 = vld [vmem:[%s18314_s5 + $0x5d8] sm:$0xff]  ;;  %v10965_v24 = vpack.c.bf16 %v2324_v18, %v2323_v14  ;;  %v2361_v10 = vld [vmem:[%s18314_s5 + $0x600] sm:$0xff] }
 0x153   : > { %10978 = vmatprep.subr.bf16.mxu1 %v10977_v25  ;;  %v2307_v25 = vld [vmem:[%s18314_s5 + $0x450] sm:$0xff]  ;;  %v10997_v29 = vpack.c.bf16 %v2356_v20, %v2355_v19  ;;  %v2380_v18 = vld [vmem:[%s18314_s5 + $0x698] sm:$0xff] }
 0x154   : > { %2942 = vmatmul.mubr.f32.vlgmr.msra.gmra.mrb[18].mxu0 %v14250_v45  ;;  %v10967_v37 = vpack.c.bf16 %v2308_v26, %v2307_v25  ;;  %v2379_v14 = vld [vmem:[%s18314_s5 + $0x690] sm:$0xff]  ;;  %v2412_v20 = vld [vmem:[%s18314_s5 + $0x798] sm:$0xff] }
 0x155   : > { %3012 = vmatmul.mubr.f32.vlgmr.msra.gmra.mrb[18].mxu1 %v14253_v46  ;;  %10948 = vmatpush3.bf16.msra.mxu0 %v10947_v34  ;;  %v2326_v34 = vld [vmem:[%s18314_s5 + $0x4e8] sm:$0xff]  ;;  %v2411_v19 = vld [vmem:[%s18314_s5 + $0x790] sm:$0xff]  ;;  %v2364_v26 = vld [vmem:[%s18314_s5 + $0x618] sm:$0xff] }
 0x156   : > { %10980 = vmatpush3.bf16.msra.mxu1 %v10979_v35  ;;  %10950 = vmatprep.subr.bf16.mxu0 %v10949_v36  ;;  %v2357_v35 = vld [vmem:[%s18314_s5 + $0x5e0] sm:$0xff]  ;;  %v2358_v36 = vld [vmem:[%s18314_s5 + $0x5e8] sm:$0xff]  ;;  %v10969_v39 = vpack.c.bf16 %v2326_v34, %v2325_v33  ;;  %v2363_v25 = vld [vmem:[%s18314_s5 + $0x610] sm:$0xff] }
 0x157   : > { %10982 = vmatprep.subr.bf16.mxu1 %v10981_v40  ;;  %3081 = vmatprep.mubr.f32.mxu0 %v14068_v7  ;;  %v2309_v40 = vld [vmem:[%s18314_s5 + $0x460] sm:$0xff]  ;;  %v11001_v44 = vpack.c.bf16 %v2358_v36, %v2357_v35  ;;  %v2382_v34 = vld [vmem:[%s18314_s5 + $0x6a8] sm:$0xff] }
 0x158   : > { %3151 = vmatprep.mubr.f32.mxu1 %v14072_v9  ;;  %v10971_v56 = vpack.c.bf16 %v2310_v41, %v2309_v40  ;;  %v2381_v33 = vld [vmem:[%s18314_s5 + $0x6a0] sm:$0xff]  ;;  %v2414_v36 = vld [vmem:[%s18314_s5 + $0x7a8] sm:$0xff] }
 0x159   : > { %10952 = vmatpush3.bf16.msra.mxu0 %v10951_v47  ;;  %v2327_v47 = vld [vmem:[%s18314_s5 + $0x4f0] sm:$0xff]  ;;  %v2413_v35 = vld [vmem:[%s18314_s5 + $0x7a0] sm:$0xff]  ;;  %v2366_v41 = vld [vmem:[%s18314_s5 + $0x628] sm:$0xff] }
 0x15a   : > { %10984 = vmatpush3.bf16.msra.mxu1 %v10983_v50  ;;  %10954 = vmatprep.subr.bf16.mxu0 %v10953_v51  ;;  %v2328_v50 = vld [vmem:[%s18314_s5 + $0x4f8] sm:$0xff]  ;;  %v8443_v51 = vld [vmem:[%s18317_s8 + $0x3] ss:$0 sm:$0xff] }
 0x15b   : > { %10986 = vmatprep.subr.bf16.mxu1 %v10985_v54  ;;  %v2360_v54 = vld [vmem:[%s18314_s5 + $0x5f8] sm:$0xff]  ;;  %v2365_v40 = vld [vmem:[%s18314_s5 + $0x620] sm:$0xff] }
 0x15c   : > { %v11005_v63 = vpack.c.bf16 %v2360_v54, %v2359_v53  ;;  %v2368_v54 = vld [vmem:[%s18314_s5 + $0x638] sm:$0xff] }
 0x15d   : > { %10956 = vmatpush3.bf16.msra.mxu0 %v10955_v59  ;;  %v10973_v59 = vpack.c.bf16 %v2328_v50, %v2327_v47  ;;  %v2384_v47 = vld [vmem:[%s18314_s5 + $0x6b8] sm:$0xff]  ;;  %v2415_v50 = vld [vmem:[%s18314_s5 + $0x7b0] sm:$0xff] }
 0x15e   : > { %10988 = vmatpush3.bf16.msra.mxu1 %v10987_v60  ;;  %10958 = vmatprep.subr.bf16.mxu0 %v10957_v61  ;;  %v2311_v60 = vld [vmem:[%s18314_s5 + $0x470] sm:$0xff]  ;;  %v2312_v61 = vld [vmem:[%s18314_s5 + $0x478] sm:$0xff]  ;;  %v11021_v53 = vpack.c.bf16 %v2384_v47, %v2383_v28 }
 0x15f   : > { %10990 = vmatprep.subr.bf16.mxu1 %v10989_v0  ;;  %v2344_v0 = vld [vmem:[%s18314_s5 + $0x578] sm:$0xff] }
 0x161   : > { %10960 = vmatpush3.bf16.msra.mxu0 %v10959_v5  ;;  %v10975_v5 = vpack.c.bf16 %v2312_v61, %v2311_v60 }
 0x162   : > { %10992 = vmatpush3.bf16.msra.mxu1 %v10991_v6  ;;  %10962 = vmatprep.subr.bf16.mxu0 %v10961_v8  ;;  %v11007_v6 = vpack.c.bf16 %v2344_v0, %v2343_v62  ;;  %v11009_v8 = vpack.c.bf16 %v2378_v1, %v2377_v21  ;;  %v2401_v0 = vld [vmem:[%s18314_s5 + $0x740] sm:$0xff]  ;;  %v2402_v1 = vld [vmem:[%s18314_s5 + $0x748] sm:$0xff] }
 0x163   : > { %10994 = vmatprep.subr.bf16.mxu1 %v10993_v13  ;;  %v11041_v13 = vpack.c.bf16 %v2410_v3, %v2409_v2  ;;  %v2387_v2 = vld [vmem:[%s18314_s5 + $0x6d0] sm:$0xff]  ;;  %v2388_v3 = vld [vmem:[%s18314_s5 + $0x6d8] sm:$0xff] }
 0x165   : > { %10964 = vmatpush3.bf16.msra.mxu0 %v10963_v22  ;;  %v11011_v22 = vpack.c.bf16 %v2362_v12, %v2361_v10  ;;  %v11059_v10 = vpack.c.bf16 %v2402_v1, %v2401_v0  ;;  %v11029_v12 = vpack.c.bf16 %v2388_v3, %v2387_v2  ;;  %v2443_v1 = vld [vmem:[%s18314_s5 + $0x890] sm:$0xff]  ;;  %v2444_v2 = vld [vmem:[%s18314_s5 + $0x898] sm:$0xff] }
 0x166   : > { %10996 = vmatpush3.bf16.msra.mxu1 %v10995_v23  ;;  %10966 = vmatprep.subr.bf16.mxu0 %v10965_v24  ;;  %v11043_v23 = vpack.c.bf16 %v2394_v15, %v2393_v11  ;;  %v11013_v24 = vpack.c.bf16 %v2380_v18, %v2379_v14  ;;  %v2371_v11 = vld [vmem:[%s18314_s5 + $0x650] sm:$0xff]  ;;  %v2404_v18 = vld [vmem:[%s18314_s5 + $0x758] sm:$0xff] }
 0x167   : > { %v8755_v43 = vpop.f32.mrb[6].mxu0  ;;  %10998 = vmatprep.subr.bf16.mxu1 %v10997_v29  ;;  %v11045_v29 = vpack.c.bf16 %v2412_v20, %v2411_v19  ;;  %v2403_v15 = vld [vmem:[%s18314_s5 + $0x750] sm:$0xff]  ;;  %v2389_v19 = vld [vmem:[%s18314_s5 + $0x6e0] sm:$0xff]  ;;  %v2390_v20 = vld [vmem:[%s18314_s5 + $0x6e8] sm:$0xff] }
 0x168   : > { %v8756_v52 = vpop.f32.mrb[7].mxu0  ;;  %v8790_v48 = vpop.f32.mrb[6].mxu1  ;;  %v2475_v3 = vld [vmem:[%s18314_s5 + $0x990] sm:$0xff] }
 0x169   : > { %v8757_v49 = vadd.f32 %v8756_v52, %v8755_v43  ;;  %10968 = vmatpush3.bf16.msra.mxu0 %v10967_v37  ;;  %v8791_v55 = vpop.f32.mrb[7].mxu1  ;;  %v11015_v37 = vpack.c.bf16 %v2364_v26, %v2363_v25  ;;  %v11049_v43 = vpack.c.bf16 %v2414_v36, %v2413_v35  ;;  %v11019_v52 = vpack.c.bf16 %v2366_v41, %v2365_v40  ;;  %v2406_v35 = vld [vmem:[%s18314_s5 + $0x768] sm:$0xff]  ;;  %v2391_v36 = vld [vmem:[%s18314_s5 + $0x6f0] sm:$0xff] }
 0x16a   : > { %11000 = vmatpush3.bf16.msra.mxu1 %v10999_v38  ;;  %v8792_v57 = vadd.f32 %v8791_v55, %v8790_v48  ;;  %10970 = vmatprep.subr.bf16.mxu0 %v10969_v39  ;;  %v11047_v38 = vpack.c.bf16 %v2396_v30, %v2395_v27  ;;  %v11017_v39 = vpack.c.bf16 %v2382_v34, %v2381_v33  ;;  %v2400_v55 = vld [vmem:[%s18314_s5 + $0x738] sm:$0xff]  ;;  %v2373_v27 = vld [vmem:[%s18314_s5 + $0x660] sm:$0xff]  ;;  %v2423_v41 = vld [vmem:[%s18314_s5 + $0x7f0] sm:$0xff] }
 0x16b   : > { %v1536_v17 = vadd.f32 %v8757_v49, %v8443_v51  ;;  %11002 = vmatprep.subr.bf16.mxu1 %v11001_v44  ;;  %v2398_v44 = vld [vmem:[%s18314_s5 + $0x728] sm:$0xff]  ;;  %v2416_v51 = vld [vmem:[%s18314_s5 + $0x7b8] sm:$0xff]  ;;  %v2399_v49 = vld [vmem:[%s18314_s5 + $0x730] sm:$0xff]  ;;  %v11063_v25 = vpack.c.bf16 %v2404_v18, %v2403_v15  ;;  %v11033_v26 = vpack.c.bf16 %v2390_v20, %v2389_v19 }
 0x16c   : > { %v11051_v48 = vpack.c.bf16 %v2398_v44, %v2397_v42  ;;  %v11055_v61 = vpack.c.bf16 %v2400_v55, %v2399_v49  ;;  %v2405_v30 = vld [vmem:[%s18314_s5 + $0x760] sm:$0xff]  ;;  %v2424_v42 = vld [vmem:[%s18314_s5 + $0x7f8] sm:$0xff]  ;;  %v2442_v55 = vld [vmem:[%s18314_s5 + $0x888] sm:$0xff] }
 0x16d   : > { %v14631_v4 = vadd.f32 %v8792_v57, %v1536_v17  ;;  %10972 = vmatpush3.bf16.msra.mxu0 %v10971_v56  ;;  %v2385_v56 = vld [vmem:[%s18314_s5 + $0x6c0] sm:$0xff]  ;;  %v2386_v57 = vld [vmem:[%s18314_s5 + $0x6c8] sm:$0xff]  ;;  %v2408_v49 = vld [vmem:[%s18314_s5 + $0x778] sm:$0xff] }
 0x16e   : > { %11004 = vmatpush3.bf16.msra.mxu1 %v11003_v58  ;;  %10974 = vmatprep.subr.bf16.mxu0 %v10973_v59  ;;  %v2417_v58 = vld [vmem:[%s18314_s5 + $0x7c0] sm:$0xff]  ;;  %v2418_v59 = vld [vmem:[%s18314_s5 + $0x7c8] sm:$0xff]  ;;  %v11025_v62 = vpack.c.bf16 %v2386_v57, %v2385_v56 }
 0x16f   : > { %11006 = vmatprep.subr.bf16.mxu1 %v11005_v63  ;;  %v2369_v17 = vld [vmem:[%s18314_s5 + $0x640] sm:$0xff]  ;;  %v2370_v63 = vld [vmem:[%s18314_s5 + $0x648] sm:$0xff]  ;;  %v11057_v21 = vpack.c.bf16 %v2418_v59, %v2417_v58 }
 0x170   : > { %v2473_v56 = vld [vmem:[%s18314_s5 + $0x980] sm:$0xff]  ;;  %v2474_v57 = vld [vmem:[%s18314_s5 + $0x988] sm:$0xff] }
 0x171   : > { %10976 = vmatpush3.bf16.msra.mxu0 %v10975_v5  ;;  %v2419_v5 = vld [vmem:[%s18314_s5 + $0x7d0] sm:$0xff]  ;;  %v11105_v0 = vpack.c.bf16 %v2474_v57, %v2473_v56  ;;  %v2445_v18 = vld [vmem:[%s18314_s5 + $0x8a0] sm:$0xff]  ;;  %v2446_v19 = vld [vmem:[%s18314_s5 + $0x8a8] sm:$0xff] }
 0x172   : > { %11008 = vmatpush3.bf16.msra.mxu1 %v11007_v6  ;;  %11010 = vmatprep.subr.bf16.mxu0 %v11009_v8  ;;  %v2420_v6 = vld [vmem:[%s18314_s5 + $0x7d8] sm:$0xff]  ;;  %v11027_v8 = vpack.c.bf16 %v2370_v63, %v2369_v17  ;;  %v2426_v17 = vld [vmem:[%s18314_s5 + $0x808] sm:$0xff]  ;;  %v2457_v63 = vld [vmem:[%s18314_s5 + $0x900] sm:$0xff] }
 0x173   : > { %11042 = vmatprep.subr.bf16.mxu1 %v11041_v13  ;;  %v2372_v13 = vld [vmem:[%s18314_s5 + $0x658] sm:$0xff]  ;;  %v11061_v14 = vpack.c.bf16 %v2420_v6, %v2419_v5  ;;  %v2477_v20 = vld [vmem:[%s18314_s5 + $0x9a0] sm:$0xff]  ;;  %v2466_v56 = vld [vmem:[%s18314_s5 + $0x948] sm:$0xff] }
 0x174   : > { %3082 = vmatmul.mubr.f32.vlgmr.msra.gmra.mrb[20].mxu0 %v14250_v45  ;;  %v2476_v5 = vld [vmem:[%s18314_s5 + $0x998] sm:$0xff]  ;;  %v2451_v57 = vld [vmem:[%s18314_s5 + $0x8d0] sm:$0xff] }
 0x175   : > { %3152 = vmatmul.mubr.f32.vlgmr.msra.gmra.mrb[20].mxu1 %v14253_v46  ;;  %11012 = vmatpush3.bf16.msra.mxu0 %v11011_v22  ;;  %v2421_v22 = vld [vmem:[%s18314_s5 + $0x7e0] sm:$0xff]  ;;  %v11109_v15 = vpack.c.bf16 %v2476_v5, %v2475_v3  ;;  %v2468_v3 = vld [vmem:[%s18314_s5 + $0x958] sm:$0xff] }
 0x176   : > { %11044 = vmatpush3.bf16.msra.mxu1 %v11043_v23  ;;  %11014 = vmatprep.subr.bf16.mxu0 %v11013_v24  ;;  %v2422_v23 = vld [vmem:[%s18314_s5 + $0x7e8] sm:$0xff]  ;;  %v11031_v24 = vpack.c.bf16 %v2372_v13, %v2371_v11  ;;  %v2428_v11 = vld [vmem:[%s18314_s5 + $0x818] sm:$0xff]  ;;  %v2459_v13 = vld [vmem:[%s18314_s5 + $0x910] sm:$0xff] }
 0x177   : > { %11046 = vmatprep.subr.bf16.mxu1 %v11045_v29  ;;  %3221 = vmatprep.mubr.f32.mxu0 %v14068_v7  ;;  %v2367_v7 = vld [vmem:[%s18314_s5 + $0x630] sm:$0xff]  ;;  %v2374_v29 = vld [vmem:[%s18314_s5 + $0x668] sm:$0xff]  ;;  %v11065_v34 = vpack.c.bf16 %v2422_v23, %v2421_v22  ;;  %v2453_v5 = vld [vmem:[%s18314_s5 + $0x8e0] sm:$0xff] }
 0x178   : > { %3291 = vmatprep.mubr.f32.mxu1 %v14072_v9  ;;  %v11053_v9 = vpack.c.bf16 %v2416_v51, %v2415_v50  ;;  %v11023_v60 = vpack.c.bf16 %v2368_v54, %v2367_v7  ;;  %v11035_v28 = vpack.c.bf16 %v2374_v29, %v2373_v27  ;;  %v11067_v50 = vpack.c.bf16 %v2406_v35, %v2405_v30  ;;  %v2478_v22 = vld [vmem:[%s18314_s5 + $0x9a8] sm:$0xff]  ;;  %v2461_v27 = vld [vmem:[%s18314_s5 + $0x920] sm:$0xff]  ;;  %v2447_v30 = vld [vmem:[%s18314_s5 + $0x8b0] sm:$0xff] }
 0x179   : > { %11016 = vmatpush3.bf16.msra.mxu0 %v11015_v37  ;;  %v2392_v37 = vld [vmem:[%s18314_s5 + $0x6f8] sm:$0xff]  ;;  %v11069_v54 = vpack.c.bf16 %v2424_v42, %v2423_v41  ;;  %v2462_v29 = vld [vmem:[%s18314_s5 + $0x928] sm:$0xff]  ;;  %v2479_v35 = vld [vmem:[%s18314_s5 + $0x9b0] sm:$0xff] }
 0x17a   : > { %11048 = vmatpush3.bf16.msra.mxu1 %v11047_v38  ;;  %11018 = vmatprep.subr.bf16.mxu0 %v11017_v39  ;;  %v8444_v38 = vld [vmem:[%s18317_s8 + $0x4] ss:$0 sm:$0xff]  ;;  %v11037_v51 = vpack.c.bf16 %v2392_v37, %v2391_v36  ;;  %v2480_v36 = vld [vmem:[%s18314_s5 + $0x9b8] sm:$0xff]  ;;  %v2431_v41 = vld [vmem:[%s18314_s5 + $0x830] sm:$0xff] }
 0x17b   : > { %11050 = vmatprep.subr.bf16.mxu1 %v11049_v43  ;;  %v14913_v37 = vld [vmem:[%s14040_s19 + $0x18] sm:$0xff] }
 0x17c   : > { %v2432_v42 = vld [vmem:[%s18314_s5 + $0x838] sm:$0xff] }
 0x17d   : > { %11020 = vmatpush3.bf16.msra.mxu0 %v11019_v52  ;;  %v2375_v52 = vld [vmem:[%s18314_s5 + $0x670] sm:$0xff] }
 0x17e   : > { %11052 = vmatpush3.bf16.msra.mxu1 %v11051_v48  ;;  %11022 = vmatprep.subr.bf16.mxu0 %v11021_v53  ;;  %v2376_v48 = vld [vmem:[%s18314_s5 + $0x678] sm:$0xff]  ;;  %v2407_v53 = vld [vmem:[%s18314_s5 + $0x770] sm:$0xff] }
 0x17f   : > { %11054 = vmatprep.subr.bf16.mxu1 %v11053_v9  ;;  %v2441_v9 = vld [vmem:[%s18314_s5 + $0x880] sm:$0xff]  ;;  %v11039_v59 = vpack.c.bf16 %v2376_v48, %v2375_v52  ;;  %v2482_v52 = vld [vmem:[%s18314_s5 + $0x9c8] sm:$0xff]  ;;  %v11087_v48 = vpack.c.bf16 %v2432_v42, %v2431_v41  ;;  %v2471_v41 = vld [vmem:[%s18314_s5 + $0x970] sm:$0xff] }
 0x181   : > { %11024 = vmatpush3.bf16.msra.mxu0 %v11023_v60  ;;  %v11071_v60 = vpack.c.bf16 %v2408_v49, %v2407_v53  ;;  %v2434_v49 = vld [vmem:[%s18314_s5 + $0x848] sm:$0xff] }
 0x182   : > { %11056 = vmatpush3.bf16.msra.mxu1 %v11055_v61  ;;  %11026 = vmatprep.subr.bf16.mxu0 %v11025_v62  ;;  %v11073_v61 = vpack.c.bf16 %v2442_v55, %v2441_v9  ;;  %v2425_v62 = vld [vmem:[%s18314_s5 + $0x800] sm:$0xff] }
 0x183   : > { %11058 = vmatprep.subr.bf16.mxu1 %v11057_v21  ;;  %v2458_v21 = vld [vmem:[%s18314_s5 + $0x908] sm:$0xff]  ;;  %v11075_v6 = vpack.c.bf16 %v2426_v17, %v2425_v62  ;;  %v2465_v9 = vld [vmem:[%s18314_s5 + $0x940] sm:$0xff] }
 0x184   : > { %v11123_v17 = vpack.c.bf16 %v2466_v56, %v2465_v9  ;;  %v2521_v9 = vld [vmem:[%s18314_s5 + $0xb00] sm:$0xff]  ;;  %v2522_v56 = vld [vmem:[%s18314_s5 + $0xb08] sm:$0xff] }
 0x185   : > { %11028 = vmatpush3.bf16.msra.mxu0 %v11027_v8  ;;  %v11107_v8 = vpack.c.bf16 %v2458_v21, %v2457_v63  ;;  %v2436_v21 = vld [vmem:[%s18314_s5 + $0x858] sm:$0xff] }
 0x186   : > { %11060 = vmatpush3.bf16.msra.mxu1 %v11059_v10  ;;  %11030 = vmatprep.subr.bf16.mxu0 %v11029_v12  ;;  %v11077_v10 = vpack.c.bf16 %v2444_v2, %v2443_v1  ;;  %v2427_v12 = vld [vmem:[%s18314_s5 + $0x810] sm:$0xff] }
 0x187   : > { %v8825_v33 = vpop.f32.mrb[8].mxu0  ;;  %11062 = vmatprep.subr.bf16.mxu1 %v11061_v14  ;;  %v2460_v14 = vld [vmem:[%s18314_s5 + $0x918] sm:$0xff]  ;;  %v11079_v23 = vpack.c.bf16 %v2428_v11, %v2427_v12  ;;  %v2467_v1 = vld [vmem:[%s18314_s5 + $0x950] sm:$0xff] }
 0x188   : > { %v8826_v39 = vpop.f32.mrb[9].mxu0  ;;  %v8860_v40 = vpop.f32.mrb[8].mxu1  ;;  %v11127_v11 = vpack.c.bf16 %v2468_v3, %v2467_v1  ;;  %v2523_v1 = vld [vmem:[%s18314_s5 + $0xb10] sm:$0xff]  ;;  %v2524_v3 = vld [vmem:[%s18314_s5 + $0xb18] sm:$0xff] }
 0x189   : > { %v8827_v43 = vadd.f32 %v8826_v39, %v8825_v33  ;;  %11032 = vmatpush3.bf16.msra.mxu0 %v11031_v24  ;;  %v8861_v44 = vpop.f32.mrb[9].mxu1  ;;  %v11111_v24 = vpack.c.bf16 %v2460_v14, %v2459_v13  ;;  %v2448_v33 = vld [vmem:[%s18314_s5 + $0x8b8] sm:$0xff]  ;;  %v11115_v39 = vpack.c.bf16 %v2462_v29, %v2461_v27  ;;  %v2438_v14 = vld [vmem:[%s18314_s5 + $0x868] sm:$0xff]  ;;  %v2487_v27 = vld [vmem:[%s18314_s5 + $0x9f0] sm:$0xff] }
 0x18a   : > { %11064 = vmatpush3.bf16.msra.mxu1 %v11063_v25  ;;  %v8862_v47 = vadd.f32 %v8861_v44, %v8860_v40  ;;  %11034 = vmatprep.subr.bf16.mxu0 %v11033_v26  ;;  %v11081_v25 = vpack.c.bf16 %v2446_v19, %v2445_v18  ;;  %v2430_v26 = vld [vmem:[%s18314_s5 + $0x828] sm:$0xff]  ;;  %v11085_v40 = vpack.c.bf16 %v2448_v33, %v2447_v30  ;;  %v2469_v18 = vld [vmem:[%s18314_s5 + $0x960] sm:$0xff] }
 0x18b   : > { %v1676_v7 = vadd.f32 %v8827_v43, %v8444_v38  ;;  %11066 = vmatprep.subr.bf16.mxu1 %v11065_v34  ;;  %v14903_v34 = vld [vmem:[%s14040_s19 + $0x8] sm:$0xff]  ;;  %v2463_v43 = vld [vmem:[%s18314_s5 + $0x930] sm:$0xff]  ;;  %v11117_v44 = vpack.c.bf16 %v2480_v36, %v2479_v35 }
 0x18d   : > { %v14832_v58 = vadd.f32 %v8862_v47, %v1676_v7  ;;  %11036 = vmatpush3.bf16.msra.mxu0 %v11035_v28  ;;  %v2464_v28 = vld [vmem:[%s18314_s5 + $0x938] sm:$0xff]  ;;  %v2449_v47 = vld [vmem:[%s18314_s5 + $0x8c0] sm:$0xff] }
 0x18e   : > { %11068 = vmatpush3.bf16.msra.mxu1 %v11067_v50  ;;  %11038 = vmatprep.subr.bf16.mxu0 %v11037_v51  ;;  %v2450_v50 = vld [vmem:[%s18314_s5 + $0x8c8] sm:$0xff]  ;;  %v2481_v51 = vld [vmem:[%s18314_s5 + $0x9c0] sm:$0xff]  ;;  %v11119_v53 = vpack.c.bf16 %v2464_v28, %v2463_v43 }
 0x18f   : > { %11070 = vmatprep.subr.bf16.mxu1 %v11069_v54  ;;  %v11089_v7 = vpack.c.bf16 %v2450_v50, %v2449_v47  ;;  %v2433_v54 = vld [vmem:[%s18314_s5 + $0x840] sm:$0xff]  ;;  %v11121_v55 = vpack.c.bf16 %v2482_v52, %v2481_v51  ;;  %v2506_v47 = vld [vmem:[%s18314_s5 + $0xa88] sm:$0xff] }
 0x190   : > { %v11091_v62 = vpack.c.bf16 %v2434_v49, %v2433_v54  ;;  %v2505_v28 = vld [vmem:[%s18314_s5 + $0xa80] sm:$0xff]  ;;  %v2538_v51 = vld [vmem:[%s18314_s5 + $0xb88] sm:$0xff] }
 0x191   : > { %11040 = vmatpush3.bf16.msra.mxu0 %v11039_v59  ;;  %v2452_v59 = vld [vmem:[%s18314_s5 + $0x8d8] sm:$0xff]  ;;  %v2537_v50 = vld [vmem:[%s18314_s5 + $0xb80] sm:$0xff]  ;;  %v2490_v49 = vld [vmem:[%s18314_s5 + $0xa08] sm:$0xff] }
 0x192   : > { %11072 = vmatpush3.bf16.msra.mxu1 %v11071_v60  ;;  %11074 = vmatprep.subr.bf16.mxu0 %v11073_v61  ;;  %v2483_v60 = vld [vmem:[%s18314_s5 + $0x9d0] sm:$0xff]  ;;  %v2484_v61 = vld [vmem:[%s18314_s5 + $0x9d8] sm:$0xff]  ;;  %v11093_v63 = vpack.c.bf16 %v2452_v59, %v2451_v57  ;;  %v2489_v54 = vld [vmem:[%s18314_s5 + $0xa00] sm:$0xff] }
 0x193   : > { %11106 = vmatprep.subr.bf16.mxu1 %v11105_v0  ;;  %v2435_v0 = vld [vmem:[%s18314_s5 + $0x850] sm:$0xff]  ;;  %v11125_v2 = vpack.c.bf16 %v2484_v61, %v2483_v60  ;;  %v2508_v59 = vld [vmem:[%s18314_s5 + $0xa98] sm:$0xff] }
 0x194   : > { %3222 = vmatmul.mubr.f32.vlgmr.msra.gmra.mrb[22].mxu0 %v14250_v45  ;;  %v2429_v45 = vld [vmem:[%s18314_s5 + $0x820] sm:$0xff]  ;;  %v11095_v12 = vpack.c.bf16 %v2436_v21, %v2435_v0  ;;  %v2507_v57 = vld [vmem:[%s18314_s5 + $0xa90] sm:$0xff]  ;;  %v2540_v61 = vld [vmem:[%s18314_s5 + $0xb98] sm:$0xff] }
 0x195   : > { %3292 = vmatmul.mubr.f32.vlgmr.msra.gmra.mrb[22].mxu1 %v14253_v46  ;;  %11076 = vmatpush3.bf16.msra.mxu0 %v11075_v6  ;;  %v11113_v46 = vpack.c.bf16 %v2478_v22, %v2477_v20  ;;  %v11083_v38 = vpack.c.bf16 %v2430_v26, %v2429_v45  ;;  %v2454_v6 = vld [vmem:[%s18314_s5 + $0x8e8] sm:$0xff]  ;;  %v2539_v60 = vld [vmem:[%s18314_s5 + $0xb90] sm:$0xff]  ;;  %v2492_v21 = vld [vmem:[%s18314_s5 + $0xa18] sm:$0xff] }
 0x196   : > { %11108 = vmatpush3.bf16.msra.mxu1 %v11107_v8  ;;  %11078 = vmatprep.subr.bf16.mxu0 %v11077_v10  ;;  %v2485_v8 = vld [vmem:[%s18314_s5 + $0x9e0] sm:$0xff]  ;;  %v2486_v10 = vld [vmem:[%s18314_s5 + $0x9e8] sm:$0xff]  ;;  %v11097_v13 = vpack.c.bf16 %v2454_v6, %v2453_v5  ;;  %v2491_v0 = vld [vmem:[%s18314_s5 + $0xa10] sm:$0xff] }
 0x197   : > { %11110 = vmatprep.subr.bf16.mxu1 %v11109_v15  ;;  %3361 = vmatprep.mubr.f32.mxu0 %v14903_v34  ;;  %v2437_v15 = vld [vmem:[%s18314_s5 + $0x860] sm:$0xff]  ;;  %v11129_v20 = vpack.c.bf16 %v2486_v10, %v2485_v8  ;;  %v2470_v22 = vld [vmem:[%s18314_s5 + $0x968] sm:$0xff] }
 0x198   : > { %3431 = vmatprep.mubr.f32.mxu1 %v14913_v37  ;;  %v11099_v33 = vpack.c.bf16 %v2438_v14, %v2437_v15  ;;  %v11131_v36 = vpack.c.bf16 %v2470_v22, %v2469_v18  ;;  %v2509_v5 = vld [vmem:[%s18314_s5 + $0xaa0] sm:$0xff]  ;;  %v2510_v6 = vld [vmem:[%s18314_s5 + $0xaa8] sm:$0xff]  ;;  %v11175_v15 = vpack.c.bf16 %v2524_v3, %v2523_v1 }
 0x199   : > { %11080 = vmatpush3.bf16.msra.mxu0 %v11079_v23  ;;  %v2455_v23 = vld [vmem:[%s18314_s5 + $0x8f0] sm:$0xff]  ;;  %v15084_v8 = vld [vmem:[%s14040_s19] sm:$0xff]  ;;  %v11145_v14 = vpack.c.bf16 %v2510_v6, %v2509_v5  ;;  %v2550_v1 = vld [vmem:[%s18314_s5 + $0xbe8] sm:$0xff] }
 0x19a   : > { %11112 = vmatpush3.bf16.msra.mxu1 %v11111_v24  ;;  %11082 = vmatprep.subr.bf16.mxu0 %v11081_v25  ;;  %v2456_v24 = vld [vmem:[%s18314_s5 + $0x8f8] sm:$0xff]  ;;  %v8445_v25 = vld [vmem:[%s18317_s8 + $0x5] ss:$0 sm:$0xff] }
 0x19b   : > { %11114 = vmatprep.subr.bf16.mxu1 %v11113_v46  ;;  %v2488_v46 = vld [vmem:[%s18314_s5 + $0x9f8] sm:$0xff]  ;;  %v2541_v10 = vld [vmem:[%s18314_s5 + $0xba0] sm:$0xff] }
 0x19c   : > { %v11133_v43 = vpack.c.bf16 %v2488_v46, %v2487_v27  ;;  %v2493_v18 = vld [vmem:[%s18314_s5 + $0xa20] sm:$0xff] }
 0x19d   : > { %11084 = vmatpush3.bf16.msra.mxu0 %v11083_v38  ;;  %v11101_v38 = vpack.c.bf16 %v2456_v24, %v2455_v23  ;;  %v2526_v23 = vld [vmem:[%s18314_s5 + $0xb28] sm:$0xff]  ;;  %v2511_v24 = vld [vmem:[%s18314_s5 + $0xab0] sm:$0xff]  ;;  %v2501_v6 = vld [vmem:[%s18314_s5 + $0xa60] sm:$0xff] }
 0x19e   : > { %11116 = vmatpush3.bf16.msra.mxu1 %v11115_v39  ;;  %11086 = vmatprep.subr.bf16.mxu0 %v11085_v40  ;;  %v2439_v39 = vld [vmem:[%s18314_s5 + $0x870] sm:$0xff]  ;;  %v2440_v40 = vld [vmem:[%s18314_s5 + $0x878] sm:$0xff] }
 0x19f   : > { %11118 = vmatprep.subr.bf16.mxu1 %v11117_v44  ;;  %v2472_v44 = vld [vmem:[%s18314_s5 + $0x978] sm:$0xff] }
 0x1a1   : > { %11088 = vmatpush3.bf16.msra.mxu0 %v11087_v48  ;;  %v11103_v48 = vpack.c.bf16 %v2440_v40, %v2439_v39  ;;  %v2513_v39 = vld [vmem:[%s18314_s5 + $0xac0] sm:$0xff]  ;;  %v2514_v40 = vld [vmem:[%s18314_s5 + $0xac8] sm:$0xff] }
 0x1a2   : > { %11120 = vmatpush3.bf16.msra.mxu1 %v11119_v53  ;;  %11090 = vmatprep.subr.bf16.mxu0 %v11089_v7  ;;  %v11135_v53 = vpack.c.bf16 %v2472_v44, %v2471_v41  ;;  %v11137_v7 = vpack.c.bf16 %v2506_v47, %v2505_v28  ;;  %v2545_v41 = vld [vmem:[%s18314_s5 + $0xbc0] sm:$0xff]  ;;  %v11153_v28 = vpack.c.bf16 %v2514_v40, %v2513_v39  ;;  %v2536_v40 = vld [vmem:[%s18314_s5 + $0xb78] sm:$0xff] }
 0x1a3   : > { %11122 = vmatprep.subr.bf16.mxu1 %v11121_v55  ;;  %v11169_v55 = vpack.c.bf16 %v2538_v51, %v2537_v50  ;;  %v2497_v47 = vld [vmem:[%s18314_s5 + $0xa40] sm:$0xff]  ;;  %v2498_v50 = vld [vmem:[%s18314_s5 + $0xa48] sm:$0xff] }
 0x1a4   : > { %v2529_v51 = vld [vmem:[%s18314_s5 + $0xb40] sm:$0xff] }
 0x1a5   : > { %11092 = vmatpush3.bf16.msra.mxu0 %v11091_v62  ;;  %v11139_v62 = vpack.c.bf16 %v2490_v49, %v2489_v54  ;;  %v2516_v54 = vld [vmem:[%s18314_s5 + $0xad8] sm:$0xff]  ;;  %v2547_v49 = vld [vmem:[%s18314_s5 + $0xbd0] sm:$0xff] }
 0x1a6   : > { %11124 = vmatpush3.bf16.msra.mxu1 %v11123_v17  ;;  %11094 = vmatprep.subr.bf16.mxu0 %v11093_v63  ;;  %v11171_v17 = vpack.c.bf16 %v2522_v56, %v2521_v9  ;;  %v11141_v63 = vpack.c.bf16 %v2508_v59, %v2507_v57  ;;  %v2548_v9 = vld [vmem:[%s18314_s5 + $0xbd8] sm:$0xff]  ;;  %v2499_v59 = vld [vmem:[%s18314_s5 + $0xa50] sm:$0xff] }
 0x1a7   : > { %v8895_v19 = vpop.f32.mrb[10].mxu0  ;;  %11126 = vmatprep.subr.bf16.mxu1 %v11125_v2  ;;  %v11173_v2 = vpack.c.bf16 %v2540_v61, %v2539_v60  ;;  %v2500_v60 = vld [vmem:[%s18314_s5 + $0xa58] sm:$0xff]  ;;  %v2531_v61 = vld [vmem:[%s18314_s5 + $0xb50] sm:$0xff] }
 0x1a8   : > { %v8896_v45 = vpop.f32.mrb[11].mxu0  ;;  %v8930_v26 = vpop.f32.mrb[10].mxu1 }
 0x1a9   : > { %v8897_v29 = vadd.f32 %v8896_v45, %v8895_v19  ;;  %11096 = vmatpush3.bf16.msra.mxu0 %v11095_v12  ;;  %v8931_v30 = vpop.f32.mrb[11].mxu1  ;;  %v2542_v12 = vld [vmem:[%s18314_s5 + $0xba8] sm:$0xff]  ;;  %v2543_v45 = vld [vmem:[%s18314_s5 + $0xbb0] sm:$0xff] }
 0x1aa   : > { %11128 = vmatpush3.bf16.msra.mxu1 %v11127_v11  ;;  %v8932_v35 = vadd.f32 %v8931_v30, %v8930_v26  ;;  %11098 = vmatprep.subr.bf16.mxu0 %v11097_v13  ;;  %v15094_v11 = vld [vmem:[%s14040_s19 + $0x10] sm:$0xff]  ;;  %v11143_v13 = vpack.c.bf16 %v2492_v21, %v2491_v0  ;;  %v2494_v19 = vld [vmem:[%s18314_s5 + $0xa28] sm:$0xff]  ;;  %v11177_v22 = vpack.c.bf16 %v2542_v12, %v2541_v10  ;;  %v2544_v26 = vld [vmem:[%s18314_s5 + $0xbb8] sm:$0xff] }
 0x1ab   : > { %v1816_v42 = vadd.f32 %v8897_v29, %v8445_v25  ;;  %11130 = vmatprep.subr.bf16.mxu1 %v11129_v20  ;;  %v2525_v20 = vld [vmem:[%s18314_s5 + $0xb20] sm:$0xff]  ;;  %v2512_v25 = vld [vmem:[%s18314_s5 + $0xab8] sm:$0xff]  ;;  %v11147_v27 = vpack.c.bf16 %v2494_v19, %v2493_v18  ;;  %v2495_v30 = vld [vmem:[%s18314_s5 + $0xa30] sm:$0xff] }
 0x1ac   : > { %v11179_v46 = vpack.c.bf16 %v2526_v23, %v2525_v20  ;;  %v11149_v29 = vpack.c.bf16 %v2512_v25, %v2511_v24  ;;  %v2518_v0 = vld [vmem:[%s18314_s5 + $0xae8] sm:$0xff]  ;;  %v2549_v21 = vld [vmem:[%s18314_s5 + $0xbe0] sm:$0xff]  ;;  %v2519_v18 = vld [vmem:[%s18314_s5 + $0xaf0] sm:$0xff] }
 0x1ad   : > { %v15039_v52 = vadd.f32 %v8932_v35, %v1816_v42  ;;  %11100 = vmatpush3.bf16.msra.mxu0 %v11099_v33  ;;  %v2496_v33 = vld [vmem:[%s18314_s5 + $0xa38] sm:$0xff]  ;;  %v2527_v35 = vld [vmem:[%s18314_s5 + $0xb30] sm:$0xff]  ;;  %v2546_v42 = vld [vmem:[%s18314_s5 + $0xbc8] sm:$0xff] }
 0x1ae   : > { %11132 = vmatpush3.bf16.msra.mxu1 %v11131_v36  ;;  %11102 = vmatprep.subr.bf16.mxu0 %v11101_v38  ;;  %v11181_v36 = vpack.c.bf16 %v2544_v26, %v2543_v45  ;;  %v2528_v38 = vld [vmem:[%s18314_s5 + $0xb38] sm:$0xff]  ;;  %v2502_v10 = vld [vmem:[%s18314_s5 + $0xa68] sm:$0xff]  ;;  %v2533_v12 = vld [vmem:[%s18314_s5 + $0xb60] sm:$0xff] }
 0x1af   : > { %11134 = vmatprep.subr.bf16.mxu1 %v11133_v43  ;;  %v11151_v43 = vpack.c.bf16 %v2496_v33, %v2495_v30  ;;  %v11183_v44 = vpack.c.bf16 %v2528_v38, %v2527_v35  ;;  %v2520_v19 = vld [vmem:[%s18314_s5 + $0xaf8] sm:$0xff]  ;;  %v8446_v20 = vld [vmem:[%s18317_s8 + $0x6] ss:$0 sm:$0xff]  ;;  %v2551_v24 = vld [vmem:[%s18314_s5 + $0xbf0] sm:$0xff] }
 0x1b0   : > { %v2552_v25 = vld [vmem:[%s18314_s5 + $0xbf8] sm:$0xff]  ;;  %v11165_v30 = vpack.c.bf16 %v2520_v19, %v2519_v18  ;;  %v2503_v33 = vld [vmem:[%s18314_s5 + $0xa70] sm:$0xff]  ;;  %v2590_v19 = vld [vmem:[%s18314_s5 + $0xd28] sm:$0xff] }
 0x1b1   : > { %11104 = vmatpush3.bf16.msra.mxu0 %v11103_v48  ;;  %v11185_v48 = vpack.c.bf16 %v2546_v42, %v2545_v41  ;;  %v2504_v35 = vld [vmem:[%s18314_s5 + $0xa78] sm:$0xff]  ;;  %v11197_v39 = vpack.c.bf16 %v2552_v25, %v2551_v24  ;;  %v2569_v41 = vld [vmem:[%s18314_s5 + $0xc80] sm:$0xff]  ;;  %v2570_v42 = vld [vmem:[%s18314_s5 + $0xc88] sm:$0xff] }
 0x1b2   : > { %11136 = vmatpush3.bf16.msra.mxu1 %v11135_v53  ;;  %11138 = vmatprep.subr.bf16.mxu0 %v11137_v7  ;;  %v2530_v53 = vld [vmem:[%s18314_s5 + $0xb48] sm:$0xff]  ;;  %v2515_v7 = vld [vmem:[%s18314_s5 + $0xad0] sm:$0xff]  ;;  %v2608_v24 = vld [vmem:[%s18314_s5 + $0xdb8] sm:$0xff] }
 0x1b3   : > { %11170 = vmatprep.subr.bf16.mxu1 %v11169_v55  ;;  %v11155_v55 = vpack.c.bf16 %v2498_v50, %v2497_v47  ;;  %v11187_v56 = vpack.c.bf16 %v2530_v53, %v2529_v51  ;;  %v11157_v57 = vpack.c.bf16 %v2516_v54, %v2515_v7  ;;  %v11167_v47 = vpack.c.bf16 %v2504_v35, %v2503_v33  ;;  %v2554_v53 = vld [vmem:[%s18314_s5 + $0xc08] sm:$0xff]  ;;  %v2585_v7 = vld [vmem:[%s18314_s5 + $0xd00] sm:$0xff]  ;;  %v2592_v33 = vld [vmem:[%s18314_s5 + $0xd38] sm:$0xff] }
 0x1b4   : > { %3362 = vmatmul.mubr.f32.vlgmr.msra.gmra.mrb[24].mxu0 %v15084_v8  ;;  %v11201_v51 = vpack.c.bf16 %v2570_v42, %v2569_v41  ;;  %v2577_v35 = vld [vmem:[%s18314_s5 + $0xcc0] sm:$0xff] }
 0x1b5   : > { %3432 = vmatmul.mubr.f32.vlgmr.msra.gmra.mrb[24].mxu1 %v15094_v11  ;;  %11140 = vmatpush3.bf16.msra.mxu0 %v11139_v62  ;;  %v11189_v62 = vpack.c.bf16 %v2548_v9, %v2547_v49  ;;  %v2586_v49 = vld [vmem:[%s18314_s5 + $0xd08] sm:$0xff]  ;;  %v2571_v9 = vld [vmem:[%s18314_s5 + $0xc90] sm:$0xff] }
 0x1b6   : > { %11172 = vmatpush3.bf16.msra.mxu1 %v11171_v17  ;;  %11142 = vmatprep.subr.bf16.mxu0 %v11141_v63  ;;  %v2532_v17 = vld [vmem:[%s18314_s5 + $0xb58] sm:$0xff]  ;;  %v2517_v63 = vld [vmem:[%s18314_s5 + $0xae0] sm:$0xff] }
 0x1b7   : > { %11174 = vmatprep.subr.bf16.mxu1 %v11173_v2  ;;  %3501 = vmatprep.mubr.f32.mxu0 %v14903_v34  ;;  %v11159_v2 = vpack.c.bf16 %v2500_v60, %v2499_v59  ;;  %v11191_v3 = vpack.c.bf16 %v2532_v17, %v2531_v61  ;;  %v11161_v5 = vpack.c.bf16 %v2518_v0, %v2517_v63  ;;  %v2556_v17 = vld [vmem:[%s18314_s5 + $0xc18] sm:$0xff]  ;;  %v2587_v63 = vld [vmem:[%s18314_s5 + $0xd10] sm:$0xff] }
 0x1b8   : > { %3571 = vmatprep.mubr.f32.mxu1 %v14913_v37  ;;  %v11235_v60 = vpack.c.bf16 %v2586_v49, %v2585_v7  ;;  %v2611_v7 = vld [vmem:[%s18314_s5 + $0xdd0] sm:$0xff] }
 0x1b9   : > { %11144 = vmatpush3.bf16.msra.mxu0 %v11143_v13 }
 0x1ba   : > { %11176 = vmatpush3.bf16.msra.mxu1 %v11175_v15  ;;  %11146 = vmatprep.subr.bf16.mxu0 %v11145_v14  ;;  %v11193_v15 = vpack.c.bf16 %v2550_v1, %v2549_v21  ;;  %v2534_v14 = vld [vmem:[%s18314_s5 + $0xb68] sm:$0xff]  ;;  %v2588_v21 = vld [vmem:[%s18314_s5 + $0xd18] sm:$0xff]  ;;  %v2573_v1 = vld [vmem:[%s18314_s5 + $0xca0] sm:$0xff] }
 0x1bb   : > { %11178 = vmatprep.subr.bf16.mxu1 %v11177_v22 }
 0x1bd   : > { %11148 = vmatpush3.bf16.msra.mxu0 %v11147_v27  ;;  %v11163_v27 = vpack.c.bf16 %v2502_v10, %v2501_v6  ;;  %v11239_v10 = vpack.c.bf16 %v2588_v21, %v2587_v63  ;;  %v2613_v63 = vld [vmem:[%s18314_s5 + $0xde0] sm:$0xff] }
 0x1be   : > { %11180 = vmatpush3.bf16.msra.mxu1 %v11179_v46  ;;  %11150 = vmatprep.subr.bf16.mxu0 %v11149_v29  ;;  %v11195_v29 = vpack.c.bf16 %v2534_v14, %v2533_v12  ;;  %v2589_v14 = vld [vmem:[%s18314_s5 + $0xd20] sm:$0xff] }
 0x1bf   : > { %11182 = vmatprep.subr.bf16.mxu1 %v11181_v36  ;;  %v2535_v36 = vld [vmem:[%s18314_s5 + $0xb70] sm:$0xff] }
 0x1c0   : > { %v11199_v50 = vpack.c.bf16 %v2536_v40, %v2535_v36  ;;  %v2578_v36 = vld [vmem:[%s18314_s5 + $0xcc8] sm:$0xff] }
 0x1c1   : > { %11152 = vmatpush3.bf16.msra.mxu0 %v11151_v43  ;;  %v2601_v43 = vld [vmem:[%s18314_s5 + $0xd80] sm:$0xff]  ;;  %v11217_v42 = vpack.c.bf16 %v2578_v36, %v2577_v35 }
 0x1c2   : > { %11184 = vmatpush3.bf16.msra.mxu1 %v11183_v44  ;;  %11154 = vmatprep.subr.bf16.mxu0 %v11153_v28  ;;  %v2602_v44 = vld [vmem:[%s18314_s5 + $0xd88] sm:$0xff] }
 0x1c3   : > { %11186 = vmatprep.subr.bf16.mxu1 %v11185_v48  ;;  %v2553_v48 = vld [vmem:[%s18314_s5 + $0xc00] sm:$0xff]  ;;  %v11233_v54 = vpack.c.bf16 %v2602_v44, %v2601_v43  ;;  %v2562_v44 = vld [vmem:[%s18314_s5 + $0xc48] sm:$0xff] }
 0x1c4   : > { %v11203_v59 = vpack.c.bf16 %v2554_v53, %v2553_v48  ;;  %v2561_v43 = vld [vmem:[%s18314_s5 + $0xc40] sm:$0xff]  ;;  %v2579_v48 = vld [vmem:[%s18314_s5 + $0xcd0] sm:$0xff]  ;;  %v2580_v53 = vld [vmem:[%s18314_s5 + $0xcd8] sm:$0xff] }
 0x1c5   : > { %11156 = vmatpush3.bf16.msra.mxu0 %v11155_v55  ;;  %v2572_v55 = vld [vmem:[%s18314_s5 + $0xc98] sm:$0xff]  ;;  %v11219_v49 = vpack.c.bf16 %v2562_v44, %v2561_v43 }
 0x1c6   : > { %11188 = vmatpush3.bf16.msra.mxu1 %v11187_v56  ;;  %11158 = vmatprep.subr.bf16.mxu0 %v11157_v57  ;;  %v2603_v56 = vld [vmem:[%s18314_s5 + $0xd90] sm:$0xff]  ;;  %v2604_v57 = vld [vmem:[%s18314_s5 + $0xd98] sm:$0xff]  ;;  %v11205_v61 = vpack.c.bf16 %v2572_v55, %v2571_v9  ;;  %v11221_v55 = vpack.c.bf16 %v2580_v53, %v2579_v48  ;;  %v2618_v48 = vld [vmem:[%s18314_s5 + $0xe08] sm:$0xff] }
 0x1c7   : > { %v8965_v13 = vpop.f32.mrb[12].mxu0  ;;  %11190 = vmatprep.subr.bf16.mxu1 %v11189_v62  ;;  %v2555_v62 = vld [vmem:[%s18314_s5 + $0xc10] sm:$0xff]  ;;  %v11237_v0 = vpack.c.bf16 %v2604_v57, %v2603_v56  ;;  %v2564_v57 = vld [vmem:[%s18314_s5 + $0xc58] sm:$0xff]  ;;  %v2649_v53 = vld [vmem:[%s18314_s5 + $0xf00] sm:$0xff] }
 0x1c8   : > { %v8966_v22 = vpop.f32.mrb[13].mxu0  ;;  %v9000_v23 = vpop.f32.mrb[12].mxu1  ;;  %v11207_v6 = vpack.c.bf16 %v2556_v17, %v2555_v62  ;;  %v2563_v56 = vld [vmem:[%s18314_s5 + $0xc50] sm:$0xff]  ;;  %v2581_v62 = vld [vmem:[%s18314_s5 + $0xce0] sm:$0xff]  ;;  %v2582_v17 = vld [vmem:[%s18314_s5 + $0xce8] sm:$0xff] }
 0x1c9   : > { %v8967_v45 = vadd.f32 %v8966_v22, %v8965_v13  ;;  %11160 = vmatpush3.bf16.msra.mxu0 %v11159_v2  ;;  %v9001_v26 = vpop.f32.mrb[13].mxu1  ;;  %v2574_v2 = vld [vmem:[%s18314_s5 + $0xca8] sm:$0xff]  ;;  %v2557_v13 = vld [vmem:[%s18314_s5 + $0xc20] sm:$0xff]  ;;  %v2576_v22 = vld [vmem:[%s18314_s5 + $0xcb8] sm:$0xff]  ;;  %v11223_v21 = vpack.c.bf16 %v2564_v57, %v2563_v56 }
 0x1ca   : > { %11192 = vmatpush3.bf16.msra.mxu1 %v11191_v3  ;;  %v9002_v46 = vadd.f32 %v9001_v26, %v9000_v23  ;;  %11162 = vmatprep.subr.bf16.mxu0 %v11161_v5  ;;  %v2605_v3 = vld [vmem:[%s18314_s5 + $0xda0] sm:$0xff]  ;;  %v2606_v5 = vld [vmem:[%s18314_s5 + $0xda8] sm:$0xff]  ;;  %v11209_v12 = vpack.c.bf16 %v2574_v2, %v2573_v1  ;;  %v2607_v23 = vld [vmem:[%s18314_s5 + $0xdb0] sm:$0xff]  ;;  %v11225_v2 = vpack.c.bf16 %v2582_v17, %v2581_v62 }
 0x1cb   : > { %v1956_v38 = vadd.f32 %v8967_v45, %v8446_v20  ;;  %11194 = vmatprep.subr.bf16.mxu1 %v11193_v15  ;;  %v2558_v15 = vld [vmem:[%s18314_s5 + $0xc28] sm:$0xff]  ;;  %v11241_v18 = vpack.c.bf16 %v2606_v5, %v2605_v3  ;;  %v2575_v20 = vld [vmem:[%s18314_s5 + $0xcb0] sm:$0xff]  ;;  %v11243_v45 = vpack.c.bf16 %v2590_v19, %v2589_v14  ;;  %v2565_v3 = vld [vmem:[%s18314_s5 + $0xc60] sm:$0xff] }
 0x1cc   : > { %v11211_v25 = vpack.c.bf16 %v2558_v15, %v2557_v13  ;;  %v11213_v26 = vpack.c.bf16 %v2576_v22, %v2575_v20  ;;  %v2566_v5 = vld [vmem:[%s18314_s5 + $0xc68] sm:$0xff]  ;;  %v2583_v15 = vld [vmem:[%s18314_s5 + $0xcf0] sm:$0xff]  ;;  %v2584_v14 = vld [vmem:[%s18314_s5 + $0xcf8] sm:$0xff] }
 0x1cd   : > { %v15246_v28 = vadd.f32 %v9002_v46, %v1956_v38  ;;  %11164 = vmatpush3.bf16.msra.mxu0 %v11163_v27  ;;  %v2559_v27 = vld [vmem:[%s18314_s5 + $0xc30] sm:$0xff]  ;;  %v2560_v46 = vld [vmem:[%s18314_s5 + $0xc38] sm:$0xff]  ;;  %v2609_v38 = vld [vmem:[%s18314_s5 + $0xdc0] sm:$0xff] }
 0x1ce   : > { %11196 = vmatpush3.bf16.msra.mxu1 %v11195_v29  ;;  %11166 = vmatprep.subr.bf16.mxu0 %v11165_v30  ;;  %v2591_v29 = vld [vmem:[%s18314_s5 + $0xd30] sm:$0xff]  ;;  %v11245_v30 = vpack.c.bf16 %v2608_v24, %v2607_v23  ;;  %v11215_v40 = vpack.c.bf16 %v2560_v46, %v2559_v27  ;;  %v2598_v13 = vld [vmem:[%s18314_s5 + $0xd68] sm:$0xff]  ;;  %v2616_v23 = vld [vmem:[%s18314_s5 + $0xdf8] sm:$0xff]  ;;  %v11229_v46 = vpack.c.bf16 %v2584_v14, %v2583_v15 }
 0x1cf   : > { %11198 = vmatprep.subr.bf16.mxu1 %v11197_v39  ;;  %v2610_v39 = vld [vmem:[%s18314_s5 + $0xdc8] sm:$0xff]  ;;  %v11247_v41 = vpack.c.bf16 %v2592_v33, %v2591_v29  ;;  %v2615_v22 = vld [vmem:[%s18314_s5 + $0xdf0] sm:$0xff]  ;;  %v2668_v56 = vld [vmem:[%s18314_s5 + $0xf98] sm:$0xff] }
 0x1d0   : > { %v2567_v29 = vld [vmem:[%s18314_s5 + $0xc70] sm:$0xff]  ;;  %v11261_v36 = vpack.c.bf16 %v2616_v23, %v2615_v22  ;;  %v2620_v62 = vld [vmem:[%s18314_s5 + $0xe18] sm:$0xff]  ;;  %v2653_v15 = vld [vmem:[%s18314_s5 + $0xf20] sm:$0xff] }
 0x1d1   : > { %11168 = vmatpush3.bf16.msra.mxu0 %v11167_v47  ;;  %v2593_v47 = vld [vmem:[%s18314_s5 + $0xd40] sm:$0xff]  ;;  %v2599_v33 = vld [vmem:[%s18314_s5 + $0xd70] sm:$0xff]  ;;  %v2672_v23 = vld [vmem:[%s18314_s5 + $0xfb8] sm:$0xff] }
 0x1d2   : > { %11200 = vmatpush3.bf16.msra.mxu1 %v11199_v50  ;;  %11202 = vmatprep.subr.bf16.mxu0 %v11201_v51  ;;  %v11249_v50 = vpack.c.bf16 %v2610_v39, %v2609_v38  ;;  %v2594_v51 = vld [vmem:[%s18314_s5 + $0xd48] sm:$0xff]  ;;  %v2600_v38 = vld [vmem:[%s18314_s5 + $0xd78] sm:$0xff]  ;;  %v2633_v39 = vld [vmem:[%s18314_s5 + $0xe80] sm:$0xff] }
 0x1d3   : > { %11234 = vmatprep.subr.bf16.mxu1 %v11233_v54  ;;  %v2612_v54 = vld [vmem:[%s18314_s5 + $0xdd8] sm:$0xff]  ;;  %v11251_v9 = vpack.c.bf16 %v2594_v51, %v2593_v47  ;;  %v11263_v47 = vpack.c.bf16 %v2600_v38, %v2599_v33  ;;  %v2617_v51 = vld [vmem:[%s18314_s5 + $0xe00] sm:$0xff]  ;;  %v2651_v17 = vld [vmem:[%s18314_s5 + $0xf10] sm:$0xff] }
 0x1d4   : > { %3502 = vmatmul.mubr.f32.vlgmr.msra.gmra.mrb[26].mxu0 %v15084_v8  ;;  %v11267_v57 = vpack.c.bf16 %v2618_v48, %v2617_v51  ;;  %v2671_v22 = vld [vmem:[%s18314_s5 + $0xfb0] sm:$0xff]  ;;  %v2673_v33 = vld [vmem:[%s18314_s5 + $0xfc0] sm:$0xff]  ;;  %v2644_v51 = vld [vmem:[%s18314_s5 + $0xed8] sm:$0xff] }
 0x1d5   : > { %3572 = vmatmul.mubr.f32.vlgmr.msra.gmra.mrb[26].mxu1 %v15094_v11  ;;  %11204 = vmatpush3.bf16.msra.mxu0 %v11203_v59  ;;  %v2595_v59 = vld [vmem:[%s18314_s5 + $0xd50] sm:$0xff] }
 0x1d6   : > { %11236 = vmatpush3.bf16.msra.mxu1 %v11235_v60  ;;  %11206 = vmatprep.subr.bf16.mxu0 %v11205_v61  ;;  %v11253_v60 = vpack.c.bf16 %v2612_v54, %v2611_v7  ;;  %v2596_v61 = vld [vmem:[%s18314_s5 + $0xd58] sm:$0xff]  ;;  %v2650_v54 = vld [vmem:[%s18314_s5 + $0xf08] sm:$0xff]  ;;  %v2675_v48 = vld [vmem:[%s18314_s5 + $0xfd0] sm:$0xff] }
 0x1d7   : > { %11238 = vmatprep.subr.bf16.mxu1 %v11237_v0  ;;  %3641 = vmatprep.mubr.f32.mxu0 %v14903_v34  ;;  %v2614_v0 = vld [vmem:[%s18314_s5 + $0xde8] sm:$0xff]  ;;  %v11255_v1 = vpack.c.bf16 %v2596_v61, %v2595_v59  ;;  %v11299_v59 = vpack.c.bf16 %v2650_v54, %v2649_v53  ;;  %v2619_v61 = vld [vmem:[%s18314_s5 + $0xe10] sm:$0xff]  ;;  %v2676_v53 = vld [vmem:[%s18314_s5 + $0xfd8] sm:$0xff] }
 0x1d8   : > { %3711 = vmatprep.mubr.f32.mxu1 %v14913_v37 }
 0x1d9   : > { %11208 = vmatpush3.bf16.msra.mxu0 %v11207_v6  ;;  %v2597_v6 = vld [vmem:[%s18314_s5 + $0xd60] sm:$0xff] }
 0x1da   : > { %11240 = vmatpush3.bf16.msra.mxu1 %v11239_v10  ;;  %11210 = vmatprep.subr.bf16.mxu0 %v11209_v12  ;;  %v11257_v12 = vpack.c.bf16 %v2614_v0, %v2613_v63  ;;  %v11259_v27 = vpack.c.bf16 %v2598_v13, %v2597_v6  ;;  %v2652_v0 = vld [vmem:[%s18314_s5 + $0xf18] sm:$0xff]  ;;  %v2622_v13 = vld [vmem:[%s18314_s5 + $0xe28] sm:$0xff] }
 0x1db   : > { %11242 = vmatprep.subr.bf16.mxu1 %v11241_v18  ;;  %v8447_v18 = vld [vmem:[%s18317_s8 + $0x7] ss:$0 sm:$0xff]  ;;  %v11303_v6 = vpack.c.bf16 %v2652_v0, %v2651_v17  ;;  %v2678_v17 = vld [vmem:[%s18314_s5 + $0xfe8] sm:$0xff] }
 0x1dd   : > { %11212 = vmatpush3.bf16.msra.mxu0 %v11211_v25 }
 0x1de   : > { %11244 = vmatpush3.bf16.msra.mxu1 %v11243_v45  ;;  %11214 = vmatprep.subr.bf16.mxu0 %v11213_v26  ;;  %v11227_v45 = vpack.c.bf16 %v2566_v5, %v2565_v3  ;;  %v2670_v3 = vld [vmem:[%s18314_s5 + $0xfa8] sm:$0xff]  ;;  %v11271_v5 = vpack.c.bf16 %v2620_v62, %v2619_v61  ;;  %v2677_v62 = vld [vmem:[%s18314_s5 + $0xfe0] sm:$0xff] }
 0x1df   : > { %11246 = vmatprep.subr.bf16.mxu1 %v11245_v30  ;;  %v2568_v30 = vld [vmem:[%s18314_s5 + $0xc78] sm:$0xff]  ;;  %v2646_v61 = vld [vmem:[%s18314_s5 + $0xee8] sm:$0xff] }
 0x1e0   : > { %v11231_v44 = vpack.c.bf16 %v2568_v30, %v2567_v29  ;;  %v2641_v29 = vld [vmem:[%s18314_s5 + $0xec0] sm:$0xff]  ;;  %v2642_v30 = vld [vmem:[%s18314_s5 + $0xec8] sm:$0xff] }
 0x1e1   : > { %11216 = vmatpush3.bf16.msra.mxu0 %v11215_v40  ;;  %v2634_v40 = vld [vmem:[%s18314_s5 + $0xe88] sm:$0xff] }
 0x1e2   : > { %11248 = vmatpush3.bf16.msra.mxu1 %v11247_v41  ;;  %11218 = vmatprep.subr.bf16.mxu0 %v11217_v42  ;;  %v2665_v41 = vld [vmem:[%s18314_s5 + $0xf80] sm:$0xff]  ;;  %v2666_v42 = vld [vmem:[%s18314_s5 + $0xf88] sm:$0xff] }
 0x1e3   : > { %11250 = vmatprep.subr.bf16.mxu1 %v11249_v50  ;;  %v11265_v50 = vpack.c.bf16 %v2634_v40, %v2633_v39  ;;  %v11297_v7 = vpack.c.bf16 %v2666_v42, %v2665_v41  ;;  %v11281_v39 = vpack.c.bf16 %v2642_v30, %v2641_v29  ;;  %v2625_v40 = vld [vmem:[%s18314_s5 + $0xe40] sm:$0xff]  ;;  %v2626_v41 = vld [vmem:[%s18314_s5 + $0xe48] sm:$0xff]  ;;  %v2664_v30 = vld [vmem:[%s18314_s5 + $0xf78] sm:$0xff] }
 0x1e4   : > { %v2657_v42 = vld [vmem:[%s18314_s5 + $0xf40] sm:$0xff] }
 0x1e5   : > { %11220 = vmatpush3.bf16.msra.mxu0 %v11219_v49  ;;  %v2635_v49 = vld [vmem:[%s18314_s5 + $0xe90] sm:$0xff] }
 0x1e6   : > { %11252 = vmatpush3.bf16.msra.mxu1 %v11251_v9  ;;  %11222 = vmatprep.subr.bf16.mxu0 %v11221_v55  ;;  %v2636_v9 = vld [vmem:[%s18314_s5 + $0xe98] sm:$0xff]  ;;  %v2667_v55 = vld [vmem:[%s18314_s5 + $0xf90] sm:$0xff] }
 0x1e7   : > { %v9035_v10 = vpop.f32.mrb[14].mxu0  ;;  %11254 = vmatprep.subr.bf16.mxu1 %v11253_v60  ;;  %v11269_v60 = vpack.c.bf16 %v2636_v9, %v2635_v49  ;;  %v11301_v63 = vpack.c.bf16 %v2668_v56, %v2667_v55  ;;  %v2627_v9 = vld [vmem:[%s18314_s5 + $0xe50] sm:$0xff]  ;;  %v2628_v55 = vld [vmem:[%s18314_s5 + $0xe58] sm:$0xff] }
 0x1e8   : > { %v9036_v19 = vpop.f32.mrb[15].mxu0  ;;  %v9070_v20 = vpop.f32.mrb[14].mxu1  ;;  %v2659_v56 = vld [vmem:[%s18314_s5 + $0xf50] sm:$0xff] }
 0x1e9   : > { %v9037_v24 = vadd.f32 %v9036_v19, %v9035_v10  ;;  %11224 = vmatpush3.bf16.msra.mxu0 %v11223_v21  ;;  %v9071_v25 = vpop.f32.mrb[15].mxu1  ;;  %v2637_v21 = vld [vmem:[%s18314_s5 + $0xea0] sm:$0xff]  ;;  %v2639_v19 = vld [vmem:[%s18314_s5 + $0xeb0] sm:$0xff] }
 0x1ea   : > { %11256 = vmatpush3.bf16.msra.mxu1 %v11255_v1  ;;  %v9072_v26 = vadd.f32 %v9071_v25, %v9070_v20  ;;  %11226 = vmatprep.subr.bf16.mxu0 %v11225_v2  ;;  %v2638_v1 = vld [vmem:[%s18314_s5 + $0xea8] sm:$0xff]  ;;  %v2669_v2 = vld [vmem:[%s18314_s5 + $0xfa0] sm:$0xff]  ;;  %v2640_v20 = vld [vmem:[%s18314_s5 + $0xeb8] sm:$0xff] }
 0x1eb   : > { %v2096_v35 = vadd.f32 %v9037_v24, %v8447_v18  ;;  %11258 = vmatprep.subr.bf16.mxu1 %v11257_v12  ;;  %v11273_v10 = vpack.c.bf16 %v2638_v1, %v2637_v21  ;;  %v2621_v12 = vld [vmem:[%s18314_s5 + $0xe20] sm:$0xff]  ;;  %v11305_v14 = vpack.c.bf16 %v2670_v3, %v2669_v2  ;;  %v2654_v18 = vld [vmem:[%s18314_s5 + $0xf28] sm:$0xff] }
 0x1ec   : > { %v11275_v24 = vpack.c.bf16 %v2622_v13, %v2621_v12  ;;  %v11307_v25 = vpack.c.bf16 %v2654_v18, %v2653_v15  ;;  %v2629_v1 = vld [vmem:[%s18314_s5 + $0xe60] sm:$0xff]  ;;  %v2630_v2 = vld [vmem:[%s18314_s5 + $0xe68] sm:$0xff]  ;;  %v2647_v12 = vld [vmem:[%s18314_s5 + $0xef0] sm:$0xff] }
 0x1ed   : > { %v15447_v43 = vadd.f32 %v9072_v26, %v2096_v35  ;;  %11228 = vmatpush3.bf16.msra.mxu0 %v11227_v45  ;;  %v11277_v45 = vpack.c.bf16 %v2640_v20, %v2639_v19  ;;  %v2624_v26 = vld [vmem:[%s18314_s5 + $0xe38] sm:$0xff]  ;;  %v2674_v35 = vld [vmem:[%s18314_s5 + $0xfc8] sm:$0xff]  ;;  %v2661_v3 = vld [vmem:[%s18314_s5 + $0xf60] sm:$0xff] }
 0x1ee   : > { %11260 = vmatpush3.bf16.msra.mxu1 %v11259_v27  ;;  %11230 = vmatprep.subr.bf16.mxu0 %v11229_v46  ;;  %v2655_v27 = vld [vmem:[%s18314_s5 + $0xf30] sm:$0xff]  ;;  %v2656_v46 = vld [vmem:[%s18314_s5 + $0xf38] sm:$0xff]  ;;  %v8448_v15 = vld [vmem:[%s18318_s9] ss:$0 sm:$0xff] }
 0x1ef   : > { %11262 = vmatprep.subr.bf16.mxu1 %v11261_v36  ;;  %v11311_v38 = vpack.c.bf16 %v2656_v46, %v2655_v27  ;;  %v2648_v13 = vld [vmem:[%s18314_s5 + $0xef8] sm:$0xff]  ;;  %v2679_v19 = vld [vmem:[%s18314_s5 + $0xff0] sm:$0xff] }
 0x1f0   : > { %v2680_v20 = vld [vmem:[%s18314_s5 + $0xff8] sm:$0xff] }
 0x1f1   : > { %11232 = vmatpush3.bf16.msra.mxu0 %v11231_v44  ;;  %v11313_v44 = vpack.c.bf16 %v2674_v35, %v2673_v33  ;;  %v2632_v27 = vld [vmem:[%s18314_s5 + $0xe78] sm:$0xff]  ;;  %v11325_v29 = vpack.c.bf16 %v2680_v20, %v2679_v19  ;;  %v3873_v33 = vld [vmem:[%s18315_s6 + $0x80] sm:$0xff]  ;;  %v3874_v35 = vld [vmem:[%s18315_s6 + $0x88] sm:$0xff] }
 0x1f2   : > { %11264 = vmatpush3.bf16.msra.mxu1 %v11263_v47  ;;  %11266 = vmatprep.subr.bf16.mxu0 %v11265_v50  ;;  %v2658_v47 = vld [vmem:[%s18314_s5 + $0xf48] sm:$0xff]  ;;  %v2643_v50 = vld [vmem:[%s18314_s5 + $0xed0] sm:$0xff]  ;;  %v3912_v19 = vld [vmem:[%s18315_s6 + $0x1b8] sm:$0xff] }
 0x1f3   : > { %11298 = vmatprep.subr.bf16.mxu1 %v11297_v7  ;;  %v11283_v7 = vpack.c.bf16 %v2626_v41, %v2625_v40  ;;  %v11315_v54 = vpack.c.bf16 %v2658_v47, %v2657_v42  ;;  %v11285_v49 = vpack.c.bf16 %v2644_v51, %v2643_v50  ;;  %v11329_v42 = vpack.c.bf16 %v3874_v35, %v3873_v33  ;;  %v3858_v47 = vld [vmem:[%s18315_s6 + $0x8] sm:$0xff]  ;;  %v3889_v50 = vld [vmem:[%s18315_s6 + $0x100] sm:$0xff] }
 0x1f4   : > { %3642 = vmatmul.mubr.f32.vlgmr.msra.gmra.mrb[28].mxu0 %v15084_v8 }
 0x1f5   : > { %3712 = vmatmul.mubr.f32.vlgmr.msra.gmra.mrb[28].mxu1 %v15094_v11  ;;  %11268 = vmatpush3.bf16.msra.mxu0 %v11267_v57  ;;  %v11317_v57 = vpack.c.bf16 %v2676_v53, %v2675_v48  ;;  %v3890_v48 = vld [vmem:[%s18315_s6 + $0x108] sm:$0xff]  ;;  %v3875_v53 = vld [vmem:[%s18315_s6 + $0x90] sm:$0xff] }
 0x1f6   : > { %11300 = vmatpush3.bf16.msra.mxu1 %v11299_v59  ;;  %11270 = vmatprep.subr.bf16.mxu0 %v11269_v60  ;;  %v2660_v59 = vld [vmem:[%s18314_s5 + $0xf58] sm:$0xff]  ;;  %v2645_v60 = vld [vmem:[%s18314_s5 + $0xee0] sm:$0xff] }
 0x1f7   : > { %11302 = vmatprep.subr.bf16.mxu1 %v11301_v63  ;;  %3781 = vmatprep.mubr.f32.mxu0 %v14903_v34  ;;  %v2623_v34 = vld [vmem:[%s18314_s5 + $0xe30] sm:$0xff]  ;;  %v11287_v63 = vpack.c.bf16 %v2628_v55, %v2627_v9  ;;  %v11319_v0 = vpack.c.bf16 %v2660_v59, %v2659_v56  ;;  %v11289_v21 = vpack.c.bf16 %v2646_v61, %v2645_v60  ;;  %v3860_v59 = vld [vmem:[%s18315_s6 + $0x18] sm:$0xff] }
 0x1f8   : > { %3851 = vmatprep.mubr.f32.mxu1 %v14913_v37  ;;  %v11309_v37 = vpack.c.bf16 %v2672_v23, %v2671_v22  ;;  %v11279_v36 = vpack.c.bf16 %v2624_v26, %v2623_v34  ;;  %v11293_v34 = vpack.c.bf16 %v2648_v13, %v2647_v12  ;;  %v2631_v26 = vld [vmem:[%s18314_s5 + $0xe70] sm:$0xff]  ;;  %v11363_v55 = vpack.c.bf16 %v3890_v48, %v3889_v50  ;;  %v3894_v13 = vld [vmem:[%s18315_s6 + $0x128] sm:$0xff] }
 0x1f9   : > { %11272 = vmatpush3.bf16.msra.mxu0 %v11271_v5  ;;  %v11295_v40 = vpack.c.bf16 %v2632_v27, %v2631_v26  ;;  %v3891_v60 = vld [vmem:[%s18315_s6 + $0x110] sm:$0xff]  ;;  %v3896_v26 = vld [vmem:[%s18315_s6 + $0x138] sm:$0xff]  ;;  %v3881_v27 = vld [vmem:[%s18315_s6 + $0xc0] sm:$0xff] }
 0x1fa   : > { %11304 = vmatpush3.bf16.msra.mxu1 %v11303_v6  ;;  %11274 = vmatprep.subr.bf16.mxu0 %v11273_v10  ;;  %v11321_v6 = vpack.c.bf16 %v2678_v17, %v2677_v62  ;;  %v2662_v10 = vld [vmem:[%s18314_s5 + $0xf68] sm:$0xff]  ;;  %v3892_v62 = vld [vmem:[%s18315_s6 + $0x118] sm:$0xff]  ;;  %v3877_v17 = vld [vmem:[%s18315_s6 + $0xa0] sm:$0xff] }
 0x1fb   : > { %11306 = vmatprep.subr.bf16.mxu1 %v11305_v14  ;;  %v3915_v50 = vld [vmem:[%s18315_s6 + $0x1d0] sm:$0xff] }
 0x1fd   : > { %11276 = vmatpush3.bf16.msra.mxu0 %v11275_v24  ;;  %v11291_v24 = vpack.c.bf16 %v2630_v2, %v2629_v1  ;;  %v15706_v1 = vld [vmem:[%s15678_s17 + $0x8] sm:$0xff] }
 0x1fe   : > { %11308 = vmatpush3.bf16.msra.mxu1 %v11307_v25  ;;  %11278 = vmatprep.subr.bf16.mxu0 %v11277_v45  ;;  %v11323_v45 = vpack.c.bf16 %v2662_v10, %v2661_v3  ;;  %v15710_v3 = vld [vmem:[%s15678_s17 + $0x18] sm:$0xff]  ;;  %v3862_v10 = vld [vmem:[%s18315_s6 + $0x28] sm:$0xff] }
 0x1ff   : > { %11310 = vmatprep.subr.bf16.mxu1 %v11309_v37  ;;  %v2663_v37 = vld [vmem:[%s18314_s5 + $0xf70] sm:$0xff] }
 0x200   : > { %v11327_v41 = vpack.c.bf16 %v2664_v30, %v2663_v37  ;;  %v3882_v37 = vld [vmem:[%s18315_s6 + $0xc8] sm:$0xff] }
 0x201   : > { %11280 = vmatpush3.bf16.msra.mxu0 %v11279_v36  ;;  %v3905_v36 = vld [vmem:[%s18315_s6 + $0x180] sm:$0xff]  ;;  %v11345_v35 = vpack.c.bf16 %v3882_v37, %v3881_v27 }
 0x202   : > { %11312 = vmatpush3.bf16.msra.mxu1 %v11311_v38  ;;  %11282 = vmatprep.subr.bf16.mxu0 %v11281_v39  ;;  %v3906_v38 = vld [vmem:[%s18315_s6 + $0x188] sm:$0xff] }
 0x203   : > { %11314 = vmatprep.subr.bf16.mxu1 %v11313_v44  ;;  %v3857_v44 = vld [vmem:[%s18315_s6] sm:$0xff]  ;;  %v11361_v51 = vpack.c.bf16 %v3906_v38, %v3905_v36  ;;  %v3866_v38 = vld [vmem:[%s18315_s6 + $0x48] sm:$0xff] }
 0x204   : > { %v11331_v9 = vpack.c.bf16 %v3858_v47, %v3857_v44  ;;  %v3865_v36 = vld [vmem:[%s18315_s6 + $0x40] sm:$0xff]  ;;  %v3883_v44 = vld [vmem:[%s18315_s6 + $0xd0] sm:$0xff]  ;;  %v3884_v47 = vld [vmem:[%s18315_s6 + $0xd8] sm:$0xff] }
 0x205   : > { %11284 = vmatpush3.bf16.msra.mxu0 %v11283_v7  ;;  %v3876_v7 = vld [vmem:[%s18315_s6 + $0x98] sm:$0xff]  ;;  %v11347_v48 = vpack.c.bf16 %v3866_v38, %v3865_v36 }
 0x206   : > { %11316 = vmatpush3.bf16.msra.mxu1 %v11315_v54  ;;  %11286 = vmatprep.subr.bf16.mxu0 %v11285_v49  ;;  %v3907_v54 = vld [vmem:[%s18315_s6 + $0x190] sm:$0xff]  ;;  %v3908_v49 = vld [vmem:[%s18315_s6 + $0x198] sm:$0xff]  ;;  %v11333_v56 = vpack.c.bf16 %v3876_v7, %v3875_v53  ;;  %v11349_v7 = vpack.c.bf16 %v3884_v47, %v3883_v44  ;;  %v3922_v44 = vld [vmem:[%s18315_s6 + $0x208] sm:$0xff] }
 0x207   : > { %v9105_v5 = vpop.f32.mrb[16].mxu0  ;;  %11318 = vmatprep.subr.bf16.mxu1 %v11317_v57  ;;  %v3859_v57 = vld [vmem:[%s18315_s6 + $0x10] sm:$0xff]  ;;  %v11365_v61 = vpack.c.bf16 %v3908_v49, %v3907_v54  ;;  %v3868_v49 = vld [vmem:[%s18315_s6 + $0x58] sm:$0xff]  ;;  %v3953_v47 = vld [vmem:[%s18315_s6 + $0x300] sm:$0xff] }
 0x208   : > { %v9106_v14 = vpop.f32.mrb[17].mxu0  ;;  %v9140_v18 = vpop.f32.mrb[16].mxu1  ;;  %v11335_v2 = vpack.c.bf16 %v3860_v59, %v3859_v57  ;;  %v3867_v54 = vld [vmem:[%s18315_s6 + $0x50] sm:$0xff]  ;;  %v3885_v57 = vld [vmem:[%s18315_s6 + $0xe0] sm:$0xff]  ;;  %v3886_v59 = vld [vmem:[%s18315_s6 + $0xe8] sm:$0xff] }
 0x209   : > { %v9107_v22 = vadd.f32 %v9106_v14, %v9105_v5  ;;  %11288 = vmatpush3.bf16.msra.mxu0 %v11287_v63  ;;  %v9141_v23 = vpop.f32.mrb[17].mxu1  ;;  %v3878_v63 = vld [vmem:[%s18315_s6 + $0xa8] sm:$0xff]  ;;  %v11367_v5 = vpack.c.bf16 %v3892_v62, %v3891_v60  ;;  %v3880_v14 = vld [vmem:[%s18315_s6 + $0xb8] sm:$0xff]  ;;  %v3917_v60 = vld [vmem:[%s18315_s6 + $0x1e0] sm:$0xff]  ;;  %v11351_v62 = vpack.c.bf16 %v3868_v49, %v3867_v54 }
 0x20a   : > { %11320 = vmatpush3.bf16.msra.mxu1 %v11319_v0  ;;  %v9142_v25 = vadd.f32 %v9141_v23, %v9140_v18  ;;  %11290 = vmatprep.subr.bf16.mxu0 %v11289_v21  ;;  %v3909_v0 = vld [vmem:[%s18315_s6 + $0x1a0] sm:$0xff]  ;;  %v3910_v21 = vld [vmem:[%s18315_s6 + $0x1a8] sm:$0xff]  ;;  %v3911_v18 = vld [vmem:[%s18315_s6 + $0x1b0] sm:$0xff] }
 0x20b   : > { %v2804_v46 = vadd.f32 %v9107_v22, %v8448_v15  ;;  %11322 = vmatprep.subr.bf16.mxu1 %v11321_v6  ;;  %v3861_v6 = vld [vmem:[%s18315_s6 + $0x20] sm:$0xff]  ;;  %v11369_v12 = vpack.c.bf16 %v3910_v21, %v3909_v0  ;;  %v3879_v15 = vld [vmem:[%s18315_s6 + $0xb0] sm:$0xff]  ;;  %v3870_v21 = vld [vmem:[%s18315_s6 + $0x68] sm:$0xff] }
 0x20c   : > { %v11339_v20 = vpack.c.bf16 %v3862_v10, %v3861_v6  ;;  %v11341_v23 = vpack.c.bf16 %v3880_v14, %v3879_v15  ;;  %v3869_v0 = vld [vmem:[%s18315_s6 + $0x60] sm:$0xff]  ;;  %v3902_v6 = vld [vmem:[%s18315_s6 + $0x168] sm:$0xff]  ;;  %v3887_v10 = vld [vmem:[%s18315_s6 + $0xf0] sm:$0xff] }
 0x20d   : > { %v15648_v39 = vadd.f32 %v9142_v25, %v2804_v46  ;;  %11292 = vmatpush3.bf16.msra.mxu0 %v11291_v24  ;;  %v3863_v24 = vld [vmem:[%s18315_s6 + $0x30] sm:$0xff]  ;;  %v3864_v25 = vld [vmem:[%s18315_s6 + $0x38] sm:$0xff]  ;;  %v3913_v46 = vld [vmem:[%s18315_s6 + $0x1c0] sm:$0xff] }
 0x20e   : > { %11324 = vmatpush3.bf16.msra.mxu1 %v11323_v45  ;;  %11294 = vmatprep.subr.bf16.mxu0 %v11293_v34  ;;  %v3895_v45 = vld [vmem:[%s18315_s6 + $0x130] sm:$0xff]  ;;  %v11373_v34 = vpack.c.bf16 %v3912_v19, %v3911_v18  ;;  %v11343_v30 = vpack.c.bf16 %v3864_v25, %v3863_v24  ;;  %v3920_v18 = vld [vmem:[%s18315_s6 + $0x1f8] sm:$0xff]  ;;  %v15888_v49 = vld [vmem:[%s15678_s17] sm:$0xff] }
 0x20f   : > { %11326 = vmatprep.subr.bf16.mxu1 %v11325_v29  ;;  %v3914_v29 = vld [vmem:[%s18315_s6 + $0x1c8] sm:$0xff]  ;;  %v11375_v33 = vpack.c.bf16 %v3896_v26, %v3895_v45  ;;  %v3919_v14 = vld [vmem:[%s18315_s6 + $0x1f0] sm:$0xff]  ;;  %v3972_v54 = vld [vmem:[%s18315_s6 + $0x398] sm:$0xff] }
 0x210   : > { %v3871_v45 = vld [vmem:[%s18315_s6 + $0x70] sm:$0xff]  ;;  %v11389_v37 = vpack.c.bf16 %v3920_v18, %v3919_v14  ;;  %v3944_v18 = vld [vmem:[%s18315_s6 + $0x2b8] sm:$0xff] }
 0x211   : > { %11296 = vmatpush3.bf16.msra.mxu0 %v11295_v40  ;;  %v3897_v40 = vld [vmem:[%s18315_s6 + $0x140] sm:$0xff]  ;;  %v3903_v26 = vld [vmem:[%s18315_s6 + $0x170] sm:$0xff] }
 0x212   : > { %11328 = vmatpush3.bf16.msra.mxu1 %v11327_v41  ;;  %11330 = vmatprep.subr.bf16.mxu0 %v11329_v42  ;;  %v11377_v41 = vpack.c.bf16 %v3914_v29, %v3913_v46  ;;  %v3898_v42 = vld [vmem:[%s18315_s6 + $0x148] sm:$0xff]  ;;  %v3904_v46 = vld [vmem:[%s18315_s6 + $0x178] sm:$0xff]  ;;  %v3937_v29 = vld [vmem:[%s18315_s6 + $0x280] sm:$0xff] }
 0x213   : > { %11362 = vmatprep.subr.bf16.mxu1 %v11361_v51  ;;  %v3916_v51 = vld [vmem:[%s18315_s6 + $0x1d8] sm:$0xff]  ;;  %v11379_v53 = vpack.c.bf16 %v3898_v42, %v3897_v40  ;;  %v11391_v40 = vpack.c.bf16 %v3904_v46, %v3903_v26  ;;  %v3921_v42 = vld [vmem:[%s18315_s6 + $0x200] sm:$0xff]  ;;  %v3943_v14 = vld [vmem:[%s18315_s6 + $0x2b0] sm:$0xff] }
 0x214   : > { %3782 = vmatmul.mubr.f32.vlgmr.msra.gmra.mrb[30].mxu0 %v15084_v8  ;;  %v11337_v8 = vpack.c.bf16 %v3878_v63, %v3877_v17  ;;  %v11353_v63 = vpack.c.bf16 %v3886_v59, %v3885_v57  ;;  %v3923_v59 = vld [vmem:[%s18315_s6 + $0x210] sm:$0xff]  ;;  %v3946_v46 = vld [vmem:[%s18315_s6 + $0x2c8] sm:$0xff] }
 0x215   : > { %3852 = vmatmul.mubr.f32.vlgmr.msra.gmra.mrb[30].mxu1 %v15094_v11  ;;  %11332 = vmatpush3.bf16.msra.mxu0 %v11331_v9  ;;  %v3893_v11 = vld [vmem:[%s18315_s6 + $0x120] sm:$0xff]  ;;  %v3899_v9 = vld [vmem:[%s18315_s6 + $0x150] sm:$0xff] }
 0x216   : > { %11364 = vmatpush3.bf16.msra.mxu1 %v11363_v55  ;;  %11334 = vmatprep.subr.bf16.mxu0 %v11333_v56  ;;  %v11371_v22 = vpack.c.bf16 %v3894_v13, %v3893_v11  ;;  %v11381_v55 = vpack.c.bf16 %v3916_v51, %v3915_v50  ;;  %v3900_v56 = vld [vmem:[%s18315_s6 + $0x158] sm:$0xff]  ;;  %v3954_v51 = vld [vmem:[%s18315_s6 + $0x308] sm:$0xff] }
 0x217   : > { %11366 = vmatprep.subr.bf16.mxu1 %v11365_v61  ;;  %4489 = vmatprep.mubr.f32.mxu0 %v15706_v1  ;;  %v3918_v61 = vld [vmem:[%s18315_s6 + $0x1e8] sm:$0xff]  ;;  %v11383_v17 = vpack.c.bf16 %v3900_v56, %v3899_v9  ;;  %v3888_v11 = vld [vmem:[%s18315_s6 + $0xf8] sm:$0xff]  ;;  %v15891_v9 = vld [vmem:[%s15678_s17 + $0x10] sm:$0xff]  ;;  %v11427_v56 = vpack.c.bf16 %v3954_v51, %v3953_v47 }
 0x218   : > { %4559 = vmatprep.mubr.f32.mxu1 %v15710_v3  ;;  %v11357_v25 = vpack.c.bf16 %v3888_v11, %v3887_v10  ;;  %v3925_v10 = vld [vmem:[%s18315_s6 + $0x220] sm:$0xff]  ;;  %v3926_v11 = vld [vmem:[%s18315_s6 + $0x228] sm:$0xff]  ;;  %v3948_v51 = vld [vmem:[%s18315_s6 + $0x2d8] sm:$0xff] }
 0x219   : > { %11336 = vmatpush3.bf16.msra.mxu0 %v11335_v2  ;;  %v3901_v2 = vld [vmem:[%s18315_s6 + $0x160] sm:$0xff]  ;;  %v3962_v47 = vld [vmem:[%s18315_s6 + $0x348] sm:$0xff] }
 0x21a   : > { %11368 = vmatpush3.bf16.msra.mxu1 %v11367_v5  ;;  %11338 = vmatprep.subr.bf16.mxu0 %v11337_v8  ;;  %v11385_v8 = vpack.c.bf16 %v3918_v61, %v3917_v60  ;;  %v11387_v24 = vpack.c.bf16 %v3902_v6, %v3901_v2  ;;  %v3924_v60 = vld [vmem:[%s18315_s6 + $0x218] sm:$0xff]  ;;  %v3955_v61 = vld [vmem:[%s18315_s6 + $0x310] sm:$0xff]  ;;  %v3974_v2 = vld [vmem:[%s18315_s6 + $0x3a8] sm:$0xff] }
 0x21b   : > { %11370 = vmatprep.subr.bf16.mxu1 %v11369_v12  ;;  %v8449_v12 = vld [vmem:[%s18318_s9 + $0x1] ss:$0 sm:$0xff] }
 0x21d   : > { %11340 = vmatpush3.bf16.msra.mxu0 %v11339_v20 }
 0x21e   : > { %11372 = vmatpush3.bf16.msra.mxu1 %v11371_v22  ;;  %11342 = vmatprep.subr.bf16.mxu0 %v11341_v23  ;;  %v11355_v22 = vpack.c.bf16 %v3870_v21, %v3869_v0  ;;  %v3942_v0 = vld [vmem:[%s18315_s6 + $0x2a8] sm:$0xff]  ;;  %v3973_v21 = vld [vmem:[%s18315_s6 + $0x3a0] sm:$0xff] }
 0x21f   : > { %11374 = vmatprep.subr.bf16.mxu1 %v11373_v34  ;;  %v3872_v34 = vld [vmem:[%s18315_s6 + $0x78] sm:$0xff] }
 0x220   : > { %v11359_v38 = vpack.c.bf16 %v3872_v34, %v3871_v45  ;;  %v3928_v45 = vld [vmem:[%s18315_s6 + $0x238] sm:$0xff]  ;;  %v3959_v34 = vld [vmem:[%s18315_s6 + $0x330] sm:$0xff] }
 0x221   : > { %11344 = vmatpush3.bf16.msra.mxu0 %v11343_v30  ;;  %v3938_v30 = vld [vmem:[%s18315_s6 + $0x288] sm:$0xff] }
 0x222   : > { %11376 = vmatpush3.bf16.msra.mxu1 %v11375_v33  ;;  %11346 = vmatprep.subr.bf16.mxu0 %v11345_v35  ;;  %v3969_v33 = vld [vmem:[%s18315_s6 + $0x380] sm:$0xff]  ;;  %v3970_v35 = vld [vmem:[%s18315_s6 + $0x388] sm:$0xff] }
 0x223   : > { %11378 = vmatprep.subr.bf16.mxu1 %v11377_v41  ;;  %v11393_v41 = vpack.c.bf16 %v3938_v30, %v3937_v29  ;;  %v11425_v50 = vpack.c.bf16 %v3970_v35, %v3969_v33  ;;  %v3977_v29 = vld [vmem:[%s18315_s6 + $0x3c0] sm:$0xff]  ;;  %v3978_v30 = vld [vmem:[%s18315_s6 + $0x3c8] sm:$0xff] }
 0x225   : > { %11348 = vmatpush3.bf16.msra.mxu0 %v11347_v48  ;;  %v3939_v48 = vld [vmem:[%s18315_s6 + $0x290] sm:$0xff] }
 0x226   : > { %11380 = vmatpush3.bf16.msra.mxu1 %v11379_v53  ;;  %11350 = vmatprep.subr.bf16.mxu0 %v11349_v7  ;;  %v3940_v53 = vld [vmem:[%s18315_s6 + $0x298] sm:$0xff]  ;;  %v3971_v7 = vld [vmem:[%s18315_s6 + $0x390] sm:$0xff] }
 0x227   : > { %v9175_v5 = vpop.f32.mrb[18].mxu0  ;;  %11382 = vmatprep.subr.bf16.mxu1 %v11381_v55  ;;  %v11395_v55 = vpack.c.bf16 %v3922_v44, %v3921_v42  ;;  %v11397_v57 = vpack.c.bf16 %v3940_v53, %v3939_v48  ;;  %v3961_v42 = vld [vmem:[%s18315_s6 + $0x340] sm:$0xff]  ;;  %v11441_v44 = vpack.c.bf16 %v3978_v30, %v3977_v29  ;;  %v3979_v48 = vld [vmem:[%s18315_s6 + $0x3d0] sm:$0xff]  ;;  %v3980_v53 = vld [vmem:[%s18315_s6 + $0x3d8] sm:$0xff] }
 0x228   : > { %v9176_v13 = vpop.f32.mrb[19].mxu0  ;;  %v9210_v15 = vpop.f32.mrb[18].mxu1  ;;  %v3967_v29 = vld [vmem:[%s18315_s6 + $0x370] sm:$0xff] }
 0x229   : > { %v9177_v19 = vadd.f32 %v9176_v13, %v9175_v5  ;;  %11352 = vmatpush3.bf16.msra.mxu0 %v11351_v62  ;;  %v9211_v20 = vpop.f32.mrb[19].mxu1  ;;  %v11429_v62 = vpack.c.bf16 %v3972_v54, %v3971_v7  ;;  %v11399_v5 = vpack.c.bf16 %v3924_v60, %v3923_v59  ;;  %v11433_v13 = vpack.c.bf16 %v3974_v2, %v3973_v21  ;;  %v3963_v59 = vld [vmem:[%s18315_s6 + $0x350] sm:$0xff] }
 0x22a   : > { %11384 = vmatpush3.bf16.msra.mxu1 %v11383_v17  ;;  %v9212_v23 = vadd.f32 %v9211_v20, %v9210_v15  ;;  %11354 = vmatprep.subr.bf16.mxu0 %v11353_v63  ;;  %v3956_v17 = vld [vmem:[%s18315_s6 + $0x318] sm:$0xff]  ;;  %v3941_v63 = vld [vmem:[%s18315_s6 + $0x2a0] sm:$0xff]  ;;  %v3958_v15 = vld [vmem:[%s18315_s6 + $0x328] sm:$0xff]  ;;  %v11443_v54 = vpack.c.bf16 %v3962_v47, %v3961_v42  ;;  %v11445_v60 = vpack.c.bf16 %v3980_v53, %v3979_v48 }
 0x22b   : > { %v2944_v27 = vadd.f32 %v9177_v19, %v8449_v12  ;;  %11386 = vmatprep.subr.bf16.mxu1 %v11385_v8  ;;  %v11431_v8 = vpack.c.bf16 %v3956_v17, %v3955_v61  ;;  %v11401_v6 = vpack.c.bf16 %v3942_v0, %v3941_v63  ;;  %v3957_v12 = vld [vmem:[%s18315_s6 + $0x320] sm:$0xff]  ;;  %v3975_v19 = vld [vmem:[%s18315_s6 + $0x3b0] sm:$0xff]  ;;  %v3976_v20 = vld [vmem:[%s18315_s6 + $0x3b8] sm:$0xff] }
 0x22c   : > { %v11437_v26 = vpack.c.bf16 %v3976_v20, %v3975_v19  ;;  %v3964_v61 = vld [vmem:[%s18315_s6 + $0x358] sm:$0xff]  ;;  %v3950_v17 = vld [vmem:[%s18315_s6 + $0x2e8] sm:$0xff]  ;;  %v3981_v63 = vld [vmem:[%s18315_s6 + $0x3e0] sm:$0xff] }
 0x22d   : > { %v15861_v36 = vadd.f32 %v9212_v23, %v2944_v27  ;;  %11356 = vmatpush3.bf16.msra.mxu0 %v11355_v22  ;;  %v11403_v22 = vpack.c.bf16 %v3926_v11, %v3925_v10  ;;  %v11435_v23 = vpack.c.bf16 %v3958_v15, %v3957_v12  ;;  %v3960_v27 = vld [vmem:[%s18315_s6 + $0x338] sm:$0xff]  ;;  %v3982_v0 = vld [vmem:[%s18315_s6 + $0x3e8] sm:$0xff]  ;;  %v11447_v2 = vpack.c.bf16 %v3964_v61, %v3963_v59  ;;  %v3965_v10 = vld [vmem:[%s18315_s6 + $0x360] sm:$0xff] }
 0x22e   : > { %11388 = vmatpush3.bf16.msra.mxu1 %v11387_v24  ;;  %11358 = vmatprep.subr.bf16.mxu0 %v11357_v25  ;;  %v11405_v24 = vpack.c.bf16 %v3944_v18, %v3943_v14  ;;  %v3927_v25 = vld [vmem:[%s18315_s6 + $0x230] sm:$0xff]  ;;  %v11439_v35 = vpack.c.bf16 %v3960_v27, %v3959_v34  ;;  %v11449_v12 = vpack.c.bf16 %v3982_v0, %v3981_v63  ;;  %v3952_v14 = vld [vmem:[%s18315_s6 + $0x2f8] sm:$0xff]  ;;  %v8450_v18 = vld [vmem:[%s18318_s9 + $0x2] ss:$0 sm:$0xff] }
 0x22f   : > { %11390 = vmatprep.subr.bf16.mxu1 %v11389_v37  ;;  %v3945_v37 = vld [vmem:[%s18315_s6 + $0x2c0] sm:$0xff]  ;;  %v11407_v33 = vpack.c.bf16 %v3928_v45, %v3927_v25  ;;  %v3951_v15 = vld [vmem:[%s18315_s6 + $0x2f0] sm:$0xff]  ;;  %v4034_v42 = vld [vmem:[%s18315_s6 + $0x588] sm:$0xff] }
 0x230   : > { %v11421_v27 = vpack.c.bf16 %v3952_v14, %v3951_v15  ;;  %v3985_v48 = vld [vmem:[%s18315_s6 + $0x400] sm:$0xff]  ;;  %v3986_v53 = vld [vmem:[%s18315_s6 + $0x408] sm:$0xff]  ;;  %v4035_v59 = vld [vmem:[%s18315_s6 + $0x590] sm:$0xff] }
 0x231   : > { %11360 = vmatpush3.bf16.msra.mxu0 %v11359_v38  ;;  %v11409_v38 = vpack.c.bf16 %v3946_v46, %v3945_v37  ;;  %v3935_v37 = vld [vmem:[%s18315_s6 + $0x270] sm:$0xff]  ;;  %v3936_v46 = vld [vmem:[%s18315_s6 + $0x278] sm:$0xff]  ;;  %v11459_v61 = vpack.c.bf16 %v3986_v53, %v3985_v48  ;;  %v3989_v14 = vld [vmem:[%s18315_s6 + $0x420] sm:$0xff] }
 0x232   : > { %11392 = vmatpush3.bf16.msra.mxu1 %v11391_v40  ;;  %11394 = vmatprep.subr.bf16.mxu0 %v11393_v41  ;;  %v3929_v40 = vld [vmem:[%s18315_s6 + $0x240] sm:$0xff]  ;;  %v3930_v41 = vld [vmem:[%s18315_s6 + $0x248] sm:$0xff]  ;;  %v11423_v47 = vpack.c.bf16 %v3936_v46, %v3935_v37  ;;  %v3987_v63 = vld [vmem:[%s18315_s6 + $0x410] sm:$0xff] }
 0x233   : > { %11426 = vmatprep.subr.bf16.mxu1 %v11425_v50  ;;  %v3947_v50 = vld [vmem:[%s18315_s6 + $0x2d0] sm:$0xff]  ;;  %v11411_v7 = vpack.c.bf16 %v3930_v41, %v3929_v40  ;;  %v4002_v40 = vld [vmem:[%s18315_s6 + $0x488] sm:$0xff]  ;;  %v4033_v41 = vld [vmem:[%s18315_s6 + $0x580] sm:$0xff] }
 0x234   : > { %4490 = vmatmul.mubr.f32.vlgmr.msra.gmra.mrb[32].mxu0 %v15888_v49  ;;  %v3988_v0 = vld [vmem:[%s18315_s6 + $0x418] sm:$0xff]  ;;  %v3991_v37 = vld [vmem:[%s18315_s6 + $0x430] sm:$0xff]  ;;  %v3994_v48 = vld [vmem:[%s18315_s6 + $0x448] sm:$0xff] }
 0x235   : > { %4560 = vmatmul.mubr.f32.vlgmr.msra.gmra.mrb[32].mxu1 %v15891_v9  ;;  %11396 = vmatpush3.bf16.msra.mxu0 %v11395_v55  ;;  %v11413_v55 = vpack.c.bf16 %v3948_v51, %v3947_v50  ;;  %v3992_v46 = vld [vmem:[%s18315_s6 + $0x438] sm:$0xff]  ;;  %v4025_v53 = vld [vmem:[%s18315_s6 + $0x540] sm:$0xff] }
 0x236   : > { %11428 = vmatpush3.bf16.msra.mxu1 %v11427_v56  ;;  %11398 = vmatprep.subr.bf16.mxu0 %v11397_v57  ;;  %v3931_v56 = vld [vmem:[%s18315_s6 + $0x250] sm:$0xff]  ;;  %v3932_v57 = vld [vmem:[%s18315_s6 + $0x258] sm:$0xff] }
 0x237   : > { %11430 = vmatprep.subr.bf16.mxu1 %v11429_v62  ;;  %4629 = vmatprep.mubr.f32.mxu0 %v15706_v1  ;;  %v3949_v62 = vld [vmem:[%s18315_s6 + $0x2e0] sm:$0xff]  ;;  %v11415_v21 = vpack.c.bf16 %v3932_v57, %v3931_v56  ;;  %v4003_v56 = vld [vmem:[%s18315_s6 + $0x490] sm:$0xff]  ;;  %v4004_v57 = vld [vmem:[%s18315_s6 + $0x498] sm:$0xff] }
 0x238   : > { %4699 = vmatprep.mubr.f32.mxu1 %v15710_v3 }
 0x239   : > { %11400 = vmatpush3.bf16.msra.mxu0 %v11399_v5  ;;  %v11417_v5 = vpack.c.bf16 %v3950_v17, %v3949_v62  ;;  %v11461_v17 = vpack.c.bf16 %v4004_v57, %v4003_v56  ;;  %v4012_v56 = vld [vmem:[%s18315_s6 + $0x4d8] sm:$0xff]  ;;  %v4043_v57 = vld [vmem:[%s18315_s6 + $0x5d0] sm:$0xff] }
 0x23a   : > { %11432 = vmatpush3.bf16.msra.mxu1 %v11431_v8  ;;  %11402 = vmatprep.subr.bf16.mxu0 %v11401_v6  ;;  %v3933_v8 = vld [vmem:[%s18315_s6 + $0x260] sm:$0xff]  ;;  %v3934_v6 = vld [vmem:[%s18315_s6 + $0x268] sm:$0xff] }
 0x23b   : > { %11434 = vmatprep.subr.bf16.mxu1 %v11433_v13  ;;  %v3966_v13 = vld [vmem:[%s18315_s6 + $0x368] sm:$0xff]  ;;  %v11419_v45 = vpack.c.bf16 %v3934_v6, %v3933_v8  ;;  %v4005_v8 = vld [vmem:[%s18315_s6 + $0x4a0] sm:$0xff] }
 0x23c   : > { %v4006_v6 = vld [vmem:[%s18315_s6 + $0x4a8] sm:$0xff] }
 0x23d   : > { %11404 = vmatpush3.bf16.msra.mxu0 %v11403_v22  ;;  %v3983_v22 = vld [vmem:[%s18315_s6 + $0x3f0] sm:$0xff]  ;;  %v11465_v15 = vpack.c.bf16 %v4006_v6, %v4005_v8  ;;  %v4014_v8 = vld [vmem:[%s18315_s6 + $0x4e8] sm:$0xff]  ;;  %v4045_v6 = vld [vmem:[%s18315_s6 + $0x5e0] sm:$0xff] }
 0x23e   : > { %11436 = vmatpush3.bf16.msra.mxu1 %v11435_v23  ;;  %11406 = vmatprep.subr.bf16.mxu0 %v11405_v24  ;;  %v3984_v23 = vld [vmem:[%s18315_s6 + $0x3f8] sm:$0xff] }
 0x23f   : > { %11438 = vmatprep.subr.bf16.mxu1 %v11437_v26  ;;  %v11451_v26 = vpack.c.bf16 %v3966_v13, %v3965_v10  ;;  %v4037_v10 = vld [vmem:[%s18315_s6 + $0x5a0] sm:$0xff] }
 0x241   : > { %11408 = vmatpush3.bf16.msra.mxu0 %v11407_v33  ;;  %v11453_v33 = vpack.c.bf16 %v3984_v23, %v3983_v22  ;;  %v4022_v22 = vld [vmem:[%s18315_s6 + $0x528] sm:$0xff]  ;;  %v4007_v23 = vld [vmem:[%s18315_s6 + $0x4b0] sm:$0xff] }
 0x242   : > { %11440 = vmatpush3.bf16.msra.mxu1 %v11439_v35  ;;  %11410 = vmatprep.subr.bf16.mxu0 %v11409_v38  ;;  %v3968_v35 = vld [vmem:[%s18315_s6 + $0x378] sm:$0xff]  ;;  %v4001_v38 = vld [vmem:[%s18315_s6 + $0x480] sm:$0xff] }
 0x243   : > { %11442 = vmatprep.subr.bf16.mxu1 %v11441_v44  ;;  %v11455_v50 = vpack.c.bf16 %v3968_v35, %v3967_v29  ;;  %v11457_v51 = vpack.c.bf16 %v4002_v40, %v4001_v38  ;;  %v4023_v29 = vld [vmem:[%s18315_s6 + $0x530] sm:$0xff]  ;;  %v4009_v35 = vld [vmem:[%s18315_s6 + $0x4c0] sm:$0xff]  ;;  %v4010_v38 = vld [vmem:[%s18315_s6 + $0x4c8] sm:$0xff] }
 0x244   : > { %v4041_v40 = vld [vmem:[%s18315_s6 + $0x5c0] sm:$0xff] }
 0x245   : > { %11412 = vmatpush3.bf16.msra.mxu0 %v11411_v7  ;;  %v4017_v7 = vld [vmem:[%s18315_s6 + $0x500] sm:$0xff] }
 0x246   : > { %11444 = vmatpush3.bf16.msra.mxu1 %v11443_v54  ;;  %11414 = vmatprep.subr.bf16.mxu0 %v11413_v55  ;;  %v11489_v54 = vpack.c.bf16 %v4034_v42, %v4033_v41  ;;  %v4018_v55 = vld [vmem:[%s18315_s6 + $0x508] sm:$0xff]  ;;  %v11471_v42 = vpack.c.bf16 %v3992_v46, %v3991_v37 }
 0x247   : > { %v9245_v11 = vpop.f32.mrb[20].mxu0  ;;  %11446 = vmatprep.subr.bf16.mxu1 %v11445_v60  ;;  %v4036_v60 = vld [vmem:[%s18315_s6 + $0x598] sm:$0xff]  ;;  %v11491_v62 = vpack.c.bf16 %v4018_v55, %v4017_v7  ;;  %v4042_v41 = vld [vmem:[%s18315_s6 + $0x5c8] sm:$0xff]  ;;  %v4011_v55 = vld [vmem:[%s18315_s6 + $0x4d0] sm:$0xff] }
 0x248   : > { %v9246_v19 = vpop.f32.mrb[21].mxu0  ;;  %v9280_v20 = vpop.f32.mrb[20].mxu1  ;;  %v11505_v7 = vpack.c.bf16 %v4042_v41, %v4041_v40  ;;  %v4000_v40 = vld [vmem:[%s18315_s6 + $0x478] sm:$0xff]  ;;  %v4031_v41 = vld [vmem:[%s18315_s6 + $0x570] sm:$0xff] }
 0x249   : > { %v9247_v24 = vadd.f32 %v9246_v19, %v9245_v11  ;;  %11416 = vmatpush3.bf16.msra.mxu0 %v11415_v21  ;;  %v9281_v25 = vpop.f32.mrb[21].mxu1  ;;  %v4019_v21 = vld [vmem:[%s18315_s6 + $0x510] sm:$0xff]  ;;  %v4038_v11 = vld [vmem:[%s18315_s6 + $0x5a8] sm:$0xff]  ;;  %v4021_v19 = vld [vmem:[%s18315_s6 + $0x520] sm:$0xff] }
 0x24a   : > { %11448 = vmatpush3.bf16.msra.mxu1 %v11447_v2  ;;  %v9282_v34 = vadd.f32 %v9281_v25, %v9280_v20  ;;  %11418 = vmatprep.subr.bf16.mxu0 %v11417_v5  ;;  %v11493_v2 = vpack.c.bf16 %v4036_v60, %v4035_v59  ;;  %v4020_v5 = vld [vmem:[%s18315_s6 + $0x518] sm:$0xff]  ;;  %v11497_v20 = vpack.c.bf16 %v4038_v11, %v4037_v10  ;;  %v4039_v25 = vld [vmem:[%s18315_s6 + $0x5b0] sm:$0xff]  ;;  %v4046_v10 = vld [vmem:[%s18315_s6 + $0x5e8] sm:$0xff] }
 0x24b   : > { %v3084_v30 = vadd.f32 %v9247_v24, %v8450_v18  ;;  %11450 = vmatprep.subr.bf16.mxu1 %v11449_v12  ;;  %v11463_v12 = vpack.c.bf16 %v3988_v0, %v3987_v63  ;;  %v11495_v13 = vpack.c.bf16 %v4020_v5, %v4019_v21  ;;  %v3990_v18 = vld [vmem:[%s18315_s6 + $0x428] sm:$0xff]  ;;  %v4008_v24 = vld [vmem:[%s18315_s6 + $0x4b8] sm:$0xff]  ;;  %v4027_v0 = vld [vmem:[%s18315_s6 + $0x550] sm:$0xff] }
 0x24c   : > { %v4044_v59 = vld [vmem:[%s18315_s6 + $0x5d8] sm:$0xff]  ;;  %v4013_v5 = vld [vmem:[%s18315_s6 + $0x4e0] sm:$0xff] }
 0x24d   : > { %v16068_v44 = vadd.f32 %v9282_v34, %v3084_v30  ;;  %11420 = vmatpush3.bf16.msra.mxu0 %v11419_v45  ;;  %v4040_v45 = vld [vmem:[%s18315_s6 + $0x5b8] sm:$0xff]  ;;  %v11467_v34 = vpack.c.bf16 %v3990_v18, %v3989_v14  ;;  %v11509_v21 = vpack.c.bf16 %v4044_v59, %v4043_v57  ;;  %v3998_v14 = vld [vmem:[%s18315_s6 + $0x468] sm:$0xff]  ;;  %v4029_v18 = vld [vmem:[%s18315_s6 + $0x560] sm:$0xff] }
 0x24e   : > { %11452 = vmatpush3.bf16.msra.mxu1 %v11451_v26  ;;  %11422 = vmatprep.subr.bf16.mxu0 %v11421_v27  ;;  %v11499_v26 = vpack.c.bf16 %v4022_v22, %v4021_v19  ;;  %v11469_v27 = vpack.c.bf16 %v4008_v24, %v4007_v23  ;;  %v11501_v30 = vpack.c.bf16 %v4040_v45, %v4039_v25  ;;  %v3996_v63 = vld [vmem:[%s18315_s6 + $0x458] sm:$0xff]  ;;  %v4030_v22 = vld [vmem:[%s18315_s6 + $0x568] sm:$0xff]  ;;  %v4015_v23 = vld [vmem:[%s18315_s6 + $0x4f0] sm:$0xff] }
 0x24f   : > { %11454 = vmatprep.subr.bf16.mxu1 %v11453_v33  ;;  %v4024_v33 = vld [vmem:[%s18315_s6 + $0x538] sm:$0xff]  ;;  %v8451_v25 = vld [vmem:[%s18318_s9 + $0x3] ss:$0 sm:$0xff] }
 0x250   : > { %v4016_v24 = vld [vmem:[%s18315_s6 + $0x4f8] sm:$0xff]  ;;  %v4049_v59 = vld [vmem:[%s18315_s6 + $0x600] sm:$0xff] }
 0x251   : > { %11424 = vmatpush3.bf16.msra.mxu0 %v11423_v47  ;;  %v11503_v47 = vpack.c.bf16 %v4024_v33, %v4023_v29  ;;  %v11515_v33 = vpack.c.bf16 %v4030_v22, %v4029_v18  ;;  %v4070_v18 = vld [vmem:[%s18315_s6 + $0x6a8] sm:$0xff] }
 0x252   : > { %11456 = vmatpush3.bf16.msra.mxu1 %v11455_v50  ;;  %11458 = vmatprep.subr.bf16.mxu0 %v11457_v51  ;;  %v11473_v50 = vpack.c.bf16 %v4010_v38, %v4009_v35  ;;  %v3993_v51 = vld [vmem:[%s18315_s6 + $0x440] sm:$0xff]  ;;  %v11485_v35 = vpack.c.bf16 %v4016_v24, %v4015_v23  ;;  %v3999_v38 = vld [vmem:[%s18315_s6 + $0x470] sm:$0xff] }
 0x253   : > { %11490 = vmatprep.subr.bf16.mxu1 %v11489_v54  ;;  %v4026_v54 = vld [vmem:[%s18315_s6 + $0x548] sm:$0xff]  ;;  %v11475_v60 = vpack.c.bf16 %v3994_v48, %v3993_v51  ;;  %v4065_v51 = vld [vmem:[%s18315_s6 + $0x680] sm:$0xff] }
 0x254   : > { %4630 = vmatmul.mubr.f32.vlgmr.msra.gmra.mrb[34].mxu0 %v15888_v49  ;;  %v4066_v48 = vld [vmem:[%s18315_s6 + $0x688] sm:$0xff] }
 0x255   : > { %4700 = vmatmul.mubr.f32.vlgmr.msra.gmra.mrb[34].mxu1 %v15891_v9  ;;  %11460 = vmatpush3.bf16.msra.mxu0 %v11459_v61  ;;  %v11507_v61 = vpack.c.bf16 %v4026_v54, %v4025_v53  ;;  %v4097_v53 = vld [vmem:[%s18315_s6 + $0x780] sm:$0xff]  ;;  %v11521_v57 = vpack.c.bf16 %v4066_v48, %v4065_v51  ;;  %v4106_v48 = vld [vmem:[%s18315_s6 + $0x7c8] sm:$0xff] }
 0x256   : > { %11492 = vmatpush3.bf16.msra.mxu1 %v11491_v62  ;;  %11462 = vmatprep.subr.bf16.mxu0 %v11461_v17  ;;  %v11477_v62 = vpack.c.bf16 %v4012_v56, %v4011_v55  ;;  %v3995_v17 = vld [vmem:[%s18315_s6 + $0x450] sm:$0xff]  ;;  %v11487_v55 = vpack.c.bf16 %v4000_v40, %v3999_v38  ;;  %v4056_v40 = vld [vmem:[%s18315_s6 + $0x638] sm:$0xff]  ;;  %v4105_v51 = vld [vmem:[%s18315_s6 + $0x7c0] sm:$0xff] }
 0x257   : > { %11494 = vmatprep.subr.bf16.mxu1 %v11493_v2  ;;  %4769 = vmatprep.mubr.f32.mxu0 %v15706_v1  ;;  %v4028_v2 = vld [vmem:[%s18315_s6 + $0x558] sm:$0xff]  ;;  %v11479_v11 = vpack.c.bf16 %v3996_v63, %v3995_v17  ;;  %v4082_v17 = vld [vmem:[%s18315_s6 + $0x708] sm:$0xff]  ;;  %v4067_v63 = vld [vmem:[%s18315_s6 + $0x690] sm:$0xff] }
 0x258   : > { %4839 = vmatprep.mubr.f32.mxu1 %v15710_v3 }
 0x259   : > { %11464 = vmatpush3.bf16.msra.mxu0 %v11463_v12  ;;  %v11511_v12 = vpack.c.bf16 %v4028_v2, %v4027_v0  ;;  %v4068_v0 = vld [vmem:[%s18315_s6 + $0x698] sm:$0xff] }
 0x25a   : > { %11496 = vmatpush3.bf16.msra.mxu1 %v11495_v13  ;;  %11466 = vmatprep.subr.bf16.mxu0 %v11465_v15  ;;  %v11481_v13 = vpack.c.bf16 %v4014_v8, %v4013_v5  ;;  %v3997_v15 = vld [vmem:[%s18315_s6 + $0x460] sm:$0xff]  ;;  %v4100_v2 = vld [vmem:[%s18315_s6 + $0x798] sm:$0xff] }
 0x25b   : > { %11498 = vmatprep.subr.bf16.mxu1 %v11497_v20  ;;  %v11513_v20 = vpack.c.bf16 %v4046_v10, %v4045_v6  ;;  %v11483_v29 = vpack.c.bf16 %v3998_v14, %v3997_v15  ;;  %v11525_v6 = vpack.c.bf16 %v4068_v0, %v4067_v63  ;;  %v4051_v10 = vld [vmem:[%s18315_s6 + $0x610] sm:$0xff]  ;;  %v4084_v15 = vld [vmem:[%s18315_s6 + $0x718] sm:$0xff]  ;;  %v4069_v14 = vld [vmem:[%s18315_s6 + $0x6a0] sm:$0xff] }
 0x25c   : > { %v11529_v24 = vpack.c.bf16 %v4070_v18, %v4069_v14  ;;  %v4107_v63 = vld [vmem:[%s18315_s6 + $0x7d0] sm:$0xff]  ;;  %v4108_v0 = vld [vmem:[%s18315_s6 + $0x7d8] sm:$0xff]  ;;  %v4109_v14 = vld [vmem:[%s18315_s6 + $0x7e0] sm:$0xff] }
 0x25d   : > { %11468 = vmatpush3.bf16.msra.mxu0 %v11467_v34  ;;  %v4110_v18 = vld [vmem:[%s18315_s6 + $0x7e8] sm:$0xff] }
 0x25e   : > { %11500 = vmatpush3.bf16.msra.mxu1 %v11499_v26  ;;  %11470 = vmatprep.subr.bf16.mxu0 %v11469_v27  ;;  %v4047_v26 = vld [vmem:[%s18315_s6 + $0x5f0] sm:$0xff]  ;;  %v4048_v27 = vld [vmem:[%s18315_s6 + $0x5f8] sm:$0xff] }
 0x25f   : > { %11502 = vmatprep.subr.bf16.mxu1 %v11501_v30 }
 0x261   : > { %11472 = vmatpush3.bf16.msra.mxu0 %v11471_v42 }
 0x262   : > { %11504 = vmatpush3.bf16.msra.mxu1 %v11503_v47  ;;  %11474 = vmatprep.subr.bf16.mxu0 %v11473_v50  ;;  %v11517_v47 = vpack.c.bf16 %v4048_v27, %v4047_v26  ;;  %v4032_v50 = vld [vmem:[%s18315_s6 + $0x578] sm:$0xff]  ;;  %v4086_v27 = vld [vmem:[%s18315_s6 + $0x728] sm:$0xff] }
 0x263   : > { %11506 = vmatprep.subr.bf16.mxu1 %v11505_v7  ;;  %v4098_v7 = vld [vmem:[%s18315_s6 + $0x788] sm:$0xff]  ;;  %v11519_v56 = vpack.c.bf16 %v4032_v50, %v4031_v41  ;;  %v4087_v41 = vld [vmem:[%s18315_s6 + $0x730] sm:$0xff] }
 0x264   : > { %v4074_v50 = vld [vmem:[%s18315_s6 + $0x6c8] sm:$0xff] }
 0x265   : > { %11476 = vmatpush3.bf16.msra.mxu0 %v11475_v60  ;;  %v4050_v60 = vld [vmem:[%s18315_s6 + $0x608] sm:$0xff] }
 0x266   : > { %11508 = vmatpush3.bf16.msra.mxu1 %v11507_v61  ;;  %11478 = vmatprep.subr.bf16.mxu0 %v11477_v62  ;;  %v4081_v61 = vld [vmem:[%s18315_s6 + $0x700] sm:$0xff]  ;;  %v11553_v62 = vpack.c.bf16 %v4098_v7, %v4097_v53  ;;  %v11523_v5 = vpack.c.bf16 %v4050_v60, %v4049_v59  ;;  %v11569_v60 = vpack.c.bf16 %v4106_v48, %v4105_v51  ;;  %v4095_v51 = vld [vmem:[%s18315_s6 + $0x770] sm:$0xff] }
 0x267   : > { %v9315_v19 = vpop.f32.mrb[22].mxu0  ;;  %11510 = vmatprep.subr.bf16.mxu1 %v11509_v21  ;;  %v4099_v21 = vld [vmem:[%s18315_s6 + $0x790] sm:$0xff]  ;;  %v11555_v8 = vpack.c.bf16 %v4082_v17, %v4081_v61  ;;  %v4089_v59 = vld [vmem:[%s18315_s6 + $0x740] sm:$0xff]  ;;  %v4090_v61 = vld [vmem:[%s18315_s6 + $0x748] sm:$0xff] }
 0x268   : > { %v9316_v45 = vpop.f32.mrb[23].mxu0  ;;  %v9350_v34 = vpop.f32.mrb[22].mxu1  ;;  %v4076_v17 = vld [vmem:[%s18315_s6 + $0x6d8] sm:$0xff] }
 0x269   : > { %v9317_v37 = vadd.f32 %v9316_v45, %v9315_v19  ;;  %11480 = vmatpush3.bf16.msra.mxu0 %v11479_v11  ;;  %v9351_v46 = vpop.f32.mrb[23].mxu1  ;;  %v4052_v11 = vld [vmem:[%s18315_s6 + $0x618] sm:$0xff]  ;;  %v4101_v19 = vld [vmem:[%s18315_s6 + $0x7a0] sm:$0xff]  ;;  %v4054_v45 = vld [vmem:[%s18315_s6 + $0x628] sm:$0xff] }
 0x26a   : > { %11512 = vmatpush3.bf16.msra.mxu1 %v11511_v12  ;;  %v9352_v30 = vadd.f32 %v9351_v46, %v9350_v34  ;;  %11482 = vmatprep.subr.bf16.mxu0 %v11481_v13  ;;  %v4083_v12 = vld [vmem:[%s18315_s6 + $0x710] sm:$0xff]  ;;  %v11557_v13 = vpack.c.bf16 %v4100_v2, %v4099_v21  ;;  %v11527_v22 = vpack.c.bf16 %v4052_v11, %v4051_v10  ;;  %v4085_v34 = vld [vmem:[%s18315_s6 + $0x720] sm:$0xff]  ;;  %v4072_v46 = vld [vmem:[%s18315_s6 + $0x6b8] sm:$0xff] }
 0x26b   : > { %v3224_v42 = vadd.f32 %v9317_v37, %v8451_v25  ;;  %11514 = vmatprep.subr.bf16.mxu1 %v11513_v20  ;;  %v4102_v20 = vld [vmem:[%s18315_s6 + $0x7a8] sm:$0xff]  ;;  %v11559_v23 = vpack.c.bf16 %v4084_v15, %v4083_v12  ;;  %v4053_v25 = vld [vmem:[%s18315_s6 + $0x620] sm:$0xff]  ;;  %v4071_v37 = vld [vmem:[%s18315_s6 + $0x6b0] sm:$0xff]  ;;  %v11571_v2 = vpack.c.bf16 %v4090_v61, %v4089_v59  ;;  %v11573_v11 = vpack.c.bf16 %v4108_v0, %v4107_v63 }
 0x26c   : > { %v11561_v26 = vpack.c.bf16 %v4102_v20, %v4101_v19  ;;  %v11533_v38 = vpack.c.bf16 %v4072_v46, %v4071_v37  ;;  %v4091_v10 = vld [vmem:[%s18315_s6 + $0x750] sm:$0xff]  ;;  %v4092_v12 = vld [vmem:[%s18315_s6 + $0x758] sm:$0xff]  ;;  %v4078_v15 = vld [vmem:[%s18315_s6 + $0x6e8] sm:$0xff] }
 0x26d   : > { %v16269_v54 = vadd.f32 %v9352_v30, %v3224_v42  ;;  %11484 = vmatpush3.bf16.msra.mxu0 %v11483_v29  ;;  %v4103_v29 = vld [vmem:[%s18315_s6 + $0x7b0] sm:$0xff]  ;;  %v4104_v30 = vld [vmem:[%s18315_s6 + $0x7b8] sm:$0xff]  ;;  %v11575_v20 = vpack.c.bf16 %v4092_v12, %v4091_v10  ;;  %v8452_v46 = vld [vmem:[%s18318_s9 + $0x4] ss:$0 sm:$0xff] }
 0x26e   : > { %11516 = vmatpush3.bf16.msra.mxu1 %v11515_v33  ;;  %11486 = vmatprep.subr.bf16.mxu0 %v11485_v35  ;;  %v11531_v33 = vpack.c.bf16 %v4054_v45, %v4053_v25  ;;  %v11563_v35 = vpack.c.bf16 %v4086_v27, %v4085_v34  ;;  %v4088_v42 = vld [vmem:[%s18315_s6 + $0x738] sm:$0xff]  ;;  %v4093_v25 = vld [vmem:[%s18315_s6 + $0x760] sm:$0xff]  ;;  %v11577_v34 = vpack.c.bf16 %v4110_v18, %v4109_v14  ;;  %v4079_v27 = vld [vmem:[%s18315_s6 + $0x6f0] sm:$0xff] }
 0x26f   : > { %11518 = vmatprep.subr.bf16.mxu1 %v11517_v47  ;;  %v4073_v47 = vld [vmem:[%s18315_s6 + $0x6c0] sm:$0xff]  ;;  %v11567_v7 = vpack.c.bf16 %v4088_v42, %v4087_v41  ;;  %v4080_v37 = vld [vmem:[%s18315_s6 + $0x6f8] sm:$0xff]  ;;  %v4162_v59 = vld [vmem:[%s18315_s6 + $0x988] sm:$0xff] }
 0x270   : > { %v11549_v42 = vpack.c.bf16 %v4080_v37, %v4079_v27  ;;  %v4113_v63 = vld [vmem:[%s18315_s6 + $0x800] sm:$0xff]  ;;  %v4114_v0 = vld [vmem:[%s18315_s6 + $0x808] sm:$0xff]  ;;  %v4163_v10 = vld [vmem:[%s18315_s6 + $0x990] sm:$0xff] }
 0x271   : > { %11488 = vmatpush3.bf16.msra.mxu0 %v11487_v55  ;;  %v11537_v55 = vpack.c.bf16 %v4074_v50, %v4073_v47  ;;  %v4063_v47 = vld [vmem:[%s18315_s6 + $0x670] sm:$0xff]  ;;  %v4064_v50 = vld [vmem:[%s18315_s6 + $0x678] sm:$0xff]  ;;  %v11587_v12 = vpack.c.bf16 %v4114_v0, %v4113_v63  ;;  %v4118_v37 = vld [vmem:[%s18315_s6 + $0x828] sm:$0xff] }
 0x272   : > { %11520 = vmatpush3.bf16.msra.mxu1 %v11519_v56  ;;  %11522 = vmatprep.subr.bf16.mxu0 %v11521_v57  ;;  %v4057_v56 = vld [vmem:[%s18315_s6 + $0x640] sm:$0xff]  ;;  %v4058_v57 = vld [vmem:[%s18315_s6 + $0x648] sm:$0xff]  ;;  %v11551_v61 = vpack.c.bf16 %v4064_v50, %v4063_v47  ;;  %v4115_v14 = vld [vmem:[%s18315_s6 + $0x810] sm:$0xff] }
 0x273   : > { %11554 = vmatprep.subr.bf16.mxu1 %v11553_v62  ;;  %v4075_v62 = vld [vmem:[%s18315_s6 + $0x6d0] sm:$0xff]  ;;  %v11539_v21 = vpack.c.bf16 %v4058_v57, %v4057_v56  ;;  %v4130_v56 = vld [vmem:[%s18315_s6 + $0x888] sm:$0xff]  ;;  %v4161_v57 = vld [vmem:[%s18315_s6 + $0x980] sm:$0xff] }
 0x274   : > { %4770 = vmatmul.mubr.f32.vlgmr.msra.gmra.mrb[36].mxu0 %v15888_v49  ;;  %v4116_v18 = vld [vmem:[%s18315_s6 + $0x818] sm:$0xff]  ;;  %v4119_v47 = vld [vmem:[%s18315_s6 + $0x830] sm:$0xff]  ;;  %v4122_v63 = vld [vmem:[%s18315_s6 + $0x848] sm:$0xff] }
 0x275   : > { %4840 = vmatmul.mubr.f32.vlgmr.msra.gmra.mrb[36].mxu1 %v15891_v9  ;;  %11524 = vmatpush3.bf16.msra.mxu0 %v11523_v5  ;;  %v11541_v5 = vpack.c.bf16 %v4076_v17, %v4075_v62  ;;  %v4120_v50 = vld [vmem:[%s18315_s6 + $0x838] sm:$0xff]  ;;  %v4153_v0 = vld [vmem:[%s18315_s6 + $0x940] sm:$0xff] }
 0x276   : > { %11556 = vmatpush3.bf16.msra.mxu1 %v11555_v8  ;;  %11526 = vmatprep.subr.bf16.mxu0 %v11525_v6  ;;  %v4059_v8 = vld [vmem:[%s18315_s6 + $0x650] sm:$0xff]  ;;  %v4060_v6 = vld [vmem:[%s18315_s6 + $0x658] sm:$0xff] }
 0x277   : > { %11558 = vmatprep.subr.bf16.mxu1 %v11557_v13  ;;  %4909 = vmatprep.mubr.f32.mxu0 %v15706_v1  ;;  %v4055_v1 = vld [vmem:[%s18315_s6 + $0x630] sm:$0xff]  ;;  %v4077_v13 = vld [vmem:[%s18315_s6 + $0x6e0] sm:$0xff]  ;;  %v11543_v19 = vpack.c.bf16 %v4060_v6, %v4059_v8  ;;  %v4132_v6 = vld [vmem:[%s18315_s6 + $0x898] sm:$0xff] }
 0x278   : > { %4979 = vmatprep.mubr.f32.mxu1 %v15710_v3  ;;  %v11565_v3 = vpack.c.bf16 %v4104_v30, %v4103_v29  ;;  %v11535_v53 = vpack.c.bf16 %v4056_v40, %v4055_v1  ;;  %v4131_v8 = vld [vmem:[%s18315_s6 + $0x890] sm:$0xff] }
 0x279   : > { %11528 = vmatpush3.bf16.msra.mxu0 %v11527_v22  ;;  %v11545_v22 = vpack.c.bf16 %v4078_v15, %v4077_v13  ;;  %v11589_v15 = vpack.c.bf16 %v4132_v6, %v4131_v8  ;;  %v4140_v8 = vld [vmem:[%s18315_s6 + $0x8d8] sm:$0xff]  ;;  %v4171_v6 = vld [vmem:[%s18315_s6 + $0x9d0] sm:$0xff] }
 0x27a   : > { %11560 = vmatpush3.bf16.msra.mxu1 %v11559_v23  ;;  %11530 = vmatprep.subr.bf16.mxu0 %v11529_v24  ;;  %v4061_v23 = vld [vmem:[%s18315_s6 + $0x660] sm:$0xff]  ;;  %v4062_v24 = vld [vmem:[%s18315_s6 + $0x668] sm:$0xff] }
 0x27b   : > { %11562 = vmatprep.subr.bf16.mxu1 %v11561_v26  ;;  %v4094_v26 = vld [vmem:[%s18315_s6 + $0x768] sm:$0xff]  ;;  %v11547_v40 = vpack.c.bf16 %v4062_v24, %v4061_v23  ;;  %v4133_v23 = vld [vmem:[%s18315_s6 + $0x8a0] sm:$0xff] }
 0x27c   : > { %v4134_v24 = vld [vmem:[%s18315_s6 + $0x8a8] sm:$0xff] }
 0x27d   : > { %11532 = vmatpush3.bf16.msra.mxu0 %v11531_v33  ;;  %v4111_v33 = vld [vmem:[%s18315_s6 + $0x7f0] sm:$0xff]  ;;  %v11593_v27 = vpack.c.bf16 %v4134_v24, %v4133_v23  ;;  %v4142_v23 = vld [vmem:[%s18315_s6 + $0x8e8] sm:$0xff]  ;;  %v4173_v24 = vld [vmem:[%s18315_s6 + $0x9e0] sm:$0xff] }
 0x27e   : > { %11564 = vmatpush3.bf16.msra.mxu1 %v11563_v35  ;;  %11534 = vmatprep.subr.bf16.mxu0 %v11533_v38  ;;  %v4112_v35 = vld [vmem:[%s18315_s6 + $0x7f8] sm:$0xff] }
 0x27f   : > { %11566 = vmatprep.subr.bf16.mxu1 %v11565_v3  ;;  %v11579_v3 = vpack.c.bf16 %v4094_v26, %v4093_v25  ;;  %v4165_v25 = vld [vmem:[%s18315_s6 + $0x9a0] sm:$0xff] }
 0x281   : > { %11536 = vmatpush3.bf16.msra.mxu0 %v11535_v53  ;;  %v11581_v53 = vpack.c.bf16 %v4112_v35, %v4111_v33  ;;  %v4136_v33 = vld [vmem:[%s18315_s6 + $0x8b8] sm:$0xff]  ;;  %v16541_v35 = vld [vmem:[%s15678_s17 + $0x8] sm:$0xff] }
 0x282   : > { %11568 = vmatpush3.bf16.msra.mxu1 %v11567_v7  ;;  %11538 = vmatprep.subr.bf16.mxu0 %v11537_v55  ;;  %v4096_v7 = vld [vmem:[%s18315_s6 + $0x778] sm:$0xff]  ;;  %v4129_v55 = vld [vmem:[%s18315_s6 + $0x880] sm:$0xff] }
 0x283   : > { %11570 = vmatprep.subr.bf16.mxu1 %v11569_v60  ;;  %v11583_v62 = vpack.c.bf16 %v4096_v7, %v4095_v51  ;;  %v11585_v17 = vpack.c.bf16 %v4130_v56, %v4129_v55  ;;  %v4151_v51 = vld [vmem:[%s18315_s6 + $0x930] sm:$0xff]  ;;  %v4137_v7 = vld [vmem:[%s18315_s6 + $0x8c0] sm:$0xff]  ;;  %v4138_v55 = vld [vmem:[%s18315_s6 + $0x8c8] sm:$0xff] }
 0x284   : > { %v4169_v56 = vld [vmem:[%s18315_s6 + $0x9c0] sm:$0xff] }
 0x285   : > { %11540 = vmatpush3.bf16.msra.mxu0 %v11539_v21  ;;  %v4145_v21 = vld [vmem:[%s18315_s6 + $0x900] sm:$0xff] }
 0x286   : > { %11572 = vmatpush3.bf16.msra.mxu1 %v11571_v2  ;;  %11542 = vmatprep.subr.bf16.mxu0 %v11541_v5  ;;  %v11617_v2 = vpack.c.bf16 %v4162_v59, %v4161_v57  ;;  %v4146_v5 = vld [vmem:[%s18315_s6 + $0x908] sm:$0xff]  ;;  %v11599_v59 = vpack.c.bf16 %v4120_v50, %v4119_v47 }
 0x287   : > { %v9385_v45 = vpop.f32.mrb[24].mxu0  ;;  %11574 = vmatprep.subr.bf16.mxu1 %v11573_v11  ;;  %v4164_v11 = vld [vmem:[%s18315_s6 + $0x998] sm:$0xff]  ;;  %v11619_v13 = vpack.c.bf16 %v4146_v5, %v4145_v21  ;;  %v4170_v57 = vld [vmem:[%s18315_s6 + $0x9c8] sm:$0xff]  ;;  %v4139_v5 = vld [vmem:[%s18315_s6 + $0x8d0] sm:$0xff] }
 0x288   : > { %v9386_v29 = vpop.f32.mrb[25].mxu0  ;;  %v9420_v30 = vpop.f32.mrb[24].mxu1  ;;  %v11633_v21 = vpack.c.bf16 %v4170_v57, %v4169_v56  ;;  %v4128_v56 = vld [vmem:[%s18315_s6 + $0x878] sm:$0xff]  ;;  %v4159_v57 = vld [vmem:[%s18315_s6 + $0x970] sm:$0xff] }
 0x289   : > { %v9387_v38 = vadd.f32 %v9386_v29, %v9385_v45  ;;  %11544 = vmatpush3.bf16.msra.mxu0 %v11543_v19  ;;  %v9421_v1 = vpop.f32.mrb[25].mxu1  ;;  %v4147_v19 = vld [vmem:[%s18315_s6 + $0x910] sm:$0xff]  ;;  %v4166_v45 = vld [vmem:[%s18315_s6 + $0x9a8] sm:$0xff] }
 0x28a   : > { %11576 = vmatpush3.bf16.msra.mxu1 %v11575_v20  ;;  %v9422_v41 = vadd.f32 %v9421_v1, %v9420_v30  ;;  %11546 = vmatprep.subr.bf16.mxu0 %v11545_v22  ;;  %v11621_v20 = vpack.c.bf16 %v4164_v11, %v4163_v10  ;;  %v4148_v22 = vld [vmem:[%s18315_s6 + $0x918] sm:$0xff]  ;;  %v4150_v29 = vld [vmem:[%s18315_s6 + $0x928] sm:$0xff]  ;;  %v4135_v30 = vld [vmem:[%s18315_s6 + $0x8b0] sm:$0xff] }
 0x28b   : > { %v3364_v48 = vadd.f32 %v9387_v38, %v8452_v46  ;;  %11578 = vmatprep.subr.bf16.mxu1 %v11577_v34  ;;  %v11591_v34 = vpack.c.bf16 %v4116_v18, %v4115_v14  ;;  %v11623_v26 = vpack.c.bf16 %v4148_v22, %v4147_v19  ;;  %v4149_v46 = vld [vmem:[%s18315_s6 + $0x920] sm:$0xff]  ;;  %v4167_v38 = vld [vmem:[%s18315_s6 + $0x9b0] sm:$0xff]  ;;  %v4168_v1 = vld [vmem:[%s18315_s6 + $0x9b8] sm:$0xff] }
 0x28c   : > { %v4172_v10 = vld [vmem:[%s18315_s6 + $0x9d8] sm:$0xff]  ;;  %v4155_v18 = vld [vmem:[%s18315_s6 + $0x950] sm:$0xff]  ;;  %v4141_v22 = vld [vmem:[%s18315_s6 + $0x8e0] sm:$0xff] }
 0x28d   : > { %v16470_v60 = vadd.f32 %v9422_v41, %v3364_v48  ;;  %11548 = vmatpush3.bf16.msra.mxu0 %v11547_v40  ;;  %v16551_v40 = vld [vmem:[%s15678_s17 + $0x18] sm:$0xff]  ;;  %v11629_v48 = vpack.c.bf16 %v4168_v1, %v4167_v38  ;;  %v11637_v19 = vpack.c.bf16 %v4172_v10, %v4171_v6  ;;  %v8453_v38 = vld [vmem:[%s18318_s9 + $0x5] ss:$0 sm:$0xff] }
 0x28e   : > { %11580 = vmatpush3.bf16.msra.mxu1 %v11579_v3  ;;  %11550 = vmatprep.subr.bf16.mxu0 %v11549_v42  ;;  %v11627_v3 = vpack.c.bf16 %v4150_v29, %v4149_v46  ;;  %v11597_v42 = vpack.c.bf16 %v4136_v33, %v4135_v30  ;;  %v4124_v14 = vld [vmem:[%s18315_s6 + $0x858] sm:$0xff]  ;;  %v4158_v29 = vld [vmem:[%s18315_s6 + $0x968] sm:$0xff]  ;;  %v4143_v30 = vld [vmem:[%s18315_s6 + $0x8f0] sm:$0xff] }
 0x28f   : > { %11582 = vmatprep.subr.bf16.mxu1 %v11581_v53  ;;  %v4152_v53 = vld [vmem:[%s18315_s6 + $0x938] sm:$0xff]  ;;  %v4177_v10 = vld [vmem:[%s18315_s6 + $0xa00] sm:$0xff] }
 0x290   : > { %v4144_v33 = vld [vmem:[%s18315_s6 + $0x8f8] sm:$0xff] }
 0x291   : > { %11552 = vmatpush3.bf16.msra.mxu0 %v11551_v61  ;;  %v11631_v61 = vpack.c.bf16 %v4152_v53, %v4151_v51 }
 0x292   : > { %11584 = vmatpush3.bf16.msra.mxu1 %v11583_v62  ;;  %11586 = vmatprep.subr.bf16.mxu0 %v11585_v17  ;;  %v11601_v62 = vpack.c.bf16 %v4138_v55, %v4137_v7  ;;  %v4121_v17 = vld [vmem:[%s18315_s6 + $0x840] sm:$0xff]  ;;  %v11613_v7 = vpack.c.bf16 %v4144_v33, %v4143_v30  ;;  %v4127_v55 = vld [vmem:[%s18315_s6 + $0x870] sm:$0xff] }
 0x293   : > { %11618 = vmatprep.subr.bf16.mxu1 %v11617_v2  ;;  %v4154_v2 = vld [vmem:[%s18315_s6 + $0x948] sm:$0xff]  ;;  %v11603_v11 = vpack.c.bf16 %v4122_v63, %v4121_v17  ;;  %v4193_v17 = vld [vmem:[%s18315_s6 + $0xa80] sm:$0xff]  ;;  %v16732_v30 = vld [vmem:[%s15678_s17 + $0x10] sm:$0xff] }
 0x294   : > { %4910 = vmatmul.mubr.f32.vlgmr.msra.gmra.mrb[38].mxu0 %v15888_v49  ;;  %v4117_v49 = vld [vmem:[%s18315_s6 + $0x820] sm:$0xff]  ;;  %v4194_v63 = vld [vmem:[%s18315_s6 + $0xa88] sm:$0xff] }
 0x295   : > { %4980 = vmatmul.mubr.f32.vlgmr.msra.gmra.mrb[38].mxu1 %v15891_v9  ;;  %11588 = vmatpush3.bf16.msra.mxu0 %v11587_v12  ;;  %v11625_v9 = vpack.c.bf16 %v4166_v45, %v4165_v25  ;;  %v11595_v41 = vpack.c.bf16 %v4118_v37, %v4117_v49  ;;  %v11635_v12 = vpack.c.bf16 %v4154_v2, %v4153_v0  ;;  %v4174_v25 = vld [vmem:[%s18315_s6 + $0x9e8] sm:$0xff]  ;;  %v4157_v37 = vld [vmem:[%s18315_s6 + $0x960] sm:$0xff] }
 0x296   : > { %11620 = vmatpush3.bf16.msra.mxu1 %v11619_v13  ;;  %11590 = vmatprep.subr.bf16.mxu0 %v11589_v15  ;;  %v11605_v13 = vpack.c.bf16 %v4140_v8, %v4139_v5  ;;  %v4123_v15 = vld [vmem:[%s18315_s6 + $0x850] sm:$0xff]  ;;  %v4126_v49 = vld [vmem:[%s18315_s6 + $0x868] sm:$0xff]  ;;  %v11643_v53 = vpack.c.bf16 %v4158_v29, %v4157_v37  ;;  %v4225_v0 = vld [vmem:[%s18315_s6 + $0xb80] sm:$0xff]  ;;  %v11615_v5 = vpack.c.bf16 %v4128_v56, %v4127_v55 }
 0x297   : > { %11622 = vmatprep.subr.bf16.mxu1 %v11621_v20  ;;  %5049 = vmatprep.mubr.f32.mxu0 %v16541_v35  ;;  %v4156_v20 = vld [vmem:[%s18315_s6 + $0x958] sm:$0xff]  ;;  %v11607_v45 = vpack.c.bf16 %v4124_v14, %v4123_v15  ;;  %v11649_v6 = vpack.c.bf16 %v4194_v63, %v4193_v17  ;;  %v4210_v15 = vld [vmem:[%s18315_s6 + $0xb08] sm:$0xff]  ;;  %v4195_v14 = vld [vmem:[%s18315_s6 + $0xa90] sm:$0xff] }
 0x298   : > { %5119 = vmatprep.mubr.f32.mxu1 %v16551_v40  ;;  %v4198_v37 = vld [vmem:[%s18315_s6 + $0xaa8] sm:$0xff]  ;;  %v4216_v63 = vld [vmem:[%s18315_s6 + $0xb38] sm:$0xff] }
 0x299   : > { %11592 = vmatpush3.bf16.msra.mxu0 %v11591_v34  ;;  %v11639_v34 = vpack.c.bf16 %v4156_v20, %v4155_v18  ;;  %v4196_v18 = vld [vmem:[%s18315_s6 + $0xa98] sm:$0xff]  ;;  %v4230_v29 = vld [vmem:[%s18315_s6 + $0xba8] sm:$0xff] }
 0x29a   : > { %11624 = vmatpush3.bf16.msra.mxu1 %v11623_v26  ;;  %11594 = vmatprep.subr.bf16.mxu0 %v11593_v27  ;;  %v11609_v26 = vpack.c.bf16 %v4142_v23, %v4141_v22  ;;  %v4125_v27 = vld [vmem:[%s18315_s6 + $0x860] sm:$0xff]  ;;  %v4228_v20 = vld [vmem:[%s18315_s6 + $0xb98] sm:$0xff] }
 0x29b   : > { %11626 = vmatprep.subr.bf16.mxu1 %v11625_v9  ;;  %v11641_v9 = vpack.c.bf16 %v4174_v25, %v4173_v24  ;;  %v11611_v51 = vpack.c.bf16 %v4126_v49, %v4125_v27  ;;  %v11653_v24 = vpack.c.bf16 %v4196_v18, %v4195_v14  ;;  %v4179_v25 = vld [vmem:[%s18315_s6 + $0xa10] sm:$0xff]  ;;  %v4212_v27 = vld [vmem:[%s18315_s6 + $0xb18] sm:$0xff]  ;;  %v4197_v49 = vld [vmem:[%s18315_s6 + $0xaa0] sm:$0xff] }
 0x29c   : > { %v4218_v18 = vld [vmem:[%s18315_s6 + $0xb48] sm:$0xff] }
 0x29d   : > { %11596 = vmatpush3.bf16.msra.mxu0 %v11595_v41 }
 0x29e   : > { %11628 = vmatpush3.bf16.msra.mxu1 %v11627_v3  ;;  %11598 = vmatprep.subr.bf16.mxu0 %v11597_v42  ;;  %v4175_v3 = vld [vmem:[%s18315_s6 + $0x9f0] sm:$0xff]  ;;  %v4176_v42 = vld [vmem:[%s18315_s6 + $0x9f8] sm:$0xff] }
 0x29f   : > { %11630 = vmatprep.subr.bf16.mxu1 %v11629_v48 }
 0x2a1   : > { %11600 = vmatpush3.bf16.msra.mxu0 %v11599_v59 }
 0x2a2   : > { %11632 = vmatpush3.bf16.msra.mxu1 %v11631_v61  ;;  %11602 = vmatprep.subr.bf16.mxu0 %v11601_v62  ;;  %v11645_v61 = vpack.c.bf16 %v4176_v42, %v4175_v3  ;;  %v4160_v62 = vld [vmem:[%s18315_s6 + $0x978] sm:$0xff]  ;;  %v4182_v3 = vld [vmem:[%s18315_s6 + $0xa28] sm:$0xff]  ;;  %v4213_v42 = vld [vmem:[%s18315_s6 + $0xb20] sm:$0xff] }
 0x2a3   : > { %11634 = vmatprep.subr.bf16.mxu1 %v11633_v21  ;;  %v4226_v21 = vld [vmem:[%s18315_s6 + $0xb88] sm:$0xff]  ;;  %v11647_v8 = vpack.c.bf16 %v4160_v62, %v4159_v57  ;;  %v4215_v62 = vld [vmem:[%s18315_s6 + $0xb30] sm:$0xff] }
 0x2a5   : > { %11604 = vmatpush3.bf16.msra.mxu0 %v11603_v11  ;;  %v4178_v11 = vld [vmem:[%s18315_s6 + $0xa08] sm:$0xff] }
 0x2a6   : > { %11636 = vmatpush3.bf16.msra.mxu1 %v11635_v12  ;;  %11606 = vmatprep.subr.bf16.mxu0 %v11605_v13  ;;  %v4209_v12 = vld [vmem:[%s18315_s6 + $0xb00] sm:$0xff]  ;;  %v11681_v13 = vpack.c.bf16 %v4226_v21, %v4225_v0  ;;  %v11651_v22 = vpack.c.bf16 %v4178_v11, %v4177_v10  ;;  %v4202_v21 = vld [vmem:[%s18315_s6 + $0xac8] sm:$0xff]  ;;  %v11695_v10 = vpack.c.bf16 %v4216_v63, %v4215_v62  ;;  %v4240_v62 = vld [vmem:[%s18315_s6 + $0xbf8] sm:$0xff] }
 0x2a7   : > { %v9455_v46 = vpop.f32.mrb[26].mxu0  ;;  %11638 = vmatprep.subr.bf16.mxu1 %v11637_v19  ;;  %v4227_v19 = vld [vmem:[%s18315_s6 + $0xb90] sm:$0xff]  ;;  %v11683_v23 = vpack.c.bf16 %v4210_v15, %v4209_v12  ;;  %v4201_v0 = vld [vmem:[%s18315_s6 + $0xac0] sm:$0xff] }
 0x2a8   : > { %v9456_v1 = vpop.f32.mrb[27].mxu0  ;;  %v9490_v41 = vpop.f32.mrb[26].mxu1  ;;  %v11665_v11 = vpack.c.bf16 %v4202_v21, %v4201_v0  ;;  %v4185_v12 = vld [vmem:[%s18315_s6 + $0xa40] sm:$0xff] }
 0x2a9   : > { %v9457_v47 = vadd.f32 %v9456_v1, %v9455_v46  ;;  %11608 = vmatpush3.bf16.msra.mxu0 %v11607_v45  ;;  %v9491_v50 = vpop.f32.mrb[27].mxu1  ;;  %v4180_v45 = vld [vmem:[%s18315_s6 + $0xa18] sm:$0xff]  ;;  %v16722_v46 = vld [vmem:[%s15678_s17] sm:$0xff]  ;;  %v11657_v1 = vpack.c.bf16 %v4198_v37, %v4197_v49  ;;  %s8333_s17 = sshll.u32 %s449_s18, 4  ;;  %s18269_s17 = int_to_ptr.vmem [resolvable:$true] %s8333_s17 }
 0x2aa   : > { %11640 = vmatpush3.bf16.msra.mxu1 %v11639_v34  ;;  %v9492_v48 = vadd.f32 %v9491_v50, %v9490_v41  ;;  %11610 = vmatprep.subr.bf16.mxu0 %v11609_v26  ;;  %v4211_v34 = vld [vmem:[%s18315_s6 + $0xb10] sm:$0xff]  ;;  %v11685_v26 = vpack.c.bf16 %v4228_v20, %v4227_v19  ;;  %v11655_v33 = vpack.c.bf16 %v4180_v45, %v4179_v25  ;;  %v4181_v41 = vld [vmem:[%s18315_s6 + $0xa20] sm:$0xff]  ;;  %v4214_v50 = vld [vmem:[%s18315_s6 + $0xb28] sm:$0xff]  ;;  %s12210_s19 = scalar_lea.vmem %s18269_s17, 512  ;;  %p12217_p0 = scmp.lt.s32.totalorder %s18269_s17, %s12215_s28 }
 0x2ab   : > { %v3504_v59 = vadd.f32 %v9457_v47, %v8453_v38  ;;  %11642 = vmatprep.subr.bf16.mxu1 %v11641_v9  ;;  %v4229_v9 = vld [vmem:[%s18315_s6 + $0xba0] sm:$0xff]  ;;  %v11687_v38 = vpack.c.bf16 %v4212_v27, %v4211_v34  ;;  %v11659_v55 = vpack.c.bf16 %v4182_v3, %v4181_v41  ;;  %v11691_v56 = vpack.c.bf16 %v4214_v50, %v4213_v42  ;;  %v4203_v19 = vld [vmem:[%s18315_s6 + $0xad0] sm:$0xff]  ;;  %v4204_v20 = vld [vmem:[%s18315_s6 + $0xad8] sm:$0xff]  ;;  %p12211_p11 = scmp.ne.s32.totalorder %s18269_s17, %s12210_s19  ;;  %p12218_p1 = scmp.lt.s32.totalorder %s12216_s23, %s12210_s19 }
 0x2ac   : > { %v11689_v47 = vpack.c.bf16 %v4230_v29, %v4229_v9  ;;  %v4217_v15 = vld [vmem:[%s18315_s6 + $0xb40] sm:$0xff]  ;;  %v11669_v45 = vpack.c.bf16 %v4204_v20, %v4203_v19  ;;  %v4187_v34 = vld [vmem:[%s18315_s6 + $0xa50] sm:$0xff]  ;;  %v4220_v37 = vld [vmem:[%s18315_s6 + $0xb58] sm:$0xff] }
 0x2ad   : > { %v16677_v2 = vadd.f32 %v9492_v48, %v3504_v59  ;;  %11612 = vmatpush3.bf16.msra.mxu0 %v11611_v51  ;;  %v4199_v51 = vld [vmem:[%s18315_s6 + $0xab0] sm:$0xff]  ;;  %v4200_v48 = vld [vmem:[%s18315_s6 + $0xab8] sm:$0xff]  ;;  %v11699_v25 = vpack.c.bf16 %v4218_v18, %v4217_v15  ;;  %v4205_v9 = vld [vmem:[%s18315_s6 + $0xae0] sm:$0xff]  ;;  %p12212_p12 = pnand %p12211_p11, %p12380_p5  ;;  %p12219_p2 = por %p12218_p1, %p12217_p0 }
 0x2ae   : > { %11644 = vmatpush3.bf16.msra.mxu1 %v11643_v53  ;;  %11614 = vmatprep.subr.bf16.mxu0 %v11613_v7  ;;  %v4231_v53 = vld [vmem:[%s18315_s6 + $0xbb0] sm:$0xff]  ;;  %v4232_v7 = vld [vmem:[%s18315_s6 + $0xbb8] sm:$0xff]  ;;  %v11661_v57 = vpack.c.bf16 %v4200_v48, %v4199_v51  ;;  %v4206_v29 = vld [vmem:[%s18315_s6 + $0xae8] sm:$0xff] }
 0x2af   : > { %11646 = vmatprep.subr.bf16.mxu1 %v11645_v61  ;;  %v4183_v59 = vld [vmem:[%s18315_s6 + $0xa30] sm:$0xff]  ;;  %v4184_v61 = vld [vmem:[%s18315_s6 + $0xa38] sm:$0xff]  ;;  %v11693_v17 = vpack.c.bf16 %v4232_v7, %v4231_v53  ;;  %v11673_v3 = vpack.c.bf16 %v4206_v29, %v4205_v9  ;;  %v4189_v42 = vld [vmem:[%s18315_s6 + $0xa60] sm:$0xff]  ;;  %p12213_p13 = pneg %p12212_p12 }
 0x2b0   : > { %v4219_v27 = vld [vmem:[%s18315_s6 + $0xb50] sm:$0xff]  ;;  %v4221_v50 = vld [vmem:[%s18315_s6 + $0xb60] sm:$0xff]  ;;  %v4222_v53 = vld [vmem:[%s18315_s6 + $0xb68] sm:$0xff] }
 0x2b1   : > { %11616 = vmatpush3.bf16.msra.mxu0 %v11615_v5  ;;  %v4233_v5 = vld [vmem:[%s18315_s6 + $0xbc0] sm:$0xff]  ;;  %v11703_v41 = vpack.c.bf16 %v4220_v37, %v4219_v27  ;;  %v4207_v7 = vld [vmem:[%s18315_s6 + $0xaf0] sm:$0xff]  ;;  %v4224_v15 = vld [vmem:[%s18315_s6 + $0xb78] sm:$0xff]  ;;  %p12220_p3 = pnand %p12219_p2, %p12213_p13 }
 0x2b2   : > { %11648 = vmatpush3.bf16.msra.mxu1 %v11647_v8  ;;  %11650 = vmatprep.subr.bf16.mxu0 %v11649_v6  ;;  %v4234_v8 = vld [vmem:[%s18315_s6 + $0xbc8] sm:$0xff]  ;;  %v11663_v6 = vpack.c.bf16 %v4184_v61, %v4183_v59  ;;  %v4239_v61 = vld [vmem:[%s18315_s6 + $0xbf0] sm:$0xff]  ;;  %v4289_v19 = vld [vmem:[%s18315_s6 + $0xd80] sm:$0xff] }
 0x2b3   : > { %11682 = vmatprep.subr.bf16.mxu1 %v11681_v13  ;;  %v4186_v13 = vld [vmem:[%s18315_s6 + $0xa48] sm:$0xff]  ;;  %v11697_v14 = vpack.c.bf16 %v4234_v8, %v4233_v5  ;;  %v11707_v5 = vpack.c.bf16 %v4222_v53, %v4221_v50  ;;  %v4259_v37 = vld [vmem:[%s18315_s6 + $0xc90] sm:$0xff]  ;;  %v4260_v9 = vld [vmem:[%s18315_s6 + $0xc98] sm:$0xff] }
 0x2b4   : > { %5050 = vmatmul.mubr.f32.vlgmr.msra.gmra.mrb[40].mxu0 %v16722_v46  ;;  %v4258_v18 = vld [vmem:[%s18315_s6 + $0xc88] sm:$0xff]  ;;  %v4291_v29 = vld [vmem:[%s18315_s6 + $0xd90] sm:$0xff] }
 0x2b5   : > { %5120 = vmatmul.mubr.f32.vlgmr.msra.gmra.mrb[40].mxu1 %v16732_v30  ;;  %11652 = vmatpush3.bf16.msra.mxu0 %v11651_v22  ;;  %v4235_v22 = vld [vmem:[%s18315_s6 + $0xbd0] sm:$0xff]  ;;  %v4290_v20 = vld [vmem:[%s18315_s6 + $0xd88] sm:$0xff] }
 0x2b6   : > { %11684 = vmatpush3.bf16.msra.mxu1 %v11683_v23  ;;  %11654 = vmatprep.subr.bf16.mxu0 %v11653_v24  ;;  %v4236_v23 = vld [vmem:[%s18315_s6 + $0xbd8] sm:$0xff]  ;;  %v11667_v24 = vpack.c.bf16 %v4186_v13, %v4185_v12  ;;  %v11709_v13 = vpack.c.bf16 %v4240_v62, %v4239_v61  ;;  %v11745_v27 = vpack.c.bf16 %v4290_v20, %v4289_v19  ;;  %v4262_v53 = vld [vmem:[%s18315_s6 + $0xca8] sm:$0xff]  ;;  %v4245_v61 = vld [vmem:[%s18315_s6 + $0xc20] sm:$0xff] }
 0x2b7   : > { %11686 = vmatprep.subr.bf16.mxu1 %v11685_v26  ;;  %5189 = vmatprep.mubr.f32.mxu0 %v16541_v35  ;;  %v4188_v26 = vld [vmem:[%s18315_s6 + $0xa58] sm:$0xff]  ;;  %v11701_v49 = vpack.c.bf16 %v4236_v23, %v4235_v22  ;;  %v4246_v62 = vld [vmem:[%s18315_s6 + $0xc28] sm:$0xff]  ;;  %v4265_v20 = vld [vmem:[%s18315_s6 + $0xcc0] sm:$0xff] }
 0x2b8   : > { %5259 = vmatprep.mubr.f32.mxu1 %v16551_v40  ;;  %v4280_v19 = vld [vmem:[%s18315_s6 + $0xd38] sm:$0xff] }
 0x2b9   : > { %11656 = vmatpush3.bf16.msra.mxu0 %v11655_v33  ;;  %v4237_v33 = vld [vmem:[%s18315_s6 + $0xbe0] sm:$0xff] }
 0x2ba   : > { %11688 = vmatpush3.bf16.msra.mxu1 %v11687_v38  ;;  %11658 = vmatprep.subr.bf16.mxu0 %v11657_v1  ;;  %v4238_v38 = vld [vmem:[%s18315_s6 + $0xbe8] sm:$0xff]  ;;  %v11671_v1 = vpack.c.bf16 %v4188_v26, %v4187_v34  ;;  %v4273_v26 = vld [vmem:[%s18315_s6 + $0xd00] sm:$0xff] }
 0x2bb   : > { %11690 = vmatprep.subr.bf16.mxu1 %v11689_v47  ;;  %v4190_v47 = vld [vmem:[%s18315_s6 + $0xa68] sm:$0xff]  ;;  %v11705_v48 = vpack.c.bf16 %v4238_v38, %v4237_v33  ;;  %v4292_v33 = vld [vmem:[%s18315_s6 + $0xd98] sm:$0xff] }
 0x2bc   : > { %v11675_v0 = vpack.c.bf16 %v4190_v47, %v4189_v42  ;;  %v4242_v34 = vld [vmem:[%s18315_s6 + $0xc08] sm:$0xff]  ;;  %v4244_v42 = vld [vmem:[%s18315_s6 + $0xc18] sm:$0xff]  ;;  %v4275_v47 = vld [vmem:[%s18315_s6 + $0xd10] sm:$0xff]  ;;  %v11749_v50 = vpack.c.bf16 %v4292_v33, %v4291_v29 }
 0x2bd   : > { %11660 = vmatpush3.bf16.msra.mxu0 %v11659_v55  ;;  %v4208_v55 = vld [vmem:[%s18315_s6 + $0xaf8] sm:$0xff]  ;;  %v4282_v29 = vld [vmem:[%s18315_s6 + $0xd48] sm:$0xff]  ;;  %v4267_v33 = vld [vmem:[%s18315_s6 + $0xcd0] sm:$0xff] }
 0x2be   : > { %11692 = vmatpush3.bf16.msra.mxu1 %v11691_v56  ;;  %11662 = vmatprep.subr.bf16.mxu0 %v11661_v57  ;;  %v8454_v56 = vld [vmem:[%s18318_s9 + $0x6] ss:$0 sm:$0xff]  ;;  %v11677_v8 = vpack.c.bf16 %v4208_v55, %v4207_v7  ;;  %v4294_v55 = vld [vmem:[%s18315_s6 + $0xda8] sm:$0xff] }
 0x2bf   : > { %11694 = vmatprep.subr.bf16.mxu1 %v11693_v17  ;;  %v4293_v7 = vld [vmem:[%s18315_s6 + $0xda0] sm:$0xff] }
 0x2c1   : > { %11664 = vmatpush3.bf16.msra.mxu0 %v11663_v6  ;;  %v4191_v6 = vld [vmem:[%s18315_s6 + $0xa70] sm:$0xff] }
 0x2c2   : > { %11696 = vmatpush3.bf16.msra.mxu1 %v11695_v10  ;;  %11666 = vmatprep.subr.bf16.mxu0 %v11665_v11  ;;  %v4192_v10 = vld [vmem:[%s18315_s6 + $0xa78] sm:$0xff]  ;;  %v4223_v11 = vld [vmem:[%s18315_s6 + $0xb70] sm:$0xff] }
 0x2c3   : > { %11698 = vmatprep.subr.bf16.mxu1 %v11697_v14  ;;  %v4257_v14 = vld [vmem:[%s18315_s6 + $0xc80] sm:$0xff]  ;;  %v11679_v23 = vpack.c.bf16 %v4192_v10, %v4191_v6  ;;  %v4296_v6 = vld [vmem:[%s18315_s6 + $0xdb8] sm:$0xff]  ;;  %v11723_v10 = vpack.c.bf16 %v4246_v62, %v4245_v61 }
 0x2c5   : > { %11668 = vmatpush3.bf16.msra.mxu0 %v11667_v24  ;;  %v11711_v24 = vpack.c.bf16 %v4224_v15, %v4223_v11  ;;  %v4248_v15 = vld [vmem:[%s18315_s6 + $0xc38] sm:$0xff] }
 0x2c6   : > { %11700 = vmatpush3.bf16.msra.mxu1 %v11699_v25  ;;  %11670 = vmatprep.subr.bf16.mxu0 %v11669_v45  ;;  %v11713_v25 = vpack.c.bf16 %v4258_v18, %v4257_v14  ;;  %v4241_v45 = vld [vmem:[%s18315_s6 + $0xc00] sm:$0xff]  ;;  %v4279_v14 = vld [vmem:[%s18315_s6 + $0xd30] sm:$0xff] }
 0x2c7   : > { %v9525_v51 = vpop.f32.mrb[28].mxu0  ;;  %11702 = vmatprep.subr.bf16.mxu1 %v11701_v49  ;;  %v4274_v49 = vld [vmem:[%s18315_s6 + $0xd08] sm:$0xff]  ;;  %v11715_v38 = vpack.c.bf16 %v4242_v34, %v4241_v45  ;;  %v11759_v34 = vpack.c.bf16 %v4280_v19, %v4279_v14  ;;  %v4303_v14 = vld [vmem:[%s18315_s6 + $0xdf0] sm:$0xff] }
 0x2c8   : > { %v9526_v57 = vpop.f32.mrb[29].mxu0  ;;  %v9560_v59 = vpop.f32.mrb[28].mxu1 }
 0x2c9   : > { %v9527_v17 = vadd.f32 %v9526_v57, %v9525_v51  ;;  %11672 = vmatpush3.bf16.msra.mxu0 %v11671_v1  ;;  %v9561_v63 = vpop.f32.mrb[29].mxu1  ;;  %v11747_v1 = vpack.c.bf16 %v4274_v49, %v4273_v26  ;;  %v4276_v51 = vld [vmem:[%s18315_s6 + $0xd18] sm:$0xff]  ;;  %v4250_v49 = vld [vmem:[%s18315_s6 + $0xc48] sm:$0xff] }
 0x2ca   : > { %11704 = vmatpush3.bf16.msra.mxu1 %v11703_v41  ;;  %v9562_v21 = vadd.f32 %v9561_v63, %v9560_v59  ;;  %11674 = vmatprep.subr.bf16.mxu0 %v11673_v3  ;;  %v11717_v41 = vpack.c.bf16 %v4260_v9, %v4259_v37  ;;  %v4243_v3 = vld [vmem:[%s18315_s6 + $0xc10] sm:$0xff]  ;;  %v11751_v57 = vpack.c.bf16 %v4276_v51, %v4275_v47  ;;  %v4281_v37 = vld [vmem:[%s18315_s6 + $0xd40] sm:$0xff]  ;;  %v4252_v51 = vld [vmem:[%s18315_s6 + $0xc58] sm:$0xff] }
 0x2cb   : > { %v3644_v12 = vadd.f32 %v9527_v17, %v8454_v56  ;;  %11706 = vmatprep.subr.bf16.mxu1 %v11705_v48  ;;  %v4261_v48 = vld [vmem:[%s18315_s6 + $0xca0] sm:$0xff]  ;;  %v11719_v56 = vpack.c.bf16 %v4244_v42, %v4243_v3  ;;  %v11753_v63 = vpack.c.bf16 %v4294_v55, %v4293_v7  ;;  %v11763_v42 = vpack.c.bf16 %v4282_v29, %v4281_v37  ;;  %v4284_v7 = vld [vmem:[%s18315_s6 + $0xd58] sm:$0xff] }
 0x2cc   : > { %v11721_v59 = vpack.c.bf16 %v4262_v53, %v4261_v48  ;;  %v4277_v17 = vld [vmem:[%s18315_s6 + $0xd20] sm:$0xff]  ;;  %v4283_v48 = vld [vmem:[%s18315_s6 + $0xd50] sm:$0xff] }
 0x2cd   : > { %v16884_v22 = vadd.f32 %v9562_v21, %v3644_v12  ;;  %11676 = vmatpush3.bf16.msra.mxu0 %v11675_v0  ;;  %v4278_v0 = vld [vmem:[%s18315_s6 + $0xd28] sm:$0xff]  ;;  %v4263_v21 = vld [vmem:[%s18315_s6 + $0xcb0] sm:$0xff]  ;;  %v4269_v55 = vld [vmem:[%s18315_s6 + $0xce0] sm:$0xff]  ;;  %v11767_v62 = vpack.c.bf16 %v4284_v7, %v4283_v48 }
 0x2ce   : > { %11708 = vmatpush3.bf16.msra.mxu1 %v11707_v5  ;;  %11678 = vmatprep.subr.bf16.mxu0 %v11677_v8  ;;  %v4264_v5 = vld [vmem:[%s18315_s6 + $0xcb8] sm:$0xff]  ;;  %v4295_v8 = vld [vmem:[%s18315_s6 + $0xdb0] sm:$0xff]  ;;  %v11755_v11 = vpack.c.bf16 %v4278_v0, %v4277_v17  ;;  %v4254_v0 = vld [vmem:[%s18315_s6 + $0xc68] sm:$0xff] }
 0x2cf   : > { %11710 = vmatprep.subr.bf16.mxu1 %v11709_v13  ;;  %v11725_v12 = vpack.c.bf16 %v4264_v5, %v4263_v21  ;;  %v4247_v13 = vld [vmem:[%s18315_s6 + $0xc30] sm:$0xff]  ;;  %v11757_v18 = vpack.c.bf16 %v4296_v6, %v4295_v8  ;;  %v4285_v21 = vld [vmem:[%s18315_s6 + $0xd60] sm:$0xff]  ;;  %v4286_v6 = vld [vmem:[%s18315_s6 + $0xd68] sm:$0xff] }
 0x2d0   : > { %v11727_v45 = vpack.c.bf16 %v4248_v15, %v4247_v13  ;;  %v4321_v29 = vld [vmem:[%s18315_s6 + $0xe80] sm:$0xff]  ;;  %v4338_v7 = vld [vmem:[%s18315_s6 + $0xf08] sm:$0xff] }
 0x2d1   : > { %11680 = vmatpush3.bf16.msra.mxu0 %v11679_v23  ;;  %v4266_v23 = vld [vmem:[%s18315_s6 + $0xcc8] sm:$0xff]  ;;  %v4337_v48 = vld [vmem:[%s18315_s6 + $0xf00] sm:$0xff] }
 0x2d2   : > { %11712 = vmatpush3.bf16.msra.mxu1 %v11711_v24  ;;  %11714 = vmatprep.subr.bf16.mxu0 %v11713_v25  ;;  %v4297_v24 = vld [vmem:[%s18315_s6 + $0xdc0] sm:$0xff]  ;;  %v4298_v25 = vld [vmem:[%s18315_s6 + $0xdc8] sm:$0xff]  ;;  %v11729_v26 = vpack.c.bf16 %v4266_v23, %v4265_v20 }
 0x2d3   : > { %11746 = vmatprep.subr.bf16.mxu1 %v11745_v27  ;;  %v4249_v27 = vld [vmem:[%s18315_s6 + $0xc40] sm:$0xff]  ;;  %v11761_v9 = vpack.c.bf16 %v4298_v25, %v4297_v24  ;;  %v11771_v25 = vpack.c.bf16 %v4286_v6, %v4285_v21  ;;  %v4339_v21 = vld [vmem:[%s18315_s6 + $0xf10] sm:$0xff] }
 0x2d4   : > { %5190 = vmatmul.mubr.f32.vlgmr.msra.gmra.mrb[42].mxu0 %v16722_v46  ;;  %v11731_v3 = vpack.c.bf16 %v4250_v49, %v4249_v27  ;;  %v4287_v27 = vld [vmem:[%s18315_s6 + $0xd70] sm:$0xff]  ;;  %v4325_v6 = vld [vmem:[%s18315_s6 + $0xea0] sm:$0xff] }
 0x2d5   : > { %5260 = vmatmul.mubr.f32.vlgmr.msra.gmra.mrb[42].mxu1 %v16732_v30  ;;  %11716 = vmatpush3.bf16.msra.mxu0 %v11715_v38  ;;  %v4268_v38 = vld [vmem:[%s18315_s6 + $0xcd8] sm:$0xff] }
 0x2d6   : > { %11748 = vmatpush3.bf16.msra.mxu1 %v11747_v1  ;;  %11718 = vmatprep.subr.bf16.mxu0 %v11717_v41  ;;  %v4299_v1 = vld [vmem:[%s18315_s6 + $0xdd0] sm:$0xff]  ;;  %v4300_v41 = vld [vmem:[%s18315_s6 + $0xdd8] sm:$0xff]  ;;  %v11733_v47 = vpack.c.bf16 %v4268_v38, %v4267_v33  ;;  %v4322_v33 = vld [vmem:[%s18315_s6 + $0xe88] sm:$0xff] }
 0x2d7   : > { %11750 = vmatprep.subr.bf16.mxu1 %v11749_v50  ;;  %5329 = vmatprep.mubr.f32.mxu0 %v16541_v35  ;;  %v4251_v50 = vld [vmem:[%s18315_s6 + $0xc50] sm:$0xff]  ;;  %v11765_v53 = vpack.c.bf16 %v4300_v41, %v4299_v1  ;;  %v4353_v38 = vld [vmem:[%s18315_s6 + $0xf80] sm:$0xff]  ;;  %v4354_v1 = vld [vmem:[%s18315_s6 + $0xf88] sm:$0xff] }
 0x2d8   : > { %5399 = vmatprep.mubr.f32.mxu1 %v16551_v40  ;;  %v11735_v61 = vpack.c.bf16 %v4252_v51, %v4251_v50  ;;  %v4305_v50 = vld [vmem:[%s18315_s6 + $0xe00] sm:$0xff]  ;;  %v4306_v51 = vld [vmem:[%s18315_s6 + $0xe08] sm:$0xff] }
 0x2d9   : > { %11720 = vmatpush3.bf16.msra.mxu0 %v11719_v56  ;;  %v4270_v56 = vld [vmem:[%s18315_s6 + $0xce8] sm:$0xff] }
 0x2da   : > { %11752 = vmatpush3.bf16.msra.mxu1 %v11751_v57  ;;  %11722 = vmatprep.subr.bf16.mxu0 %v11721_v59  ;;  %v4301_v57 = vld [vmem:[%s18315_s6 + $0xde0] sm:$0xff]  ;;  %v4302_v59 = vld [vmem:[%s18315_s6 + $0xde8] sm:$0xff]  ;;  %v11737_v17 = vpack.c.bf16 %v4270_v56, %v4269_v55  ;;  %v4323_v55 = vld [vmem:[%s18315_s6 + $0xe90] sm:$0xff] }
 0x2db   : > { %11754 = vmatprep.subr.bf16.mxu1 %v11753_v63  ;;  %v4253_v63 = vld [vmem:[%s18315_s6 + $0xc60] sm:$0xff]  ;;  %v11769_v8 = vpack.c.bf16 %v4302_v59, %v4301_v57  ;;  %v4324_v56 = vld [vmem:[%s18315_s6 + $0xe98] sm:$0xff]  ;;  %v4355_v57 = vld [vmem:[%s18315_s6 + $0xf90] sm:$0xff] }
 0x2dc   : > { %v11739_v23 = vpack.c.bf16 %v4254_v0, %v4253_v63  ;;  %v4356_v59 = vld [vmem:[%s18315_s6 + $0xf98] sm:$0xff]  ;;  %v4307_v63 = vld [vmem:[%s18315_s6 + $0xe10] sm:$0xff] }
 0x2dd   : > { %11724 = vmatpush3.bf16.msra.mxu0 %v11723_v10  ;;  %v4271_v10 = vld [vmem:[%s18315_s6 + $0xcf0] sm:$0xff]  ;;  %v4308_v0 = vld [vmem:[%s18315_s6 + $0xe18] sm:$0xff] }
 0x2de   : > { %11756 = vmatpush3.bf16.msra.mxu1 %v11755_v11  ;;  %11726 = vmatprep.subr.bf16.mxu0 %v11725_v12  ;;  %v4272_v11 = vld [vmem:[%s18315_s6 + $0xcf8] sm:$0xff]  ;;  %v8455_v12 = vld [vmem:[%s18318_s9 + $0x7] ss:$0 sm:$0xff] }
 0x2df   : > { %11758 = vmatprep.subr.bf16.mxu1 %v11757_v18  ;;  %v4304_v18 = vld [vmem:[%s18315_s6 + $0xdf8] sm:$0xff] }
 0x2e0   : > { %v11773_v37 = vpack.c.bf16 %v4304_v18, %v4303_v14  ;;  %v4309_v18 = vld [vmem:[%s18315_s6 + $0xe20] sm:$0xff] }
 0x2e1   : > { %11728 = vmatpush3.bf16.msra.mxu0 %v11727_v45  ;;  %v11741_v45 = vpack.c.bf16 %v4272_v11, %v4271_v10  ;;  %v4326_v10 = vld [vmem:[%s18315_s6 + $0xea8] sm:$0xff]  ;;  %v4357_v11 = vld [vmem:[%s18315_s6 + $0xfa0] sm:$0xff] }
 0x2e2   : > { %11760 = vmatpush3.bf16.msra.mxu1 %v11759_v34  ;;  %11730 = vmatprep.subr.bf16.mxu0 %v11729_v26  ;;  %v4255_v34 = vld [vmem:[%s18315_s6 + $0xc70] sm:$0xff]  ;;  %v4256_v26 = vld [vmem:[%s18315_s6 + $0xc78] sm:$0xff]  ;;  %v11785_v14 = vpack.c.bf16 %v4326_v10, %v4325_v6 }
 0x2e3   : > { %11762 = vmatprep.subr.bf16.mxu1 %v11761_v9  ;;  %v4288_v9 = vld [vmem:[%s18315_s6 + $0xd78] sm:$0xff] }
 0x2e4   : > { %v4348_v10 = vld [vmem:[%s18315_s6 + $0xf58] sm:$0xff] }
 0x2e5   : > { %11732 = vmatpush3.bf16.msra.mxu0 %v11731_v3  ;;  %v11743_v3 = vpack.c.bf16 %v4256_v26, %v4255_v34  ;;  %v4359_v34 = vld [vmem:[%s18315_s6 + $0xfb0] sm:$0xff]  ;;  %v4360_v26 = vld [vmem:[%s18315_s6 + $0xfb8] sm:$0xff] }
 0x2e6   : > { %11764 = vmatpush3.bf16.msra.mxu1 %v11763_v42  ;;  %11734 = vmatprep.subr.bf16.mxu0 %v11733_v47  ;;  %v11775_v42 = vpack.c.bf16 %v4288_v9, %v4287_v27  ;;  %v11777_v47 = vpack.c.bf16 %v4322_v33, %v4321_v29  ;;  %v4312_v9 = vld [vmem:[%s18315_s6 + $0xe38] sm:$0xff]  ;;  %v4343_v29 = vld [vmem:[%s18315_s6 + $0xf30] sm:$0xff] }
 0x2e7   : > { %v9595_v5 = vpop.f32.mrb[30].mxu0  ;;  %11766 = vmatprep.subr.bf16.mxu1 %v11765_v53  ;;  %v11809_v53 = vpack.c.bf16 %v4354_v1, %v4353_v38  ;;  %v4344_v33 = vld [vmem:[%s18315_s6 + $0xf38] sm:$0xff]  ;;  %v4329_v38 = vld [vmem:[%s18315_s6 + $0xec0] sm:$0xff]  ;;  %v4330_v1 = vld [vmem:[%s18315_s6 + $0xec8] sm:$0xff] }
 0x2e8   : > { %v9596_v13 = vpop.f32.mrb[31].mxu0  ;;  %v9630_v15 = vpop.f32.mrb[30].mxu1 }
 0x2e9   : > { %v9597_v19 = vadd.f32 %v9596_v13, %v9595_v5  ;;  %11736 = vmatpush3.bf16.msra.mxu0 %v11735_v61  ;;  %v9631_v20 = vpop.f32.mrb[31].mxu1  ;;  %v11779_v61 = vpack.c.bf16 %v4306_v51, %v4305_v50  ;;  %v11813_v5 = vpack.c.bf16 %v4356_v59, %v4355_v57  ;;  %v11783_v13 = vpack.c.bf16 %v4308_v0, %v4307_v63  ;;  %v4331_v57 = vld [vmem:[%s18315_s6 + $0xed0] sm:$0xff]  ;;  %v4332_v59 = vld [vmem:[%s18315_s6 + $0xed8] sm:$0xff] }
 0x2ea   : > { %11768 = vmatpush3.bf16.msra.mxu1 %v11767_v62  ;;  %v9632_v24 = vadd.f32 %v9631_v20, %v9630_v15  ;;  %11738 = vmatprep.subr.bf16.mxu0 %v11737_v17  ;;  %v11811_v62 = vpack.c.bf16 %v4338_v7, %v4337_v48  ;;  %v11781_v17 = vpack.c.bf16 %v4324_v56, %v4323_v55  ;;  %v4341_v20 = vld [vmem:[%s18315_s6 + $0xf20] sm:$0xff]  ;;  %v4346_v56 = vld [vmem:[%s18315_s6 + $0xf48] sm:$0xff] }
 0x2eb   : > { %v3784_v49 = vadd.f32 %v9597_v19, %v8455_v12  ;;  %11770 = vmatprep.subr.bf16.mxu1 %v11769_v8  ;;  %v4340_v8 = vld [vmem:[%s18315_s6 + $0xf18] sm:$0xff]  ;;  %v4358_v12 = vld [vmem:[%s18315_s6 + $0xfa8] sm:$0xff]  ;;  %v11823_v50 = vpack.c.bf16 %v4344_v33, %v4343_v29  ;;  %v11793_v51 = vpack.c.bf16 %v4330_v1, %v4329_v38  ;;  %v4313_v48 = vld [vmem:[%s18315_s6 + $0xe40] sm:$0xff]  ;;  %v11797_v0 = vpack.c.bf16 %v4332_v59, %v4331_v57 }
 0x2ec   : > { %v11815_v15 = vpack.c.bf16 %v4340_v8, %v4339_v21  ;;  %v4310_v19 = vld [vmem:[%s18315_s6 + $0xe28] sm:$0xff]  ;;  %v4345_v7 = vld [vmem:[%s18315_s6 + $0xf40] sm:$0xff]  ;;  %v4315_v21 = vld [vmem:[%s18315_s6 + $0xe50] sm:$0xff]  ;;  %v12274_v59 = vmov 0.0  }
 0x2ed   : > { %v17085_v41 = vadd.f32 %v9632_v24, %v3784_v49  ;;  %11740 = vmatpush3.bf16.msra.mxu0 %v11739_v23  ;;  %v11817_v23 = vpack.c.bf16 %v4358_v12, %v4357_v11  ;;  %v4342_v24 = vld [vmem:[%s18315_s6 + $0xf28] sm:$0xff]  ;;  %v11787_v27 = vpack.c.bf16 %v4310_v19, %v4309_v18  ;;  %v11827_v63 = vpack.c.bf16 %v4346_v56, %v4345_v7  ;;  %v4347_v8 = vld [vmem:[%s18315_s6 + $0xf50] sm:$0xff]  ;;  %v4333_v11 = vld [vmem:[%s18315_s6 + $0xee0] sm:$0xff] }
 0x2ee   : > { %11772 = vmatpush3.bf16.msra.mxu1 %v11771_v25  ;;  %11742 = vmatprep.subr.bf16.mxu0 %v11741_v45  ;;  %v4327_v25 = vld [vmem:[%s18315_s6 + $0xeb0] sm:$0xff]  ;;  %v4328_v45 = vld [vmem:[%s18315_s6 + $0xeb8] sm:$0xff]  ;;  %v11819_v49 = vpack.c.bf16 %v4342_v24, %v4341_v20  ;;  %v4334_v12 = vld [vmem:[%s18315_s6 + $0xee8] sm:$0xff]  ;;  %v11831_v18 = vpack.c.bf16 %v4348_v10, %v4347_v8 }
 0x2ef   : > { %11774 = vmatprep.subr.bf16.mxu1 %v11773_v37  ;;  %v11789_v37 = vpack.c.bf16 %v4328_v45, %v4327_v25  ;;  %v11801_v19 = vpack.c.bf16 %v4334_v12, %v4333_v11  ;;  %v4317_v20 = vld [vmem:[%s18315_s6 + $0xe60] sm:$0xff]  ;;  %v4368_v29 = vld [vmem:[%s18315_s6 + $0xff8] sm:$0xff] }
 0x2f0   : > { %v4349_v24 = vld [vmem:[%s18315_s6 + $0xf60] sm:$0xff]  ;;  %v4352_v7 = vld [vmem:[%s18315_s6 + $0xf78] sm:$0xff] }
 0x2f1   : > { %11744 = vmatpush3.bf16.msra.mxu0 %v11743_v3  ;;  %v4361_v3 = vld [vmem:[%s18315_s6 + $0xfc0] sm:$0xff] }
 0x2f2   : > { %11776 = vmatpush3.bf16.msra.mxu1 %v11775_v42  ;;  %11778 = vmatprep.subr.bf16.mxu0 %v11777_v47  ;;  %v4362_v42 = vld [vmem:[%s18315_s6 + $0xfc8] sm:$0xff]  ;;  %v8460_v11 = vld [vmem:[%s18319_s10 + $0x4] ss:$0 sm:$0xff] }
 0x2f3   : > { %11810 = vmatprep.subr.bf16.mxu1 %v11809_v53  ;;  %v4314_v53 = vld [vmem:[%s18315_s6 + $0xe48] sm:$0xff]  ;;  %v11825_v55 = vpack.c.bf16 %v4362_v42, %v4361_v3 }
 0x2f4   : > { %5330 = vmatmul.mubr.f32.vlgmr.msra.gmra.mrb[44].mxu0 %v16722_v46 }
 0x2f5   : > { %5400 = vmatmul.mubr.f32.vlgmr.msra.gmra.mrb[44].mxu1 %v16732_v30  ;;  %11780 = vmatpush3.bf16.msra.mxu0 %v11779_v61  ;;  %v4363_v61 = vld [vmem:[%s18315_s6 + $0xfd0] sm:$0xff] }
 0x2f6   : > { %11812 = vmatpush3.bf16.msra.mxu1 %v11811_v62  ;;  %11782 = vmatprep.subr.bf16.mxu0 %v11781_v17  ;;  %v4364_v62 = vld [vmem:[%s18315_s6 + $0xfd8] sm:$0xff]  ;;  %v11795_v17 = vpack.c.bf16 %v4314_v53, %v4313_v48  ;;  %v4351_v53 = vld [vmem:[%s18315_s6 + $0xf70] sm:$0xff] }
 0x2f7   : > { %11814 = vmatprep.subr.bf16.mxu1 %v11813_v5  ;;  %5469 = vmatprep.mubr.f32.mxu0 %v16541_v35  ;;  %v4311_v35 = vld [vmem:[%s18315_s6 + $0xe30] sm:$0xff]  ;;  %v4316_v5 = vld [vmem:[%s18315_s6 + $0xe58] sm:$0xff]  ;;  %v11829_v6 = vpack.c.bf16 %v4364_v62, %v4363_v61  ;;  %v11839_v57 = vpack.c.bf16 %v4352_v7, %v4351_v53  ;;  %v8459_v62 = vld [vmem:[%s18319_s10 + $0x3] ss:$0 sm:$0xff] }
 0x2f8   : > { %5539 = vmatprep.mubr.f32.mxu1 %v16551_v40  ;;  %v11821_v40 = vpack.c.bf16 %v4360_v26, %v4359_v34  ;;  %v11791_v47 = vpack.c.bf16 %v4312_v9, %v4311_v35  ;;  %v4350_v34 = vld [vmem:[%s18315_s6 + $0xf68] sm:$0xff]  ;;  %v4335_v26 = vld [vmem:[%s18315_s6 + $0xef0] sm:$0xff] }
 0x2f9   : > { %11784 = vmatpush3.bf16.msra.mxu0 %v11783_v13  ;;  %v4365_v13 = vld [vmem:[%s18315_s6 + $0xfe0] sm:$0xff]  ;;  %v4367_v9 = vld [vmem:[%s18315_s6 + $0xff0] sm:$0xff]  ;;  %v11835_v3 = vpack.c.bf16 %v4350_v34, %v4349_v24 }
 0x2fa   : > { %11816 = vmatpush3.bf16.msra.mxu1 %v11815_v15  ;;  %11786 = vmatprep.subr.bf16.mxu0 %v11785_v14  ;;  %v4366_v15 = vld [vmem:[%s18315_s6 + $0xfe8] sm:$0xff]  ;;  %v11799_v14 = vpack.c.bf16 %v4316_v5, %v4315_v21  ;;  %v11837_v48 = vpack.c.bf16 %v4368_v29, %v4367_v9  ;;  %v8461_v24 = vld [vmem:[%s18319_s10 + $0x5] ss:$0 sm:$0xff]  ;;  %v8462_v9 = vld [vmem:[%s18319_s10 + $0x6] ss:$0 sm:$0xff] }
 0x2fb   : > { %11818 = vmatprep.subr.bf16.mxu1 %v11817_v23  ;;  %v4318_v23 = vld [vmem:[%s18315_s6 + $0xe68] sm:$0xff]  ;;  %v11833_v45 = vpack.c.bf16 %v4366_v15, %v4365_v13 }
 0x2fc   : > { %v11803_v38 = vpack.c.bf16 %v4318_v23, %v4317_v20 }
 0x2fd   : > { %11788 = vmatpush3.bf16.msra.mxu0 %v11787_v27  ;;  %v4336_v27 = vld [vmem:[%s18315_s6 + $0xef8] sm:$0xff] }
 0x2fe   : > { %11820 = vmatpush3.bf16.msra.mxu1 %v11819_v49  ;;  %11790 = vmatprep.subr.bf16.mxu0 %v11789_v37  ;;  %v8456_v49 = vld [vmem:[%s18319_s10] ss:$0 sm:$0xff]  ;;  %v11805_v42 = vpack.c.bf16 %v4336_v27, %v4335_v26 }
 0x2ff   : > { %11822 = vmatprep.subr.bf16.mxu1 %v11821_v40 }
 0x301   : > { %11792 = vmatpush3.bf16.msra.mxu0 %v11791_v47  ;;  %v4319_v47 = vld [vmem:[%s18315_s6 + $0xe70] sm:$0xff] }
 0x302   : > { %11824 = vmatpush3.bf16.msra.mxu1 %v11823_v50  ;;  %11794 = vmatprep.subr.bf16.mxu0 %v11793_v51  ;;  %v4320_v50 = vld [vmem:[%s18315_s6 + $0xe78] sm:$0xff] }
 0x303   : > { %11826 = vmatprep.subr.bf16.mxu1 %v11825_v55  ;;  %v11807_v56 = vpack.c.bf16 %v4320_v50, %v4319_v47  ;;  %v8463_v50 = vld [vmem:[%s18319_s10 + $0x7] ss:$0 sm:$0xff] }
 0x305   : > { %11796 = vmatpush3.bf16.msra.mxu0 %v11795_v17 }
 0x306   : > { %11828 = vmatpush3.bf16.msra.mxu1 %v11827_v63  ;;  %11798 = vmatprep.subr.bf16.mxu0 %v11797_v0 }
 0x307   : > { %v9665_v25 = vpop.f32.mrb[32].mxu0  ;;  %11830 = vmatprep.subr.bf16.mxu1 %v11829_v6 }
 0x308   : > { %v9666_v37 = vpop.f32.mrb[33].mxu0  ;;  %v9700_v35 = vpop.f32.mrb[32].mxu1 }
 0x309   : > { %v9667_v40 = vadd.f32 %v9666_v37, %v9665_v25  ;;  %11800 = vmatpush3.bf16.msra.mxu0 %v11799_v14  ;;  %v9701_v33 = vpop.f32.mrb[33].mxu1 }
 0x30a   : > { %11832 = vmatpush3.bf16.msra.mxu1 %v11831_v18  ;;  %v9702_v1 = vadd.f32 %v9701_v33, %v9700_v35  ;;  %11802 = vmatprep.subr.bf16.mxu0 %v11801_v19 }
 0x30b   : > { %v4492_v51 = vadd.f32 %v9667_v40, %v8456_v49  ;;  %11834 = vmatprep.subr.bf16.mxu1 %v11833_v45 }
 0x30d   : > { %v4562_v55 = vadd.f32 %v9702_v1, %v4492_v51  ;;  %11804 = vmatpush3.bf16.msra.mxu0 %v11803_v38 }
 0x30e   : > { %11836 = vmatpush3.bf16.msra.mxu1 %v11835_v3  ;;  %11806 = vmatprep.subr.bf16.mxu0 %v11805_v42 }
 0x30f   : > { %11838 = vmatprep.subr.bf16.mxu1 %v11837_v48 }
 0x311   : > { %11808 = vmatpush3.bf16.msra.mxu0 %v11807_v56 }
 0x312   : > { %11840 = vmatpush3.bf16.msra.mxu1 %v11839_v57  ;;  %10225 = vmatprep.subr.mxu0 %v12274_v59 }
 0x313   : > { %10230 = vmatprep.subr.mxu1 %v12274_v59 }
 0x314   : > { %5470 = vmatmul.mubr.f32.vlgmr.msra.gmra.mrb[46].mxu0 %v16722_v46 }
 0x315   : > { %5540 = vmatmul.mubr.f32.vlgmr.msra.gmra.mrb[46].mxu1 %v16732_v30  ;;  %10227 = vmatprep.mubr.msk.f32.mxu0 %vm12275_vm0, %v12274_v59 }
 0x316   : > { %10232 = vmatprep.mubr.msk.f32.mxu1 %vm12275_vm0, %v12274_v59 }
 0x31a   : > { %10226 = vmatpush3.xpose.msk.msra.mxu0 %vm5545_vm1, %v15648_v39 }
 0x31b   : > { %10231 = vmatpush3.xpose.msk.msra.mxu1 %vm5545_vm1, %v15861_v36  ;;  %10235 = vmatprep.subr.mxu0 %v12274_v59 }
 0x31c   : > { %10240 = vmatprep.subr.mxu1 %v12274_v59 }
 0x31d   : > { %10228 = vmatmul.mubr.msk.f32.vlgmr.msra.gmra.mrb[48].mxu0 %vm5545_vm1, %v14010_v31 }
 0x31e   : > { %10233 = vmatmul.mubr.msk.f32.vlgmr.msra.gmra.mrb[48].mxu1 %vm5545_vm1, %v14223_v32  ;;  %10236 = vmatpush3.xpose.msk.msra.mxu0 %vm5545_vm1, %v16068_v44  ;;  %v8457_v32 = vld [vmem:[%s18319_s10 + $0x1] ss:$0 sm:$0xff] }
 0x31f   : > { %10241 = vmatpush3.xpose.msk.msra.mxu1 %vm5545_vm1, %v16269_v54  ;;  %10237 = vmatprep.mubr.msk.f32.mxu0 %vm12275_vm0, %v12274_v59 }
 0x320   : > { %10242 = vmatprep.mubr.msk.f32.mxu1 %vm12275_vm0, %v12274_v59  ;;  %10245 = vmatprep.subr.mxu0 %v12274_v59 }
 0x321   : > { %10238 = vmatmul.mubr.msk.f32.vlgmr.msra.gmra.mrb[50].mxu0 %vm5545_vm1, %v14430_v16  ;;  %10250 = vmatprep.subr.mxu1 %v12274_v59 }
 0x322   : > { %10243 = vmatmul.mubr.msk.f32.vlgmr.msra.gmra.mrb[50].mxu1 %vm5545_vm1, %v14631_v4  ;;  %10246 = vmatpush3.xpose.msk.msra.mxu0 %vm5545_vm1, %v16470_v60 }
 0x323   : > { %10251 = vmatpush3.xpose.msk.msra.mxu1 %vm5545_vm1, %v16677_v2  ;;  %10247 = vmatprep.mubr.msk.f32.mxu0 %vm12275_vm0, %v12274_v59 }
 0x324   : > { %10252 = vmatprep.mubr.msk.f32.mxu1 %vm12275_vm0, %v12274_v59  ;;  %10255 = vmatprep.subr.mxu0 %v12274_v59 }
 0x325   : > { %10248 = vmatmul.mubr.msk.f32.vlgmr.msra.gmra.mrb[52].mxu0 %vm5545_vm1, %v14832_v58  ;;  %10260 = vmatprep.subr.mxu1 %v12274_v59 }
 0x326   : > { %10253 = vmatmul.mubr.msk.f32.vlgmr.msra.gmra.mrb[52].mxu1 %vm5545_vm1, %v15039_v52  ;;  %10256 = vmatpush3.xpose.msk.msra.mxu0 %vm5545_vm1, %v16884_v22 }
 0x327   : > { %10261 = vmatpush3.xpose.msk.msra.mxu1 %vm5545_vm1, %v17085_v41  ;;  %v9735_v31 = vpop.f32.mrb[34].mxu0  ;;  %10257 = vmatprep.mubr.msk.f32.mxu0 %vm12275_vm0, %v12274_v59 }
 0x328   : > { %v9736_v16 = vpop.f32.mrb[35].mxu0  ;;  %10262 = vmatprep.mubr.msk.f32.mxu1 %vm12275_vm0, %v12274_v59  ;;  %v9770_v4 = vpop.f32.mrb[34].mxu1  ;;  %10265 = vmatprep.subr.mxu0 %v12274_v59 }
 0x329   : > { %v9737_v58 = vadd.f32 %v9736_v16, %v9735_v31  ;;  %10258 = vmatmul.mubr.msk.f32.vlgmr.msra.gmra.mrb[54].mxu0 %vm5545_vm1, %v15246_v28  ;;  %v9771_v52 = vpop.f32.mrb[35].mxu1  ;;  %10270 = vmatprep.subr.mxu1 %v12274_v59 }
 0x32a   : > { %10263 = vmatmul.mubr.msk.f32.vlgmr.msra.gmra.mrb[54].mxu1 %vm5545_vm1, %v15447_v43  ;;  %v9772_v39 = vadd.f32 %v9771_v52, %v9770_v4  ;;  %10266 = vmatpush3.msra.mxu0 %v4562_v55  ;;  %v8458_v43 = vld [vmem:[%s18319_s10 + $0x2] ss:$0 sm:$0xff] }
 0x32b   : > { %v4632_v36 = vadd.f32 %v9737_v58, %v8457_v32  ;;  %10267 = vmatprep.mubr.msk.f32.mxu0 %vm12275_vm0, %v12274_v59  ;;  %10275 = vmatprep.subr.mxu0 %v12274_v59  ;;  %v6162_v32 = vld [vmem:[%s468_s26] sm:$0xff] }
 0x32c   : > { %10272 = vmatprep.mubr.msk.f32.mxu1 %vm12275_vm0, %v12274_v59 }
 0x32d   : > { %v4702_v44 = vadd.f32 %v9772_v39, %v4632_v36 }
 0x32f   : > { %10271 = vmatpush3.msra.mxu1 %v4702_v44 }
 0x330   : > { %10280 = vmatprep.subr.mxu1 %v12274_v59 }
 0x347   : > { %v9805_v28 = vpop.f32.mrb[36].mxu0 }
 0x348   : > { %v9806_v54 = vpop.f32.mrb[37].mxu0  ;;  %v9840_v60 = vpop.f32.mrb[36].mxu1 }
 0x349   : > { %v9807_v2 = vadd.f32 %v9806_v54, %v9805_v28  ;;  %v9841_v46 = vpop.f32.mrb[37].mxu1 }
 0x34a   : > { %v9842_v30 = vadd.f32 %v9841_v46, %v9840_v60 }
 0x34b   : > { %v4772_v22 = vadd.f32 %v9807_v2, %v8458_v43 }
 0x34d   : > { %v17346_v41 = vadd.f32 %v9842_v30, %v4772_v22 }
 0x367   : > { %v9875_v61 = vpop.f32.mrb[38].mxu0 }
 0x368   : > { %v9876_v17 = vpop.f32.mrb[39].mxu0  ;;  %v9910_v63 = vpop.f32.mrb[38].mxu1 }
 0x369   : > { %v9877_v0 = vadd.f32 %v9876_v17, %v9875_v61  ;;  %v9911_v21 = vpop.f32.mrb[39].mxu1 }
 0x36a   : > { %v9912_v5 = vadd.f32 %v9911_v21, %v9910_v63 }
 0x36b   : > { %v4912_v8 = vadd.f32 %v9877_v0, %v8459_v62 }
 0x36d   : > { %v17351_v6 = vadd.f32 %v9912_v5, %v4912_v8 }
 0x387   : > { %v9945_v10 = vpop.f32.mrb[40].mxu0 }
 0x388   : > { %v9946_v12 = vpop.f32.mrb[41].mxu0  ;;  %v9980_v13 = vpop.f32.mrb[40].mxu1 }
 0x389   : > { %v9947_v15 = vadd.f32 %v9946_v12, %v9945_v10  ;;  %v9981_v14 = vpop.f32.mrb[41].mxu1 }
 0x38a   : > { %v9982_v18 = vadd.f32 %v9981_v14, %v9980_v13 }
 0x38b   : > { %v5052_v19 = vadd.f32 %v9947_v15, %v8460_v11 }
 0x38d   : > { %v17356_v20 = vadd.f32 %v9982_v18, %v5052_v19 }
 0x3a7   : > { %v10015_v23 = vpop.f32.mrb[42].mxu0 }
 0x3a8   : > { %v10016_v25 = vpop.f32.mrb[43].mxu0  ;;  %v10050_v45 = vpop.f32.mrb[42].mxu1 }
 0x3a9   : > { %v10017_v34 = vadd.f32 %v10016_v25, %v10015_v23  ;;  %v10051_v26 = vpop.f32.mrb[43].mxu1 }
 0x3aa   : > { %v10052_v27 = vadd.f32 %v10051_v26, %v10050_v45 }
 0x3ab   : > { %v5192_v49 = vadd.f32 %v10017_v34, %v8461_v24 }
 0x3ad   : > { %v17361_v37 = vadd.f32 %v10052_v27, %v5192_v49 }
 0x3c7   : > { %v10085_v35 = vpop.f32.mrb[44].mxu0 }
 0x3c8   : > { %v10086_v29 = vpop.f32.mrb[45].mxu0  ;;  %v10120_v40 = vpop.f32.mrb[44].mxu1 }
 0x3c9   : > { %v10087_v33 = vadd.f32 %v10086_v29, %v10085_v35  ;;  %v10121_v38 = vpop.f32.mrb[45].mxu1 }
 0x3ca   : > { %v10122_v1 = vadd.f32 %v10121_v38, %v10120_v40 }
 0x3cb   : > { %v5332_v3 = vadd.f32 %v10087_v33, %v8462_v9 }
 0x3cd   : > { %v17366_v42 = vadd.f32 %v10122_v1, %v5332_v3 }
 0x3e7   : > { %v10155_v47 = vpop.f32.mrb[46].mxu0 }
 0x3e8   : > { %v10156_v51 = vpop.f32.mrb[47].mxu0  ;;  %v10190_v48 = vpop.f32.mrb[46].mxu1 }
 0x3e9   : > { %v10157_v53 = vadd.f32 %v10156_v51, %v10155_v47  ;;  %v10191_v7 = vpop.f32.mrb[47].mxu1 }
 0x3ea   : > { %v10192_v55 = vadd.f32 %v10191_v7, %v10190_v48 }
 0x3eb   : > { %v5472_v56 = vadd.f32 %v10157_v53, %v8463_v50 }
 0x3ed   : > { %v17372_v57 = vadd.f32 %v10192_v55, %v5472_v56 }
 0x3f0   : > { %v5618_v31 = vpop.f32.mrb[48].mxu0 }
 0x3f1   : > { %v6154_v16 = vmul.f32 0.125, %v5618_v31  ;;  %v5694_v4 = vpop.f32.mrb[48].mxu1  ;;  %v10229_v58 = vpop.f32.mrb[49].mxu0 }
 0x3f2   : > { %v6155_v52 = vmul.f32 0.125, %v5694_v4  ;;  %v10234_v39 = vpop.f32.mrb[49].mxu1 }
 0x3f3   : > { %v6163_v36 = vadd.f32 %v6162_v32, %v6154_v16 }
 0x3f4   : > { %v5770_v44 = vpop.f32.mrb[50].mxu0  ;;  %v6164_v2 = vadd.f32 %v6162_v32, %v6155_v52 }
 0x3f5   : > { %v6156_v28 = vmul.f32 0.125, %v5770_v44  ;;  %v5846_v43 = vpop.f32.mrb[50].mxu1  ;;  %v10239_v54 = vpop.f32.mrb[51].mxu0  ;;  %v6172_v60 = vsel %vm6171_vm2, %v6163_v36, -inf }
 0x3f6   : > { %v6157_v46 = vmul.f32 0.125, %v5846_v43  ;;  %v10244_v30 = vpop.f32.mrb[51].mxu1  ;;  %6173 = vmax.xlane.f32.xlu0 %v6172_v60  ;;  %v6175_v0 = vsel %vm6171_vm2, %v6164_v2, -inf }
 0x3f7   : > { %v6165_v22 = vadd.f32 %v6162_v32, %v6156_v28 }
 0x3f8   : > { %v5922_v61 = vpop.f32.mrb[52].mxu0  ;;  %v6166_v5 = vadd.f32 %v6162_v32, %v6157_v46 }
 0x3f9   : > { %v6158_v62 = vmul.f32 0.125, %v5922_v61  ;;  %v5998_v17 = vpop.f32.mrb[52].mxu1  ;;  %v10249_v63 = vpop.f32.mrb[53].mxu0  ;;  %v6178_v21 = vsel %vm6171_vm2, %v6165_v22, -inf }
 0x3fa   : > { %v6159_v8 = vmul.f32 0.125, %v5998_v17  ;;  %v10254_v10 = vpop.f32.mrb[53].mxu1  ;;  %6176 = vmax.xlane.f32.xlu0 %v6175_v0  ;;  %6179 = vmax.xlane.f32.xlu1 %v6178_v21  ;;  %v6181_v18 = vsel %vm6171_vm2, %v6166_v5, -inf }
 0x3fb   : > { %v6167_v11 = vadd.f32 %v6162_v32, %v6158_v62 }
 0x3fc   : > { %v6074_v12 = vpop.f32.mrb[54].mxu0  ;;  %v6168_v23 = vadd.f32 %v6162_v32, %v6159_v8 }
 0x3fd   : > { %v6160_v13 = vmul.f32 0.125, %v6074_v12  ;;  %v6150_v15 = vpop.f32.mrb[54].mxu1  ;;  %v10259_v14 = vpop.f32.mrb[55].mxu0  ;;  %v6184_v19 = vsel %vm6171_vm2, %v6167_v11, -inf }
 0x3fe   : > { %v10264_v24 = vpop.f32.mrb[55].mxu1  ;;  %6182 = vmax.xlane.f32.xlu1 %v6181_v18  ;;  %6185 = vmax.xlane.f32.xlu0 %v6184_v19  ;;  %v6161_v25 = vmul.f32 0.125, %v6150_v15  ;;  %v6187_v45 = vsel %vm6171_vm2, %v6168_v23, -inf }
 0x3ff   : > { %v6169_v34 = vadd.f32 %v6162_v32, %v6160_v13 }
 0x400   : > { %v6170_v27 = vadd.f32 %v6162_v32, %v6161_v25 }
 0x401   : > { %v6190_v26 = vsel %vm6171_vm2, %v6169_v34, -inf }
 0x402   : > { %6188 = vmax.xlane.f32.xlu1 %v6187_v45  ;;  %v6193_v49 = vsel %vm6171_vm2, %v6170_v27, -inf }
 0x406   : > { %6191 = vmax.xlane.f32.xlu1 %v6190_v26 }
 0x40a   : > { %6194 = vmax.xlane.f32.xlu1 %v6193_v49 }
 0x483   : > { %v6174_v35 = vpop.xlane.xlu0 %6173 }
 0x484   : > { %v6196_v9 = vsub.f32 %v6163_v36, %v6174_v35  ;;  %v6847_v35 = vld [vmem:[%s18316_s7 + $0x18] sm:$0xff] }
 0x486   : > { %v6204_v29 = vmul.f32 1.442695, %v6196_v9  ;;  %v6851_v9 = vld [vmem:[%s18316_s7 + $0x38] sm:$0xff] }
 0x487   : > { %v6177_v40 = vpop.xlane.xlu0 %6176  ;;  %v6180_v33 = vpop.xlane.xlu1 %6179 }
 0x488   : > { %12166 = vpow2.f32 %v6204_v29  ;;  %v6197_v38 = vsub.f32 %v6164_v2, %v6177_v40  ;;  %v6198_v1 = vsub.f32 %v6165_v22, %v6180_v33  ;;  %v6844_v33 = vld [vmem:[%s18316_s7] sm:$0xff] }
 0x48a   : > { %v6206_v3 = vmul.f32 1.442695, %v6197_v38  ;;  %v6208_v47 = vmul.f32 1.442695, %v6198_v1 }
 0x48b   : > { %v6183_v50 = vpop.xlane.xlu1 %6182  ;;  %v6186_v51 = vpop.xlane.xlu0 %6185 }
 0x48c   : > { %12168 = vpow2.f32 %v6206_v3  ;;  %v6199_v48 = vsub.f32 %v6166_v5, %v6183_v50  ;;  %v6200_v53 = vsub.f32 %v6167_v11, %v6186_v51  ;;  %v6857_v3 = vld [vmem:[%s18316_s7 + $0x68] sm:$0xff] }
 0x48d   : > { %12170 = vpow2.f32 %v6208_v47  ;;  %v11857_v47 = vpack.c.bf16 %v6851_v9, %v6847_v35  ;;  %v6885_v35 = vld [vmem:[%s18316_s7 + $0x148] sm:$0xff] }
 0x48e   : > { %v6210_v7 = vmul.f32 1.442695, %v6199_v48  ;;  %v6212_v55 = vmul.f32 1.442695, %v6200_v53  ;;  %v6846_v48 = vld [vmem:[%s18316_s7 + $0x10] sm:$0xff]  ;;  %v6889_v9 = vld [vmem:[%s18316_s7 + $0x168] sm:$0xff] }
 0x48f   : > { %v6189_v56 = vpop.xlane.xlu1 %6188  ;;  %v6850_v53 = vld [vmem:[%s18316_s7 + $0x30] sm:$0xff] }
 0x490   : > { %12172 = vpow2.f32 %v6210_v7  ;;  %v6201_v31 = vsub.f32 %v6168_v23, %v6189_v56  ;;  %v6852_v56 = vld [vmem:[%s18316_s7 + $0x40] sm:$0xff] }
 0x491   : > { %12174 = vpow2.f32 %v6212_v55 }
 0x492   : > { %v12167_v32 = vpop.eup %12166  ;;  %v6214_v16 = vmul.f32 1.442695, %v6201_v31  ;;  %v6856_v31 = vld [vmem:[%s18316_s7 + $0x60] sm:$0xff] }
 0x493   : > { %v6192_v4 = vpop.xlane.xlu1 %6191  ;;  %v6220_v58 = vsel %vm6171_vm2, %v12167_v32, 0.0 }
 0x494   : > { %12176 = vpow2.f32 %v6214_v16  ;;  %v6202_v52 = vsub.f32 %v6169_v34, %v6192_v4  ;;  %6221 = vadd.xlane.f32.xlu0 %v6220_v58  ;;  %v6865_v16 = vld [vmem:[%s18316_s7 + $0xa8] sm:$0xff]  ;;  %v11859_v58 = vpack.c.bf16 %v6850_v53, %v6846_v48 }
 0x495   : > { %v6897_v53 = vld [vmem:[%s18316_s7 + $0x1a8] sm:$0xff] }
 0x496   : > { %v12169_v39 = vpop.eup %12168  ;;  %v6216_v36 = vmul.f32 1.442695, %v6202_v52  ;;  %v11847_v52 = vpack.c.bf16 %v6856_v31, %v6852_v56 }
 0x497   : > { %v6195_v44 = vpop.xlane.xlu1 %6194  ;;  %v6223_v28 = vsel %vm6171_vm2, %v12169_v39, 0.0  ;;  %v12171_v43 = vpop.eup %12170 }
 0x498   : > { %12178 = vpow2.f32 %v6216_v36  ;;  %v6203_v54 = vsub.f32 %v6170_v27, %v6195_v44  ;;  %6224 = vadd.xlane.f32.xlu0 %v6223_v28  ;;  %v6226_v46 = vsel %vm6171_vm2, %v12171_v43, 0.0  ;;  %v6845_v27 = vld [vmem:[%s18316_s7 + $0x8] sm:$0xff]  ;;  %v6858_v36 = vld [vmem:[%s18316_s7 + $0x70] sm:$0xff] }
 0x49a   : > { %v12173_v60 = vpop.eup %12172  ;;  %v6218_v2 = vmul.f32 1.442695, %v6203_v54  ;;  %v6863_v54 = vld [vmem:[%s18316_s7 + $0x98] sm:$0xff] }
 0x49b   : > { %v6229_v30 = vsel %vm6171_vm2, %v12173_v60, 0.0  ;;  %v12175_v22 = vpop.eup %12174 }
 0x49c   : > { %12180 = vpow2.f32 %v6218_v2  ;;  %6227 = vadd.xlane.f32.xlu0 %v6226_v46  ;;  %6230 = vadd.xlane.f32.xlu1 %v6229_v30  ;;  %v6232_v62 = vsel %vm6171_vm2, %v12175_v22, 0.0  ;;  %v6864_v2 = vld [vmem:[%s18316_s7 + $0xa0] sm:$0xff]  ;;  %v6867_v46 = vld [vmem:[%s18316_s7 + $0xb8] sm:$0xff]  ;;  %v6869_v30 = vld [vmem:[%s18316_s7 + $0xc8] sm:$0xff] }
 0x49e   : > { %v12177_v61 = vpop.eup %12176 }
 0x49f   : > { %v6235_v17 = vsel %vm6171_vm2, %v12177_v61, 0.0 }
 0x4a0   : > { %6233 = vadd.xlane.f32.xlu0 %v6232_v62  ;;  %6236 = vadd.xlane.f32.xlu1 %v6235_v17  ;;  %v6862_v17 = vld [vmem:[%s18316_s7 + $0x90] sm:$0xff] }
 0x4a2   : > { %v17391_v63 = vpop.eup %12178 }
 0x4a3   : > { %v6238_v0 = vsel %vm6171_vm2, %v17391_v63, 0.0 }
 0x4a4   : > { %6239 = vadd.xlane.f32.xlu0 %v6238_v0  ;;  %v6866_v0 = vld [vmem:[%s18316_s7 + $0xb0] sm:$0xff] }
 0x4a6   : > { %v17395_v21 = vpop.eup %12180 }
 0x4a7   : > { %v6241_v5 = vsel %vm6171_vm2, %v17395_v21, 0.0 }
 0x4a8   : > { %6242 = vadd.xlane.f32.xlu1 %v6241_v5  ;;  %v6868_v5 = vld [vmem:[%s18316_s7 + $0xc0] sm:$0xff] }
 0x521   : > { %v6222_v8 = vpop.xlane.xlu0 %6221 }
 0x522   : > { %12182 = vrcp.f32 %v6222_v8  ;;  %v6872_v8 = vld [vmem:[%s18316_s7 + $0xe0] sm:$0xff] }
 0x525   : > { %v6225_v10 = vpop.xlane.xlu0 %6224 }
 0x526   : > { %12184 = vrcp.f32 %v6225_v10  ;;  %v6871_v10 = vld [vmem:[%s18316_s7 + $0xd8] sm:$0xff] }
 0x529   : > { %v6228_v11 = vpop.xlane.xlu0 %6227  ;;  %v6231_v12 = vpop.xlane.xlu1 %6230 }
 0x52a   : > { %12186 = vrcp.f32 %v6228_v11  ;;  %v6875_v11 = vld [vmem:[%s18316_s7 + $0xf8] sm:$0xff] }
 0x52b   : > { %12188 = vrcp.f32 %v6231_v12  ;;  %v11867_v12 = vpack.c.bf16 %v6866_v0, %v6862_v17  ;;  %v6906_v17 = vld [vmem:[%s18316_s7 + $0x1f0] sm:$0xff] }
 0x52c   : > { %v12183_v13 = vpop.eup %12182 }
 0x52d   : > { %v6252_v15 = vmul.f32 %v12183_v13, %v12167_v32  ;;  %v6234_v14 = vpop.xlane.xlu0 %6233  ;;  %v6237_v18 = vpop.xlane.xlu1 %6236  ;;  %v6861_v32 = vld [vmem:[%s18316_s7 + $0x88] sm:$0xff]  ;;  %v11855_v13 = vpack.c.bf16 %v6872_v8, %v6868_v5  ;;  %v6911_v5 = vld [vmem:[%s18316_s7 + $0x218] sm:$0xff] }
 0x52e   : > { %12190 = vrcp.f32 %v6234_v14  ;;  %v6870_v14 = vld [vmem:[%s18316_s7 + $0xd0] sm:$0xff]  ;;  %v6915_v8 = vld [vmem:[%s18316_s7 + $0x238] sm:$0xff] }
 0x52f   : > { %12192 = vrcp.f32 %v6237_v18  ;;  %10268 = vmatmul.mubr.msk.f32.vlgmr.msra.gmra.mrb[56].mxu0 %vm6171_vm2, %v6252_v15  ;;  %v11869_v15 = vpack.c.bf16 %v6875_v11, %v6871_v10  ;;  %v6874_v18 = vld [vmem:[%s18316_s7 + $0xf0] sm:$0xff] }
 0x530   : > { %v12185_v19 = vpop.eup %12184  ;;  %10276 = vmatpush3.msra.mxu0 %v17346_v41  ;;  %10277 = vmatprep.mubr.msk.f32.mxu0 %vm12275_vm0, %v12274_v59 }
 0x531   : > { %v6253_v23 = vmul.f32 %v12185_v19, %v12169_v39  ;;  %v6240_v24 = vpop.xlane.xlu0 %6239  ;;  %10285 = vmatprep.subr.mxu0 %v12274_v59  ;;  %v6854_v39 = vld [vmem:[%s18316_s7 + $0x50] sm:$0xff]  ;;  %v11871_v19 = vpack.c.bf16 %v6874_v18, %v6870_v14  ;;  %v6908_v14 = vld [vmem:[%s18316_s7 + $0x200] sm:$0xff] }
 0x532   : > { %12194 = vrcp.f32 %v6240_v24  ;;  %v6881_v24 = vld [vmem:[%s18316_s7 + $0x128] sm:$0xff]  ;;  %v6912_v18 = vld [vmem:[%s18316_s7 + $0x220] sm:$0xff] }
 0x533   : > { %10273 = vmatmul.mubr.msk.f32.vlgmr.msra.gmra.mrb[56].mxu1 %vm6171_vm2, %v6253_v23  ;;  %v6877_v23 = vld [vmem:[%s18316_s7 + $0x108] sm:$0xff] }
 0x534   : > { %v12187_v25 = vpop.eup %12186  ;;  %10281 = vmatpush3.msra.mxu1 %v17351_v6  ;;  %10282 = vmatprep.mubr.msk.f32.mxu1 %vm12275_vm0, %v12274_v59  ;;  %v6849_v6 = vld [vmem:[%s18316_s7 + $0x28] sm:$0xff] }
 0x535   : > { %v12189_v45 = vpop.eup %12188  ;;  %v6254_v34 = vmul.f32 %v12187_v25, %v12171_v43  ;;  %v6243_v26 = vpop.xlane.xlu1 %6242  ;;  %10290 = vmatprep.subr.mxu1 %v12274_v59  ;;  %v11841_v1 = vpack.c.bf16 %v6849_v6, %v6845_v27  ;;  %v11849_v43 = vpack.c.bf16 %v6865_v16, %v6861_v32  ;;  %v6879_v25 = vld [vmem:[%s18316_s7 + $0x118] sm:$0xff]  ;;  %v6880_v27 = vld [vmem:[%s18316_s7 + $0x120] sm:$0xff]  ;;  %v6878_v6 = vld [vmem:[%s18316_s7 + $0x110] sm:$0xff] }
 0x536   : > { %v6255_v41 = vmul.f32 %v12189_v45, %v12173_v60  ;;  %12196 = vrcp.f32 %v6243_v26  ;;  %v6860_v60 = vld [vmem:[%s18316_s7 + $0x80] sm:$0xff]  ;;  %v11873_v45 = vpack.c.bf16 %v6881_v24, %v6877_v23  ;;  %v11921_v23 = vpack.c.bf16 %v6915_v8, %v6911_v5  ;;  %v6910_v24 = vld [vmem:[%s18316_s7 + $0x210] sm:$0xff] }
 0x537   : > { %10278 = vmatmul.mubr.msk.f32.vlgmr.msra.gmra.mrb[58].mxu0 %vm6171_vm2, %v6254_v34  ;;  %v11851_v62 = vpack.c.bf16 %v6864_v2, %v6860_v60  ;;  %v6883_v34 = vld [vmem:[%s18316_s7 + $0x138] sm:$0xff]  ;;  %v6896_v32 = vld [vmem:[%s18316_s7 + $0x1a0] sm:$0xff] }
 0x538   : > { %v12191_v49 = vpop.eup %12190  ;;  %10283 = vmatmul.mubr.msk.f32.vlgmr.msra.gmra.mrb[58].mxu1 %vm6171_vm2, %v6255_v41  ;;  %10286 = vmatpush3.msra.mxu0 %v17356_v20  ;;  %v6848_v20 = vld [vmem:[%s18316_s7 + $0x20] sm:$0xff]  ;;  %v11889_v26 = vpack.c.bf16 %v6883_v34, %v6879_v25  ;;  %v6914_v25 = vld [vmem:[%s18316_s7 + $0x230] sm:$0xff] }
 0x539   : > { %v12193_v29 = vpop.eup %12192  ;;  %v6256_v40 = vmul.f32 %v12191_v49, %v12175_v22  ;;  %10291 = vmatpush3.msra.mxu1 %v17361_v37  ;;  %10287 = vmatprep.mubr.msk.f32.mxu0 %vm12275_vm0, %v12274_v59  ;;  %v6853_v37 = vld [vmem:[%s18316_s7 + $0x48] sm:$0xff]  ;;  %v11843_v51 = vpack.c.bf16 %v6848_v20, %v6844_v33  ;;  %v6876_v41 = vld [vmem:[%s18316_s7 + $0x100] sm:$0xff]  ;;  %v6882_v49 = vld [vmem:[%s18316_s7 + $0x130] sm:$0xff] }
 0x53a   : > { %v6257_v38 = vmul.f32 %v12193_v29, %v12177_v61  ;;  %10292 = vmatprep.mubr.msk.f32.mxu1 %vm12275_vm0, %v12274_v59  ;;  %10295 = vmatprep.subr.mxu0 %v12274_v59  ;;  %v11845_v55 = vpack.c.bf16 %v6857_v3, %v6853_v37  ;;  %v6873_v22 = vld [vmem:[%s18316_s7 + $0xe8] sm:$0xff]  ;;  %v11863_v61 = vpack.c.bf16 %v6858_v36, %v6854_v39  ;;  %v6887_v29 = vld [vmem:[%s18316_s7 + $0x158] sm:$0xff]  ;;  %v6940_v8 = vld [vmem:[%s18316_s7 + $0x300] sm:$0xff] }
 0x53b   : > { %10300 = vmatprep.subr.mxu1 %v12274_v59  ;;  %10288 = vmatmul.mubr.msk.f32.vlgmr.msra.gmra.mrb[60].mxu0 %vm6171_vm2, %v6256_v40  ;;  %v6891_v40 = vld [vmem:[%s18316_s7 + $0x178] sm:$0xff]  ;;  %v11875_v33 = vpack.c.bf16 %v6880_v27, %v6876_v41  ;;  %v11891_v20 = vpack.c.bf16 %v6882_v49, %v6878_v6  ;;  %v11877_v37 = vpack.c.bf16 %v6889_v9, %v6885_v35  ;;  %v6901_v39 = vld [vmem:[%s18316_s7 + $0x1c8] sm:$0xff] }
 0x53c   : > { %v12195_v50 = vpop.eup %12194  ;;  %10293 = vmatmul.mubr.msk.f32.vlgmr.msra.gmra.mrb[60].mxu1 %vm6171_vm2, %v6257_v38  ;;  %10296 = vmatpush3.msra.mxu0 %v17366_v42  ;;  %v6855_v42 = vld [vmem:[%s18316_s7 + $0x58] sm:$0xff]  ;;  %v6884_v38 = vld [vmem:[%s18316_s7 + $0x140] sm:$0xff]  ;;  %v11893_v3 = vpack.c.bf16 %v6891_v40, %v6887_v29  ;;  %v11907_v9 = vpack.c.bf16 %v6912_v18, %v6908_v14  ;;  %v11923_v29 = vpack.c.bf16 %v6914_v25, %v6910_v24  ;;  %v6946_v14 = vld [vmem:[%s18316_s7 + $0x330] sm:$0xff] }
 0x53d   : > { %v6258_v7 = vmul.f32 %v12195_v50, %v17391_v63  ;;  %10301 = vmatpush3.msra.mxu1 %v17372_v57  ;;  %10297 = vmatprep.mubr.msk.f32.mxu0 %vm12275_vm0, %v12274_v59  ;;  %v6859_v57 = vld [vmem:[%s18316_s7 + $0x78] sm:$0xff]  ;;  %v11865_v63 = vpack.c.bf16 %v6867_v46, %v6863_v54  ;;  %v6890_v50 = vld [vmem:[%s18316_s7 + $0x170] sm:$0xff]  ;;  %v6900_v46 = vld [vmem:[%s18316_s7 + $0x1c0] sm:$0xff] }
 0x53e   : > { %10302 = vmatprep.mubr.msk.f32.mxu1 %vm12275_vm0, %v12274_v59  ;;  %11842 = vmatprep.subr.bf16.mxu0 %v11841_v1  ;;  %v11861_v28 = vpack.c.bf16 %v6859_v57, %v6855_v42  ;;  %v6888_v1 = vld [vmem:[%s18316_s7 + $0x160] sm:$0xff]  ;;  %v6919_v41 = vld [vmem:[%s18316_s7 + $0x258] sm:$0xff]  ;;  %v6949_v18 = vld [vmem:[%s18316_s7 + $0x348] sm:$0xff] }
 0x53f   : > { %10298 = vmatmul.mubr.msk.f32.vlgmr.msra.gmra.mrb[62].mxu0 %vm6171_vm2, %v6258_v7  ;;  %11858 = vmatprep.subr.bf16.mxu1 %v11857_v47  ;;  %v6886_v47 = vld [vmem:[%s18316_s7 + $0x150] sm:$0xff]  ;;  %v6895_v7 = vld [vmem:[%s18316_s7 + $0x198] sm:$0xff]  ;;  %v11879_v56 = vpack.c.bf16 %v6888_v1, %v6884_v38  ;;  %v6892_v57 = vld [vmem:[%s18316_s7 + $0x180] sm:$0xff] }
 0x540   : > { %v12197_v4 = vpop.eup %12196  ;;  %11844 = vmatpush1.bf16.msra.mxu0 %v11843_v51  ;;  %7167 = vmatprep.mubr.f32.mxu0 %v12274_v59  ;;  %v6893_v51 = vld [vmem:[%s18316_s7 + $0x188] sm:$0xff]  ;;  %v11895_v31 = vpack.c.bf16 %v6890_v50, %v6886_v47  ;;  %v11883_v60 = vpack.c.bf16 %v6896_v32, %v6892_v57  ;;  %v6923_v27 = vld [vmem:[%s18316_s7 + $0x278] sm:$0xff]  ;;  %v6916_v40 = vld [vmem:[%s18316_s7 + $0x240] sm:$0xff] }
 0x541   : > { %v6259_v44 = vmul.f32 %v12197_v4, %v17395_v21  ;;  %11846 = vmatprep.subr.bf16.mxu0 %v11845_v55  ;;  %v11853_v21 = vpack.c.bf16 %v6873_v22, %v6869_v30  ;;  %v6899_v55 = vld [vmem:[%s18316_s7 + $0x1b8] sm:$0xff]  ;;  %v11881_v16 = vpack.c.bf16 %v6897_v53, %v6893_v51  ;;  %v6904_v30 = vld [vmem:[%s18316_s7 + $0x1e0] sm:$0xff]  ;;  %v11925_v38 = vpack.c.bf16 %v6923_v27, %v6919_v41  ;;  %v6918_v1 = vld [vmem:[%s18316_s7 + $0x250] sm:$0xff] }
 0x542   : > { %v11897_v4 = vpack.c.bf16 %v6899_v55, %v6895_v7  ;;  %v6929_v50 = vld [vmem:[%s18316_s7 + $0x2a8] sm:$0xff]  ;;  %v6927_v51 = vld [vmem:[%s18316_s7 + $0x298] sm:$0xff]  ;;  %v6926_v32 = vld [vmem:[%s18316_s7 + $0x290] sm:$0xff] }
 0x543   : > { %10303 = vmatmul.mubr.msk.f32.vlgmr.msra.gmra.mrb[62].mxu1 %vm6171_vm2, %v6259_v44  ;;  %v6905_v44 = vld [vmem:[%s18316_s7 + $0x1e8] sm:$0xff]  ;;  %v6955_v24 = vld [vmem:[%s18316_s7 + $0x378] sm:$0xff]  ;;  %v6952_v41 = vld [vmem:[%s18316_s7 + $0x360] sm:$0xff] }
 0x544   : > { %11860 = vmatpush1.bf16.msra.mxu1 %v11859_v58  ;;  %11848 = vmatpush1.bf16.msra.mxu0 %v11847_v52  ;;  %v6894_v58 = vld [vmem:[%s18316_s7 + $0x190] sm:$0xff]  ;;  %v11885_v22 = vpack.c.bf16 %v6905_v44, %v6901_v39  ;;  %v6935_v39 = vld [vmem:[%s18316_s7 + $0x2d8] sm:$0xff] }
 0x545   : > { %11862 = vmatprep.subr.bf16.mxu1 %v11861_v28  ;;  %11850 = vmatprep.subr.bf16.mxu0 %v11849_v43  ;;  %v6898_v52 = vld [vmem:[%s18316_s7 + $0x1b0] sm:$0xff]  ;;  %v6903_v28 = vld [vmem:[%s18316_s7 + $0x1d8] sm:$0xff] }
 0x546   : > { %7238 = vmatprep.mubr.f32.mxu1 %v12274_v59  ;;  %v6907_v43 = vld [vmem:[%s18316_s7 + $0x1f8] sm:$0xff]  ;;  %v11899_v2 = vpack.c.bf16 %v6898_v52, %v6894_v58  ;;  %v6937_v52 = vld [vmem:[%s18316_s7 + $0x2e8] sm:$0xff] }
 0x548   : > { %11864 = vmatpush1.bf16.msra.mxu1 %v11863_v61  ;;  %11852 = vmatpush1.bf16.msra.mxu0 %v11851_v62  ;;  %v11901_v61 = vpack.c.bf16 %v6907_v43, %v6903_v28  ;;  %v6902_v62 = vld [vmem:[%s18316_s7 + $0x1d0] sm:$0xff] }
 0x549   : > { %11866 = vmatprep.subr.bf16.mxu1 %v11865_v63  ;;  %11854 = vmatprep.subr.bf16.mxu0 %v11853_v21  ;;  %v6909_v63 = vld [vmem:[%s18316_s7 + $0x208] sm:$0xff] }
 0x54a   : > { %v6913_v21 = vld [vmem:[%s18316_s7 + $0x228] sm:$0xff] }
 0x54c   : > { %11868 = vmatpush1.bf16.msra.mxu1 %v11867_v12  ;;  %11856 = vmatpush1.bf16.msra.mxu0 %v11855_v13  ;;  %v11887_v13 = vpack.c.bf16 %v6904_v30, %v6900_v46  ;;  %v6934_v30 = vld [vmem:[%s18316_s7 + $0x2d0] sm:$0xff] }
 0x54d   : > { %11870 = vmatprep.subr.bf16.mxu1 %v11869_v15  ;;  %11874 = vmatprep.subr.bf16.mxu0 %v11873_v45  ;;  %v11903_v15 = vpack.c.bf16 %v6906_v17, %v6902_v62  ;;  %v6917_v45 = vld [vmem:[%s18316_s7 + $0x248] sm:$0xff]  ;;  %v6943_v17 = vld [vmem:[%s18316_s7 + $0x318] sm:$0xff] }
 0x54e   : > { %v6945_v62 = vld [vmem:[%s18316_s7 + $0x328] sm:$0xff] }
 0x550   : > { %11872 = vmatpush1.bf16.msra.mxu1 %v11871_v19  ;;  %v11905_v19 = vpack.c.bf16 %v6913_v21, %v6909_v63  ;;  %v6947_v63 = vld [vmem:[%s18316_s7 + $0x338] sm:$0xff] }
 0x551   : > { %11890 = vmatprep.subr.bf16.mxu1 %v11889_v26  ;;  %v6921_v26 = vld [vmem:[%s18316_s7 + $0x268] sm:$0xff] }
 0x602   : > { %v6329_v48 = vpop.f32.mrb[56].mxu0 }
 0x603   : > { %v10269_v42 = vpop.f32.mrb[57].mxu0  ;;  %8488 = vmatmul.mubr.msk.f32.vlgmr.msra.gmra.mrb[64].mxu0 %vm5545_vm1, %v6329_v48  ;;  %8489 = vmatmul.mubr.msk.f32.vlgmr.msra.gmra.mrb[64].mxu1 %vm5545_vm1, %v6329_v48  ;;  %v6931_v48 = vld [vmem:[%s18316_s7 + $0x2b8] sm:$0xff] }
 0x604   : > { %11876 = vmatpush1.bf16.msra.mxu0 %v11875_v33  ;;  %11892 = vmatpush1.bf16.msra.mxu1 %v11891_v20  ;;  %v6920_v33 = vld [vmem:[%s18316_s7 + $0x260] sm:$0xff]  ;;  %v11909_v20 = vpack.c.bf16 %v6921_v26, %v6917_v45  ;;  %v11929_v57 = vpack.c.bf16 %v6931_v48, %v6927_v51  ;;  %v6962_v48 = vld [vmem:[%s18316_s7 + $0x3b0] sm:$0xff] }
 0x605   : > { %11878 = vmatprep.subr.bf16.mxu0 %v11877_v37  ;;  %11894 = vmatprep.subr.bf16.mxu1 %v11893_v3  ;;  %v6922_v37 = vld [vmem:[%s18316_s7 + $0x270] sm:$0xff]  ;;  %v6925_v3 = vld [vmem:[%s18316_s7 + $0x288] sm:$0xff]  ;;  %v11911_v7 = vpack.c.bf16 %v6920_v33, %v6916_v40  ;;  %v6924_v42 = vld [vmem:[%s18316_s7 + $0x280] sm:$0xff] }
 0x606   : > { %v17606_v36 = vpop.f32.mrb[56].mxu1  ;;  %7312 = vmatprep.mubr.f32.mxu0 %v12274_v59  ;;  %7383 = vmatprep.mubr.f32.mxu1 %v12274_v59  ;;  %v11927_v55 = vpack.c.bf16 %v6922_v37, %v6918_v1  ;;  %v6948_v26 = vld [vmem:[%s18316_s7 + $0x340] sm:$0xff]  ;;  %v6961_v40 = vld [vmem:[%s18316_s7 + $0x3a8] sm:$0xff]  ;;  %v6959_v33 = vld [vmem:[%s18316_s7 + $0x398] sm:$0xff] }
 0x607   : > { %v10274_v54 = vpop.f32.mrb[57].mxu1  ;;  %v6956_v37 = vld [vmem:[%s18316_s7 + $0x380] sm:$0xff] }
 0x608   : > { %11880 = vmatpush1.bf16.msra.mxu0 %v11879_v56  ;;  %11896 = vmatpush1.bf16.msra.mxu1 %v11895_v31  ;;  %v6928_v56 = vld [vmem:[%s18316_s7 + $0x2a0] sm:$0xff]  ;;  %v11913_v31 = vpack.c.bf16 %v6929_v50, %v6925_v3 }
 0x609   : > { %11882 = vmatprep.subr.bf16.mxu0 %v11881_v16  ;;  %11898 = vmatprep.subr.bf16.mxu1 %v11897_v4  ;;  %v6930_v16 = vld [vmem:[%s18316_s7 + $0x2b0] sm:$0xff]  ;;  %v6933_v4 = vld [vmem:[%s18316_s7 + $0x2c8] sm:$0xff]  ;;  %v11915_v28 = vpack.c.bf16 %v6928_v56, %v6924_v42  ;;  %v6932_v54 = vld [vmem:[%s18316_s7 + $0x2c0] sm:$0xff] }
 0x60a   : > { %v17634_v0 = vpop.f32.mrb[58].mxu0  ;;  %v11931_v43 = vpack.c.bf16 %v6930_v16, %v6926_v32  ;;  %v6960_v3 = vld [vmem:[%s18316_s7 + $0x3a0] sm:$0xff]  ;;  %v6971_v42 = vld [vmem:[%s18316_s7 + $0x3f8] sm:$0xff] }
 0x60b   : > { %v17645_v10 = vpop.f32.mrb[58].mxu1  ;;  %v10279_v11 = vpop.f32.mrb[59].mxu0  ;;  %v11947_v56 = vpack.c.bf16 %v6960_v3, %v6956_v37  ;;  %v6968_v32 = vld [vmem:[%s18316_s7 + $0x3e0] sm:$0xff] }
 0x60c   : > { %v10284_v12 = vpop.f32.mrb[59].mxu1  ;;  %11884 = vmatpush1.bf16.msra.mxu0 %v11883_v60  ;;  %11900 = vmatpush1.bf16.msra.mxu1 %v11899_v2  ;;  %v6936_v60 = vld [vmem:[%s18316_s7 + $0x2e0] sm:$0xff]  ;;  %v11917_v2 = vpack.c.bf16 %v6937_v52, %v6933_v4  ;;  %v6966_v52 = vld [vmem:[%s18316_s7 + $0x3d0] sm:$0xff] }
 0x60d   : > { %11886 = vmatprep.subr.bf16.mxu0 %v11885_v22  ;;  %11902 = vmatprep.subr.bf16.mxu1 %v11901_v61  ;;  %v6938_v22 = vld [vmem:[%s18316_s7 + $0x2f0] sm:$0xff]  ;;  %v6941_v61 = vld [vmem:[%s18316_s7 + $0x308] sm:$0xff]  ;;  %v11919_v21 = vpack.c.bf16 %v6936_v60, %v6932_v54  ;;  %v6944_v11 = vld [vmem:[%s18316_s7 + $0x320] sm:$0xff] }
 0x60e   : > { %v17662_v34 = vpop.f32.mrb[60].mxu0  ;;  %v11935_v5 = vpack.c.bf16 %v6938_v22, %v6934_v30  ;;  %v11937_v12 = vpack.c.bf16 %v6945_v62, %v6941_v61  ;;  %v11939_v25 = vpack.c.bf16 %v6944_v11, %v6940_v8  ;;  %v6974_v61 = vld [vmem:[%s18316_s7 + $0x410] sm:$0xff]  ;;  %v6996_v3 = vld [vmem:[%s18316_s7 + $0x4c0] sm:$0xff] }
 0x60f   : > { %v17673_v6 = vpop.f32.mrb[60].mxu1  ;;  %v10289_v49 = vpop.f32.mrb[61].mxu0  ;;  %v6978_v62 = vld [vmem:[%s18316_s7 + $0x430] sm:$0xff] }
 0x610   : > { %v10294_v35 = vpop.f32.mrb[61].mxu1  ;;  %11888 = vmatpush1.bf16.msra.mxu0 %v11887_v13  ;;  %11904 = vmatpush1.bf16.msra.mxu1 %v11903_v15  ;;  %v11953_v13 = vpack.c.bf16 %v6947_v63, %v6943_v17  ;;  %v6942_v15 = vld [vmem:[%s18316_s7 + $0x310] sm:$0xff]  ;;  %v6981_v17 = vld [vmem:[%s18316_s7 + $0x448] sm:$0xff]  ;;  %v11987_v11 = vpack.c.bf16 %v6978_v62, %v6974_v61 }
 0x611   : > { %11906 = vmatprep.subr.bf16.mxu0 %v11905_v19  ;;  %11922 = vmatprep.subr.bf16.mxu1 %v11921_v23  ;;  %v6953_v19 = vld [vmem:[%s18316_s7 + $0x368] sm:$0xff]  ;;  %v6951_v23 = vld [vmem:[%s18316_s7 + $0x358] sm:$0xff]  ;;  %v11955_v45 = vpack.c.bf16 %v6946_v14, %v6942_v15  ;;  %v6950_v35 = vld [vmem:[%s18316_s7 + $0x350] sm:$0xff] }
 0x612   : > { %v17690_v47 = vpop.f32.mrb[62].mxu0  ;;  %v11941_v27 = vpack.c.bf16 %v6953_v19, %v6949_v18  ;;  %v11957_v49 = vpack.c.bf16 %v6955_v24, %v6951_v23  ;;  %v6985_v63 = vld [vmem:[%s18316_s7 + $0x468] sm:$0xff]  ;;  %v6982_v18 = vld [vmem:[%s18316_s7 + $0x450] sm:$0xff] }
 0x613   : > { %8490 = vmatmul.mubr.msk.f32.vlgmr.msra.gmra.mrb[64].mxu0 %vm5545_vm1, %v17606_v36  ;;  %8491 = vmatmul.mubr.msk.f32.vlgmr.msra.gmra.mrb[64].mxu1 %vm5545_vm1, %v17606_v36  ;;  %v10299_v53 = vpop.f32.mrb[63].mxu0  ;;  %v6939_v36 = vld [vmem:[%s18316_s7 + $0x2f8] sm:$0xff]  ;;  %v11973_v15 = vpack.c.bf16 %v6985_v63, %v6981_v17  ;;  %v6986_v19 = vld [vmem:[%s18316_s7 + $0x470] sm:$0xff]  ;;  %v6989_v23 = vld [vmem:[%s18316_s7 + $0x488] sm:$0xff] }
 0x614   : > { %11908 = vmatpush1.bf16.msra.mxu0 %v11907_v9  ;;  %11924 = vmatpush1.bf16.msra.mxu1 %v11923_v29  ;;  %v11933_v46 = vpack.c.bf16 %v6939_v36, %v6935_v39  ;;  %v6954_v9 = vld [vmem:[%s18316_s7 + $0x370] sm:$0xff]  ;;  %v6957_v29 = vld [vmem:[%s18316_s7 + $0x388] sm:$0xff] }
 0x615   : > { %11910 = vmatprep.subr.bf16.mxu0 %v11909_v20  ;;  %11926 = vmatprep.subr.bf16.mxu1 %v11925_v38  ;;  %v6963_v20 = vld [vmem:[%s18316_s7 + $0x3b8] sm:$0xff]  ;;  %v11943_v38 = vpack.c.bf16 %v6952_v41, %v6948_v26  ;;  %v11959_v1 = vpack.c.bf16 %v6954_v9, %v6950_v35  ;;  %v11945_v50 = vpack.c.bf16 %v6961_v40, %v6957_v29  ;;  %v6965_v53 = vld [vmem:[%s18316_s7 + $0x3c8] sm:$0xff]  ;;  %v6970_v39 = vld [vmem:[%s18316_s7 + $0x3f0] sm:$0xff] }
 0x616   : > { %v17720_v58 = vpop.f32.mrb[62].mxu1  ;;  %7457 = vmatprep.mubr.f32.mxu0 %v12274_v59  ;;  %7528 = vmatprep.mubr.f32.mxu1 %v12274_v59  ;;  %v11961_v51 = vpack.c.bf16 %v6963_v20, %v6959_v33  ;;  %v6973_v36 = vld [vmem:[%s18316_s7 + $0x408] sm:$0xff]  ;;  %v11967_v60 = vpack.c.bf16 %v6970_v39, %v6966_v52  ;;  %v11991_v41 = vpack.c.bf16 %v6986_v19, %v6982_v18  ;;  %v6994_v29 = vld [vmem:[%s18316_s7 + $0x4b0] sm:$0xff]  ;;  %v6999_v20 = vld [vmem:[%s18316_s7 + $0x4d8] sm:$0xff] }
 0x617   : > { %v10304_v44 = vpop.f32.mrb[63].mxu1  ;;  %v6993_v24 = vld [vmem:[%s18316_s7 + $0x4a8] sm:$0xff]  ;;  %v7006_v39 = vld [vmem:[%s18316_s7 + $0x510] sm:$0xff] }
 0x618   : > { %11912 = vmatpush1.bf16.msra.mxu0 %v11911_v7  ;;  %11928 = vmatpush1.bf16.msra.mxu1 %v11927_v55  ;;  %v6969_v7 = vld [vmem:[%s18316_s7 + $0x3e8] sm:$0xff]  ;;  %v6967_v55 = vld [vmem:[%s18316_s7 + $0x3d8] sm:$0xff]  ;;  %v11977_v35 = vpack.c.bf16 %v6993_v24, %v6989_v23  ;;  %v7014_v62 = vld [vmem:[%s18316_s7 + $0x550] sm:$0xff] }
 0x619   : > { %11914 = vmatprep.subr.bf16.mxu0 %v11913_v31  ;;  %11930 = vmatprep.subr.bf16.mxu1 %v11929_v57  ;;  %v6964_v57 = vld [vmem:[%s18316_s7 + $0x3c0] sm:$0xff]  ;;  %v11949_v16 = vpack.c.bf16 %v6969_v7, %v6965_v53  ;;  %v11965_v4 = vpack.c.bf16 %v6971_v42, %v6967_v55  ;;  %v6977_v44 = vld [vmem:[%s18316_s7 + $0x428] sm:$0xff]  ;;  %v7002_v53 = vld [vmem:[%s18316_s7 + $0x4f0] sm:$0xff] }
 0x61a   : > { %v11951_v54 = vpack.c.bf16 %v6968_v32, %v6964_v57  ;;  %v11969_v30 = vpack.c.bf16 %v6977_v44, %v6973_v36  ;;  %v6997_v40 = vld [vmem:[%s18316_s7 + $0x4c8] sm:$0xff]  ;;  %v7007_v42 = vld [vmem:[%s18316_s7 + $0x518] sm:$0xff]  ;;  %v7004_v32 = vld [vmem:[%s18316_s7 + $0x500] sm:$0xff] }
 0x61b   : > { %v7001_v33 = vld [vmem:[%s18316_s7 + $0x4e8] sm:$0xff]  ;;  %v7010_v36 = vld [vmem:[%s18316_s7 + $0x530] sm:$0xff] }
 0x61c   : > { %11916 = vmatpush1.bf16.msra.mxu0 %v11915_v28  ;;  %11932 = vmatpush1.bf16.msra.mxu1 %v11931_v43  ;;  %v6975_v28 = vld [vmem:[%s18316_s7 + $0x418] sm:$0xff]  ;;  %v7005_v7 = vld [vmem:[%s18316_s7 + $0x508] sm:$0xff]  ;;  %v7018_v17 = vld [vmem:[%s18316_s7 + $0x570] sm:$0xff] }
 0x61d   : > { %11918 = vmatprep.subr.bf16.mxu0 %v11917_v2  ;;  %11934 = vmatprep.subr.bf16.mxu1 %v11933_v46  ;;  %v6979_v43 = vld [vmem:[%s18316_s7 + $0x438] sm:$0xff]  ;;  %v6972_v2 = vld [vmem:[%s18316_s7 + $0x400] sm:$0xff]  ;;  %v7009_v55 = vld [vmem:[%s18316_s7 + $0x528] sm:$0xff] }
 0x61e   : > { %v6976_v46 = vld [vmem:[%s18316_s7 + $0x420] sm:$0xff]  ;;  %v11985_v22 = vpack.c.bf16 %v6979_v43, %v6975_v28  ;;  %v7013_v44 = vld [vmem:[%s18316_s7 + $0x548] sm:$0xff]  ;;  %v7015_v43 = vld [vmem:[%s18316_s7 + $0x558] sm:$0xff] }
 0x61f   : > { %v11971_v8 = vpack.c.bf16 %v6976_v46, %v6972_v2  ;;  %v7017_v28 = vld [vmem:[%s18316_s7 + $0x568] sm:$0xff]  ;;  %v12019_v2 = vpack.c.bf16 %v7010_v36, %v7006_v39  ;;  %v7012_v46 = vld [vmem:[%s18316_s7 + $0x540] sm:$0xff]  ;;  %v7026_v19 = vld [vmem:[%s18316_s7 + $0x5b0] sm:$0xff] }
 0x620   : > { %11920 = vmatpush1.bf16.msra.mxu0 %v11919_v21  ;;  %11936 = vmatpush1.bf16.msra.mxu1 %v11935_v5  ;;  %v6983_v21 = vld [vmem:[%s18316_s7 + $0x458] sm:$0xff]  ;;  %v7021_v63 = vld [vmem:[%s18316_s7 + $0x588] sm:$0xff]  ;;  %v7046_v39 = vld [vmem:[%s18316_s7 + $0x650] sm:$0xff] }
 0x621   : > { %11938 = vmatprep.subr.bf16.mxu0 %v11937_v12  ;;  %11954 = vmatprep.subr.bf16.mxu1 %v11953_v13  ;;  %v6987_v5 = vld [vmem:[%s18316_s7 + $0x478] sm:$0xff]  ;;  %v6980_v12 = vld [vmem:[%s18316_s7 + $0x440] sm:$0xff]  ;;  %v7029_v23 = vld [vmem:[%s18316_s7 + $0x5c8] sm:$0xff] }
 0x622   : > { %v6984_v13 = vld [vmem:[%s18316_s7 + $0x460] sm:$0xff]  ;;  %v11989_v14 = vpack.c.bf16 %v6987_v5, %v6983_v21  ;;  %v7025_v21 = vld [vmem:[%s18316_s7 + $0x5a8] sm:$0xff]  ;;  %v7023_v5 = vld [vmem:[%s18316_s7 + $0x598] sm:$0xff] }
 0x623   : > { %8492 = vmatmul.mubr.msk.f32.vlgmr.msra.gmra.mrb[64].mxu0 %vm5545_vm1, %v17634_v0  ;;  %8493 = vmatmul.mubr.msk.f32.vlgmr.msra.gmra.mrb[64].mxu1 %vm5545_vm1, %v17634_v0  ;;  %v6958_v0 = vld [vmem:[%s18316_s7 + $0x390] sm:$0xff]  ;;  %v11975_v26 = vpack.c.bf16 %v6984_v13, %v6980_v12  ;;  %v12023_v12 = vpack.c.bf16 %v7018_v17, %v7014_v62  ;;  %v7020_v13 = vld [vmem:[%s18316_s7 + $0x580] sm:$0xff]  ;;  %v7033_v24 = vld [vmem:[%s18316_s7 + $0x5e8] sm:$0xff] }
 0x624   : > { %11940 = vmatpush1.bf16.msra.mxu0 %v11939_v25  ;;  %11956 = vmatpush1.bf16.msra.mxu1 %v11955_v45  ;;  %v11963_v31 = vpack.c.bf16 %v6962_v48, %v6958_v0  ;;  %v6991_v25 = vld [vmem:[%s18316_s7 + $0x498] sm:$0xff]  ;;  %v6998_v48 = vld [vmem:[%s18316_s7 + $0x4d0] sm:$0xff]  ;;  %v7061_v17 = vld [vmem:[%s18316_s7 + $0x6c8] sm:$0xff] }
 0x625   : > { %11942 = vmatprep.subr.bf16.mxu0 %v11941_v27  ;;  %11958 = vmatprep.subr.bf16.mxu1 %v11957_v49  ;;  %v6995_v45 = vld [vmem:[%s18316_s7 + $0x4b8] sm:$0xff]  ;;  %v6988_v27 = vld [vmem:[%s18316_s7 + $0x480] sm:$0xff]  ;;  %v11999_v57 = vpack.c.bf16 %v7002_v53, %v6998_v48  ;;  %v7038_v48 = vld [vmem:[%s18316_s7 + $0x610] sm:$0xff] }
 0x626   : > { %7602 = vmatprep.mubr.f32.mxu0 %v12274_v59  ;;  %7673 = vmatprep.mubr.f32.mxu1 %v12274_v59  ;;  %v6992_v49 = vld [vmem:[%s18316_s7 + $0x4a0] sm:$0xff]  ;;  %v11993_v9 = vpack.c.bf16 %v6995_v45, %v6991_v25  ;;  %v7031_v25 = vld [vmem:[%s18316_s7 + $0x5d8] sm:$0xff]  ;;  %v7042_v53 = vld [vmem:[%s18316_s7 + $0x630] sm:$0xff] }
 0x627   : > { %v7035_v45 = vld [vmem:[%s18316_s7 + $0x5f8] sm:$0xff]  ;;  %v7050_v36 = vld [vmem:[%s18316_s7 + $0x670] sm:$0xff] }
 0x628   : > { %11944 = vmatpush1.bf16.msra.mxu0 %v11943_v38  ;;  %11960 = vmatpush1.bf16.msra.mxu1 %v11959_v1  ;;  %v7003_v38 = vld [vmem:[%s18316_s7 + $0x4f8] sm:$0xff]  ;;  %v11979_v1 = vpack.c.bf16 %v6992_v49, %v6988_v27  ;;  %v7028_v27 = vld [vmem:[%s18316_s7 + $0x5c0] sm:$0xff]  ;;  %v7058_v62 = vld [vmem:[%s18316_s7 + $0x6b0] sm:$0xff] }
 0x629   : > { %11946 = vmatprep.subr.bf16.mxu0 %v11945_v50  ;;  %11962 = vmatprep.subr.bf16.mxu1 %v11961_v51  ;;  %v7000_v50 = vld [vmem:[%s18316_s7 + $0x4e0] sm:$0xff]  ;;  %v11981_v51 = vpack.c.bf16 %v7001_v33, %v6997_v40  ;;  %v11997_v0 = vpack.c.bf16 %v7003_v38, %v6999_v20  ;;  %v7037_v40 = vld [vmem:[%s18316_s7 + $0x608] sm:$0xff]  ;;  %v7039_v20 = vld [vmem:[%s18316_s7 + $0x618] sm:$0xff] }
 0x62a   : > { %v7032_v49 = vld [vmem:[%s18316_s7 + $0x5e0] sm:$0xff]  ;;  %v7041_v33 = vld [vmem:[%s18316_s7 + $0x628] sm:$0xff]  ;;  %v7043_v38 = vld [vmem:[%s18316_s7 + $0x638] sm:$0xff] }
 0x62c   : > { %11948 = vmatpush1.bf16.msra.mxu0 %v11947_v56  ;;  %11964 = vmatpush1.bf16.msra.mxu1 %v11963_v31  ;;  %v7011_v56 = vld [vmem:[%s18316_s7 + $0x538] sm:$0xff]  ;;  %v11983_v31 = vpack.c.bf16 %v7000_v50, %v6996_v3  ;;  %v7036_v3 = vld [vmem:[%s18316_s7 + $0x600] sm:$0xff] }
 0x62d   : > { %11950 = vmatprep.subr.bf16.mxu0 %v11949_v16  ;;  %11966 = vmatprep.subr.bf16.mxu1 %v11965_v4  ;;  %v7008_v16 = vld [vmem:[%s18316_s7 + $0x520] sm:$0xff]  ;;  %v12001_v4 = vpack.c.bf16 %v7009_v55, %v7005_v7  ;;  %v12017_v52 = vpack.c.bf16 %v7011_v56, %v7007_v42  ;;  %v7045_v7 = vld [vmem:[%s18316_s7 + $0x648] sm:$0xff]  ;;  %v7047_v42 = vld [vmem:[%s18316_s7 + $0x658] sm:$0xff] }
 0x62e   : > { %v7040_v50 = vld [vmem:[%s18316_s7 + $0x620] sm:$0xff]  ;;  %v7049_v55 = vld [vmem:[%s18316_s7 + $0x668] sm:$0xff]  ;;  %v7051_v56 = vld [vmem:[%s18316_s7 + $0x678] sm:$0xff] }
 0x630   : > { %11952 = vmatpush1.bf16.msra.mxu0 %v11951_v54  ;;  %11968 = vmatpush1.bf16.msra.mxu1 %v11967_v60  ;;  %v7019_v54 = vld [vmem:[%s18316_s7 + $0x578] sm:$0xff]  ;;  %v12003_v60 = vpack.c.bf16 %v7008_v16, %v7004_v32  ;;  %v7044_v32 = vld [vmem:[%s18316_s7 + $0x640] sm:$0xff] }
 0x631   : > { %11970 = vmatprep.subr.bf16.mxu0 %v11969_v30  ;;  %11986 = vmatprep.subr.bf16.mxu1 %v11985_v22  ;;  %v7016_v30 = vld [vmem:[%s18316_s7 + $0x560] sm:$0xff]  ;;  %v12005_v22 = vpack.c.bf16 %v7017_v28, %v7013_v44  ;;  %v12021_v61 = vpack.c.bf16 %v7019_v54, %v7015_v43  ;;  %v7053_v44 = vld [vmem:[%s18316_s7 + $0x688] sm:$0xff]  ;;  %v7055_v43 = vld [vmem:[%s18316_s7 + $0x698] sm:$0xff] }
 0x632   : > { %v7048_v16 = vld [vmem:[%s18316_s7 + $0x660] sm:$0xff]  ;;  %v7057_v28 = vld [vmem:[%s18316_s7 + $0x6a8] sm:$0xff]  ;;  %v7059_v54 = vld [vmem:[%s18316_s7 + $0x6b8] sm:$0xff] }
 0x633   : > { %8494 = vmatmul.mubr.msk.f32.vlgmr.msra.gmra.mrb[64].mxu0 %vm5545_vm1, %v17645_v10  ;;  %8495 = vmatmul.mubr.msk.f32.vlgmr.msra.gmra.mrb[64].mxu1 %vm5545_vm1, %v17645_v10  ;;  %v6990_v10 = vld [vmem:[%s18316_s7 + $0x490] sm:$0xff] }
 0x634   : > { %11972 = vmatpush1.bf16.msra.mxu0 %v11971_v8  ;;  %11988 = vmatpush1.bf16.msra.mxu1 %v11987_v11  ;;  %v11995_v37 = vpack.c.bf16 %v6994_v29, %v6990_v10  ;;  %v7027_v8 = vld [vmem:[%s18316_s7 + $0x5b8] sm:$0xff]  ;;  %v12007_v11 = vpack.c.bf16 %v7016_v30, %v7012_v46  ;;  %v7030_v10 = vld [vmem:[%s18316_s7 + $0x5d0] sm:$0xff]  ;;  %v7052_v46 = vld [vmem:[%s18316_s7 + $0x680] sm:$0xff] }
 0x635   : > { %11974 = vmatprep.subr.bf16.mxu0 %v11973_v15  ;;  %11990 = vmatprep.subr.bf16.mxu1 %v11989_v14  ;;  %v7024_v15 = vld [vmem:[%s18316_s7 + $0x5a0] sm:$0xff]  ;;  %v12009_v14 = vpack.c.bf16 %v7025_v21, %v7021_v63  ;;  %v12025_v18 = vpack.c.bf16 %v7027_v8, %v7023_v5  ;;  %v7034_v29 = vld [vmem:[%s18316_s7 + $0x5f0] sm:$0xff]  ;;  %v7065_v63 = vld [vmem:[%s18316_s7 + $0x6e8] sm:$0xff] }
 0x636   : > { %7747 = vmatprep.mubr.f32.mxu0 %v12274_v59  ;;  %7818 = vmatprep.mubr.f32.mxu1 %v12274_v59  ;;  %v7056_v30 = vld [vmem:[%s18316_s7 + $0x6a0] sm:$0xff]  ;;  %v7063_v21 = vld [vmem:[%s18316_s7 + $0x6d8] sm:$0xff] }
 0x637   : > { %v7067_v5 = vld [vmem:[%s18316_s7 + $0x6f8] sm:$0xff]  ;;  %v12043_v8 = vpack.c.bf16 %v7056_v30, %v7052_v46  ;;  %v7096_v30 = vld [vmem:[%s18316_s7 + $0x7e0] sm:$0xff] }
 0x638   : > { %11976 = vmatpush1.bf16.msra.mxu0 %v11975_v26  ;;  %11992 = vmatpush1.bf16.msra.mxu1 %v11991_v41  ;;  %v12011_v26 = vpack.c.bf16 %v7024_v15, %v7020_v13  ;;  %v7064_v13 = vld [vmem:[%s18316_s7 + $0x6e0] sm:$0xff]  ;;  %v12045_v15 = vpack.c.bf16 %v7065_v63, %v7061_v17 }
 0x639   : > { %11978 = vmatprep.subr.bf16.mxu0 %v11977_v35  ;;  %11994 = vmatprep.subr.bf16.mxu1 %v11993_v9  ;;  %v12013_v35 = vpack.c.bf16 %v7033_v24, %v7029_v23  ;;  %v12029_v9 = vpack.c.bf16 %v7035_v45, %v7031_v25  ;;  %v7073_v23 = vld [vmem:[%s18316_s7 + $0x728] sm:$0xff]  ;;  %v7071_v24 = vld [vmem:[%s18316_s7 + $0x718] sm:$0xff] }
 0x63a   : > { %v7075_v25 = vld [vmem:[%s18316_s7 + $0x738] sm:$0xff] }
 0x63c   : > { %11980 = vmatpush1.bf16.msra.mxu0 %v11979_v1  ;;  %11996 = vmatpush1.bf16.msra.mxu1 %v11995_v37  ;;  %v12015_v1 = vpack.c.bf16 %v7032_v49, %v7028_v27  ;;  %v12031_v37 = vpack.c.bf16 %v7034_v29, %v7030_v10  ;;  %v7072_v27 = vld [vmem:[%s18316_s7 + $0x720] sm:$0xff]  ;;  %v7074_v10 = vld [vmem:[%s18316_s7 + $0x730] sm:$0xff]  ;;  %v7077_v29 = vld [vmem:[%s18316_s7 + $0x748] sm:$0xff] }
 0x63d   : > { %11982 = vmatprep.subr.bf16.mxu0 %v11981_v51  ;;  %11998 = vmatprep.subr.bf16.mxu1 %v11997_v0  ;;  %v12033_v51 = vpack.c.bf16 %v7041_v33, %v7037_v40  ;;  %v12049_v0 = vpack.c.bf16 %v7043_v38, %v7039_v20  ;;  %v7081_v40 = vld [vmem:[%s18316_s7 + $0x768] sm:$0xff]  ;;  %v7079_v33 = vld [vmem:[%s18316_s7 + $0x758] sm:$0xff] }
 0x63e   : > { %v7083_v20 = vld [vmem:[%s18316_s7 + $0x778] sm:$0xff] }
 0x640   : > { %11984 = vmatpush1.bf16.msra.mxu0 %v11983_v31  ;;  %12000 = vmatpush1.bf16.msra.mxu1 %v11999_v57  ;;  %v12035_v31 = vpack.c.bf16 %v7040_v50, %v7036_v3  ;;  %v12051_v57 = vpack.c.bf16 %v7042_v53, %v7038_v48  ;;  %v7080_v3 = vld [vmem:[%s18316_s7 + $0x760] sm:$0xff]  ;;  %v12069_v50 = vpack.c.bf16 %v7081_v40, %v7077_v29  ;;  %v7082_v48 = vld [vmem:[%s18316_s7 + $0x770] sm:$0xff]  ;;  %v7085_v53 = vld [vmem:[%s18316_s7 + $0x788] sm:$0xff] }
 0x641   : > { %12002 = vmatprep.subr.bf16.mxu0 %v12001_v4  ;;  %12018 = vmatprep.subr.bf16.mxu1 %v12017_v52  ;;  %v12037_v4 = vpack.c.bf16 %v7049_v55, %v7045_v7  ;;  %v12053_v52 = vpack.c.bf16 %v7051_v56, %v7047_v42  ;;  %v7089_v7 = vld [vmem:[%s18316_s7 + $0x7a8] sm:$0xff]  ;;  %v7087_v55 = vld [vmem:[%s18316_s7 + $0x798] sm:$0xff] }
 0x642   : > { %v7091_v42 = vld [vmem:[%s18316_s7 + $0x7b8] sm:$0xff] }
 0x643   : > { %8496 = vmatmul.mubr.msk.f32.vlgmr.msra.gmra.mrb[64].mxu0 %vm5545_vm1, %v17662_v34  ;;  %8497 = vmatmul.mubr.msk.f32.vlgmr.msra.gmra.mrb[64].mxu1 %vm5545_vm1, %v17662_v34  ;;  %v7022_v34 = vld [vmem:[%s18316_s7 + $0x590] sm:$0xff] }
 0x644   : > { %12004 = vmatpush1.bf16.msra.mxu0 %v12003_v60  ;;  %12020 = vmatpush1.bf16.msra.mxu1 %v12019_v2  ;;  %v12027_v41 = vpack.c.bf16 %v7026_v19, %v7022_v34  ;;  %v12039_v60 = vpack.c.bf16 %v7048_v16, %v7044_v32  ;;  %v12055_v2 = vpack.c.bf16 %v7050_v36, %v7046_v39  ;;  %v7066_v34 = vld [vmem:[%s18316_s7 + $0x6f0] sm:$0xff]  ;;  %v7069_v19 = vld [vmem:[%s18316_s7 + $0x708] sm:$0xff]  ;;  %v7088_v32 = vld [vmem:[%s18316_s7 + $0x7a0] sm:$0xff] }
 0x645   : > { %12006 = vmatprep.subr.bf16.mxu0 %v12005_v22  ;;  %12022 = vmatprep.subr.bf16.mxu1 %v12021_v61  ;;  %v12041_v22 = vpack.c.bf16 %v7057_v28, %v7053_v44  ;;  %v12057_v61 = vpack.c.bf16 %v7059_v54, %v7055_v43  ;;  %v12065_v49 = vpack.c.bf16 %v7073_v23, %v7069_v19  ;;  %v7093_v39 = vld [vmem:[%s18316_s7 + $0x7c8] sm:$0xff]  ;;  %v7095_v44 = vld [vmem:[%s18316_s7 + $0x7d8] sm:$0xff] }
 0x646   : > { %7892 = vmatprep.mubr.f32.mxu0 %v12274_v59  ;;  %7963 = vmatprep.mubr.f32.mxu1 %v12274_v59  ;;  %v12073_v16 = vpack.c.bf16 %v7089_v7, %v7085_v53  ;;  %v7097_v36 = vld [vmem:[%s18316_s7 + $0x7e8] sm:$0xff]  ;;  %v7099_v28 = vld [vmem:[%s18316_s7 + $0x7f8] sm:$0xff] }
 0x647   : > { %v12093_v46 = vpack.c.bf16 %v7099_v28, %v7095_v44 }
 0x648   : > { %12008 = vmatpush1.bf16.msra.mxu0 %v12007_v11  ;;  %12024 = vmatpush1.bf16.msra.mxu1 %v12023_v12  ;;  %v7060_v12 = vld [vmem:[%s18316_s7 + $0x6c0] sm:$0xff] }
 0x649   : > { %12010 = vmatprep.subr.bf16.mxu0 %v12009_v14  ;;  %12026 = vmatprep.subr.bf16.mxu1 %v12025_v18  ;;  %v12061_v14 = vpack.c.bf16 %v7067_v5, %v7063_v21  ;;  %v7062_v18 = vld [vmem:[%s18316_s7 + $0x6d0] sm:$0xff]  ;;  %v12047_v45 = vpack.c.bf16 %v7064_v13, %v7060_v12  ;;  %v8288_v5 = vld [vmem:[%s18320_s11] sm:$0xf] }
 0x64c   : > { %12012 = vmatpush1.bf16.msra.mxu0 %v12011_v26  ;;  %12028 = vmatpush1.bf16.msra.mxu1 %v12027_v41  ;;  %v12063_v26 = vpack.c.bf16 %v7066_v34, %v7062_v18  ;;  %v7068_v41 = vld [vmem:[%s18316_s7 + $0x700] sm:$0xff] }
 0x64d   : > { %12014 = vmatprep.subr.bf16.mxu0 %v12013_v35  ;;  %12030 = vmatprep.subr.bf16.mxu1 %v12029_v9  ;;  %v12081_v35 = vpack.c.bf16 %v7075_v25, %v7071_v24  ;;  %v7070_v9 = vld [vmem:[%s18316_s7 + $0x710] sm:$0xff]  ;;  %v12067_v38 = vpack.c.bf16 %v7072_v27, %v7068_v41 }
 0x650   : > { %12016 = vmatpush1.bf16.msra.mxu0 %v12015_v1  ;;  %12032 = vmatpush1.bf16.msra.mxu1 %v12031_v37  ;;  %v12083_v1 = vpack.c.bf16 %v7074_v10, %v7070_v9  ;;  %v7076_v37 = vld [vmem:[%s18316_s7 + $0x740] sm:$0xff] }
 0x651   : > { %12034 = vmatprep.subr.bf16.mxu0 %v12033_v51  ;;  %12050 = vmatprep.subr.bf16.mxu1 %v12049_v0  ;;  %v12085_v51 = vpack.c.bf16 %v7083_v20, %v7079_v33  ;;  %v7078_v0 = vld [vmem:[%s18316_s7 + $0x750] sm:$0xff]  ;;  %v12071_v56 = vpack.c.bf16 %v7080_v3, %v7076_v37 }
 0x653   : > { %8498 = vmatmul.mubr.msk.f32.vlgmr.msra.gmra.mrb[64].mxu0 %vm5545_vm1, %v17673_v6  ;;  %8499 = vmatmul.mubr.msk.f32.vlgmr.msra.gmra.mrb[64].mxu1 %vm5545_vm1, %v17673_v6  ;;  %v7054_v6 = vld [vmem:[%s18316_s7 + $0x690] sm:$0xff] }
 0x654   : > { %12036 = vmatpush1.bf16.msra.mxu0 %v12035_v31  ;;  %12052 = vmatpush1.bf16.msra.mxu1 %v12051_v57  ;;  %v12059_v11 = vpack.c.bf16 %v7058_v62, %v7054_v6  ;;  %v12087_v31 = vpack.c.bf16 %v7082_v48, %v7078_v0  ;;  %v7084_v57 = vld [vmem:[%s18316_s7 + $0x780] sm:$0xff]  ;;  %v8290_v62 = vlaneseq }
 0x655   : > { %12038 = vmatprep.subr.bf16.mxu0 %v12037_v4  ;;  %12054 = vmatprep.subr.bf16.mxu1 %v12053_v52  ;;  %v12089_v4 = vpack.c.bf16 %v7091_v42, %v7087_v55  ;;  %v7090_v52 = vld [vmem:[%s18316_s7 + $0x7b0] sm:$0xff]  ;;  %v12075_v43 = vpack.c.bf16 %v7088_v32, %v7084_v57 }
 0x656   : > { %8037 = vmatprep.mubr.f32.mxu0 %v12274_v59  ;;  %8108 = vmatprep.mubr.f32.mxu1 %v12274_v59  ;;  %v8291_v17 = vshrl.u32 %v8290_v62, 7 }
 0x658   : > { %12040 = vmatpush1.bf16.msra.mxu0 %v12039_v60  ;;  %12056 = vmatpush1.bf16.msra.mxu1 %v12055_v2  ;;  %v7092_v60 = vld [vmem:[%s18316_s7 + $0x7c0] sm:$0xff]  ;;  %v12077_v2 = vpack.c.bf16 %v7097_v36, %v7093_v39  ;;  %v8292_v63 = vsub.s32 0, %v8291_v17  ;;  %v8300_v21 = vsub.s32 2, %v8291_v17 }
 0x659   : > { %12042 = vmatprep.subr.bf16.mxu0 %v12041_v22  ;;  %12058 = vmatprep.subr.bf16.mxu1 %v12057_v61  ;;  %v7098_v22 = vld [vmem:[%s18316_s7 + $0x7f0] sm:$0xff]  ;;  %v12079_v61 = vpack.c.bf16 %v7096_v30, %v7092_v60 }
 0x65a   : > { %v8293_v12 = vrot.slane %v8288_v5, %v8292_v63  ;;  %v8301_v13 = vrot.slane %v8288_v5, %v8300_v21 }
 0x65c   : > { %12044 = vmatpush1.bf16.msra.mxu0 %v12043_v8  ;;  %12060 = vmatpush1.bf16.msra.mxu1 %v12059_v11  ;;  %v8296_v8 = vsub.s32 1, %v8291_v17  ;;  %v8304_v11 = vsub.s32 3, %v8291_v17 }
 0x65d   : > { %12046 = vmatprep.subr.bf16.mxu0 %v12045_v15  ;;  %12062 = vmatprep.subr.bf16.mxu1 %v12061_v14 }
 0x65e   : > { %v8297_v15 = vrot.slane %v8288_v5, %v8296_v8  ;;  %v8305_v14 = vrot.slane %v8288_v5, %v8304_v11 }
 0x660   : > { %12048 = vmatpush1.bf16.msra.mxu0 %v12047_v45  ;;  %12064 = vmatpush1.bf16.msra.mxu1 %v12063_v26 }
 0x661   : > { %12066 = vmatprep.subr.bf16.mxu0 %v12065_v49  ;;  %12082 = vmatprep.subr.bf16.mxu1 %v12081_v35 }
 0x663   : > { %8500 = vmatmul.mubr.msk.f32.vlgmr.msra.gmra.mrb[64].mxu0 %vm5545_vm1, %v17690_v47  ;;  %8501 = vmatmul.mubr.msk.f32.vlgmr.msra.gmra.mrb[64].mxu1 %vm5545_vm1, %v17690_v47  ;;  %v7086_v47 = vld [vmem:[%s18316_s7 + $0x790] sm:$0xff] }
 0x664   : > { %12068 = vmatpush1.bf16.msra.mxu0 %v12067_v38  ;;  %12084 = vmatpush1.bf16.msra.mxu1 %v12083_v1  ;;  %v12091_v54 = vpack.c.bf16 %v7090_v52, %v7086_v47 }
 0x665   : > { %12070 = vmatprep.subr.bf16.mxu0 %v12069_v50  ;;  %12086 = vmatprep.subr.bf16.mxu1 %v12085_v51 }
 0x666   : > { %8182 = vmatprep.mubr.f32.mxu0 %v12274_v59  ;;  %8253 = vmatprep.mubr.f32.mxu1 %v12274_v59  ;;  %v7094_v59 = vld [vmem:[%s18316_s7 + $0x7d0] sm:$0xff] }
 0x667   : > { %v12095_v6 = vpack.c.bf16 %v7098_v22, %v7094_v59 }
 0x668   : > { %12072 = vmatpush1.bf16.msra.mxu0 %v12071_v56  ;;  %12088 = vmatpush1.bf16.msra.mxu1 %v12087_v31 }
 0x669   : > { %12074 = vmatprep.subr.bf16.mxu0 %v12073_v16  ;;  %12090 = vmatprep.subr.bf16.mxu1 %v12089_v4 }
 0x66c   : > { %12076 = vmatpush1.bf16.msra.mxu0 %v12075_v43  ;;  %12092 = vmatpush1.bf16.msra.mxu1 %v12091_v54 }
 0x66d   : > { %12078 = vmatprep.subr.bf16.mxu0 %v12077_v2  ;;  %12094 = vmatprep.subr.bf16.mxu1 %v12093_v46 }
 0x670   : > { %12080 = vmatpush1.bf16.msra.mxu0 %v12079_v61  ;;  %12096 = vmatpush1.bf16.msra.mxu1 %v12095_v6 }
 0x673   : > { %8502 = vmatmul.mubr.msk.f32.vlgmr.msra.gmra.mrb[64].mxu0 %vm5545_vm1, %v17720_v58  ;;  %8503 = vmatmul.mubr.msk.f32.vlgmr.msra.gmra.mrb[64].mxu1 %vm5545_vm1, %v17720_v58 }
 0x746   : > { %v8184_v58 = vpop.f32.mrb[64].mxu0  ;;  %v8255_v18 = vpop.f32.mrb[64].mxu1 }
 0x747   : > { %v8310_v34 = vadd.f32 %v8293_v12, %v8184_v58  ;;  %v8312_v19 = vadd.f32 %v8301_v13, %v8255_v18  ;;  %v8186_v23 = vpop.f32.mrb[65].mxu0  ;;  %v8257_v24 = vpop.f32.mrb[65].mxu1 }
 0x748   : > { %v8311_v25 = vadd.f32 %v8297_v15, %v8186_v23  ;;  %v8313_v45 = vadd.f32 %v8305_v14, %v8257_v24 }
 0x749   : > { %8314 = vst [vmem:[%s449_s18] sm:$0xff] %v8310_v34  ;;  %8316 = vst [vmem:[%s449_s18 + $0x10] sm:$0xff] %v8312_v19 }
 0x74a   : > { %8315 = vst [vmem:[%s449_s18 + $0x8] sm:$0xff] %v8311_v25  ;;  %8317 = vst [vmem:[%s449_s18 + $0x18] sm:$0xff] %v8313_v45 }
 0x74b   : > { %12223 = shalt.err (!%p12220_p3)
}
 0x74c   : > { %s12224_s29 = scalar_lea.hbm %s18267_s14, 512  ;;  %s12228_s16 = scalar_lea.hbm %s18321_s12, 1024 }
 0x74d   : > { %p12225_p4 = scmp.ne.s32.totalorder %s18267_s14, %s12224_s29  ;;  %p12229_p9 = scmp.lt.u32.totalorder %s18267_s14, %s18321_s12 }
 0x74e   : > { %p12230_p10 = scmp.lt.u32.totalorder %s12228_s16, %s12224_s29  ;;  %p12232_p12 = scmp.lt.u32.totalorder %s12224_s29, %s18267_s14 }
 0x74f   : > { %p12226_p7 = pnand %p12225_p4, %p12380_p5 }
 0x750   : > { %p12231_p11 = por %p12230_p10, %p12229_p9 }
 0x751   : > { %p12227_p8 = pneg %p12226_p7 }
 0x752   : > { %p12233_p13 = por %p12232_p12, %p12231_p11 }
 0x754   : > { %p12234_p0 = pnand %p12233_p13, %p12227_p8 }
 0x756   : > { %12237 = shalt.err (!%p12234_p0)
}
 0x757   : > { %12125 = dma.vmem_to_hbm [thread:$0]  (%p12380_p5), %s18269_s17, 512, %s18267_s14, %s8319_s25  }
 0x758 PF: > { %p12131_p1 = scmp.ge.s32.totalorder %s12272_s24, 2  ;;  %s8345_s19 = sand.u32 1, %s12260_s21  }
 0x759   : > { %s8346_s30 = scalar_lea.sflag [#allocation3], %s8345_s19 }
 0x75a   : > { %p12128_p2 = pnand %p12131_p1, %p12384_p6 }
 0x75c   : > { %12255 = dma.done.wait (!%p12128_p2), %s8346_s30, 512  }
 0x75d   : > { %12257 = vsyncadd (!%p12128_p2), %s8346_s30, 4294966784  ;;  %s18333_s24 = sld [smem:[#allocation6_spill]]  ;;  %s18334_s28 = sld [smem:[#allocation5_spill]] }
 0x75e   : > { %s18335_s23 = sld [smem:[#allocation7_spill]]  ;;  %s18336_s21 = smov %s12264_s22 }
 0x763   : > { %p22_p3 = scmp.ge.s32.totalorder %s18333_s24, 4   ;;  %s18337_s22 = smov %s18334_s28 }
 0x765   :  { %24 = sbr.rel (!%p22_p3) target bundleno = 3 (0x3), region = 112 }
 0x76c   :  { %8351 = vsyncpa [#allocation3], 1 }
 0x76d   :  { %8353 = vsyncpa [#allocation3 + $0x1], 1 }

</bundles_post_ra>
